<compile_context>
chip_gen: v7x
topology: tpu7x:2x2x1
jax: 0.10.0
libtpu: 0.0.40
codegen_flags: <defaults>
</compile_context>

<pallas_src>
import itertools
from collections import defaultdict

import numpy as np
import jax
import jax.numpy as jnp
from jax import lax
from jax.experimental import pallas as pl
from jax.experimental.pallas import tpu as pltpu

LANE = 128
# Explicit scoped-VMEM budget: well above the 16/32 MiB defaults, with
# headroom under v7x's 64 MiB physical per-TensorCore VMEM.
VMEM_LIMIT_BYTES = 48 * 1024 * 1024
# RE pair tile (sweep 256-512; 256 keeps padded work tiny at small P).
RE_PAIR_TILE = 256


def _round_up(x, m):
    return ((x + m - 1) // m) * m


def _call_with_const_block_hint(builder, *args):
    """builder(single_buffer) -> pallas_call.  First try with grid-invariant
    blocks marked pl.Buffered(1) (no redundant double-buffering of constant
    blocks); fall back to default pipelining if the installed Pallas/Mosaic
    rejects the pipeline_mode hint."""
    try:
        out = builder(True)(*args)
        jax.block_until_ready(out)
        return out
    except Exception:
        return builder(False)(*args)


# ----------------------------- GRU kernel -----------------------------------
def gru_stack_kernel(x_ref, wih_ref, whh_ref, bih_ref, bhh_ref, out_ref,
                     gi_f_ref, gi_b_ref):
    """Whole bidirectional GRU stack.  Grid axis 0 = layer index (sequential).

    x_ref   : (T, B, Ipad)         layer-0 input (grid-invariant block)
    wih_ref : (1, Ipad, 6*Hpad)    [fwd | bwd] input weights (bf16, transposed)
    whh_ref : (1, 2, Hpad, 3*Hpad) recurrent weights per direction (bf16)
    bih_ref : (1, 1, 6*Hpad)       [fwd | bwd] input bias (f32)
    bhh_ref : (1, 2, 1, 3*Hpad)    recurrent bias per direction (f32)
    out_ref : (T, B, 2*Hpad)       resident output; fwd lanes [0:Hpad],
                                   bwd lanes [Hpad:2*Hpad]; re-read as the
                                   next layer's input.
    gi_f/gi_b : VMEM scratch (T, B, 3*Hpad) bf16 -- hoisted input projections.
    """
    layer = pl.program_id(0)
    T, B, Ipad = x_ref.shape
    Hpad = whh_ref.shape[2]
    G3 = 3 * Hpad

    wih = wih_ref[0]                                   # (Ipad, 6*Hpad) bf16
    bih = bih_ref[0]                                   # (1, 6*Hpad)    f32

    def project(inp):
        # Hoisted input projection for BOTH directions: one big bf16 MXU matmul.
        # TODO(synk): for very large T*B, tile this projection over T.
        x2d = inp.reshape(T * B, Ipad).astype(jnp.bfloat16)
        gi = jnp.dot(x2d, wih, preferred_element_type=jnp.float32) + bih
        gi_f_ref[...] = gi[:, :G3].reshape(T, B, G3).astype(jnp.bfloat16)
        gi_b_ref[...] = gi[:, G3:].reshape(T, B, G3).astype(jnp.bfloat16)

    @pl.when(layer == 0)
    def _():
        project(x_ref[...])

    @pl.when(layer != 0)
    def _():
        # previous layer's activations are still resident in out_ref
        project(out_ref[...])

    whh_f = whh_ref[0, 0]                              # (Hpad, G3) bf16
    whh_b = whh_ref[0, 1]
    bhh_f = bhh_ref[0, 0]                              # (1, G3)    f32
    bhh_b = bhh_ref[0, 1]

    def gates(gx, gh, h):
        r = jax.nn.sigmoid(gx[:, :Hpad] + gh[:, :Hpad])
        z = jax.nn.sigmoid(gx[:, Hpad:2 * Hpad] + gh[:, Hpad:2 * Hpad])
        n = jnp.tanh(gx[:, 2 * Hpad:] + r * gh[:, 2 * Hpad:])
        return (1.0 - z) * n + z * h

    def step(t, carry):
        h_f, h_b = carry
        tf = t
        tb = T - 1 - t
        gx_f = gi_f_ref[tf].astype(jnp.float32)        # (B, G3)
        gx_b = gi_b_ref[tb].astype(jnp.float32)
        # Two independent recurrent matmuls back-to-back: fwd/bwd chains are
        # interleaved by the scheduler, hiding MXU/EUP latency.
        gh_f = jnp.dot(h_f.astype(jnp.bfloat16), whh_f,
                       preferred_element_type=jnp.float32) + bhh_f
        gh_b = jnp.dot(h_b.astype(jnp.bfloat16), whh_b,
                       preferred_element_type=jnp.float32) + bhh_b
        h_f_new = gates(gx_f, gh_f, h_f)
        h_b_new = gates(gx_b, gh_b, h_b)
        out_ref[tf, :, :Hpad] = h_f_new
        out_ref[tb, :, Hpad:] = h_b_new
        return (h_f_new, h_b_new)

    h0 = jnp.zeros((B, Hpad), jnp.float32)
    unroll = T if T <= 8 else 4
    lax.fori_loop(0, T, step, (h0, h0), unroll=unroll)


def gru_stack(x_pad, wih_all, whh_all, bih_all, bhh_all):
    """x_pad: (T, B, Ipad) -> (T, B, 2*Hpad) after all layers."""
    T, B, Ipad = x_pad.shape
    n_layers = wih_all.shape[0]
    Hpad = whh_all.shape[2]
    G3 = 3 * Hpad

    def builder(single_buffer):
        x_kwargs = {}
        if single_buffer:
            x_kwargs['pipeline_mode'] = pl.Buffered(1)   # grid-invariant block
        return pl.pallas_call(
            gru_stack_kernel,
            out_shape=jax.ShapeDtypeStruct((T, B, 2 * Hpad), jnp.float32),
            grid_spec=pltpu.PrefetchScalarGridSpec(
                num_scalar_prefetch=0,
                grid=(n_layers,),
                in_specs=[
                    pl.BlockSpec((T, B, Ipad), lambda l: (0, 0, 0), **x_kwargs),
                    pl.BlockSpec((1, Ipad, 2 * G3), lambda l: (l, 0, 0)),
                    pl.BlockSpec((1, 2, Hpad, G3), lambda l: (l, 0, 0, 0)),
                    pl.BlockSpec((1, 1, 2 * G3), lambda l: (l, 0, 0)),
                    pl.BlockSpec((1, 2, 1, G3), lambda l: (l, 0, 0, 0)),
                ],
                out_specs=pl.BlockSpec((T, B, 2 * Hpad), lambda l: (0, 0, 0)),
                scratch_shapes=[pltpu.VMEM((T, B, G3), jnp.bfloat16),
                                pltpu.VMEM((T, B, G3), jnp.bfloat16)],
            ),
            compiler_params=pltpu.CompilerParams(
                dimension_semantics=("arbitrary",),
                vmem_limit_bytes=VMEM_LIMIT_BYTES),
        )

    return _call_with_const_block_hint(
        builder, x_pad, wih_all, whh_all, bih_all, bhh_all)


# -------------------------- RE scoring kernel --------------------------------
def _make_re_kernel(R):
    def re_score_kernel(nvalid_ref, e1_ref, e2_ref, tgt_ref,
                        w1t_ref, b1_ref, mdt_ref,
                        w2h1_ref, w2h2_ref, w2c_ref, w2d_ref, b2_ref,
                        loss_ref, scores_ref):
        pi = pl.program_id(0)
        TP, _ = e1_ref.shape
        Rpad = scores_ref.shape[1]

        e1 = e1_ref[...]
        e2 = e2_ref[...]
        e1b = e1.astype(jnp.bfloat16)
        e2b = e2.astype(jnp.bfloat16)

        # FFNNr1 + ReLU, two bf16 MXU matmuls (no VMEM concat copy).
        b1 = b1_ref[...]
        h1 = jnp.maximum(
            jnp.dot(e1b, w1t_ref[...], preferred_element_type=jnp.float32) + b1,
            0.0)
        h2 = jnp.maximum(
            jnp.dot(e2b, w1t_ref[...], preferred_element_type=jnp.float32) + b1,
            0.0)

        # cosine similarity (per-norm eps clamp; matches torch.cosine_similarity
        # away from zero norms).
        eps = 1e-8
        dotp = jnp.sum(h1 * h2, axis=-1, keepdims=True)
        n1 = jnp.sqrt(jnp.sum(h1 * h1, axis=-1, keepdims=True))
        n2 = jnp.sqrt(jnp.sum(h2 * h2, axis=-1, keepdims=True))
        cos = dotp / (jnp.maximum(n1, eps) * jnp.maximum(n2, eps))   # (TP, 1)

        # distmult with diagonal M_r: score_r = sum_k e1_k * diag_{r,k} * e2_k
        dist = jnp.dot((e1 * e2).astype(jnp.bfloat16), mdt_ref[...],
                       preferred_element_type=jnp.float32)

        # FFNNr2 on concat([h1, h2, cos, dist]) expressed as a split matmul
        logits = (jnp.dot(h1.astype(jnp.bfloat16), w2h1_ref[...],
                          preferred_element_type=jnp.float32)
                  + jnp.dot(h2.astype(jnp.bfloat16), w2h2_ref[...],
                            preferred_element_type=jnp.float32)
                  + cos * w2c_ref[...]
                  + jnp.dot(dist.astype(jnp.bfloat16), w2d_ref[...],
                            preferred_element_type=jnp.float32)
                  + b2_ref[...])
        p = jax.nn.sigmoid(logits)                                   # (TP, Rpad)
        scores_ref[...] = p

        # BCELoss (mean over R per pair, summed over pairs), computed from the
        # logits: log(sigmoid(x)) = -softplus(-x), log(1-sigmoid(x)) = -softplus(x),
        # clamped at -100 like torch; masked to valid rows / relation columns.
        t = tgt_ref[...]
        col = lax.broadcasted_iota(jnp.int32, (TP, Rpad), 1)
        row = lax.broadcasted_iota(jnp.int32, (TP, Rpad), 0) + pi * TP
        mask = jnp.logical_and(col < R, row < nvalid_ref[0]).astype(jnp.float32)
        logp = jnp.maximum(-jax.nn.softplus(-logits), -100.0)
        logq = jnp.maximum(-jax.nn.softplus(logits), -100.0)
        bce = -(t * logp + (1.0 - t) * logq) * mask
        partial = jnp.sum(bce) * (1.0 / R)
        # per-tile partial loss, written to lane 0 of this tile's (1,128) block
        lane = lax.broadcasted_iota(jnp.int32, (1, LANE), 1)
        loss_ref[...] = jnp.where(lane == 0, partial, 0.0)

    return re_score_kernel


def re_pair_scores_and_loss(e1p, e2p, tgtp, nvalid, rw, R, tp=RE_PAIR_TILE):
    P_pad, Epad = e1p.shape
    Fpad = rw['w1t'].shape[1]
    Rpad = rw['b2'].shape[1]
    n_tiles = P_pad // tp

    def builder(single_buffer):
        full = lambda i, nv: (0, 0)
        tile = lambda i, nv: (i, 0)

        def const(shape):
            if single_buffer:
                return pl.BlockSpec(shape, full, pipeline_mode=pl.Buffered(1))
            return pl.BlockSpec(shape, full)

        return pl.pallas_call(
            _make_re_kernel(R),
            out_shape=(jax.ShapeDtypeStruct((1, n_tiles * LANE), jnp.float32),
                       jax.ShapeDtypeStruct((P_pad, Rpad), jnp.float32)),
            grid_spec=pltpu.PrefetchScalarGridSpec(
                num_scalar_prefetch=1,
                grid=(n_tiles,),
                in_specs=[
                    pl.BlockSpec((tp, Epad), tile),      # e1
                    pl.BlockSpec((tp, Epad), tile),      # e2
                    pl.BlockSpec((tp, Rpad), tile),      # targets
                    const((Epad, Fpad)),                 # W1^T           (bf16)
                    const((1, Fpad)),                    # b1
                    const((Epad, Rpad)),                 # Mdiag^T        (bf16)
                    const((Fpad, Rpad)),                 # W2[:, :F]^T    (bf16)
                    const((Fpad, Rpad)),                 # W2[:, F:2F]^T  (bf16)
                    const((1, Rpad)),                    # W2 cosine column
                    const((Rpad, Rpad)),                 # W2[:, 2F+1:]^T (bf16)
                    const((1, Rpad)),                    # b2
                ],
                out_specs=(pl.BlockSpec((1, LANE), lambda i, nv: (0, i)),
                           pl.BlockSpec((tp, Rpad), tile)),
            ),
            compiler_params=pltpu.CompilerParams(
                dimension_semantics=("parallel",),
                vmem_limit_bytes=VMEM_LIMIT_BYTES),
        )

    loss_parts, scores = _call_with_const_block_hint(
        builder, nvalid, e1p, e2p, tgtp, rw['w1t'], rw['b1'], rw['mdt'],
        rw['w2h1t'], rw['w2h2t'], rw['w2c'], rw['w2dt'], rw['b2'])
    return jnp.sum(loss_parts), scores


# ------------------------- weight prep (once, at init) ------------------------
def _pad_gru_layer(dir_weights, in_rows, Ipad, Hpad):
    """PyTorch (3H,in)/(3H,H) r,z,n weights (fwd,bwd) -> fused, transposed,
    lane-padded layout: wih (Ipad, 6*Hpad), whh (2, Hpad, 3*Hpad), biases."""
    H = dir_weights[0][1].shape[1]
    wih_p = np.zeros((Ipad, 6 * Hpad), np.float32)
    whh_p = np.zeros((2, Hpad, 3 * Hpad), np.float32)
    bih_p = np.zeros((1, 6 * Hpad), np.float32)
    bhh_p = np.zeros((2, 1, 3 * Hpad), np.float32)
    in_rows = np.asarray(in_rows)
    for d, (wih, whh, bih, bhh) in enumerate(dir_weights):
        wih = np.asarray(wih); whh = np.asarray(whh)
        bih = np.asarray(bih); bhh = np.asarray(bhh)
        for g in range(3):
            c = (3 * d + g) * Hpad
            wih_p[in_rows, c:c + H] = wih[g * H:(g + 1) * H, :].T
            bih_p[0, c:c + H] = bih[g * H:(g + 1) * H]
            c2 = g * Hpad
            whh_p[d, :H, c2:c2 + H] = whh[g * H:(g + 1) * H, :].T
            bhh_p[d, 0, c2:c2 + H] = bhh[g * H:(g + 1) * H]
    return wih_p, whh_p, bih_p, bhh_p


def init_params(key, S, L, R, F, num_layers):
    H = S                               # nn.GRU(2*S, S, ...)
    Hpad = max(LANE, _round_up(H, LANE))
    Ipad = 2 * Hpad                     # unified per-layer input width
    assert 2 * S <= Ipad
    E = 2 * S + L
    Epad = _round_up(E, LANE)
    Fpad = _round_up(F, LANE)
    Rpad = _round_up(R, LANE)

    k = 1.0 / np.sqrt(H)
    keys = jax.random.split(key, 8 * num_layers + 5)
    ki = 0

    wih_l, whh_l, bih_l, bhh_l = [], [], [], []
    for l in range(num_layers):
        in_size = 2 * S if l == 0 else 2 * H
        if l == 0:
            in_rows = np.arange(in_size)
        else:   # previous layer output layout: [fwd 0:H | pad | bwd Hpad:Hpad+H | pad]
            in_rows = np.concatenate([np.arange(H), Hpad + np.arange(H)])
        dirs = []
        for _ in range(2):
            wih = jax.random.uniform(keys[ki], (3 * H, in_size), jnp.float32, -k, k); ki += 1
            whh = jax.random.uniform(keys[ki], (3 * H, H), jnp.float32, -k, k); ki += 1
            bih = jax.random.uniform(keys[ki], (3 * H,), jnp.float32, -k, k); ki += 1
            bhh = jax.random.uniform(keys[ki], (3 * H,), jnp.float32, -k, k); ki += 1
            dirs.append((np.asarray(wih), np.asarray(whh),
                         np.asarray(bih), np.asarray(bhh)))
        wp, hp, bip, bhp = _pad_gru_layer(dirs, in_rows, Ipad, Hpad)
        wih_l.append(wp); whh_l.append(hp); bih_l.append(bip); bhh_l.append(bhp)

    params = {
        'num_layers': num_layers, 'H': H, 'Hpad': Hpad, 'Ipad': Ipad,
        'Epad': Epad, 'Rpad': Rpad,
        # MXU operands stored in bf16 (cast once here); biases stay f32.
        'gru': (jnp.asarray(np.stack(wih_l), jnp.bfloat16),
                jnp.asarray(np.stack(whh_l), jnp.bfloat16),
                jnp.asarray(np.stack(bih_l), jnp.float32),
                jnp.asarray(np.stack(bhh_l), jnp.float32)),
    }

    # RE weights (PyTorch nn.Linear layout) -> padded / transposed once here.
    kf1 = 1.0 / np.sqrt(E)
    kf2 = 1.0 / np.sqrt(2 * F + 1 + R)
    W1 = np.asarray(jax.random.uniform(keys[ki], (F, E), jnp.float32, -kf1, kf1)); ki += 1
    b1 = np.asarray(jax.random.uniform(keys[ki], (F,), jnp.float32, -kf1, kf1)); ki += 1
    W2 = np.asarray(jax.random.uniform(keys[ki], (R, 2 * F + 1 + R), jnp.float32, -kf2, kf2)); ki += 1
    b2 = np.asarray(jax.random.uniform(keys[ki], (R,), jnp.float32, -kf2, kf2)); ki += 1
    Mdiag = np.asarray(jax.random.uniform(keys[ki], (R, E), jnp.float32, 0.0, 1.0)); ki += 1

    w1t = np.zeros((Epad, Fpad), np.float32);   w1t[:E, :F] = W1.T
    b1p = np.zeros((1, Fpad), np.float32);      b1p[0, :F] = b1
    mdt = np.zeros((Epad, Rpad), np.float32);   mdt[:E, :R] = Mdiag.T
    w2h1t = np.zeros((Fpad, Rpad), np.float32); w2h1t[:F, :R] = W2[:, :F].T
    w2h2t = np.zeros((Fpad, Rpad), np.float32); w2h2t[:F, :R] = W2[:, F:2 * F].T
    w2c = np.zeros((1, Rpad), np.float32);      w2c[0, :R] = W2[:, 2 * F]
    w2dt = np.zeros((Rpad, Rpad), np.float32);  w2dt[:R, :R] = W2[:, 2 * F + 1:].T
    b2p = np.zeros((1, Rpad), np.float32);      b2p[0, :R] = b2
    params['re'] = {
        'w1t': jnp.asarray(w1t, jnp.bfloat16),
        'b1': jnp.asarray(b1p),
        'mdt': jnp.asarray(mdt, jnp.bfloat16),
        'w2h1t': jnp.asarray(w2h1t, jnp.bfloat16),
        'w2h2t': jnp.asarray(w2h2t, jnp.bfloat16),
        'w2c': jnp.asarray(w2c),
        'w2dt': jnp.asarray(w2dt, jnp.bfloat16),
        'b2': jnp.asarray(b2p),
    }
    return params


# ------------------------------ forward --------------------------------------
def respecific_rnn_forward(params, shared_repr, ner_tag_emb,
                           rstartseqs, rendseqs, rseqs, num_rel_types):
    # TODO(synk): nn.Dropout / re_dropout are stochastic; treated as identity (eval mode).
    T, B, I0 = shared_repr.shape
    H = params['H']; Hpad = params['Hpad']; Ipad = params['Ipad']
    Epad = params['Epad']; Rpad = params['Rpad']

    # Pad batch to a sublane multiple and the feature dim to the unified
    # (2*Hpad)-lane layer-input width (padding rows hit all-zero Wih rows).
    B_pad = _round_up(max(B, 8), 8)
    x = jnp.pad(shared_repr, ((0, 0), (0, B_pad - B), (0, Ipad - I0)))

    wih_all, whh_all, bih_all, bhh_all = params['gru']
    y = gru_stack(x, wih_all, whh_all, bih_all, bhh_all)     # (T, B_pad, 2*Hpad)

    # Lane-padded RE entity embedding: [fwd H | bwd H | ner L | 0...] (Epad lanes)
    re_rep = jnp.concatenate(
        [y[:, :B, :H], y[:, :B, Hpad:Hpad + H], ner_tag_emb], axis=-1)  # (T,B,E)
    E = re_rep.shape[-1]
    re_rep_pad = jnp.pad(re_rep, ((0, 0), (0, 0), (0, Epad - E)))

    # Host-side pair enumeration + BCE targets (mirrors reference _trim_embeddings;
    # the reference loops over the GRU *time* axis and indexes the batch axis).
    D0 = re_rep.shape[0]
    seq_idx, a_idx, b_idx, targets = [], [], [], []
    for i in range(D0):
        rstart = list(map(int, np.asarray(rstartseqs[i])))
        rend = list(map(int, np.asarray(rendseqs[i])))
        rseq = list(map(int, np.asarray(rseqs[i])))
        tokens = rstart + rend
        true_labels = defaultdict(list)
        for s, e, rel in zip(rstart, rend, rseq):
            true_labels[rel].append((s, e))
        for (pa, pb) in itertools.combinations(range(len(tokens)), 2):
            seq_idx.append(i)
            a_idx.append(tokens[pa])
            b_idx.append(tokens[pb])
            tgt = np.zeros((num_rel_types,), np.float32)
            for r in range(num_rel_types):
                if (tokens[pa], tokens[pb]) in true_labels[r]:
                    tgt[r] = 1.0
            targets.append(tgt)

    P = len(seq_idx)
    if P == 0:
        return {'loss': jnp.float32(0.0)}, jnp.zeros((0, num_rel_types), jnp.float32)

    TP = RE_PAIR_TILE
    P_pad = _round_up(P, TP)
    seq_idx = jnp.asarray(np.array(seq_idx, np.int32))
    a_idx = jnp.asarray(np.array(a_idx, np.int32))
    b_idx = jnp.asarray(np.array(b_idx, np.int32))

    # TODO(synk): pair-row gather stays in XLA; an in-kernel DMA gather would
    # issue ~TP tiny copies per tile and only pays off at much larger P.
    e1 = re_rep_pad[seq_idx, a_idx]                # (P, Epad)
    e2 = re_rep_pad[seq_idx, b_idx]
    e1p = jnp.pad(e1, ((0, P_pad - P), (0, 0)))
    e2p = jnp.pad(e2, ((0, P_pad - P), (0, 0)))
    tgtp = np.zeros((P_pad, Rpad), np.float32)
    tgtp[:P, :num_rel_types] = np.stack(targets)
    tgtp = jnp.asarray(tgtp)
    nvalid = jnp.asarray(np.array([P], np.int32))

    loss, scores_pad = re_pair_scores_and_loss(
        e1p, e2p, tgtp, nvalid, params['re'], num_rel_types, tp=TP)
    return {'loss': loss}, scores_pad[:P, :num_rel_types]


# ----------------------------- main -------------------------------------------
if __name__ == "__main__":
    # small shapes consistent with the module
    S = 16          # shared_layer_size  (GRU input = 2*S = 32, hidden = S)
    L = 8           # label_embeddings_size
    R = 3           # num_rel_types
    F = 16          # re_ff1_size
    num_layers = 2
    D0, D1 = 4, 8   # (time, batch) for the GRU; (batch, tokens) for trimming
    K = 2           # relations annotated per sequence

    key = jax.random.PRNGKey(0)
    kp, kx, kt, ks, ke, kr = jax.random.split(key, 6)
    params = init_params(kp, S, L, R, F, num_layers)

    shared_representations = jax.random.normal(kx, (D0, D1, 2 * S), jnp.float32)
    ner_tag_embeddings = jax.random.normal(kt, (D0, D1, L), jnp.float32)
    rstartseqs = np.array(jax.random.randint(ks, (D0, K), 0, D1))
    rendseqs = np.array(jax.random.randint(ke, (D0, K), 0, D1))
    rseqs = np.array(jax.random.randint(kr, (D0, K), 0, R))

    out, scores = respecific_rnn_forward(
        params, shared_representations, ner_tag_embeddings,
        rstartseqs, rendseqs, rseqs, R)
    jax.block_until_ready(out['loss'])
    jax.block_until_ready(scores)
    print("KERNEL_OK")
</pallas_src>

<mosaic_0001>
module attributes {stable_mosaic.version = 11 : i64} {
  func.func @gru_stack_kernel(%arg0: i32, %arg1: memref<4x8x256xf32, #tpu.memory_space<vmem>>, %arg2: memref<1x256x768xbf16, #tpu.memory_space<vmem>>, %arg3: memref<1x2x128x384xbf16, #tpu.memory_space<vmem>>, %arg4: memref<1x1x768xf32, #tpu.memory_space<vmem>>, %arg5: memref<1x2x1x384xf32, #tpu.memory_space<vmem>>, %arg6: memref<4x8x256xf32, #tpu.memory_space<vmem>>, %arg7: memref<4x8x384xbf16, #tpu.memory_space<vmem>>, %arg8: memref<4x8x384xbf16, #tpu.memory_space<vmem>>) attributes {dimension_semantics = [#tpu.dimension_semantics<arbitrary>], iteration_bounds = array<i64: 2>, scalar_prefetch = 0 : i64, scratch_operands = 2 : i64, tpu.core_type = #tpu.core_type<tc>, window_params = [{pipeline_mode = #tpu.pipeline_mode<synchronous>, transform_indices = @transform_0, window_bounds = array<i64: 4, 8, 256>}, {transform_indices = @transform_1, window_bounds = array<i64: 1, 256, 768>}, {transform_indices = @transform_2, window_bounds = array<i64: 1, 2, 128, 384>}, {transform_indices = @transform_3, window_bounds = array<i64: 1, 1, 768>}, {transform_indices = @transform_4, window_bounds = array<i64: 1, 2, 1, 384>}, {pipeline_mode = #tpu.pipeline_mode<synchronous>, transform_indices = @transform_5, window_bounds = array<i64: 4, 8, 256>}]} {
    %c0 = arith.constant 0 : index
    %c0_0 = arith.constant 0 : index
    %c0_1 = arith.constant 0 : index
    %0 = vector.load %arg2[%c0, %c0_0, %c0_1] : memref<1x256x768xbf16, #tpu.memory_space<vmem>>, vector<1x256x768xbf16>
    %1 = vector.shape_cast %0 : vector<1x256x768xbf16> to vector<256x768xbf16>
    %c0_2 = arith.constant 0 : index
    %c0_3 = arith.constant 0 : index
    %c0_4 = arith.constant 0 : index
    %2 = vector.load %arg4[%c0_2, %c0_3, %c0_4] : memref<1x1x768xf32, #tpu.memory_space<vmem>>, vector<1x1x768xf32>
    %3 = vector.shape_cast %2 : vector<1x1x768xf32> to vector<1x768xf32>
    %c0_i32 = arith.constant 0 : i32
    %4 = arith.cmpi eq, %arg0, %c0_i32 : i32
    %5 = arith.extui %4 : i1 to i32
    %c0_i32_5 = arith.constant 0 : i32
    %6 = arith.cmpi ne, %5, %c0_i32_5 : i32
    scf.if %6 {
      %c0_91 = arith.constant 0 : index
      %c0_92 = arith.constant 0 : index
      %c0_93 = arith.constant 0 : index
      %327 = vector.load %arg1[%c0_91, %c0_92, %c0_93] : memref<4x8x256xf32, #tpu.memory_space<vmem>>, vector<4x8x256xf32>
      %328 = vector.shape_cast %327 : vector<4x8x256xf32> to vector<32x256xf32>
      %329 = arith.truncf %328 : vector<32x256xf32> to vector<32x256xbf16>
      %cst_94 = arith.constant dense<0.000000e+00> : vector<32x768xf32>
      %330 = tpu.matmul %329, %1, %cst_94 {dimension_numbers = #tpu.dot_dimension_numbers<[1], [0], [0], [1], [0, 0, 1, 1], [], []>} : vector<32x256xbf16>, vector<256x768xbf16>, vector<32x768xf32> -> vector<32x768xf32>
      %331 = vector.broadcast %3 : vector<1x768xf32> to vector<32x768xf32>
      %332 = arith.addf %330, %331 : vector<32x768xf32>
      %333 = vector.extract_strided_slice %332 {offsets = [0, 0], sizes = [32, 384], strides = [1, 1]} : vector<32x768xf32> to vector<32x384xf32>
      %334 = vector.shape_cast %333 : vector<32x384xf32> to vector<4x8x384xf32>
      %335 = arith.truncf %334 : vector<4x8x384xf32> to vector<4x8x384xbf16>
      %c0_95 = arith.constant 0 : index
      %c0_96 = arith.constant 0 : index
      %c0_97 = arith.constant 0 : index
      %336 = vector.load %arg7[%c0_95, %c0_96, %c0_97] : memref<4x8x384xbf16, #tpu.memory_space<vmem>>, vector<4x8x384xbf16>
      tpu.vector_store %arg7[%c0_95, %c0_96, %c0_97], %335 {strides = array<i32>} : memref<4x8x384xbf16, #tpu.memory_space<vmem>>, vector<4x8x384xbf16>,
      %337 = vector.extract_strided_slice %332 {offsets = [0, 384], sizes = [32, 384], strides = [1, 1]} : vector<32x768xf32> to vector<32x384xf32>
      %338 = vector.shape_cast %337 : vector<32x384xf32> to vector<4x8x384xf32>
      %339 = arith.truncf %338 : vector<4x8x384xf32> to vector<4x8x384xbf16>
      %c0_98 = arith.constant 0 : index
      %c0_99 = arith.constant 0 : index
      %c0_100 = arith.constant 0 : index
      %340 = vector.load %arg8[%c0_98, %c0_99, %c0_100] : memref<4x8x384xbf16, #tpu.memory_space<vmem>>, vector<4x8x384xbf16>
      tpu.vector_store %arg8[%c0_98, %c0_99, %c0_100], %339 {strides = array<i32>} : memref<4x8x384xbf16, #tpu.memory_space<vmem>>, vector<4x8x384xbf16>,
    } else {
    }
    %c0_i32_6 = arith.constant 0 : i32
    %7 = arith.cmpi ne, %arg0, %c0_i32_6 : i32
    %8 = arith.extui %7 : i1 to i32
    %c0_i32_7 = arith.constant 0 : i32
    %9 = arith.cmpi ne, %8, %c0_i32_7 : i32
    scf.if %9 {
      %c0_91 = arith.constant 0 : index
      %c0_92 = arith.constant 0 : index
      %c0_93 = arith.constant 0 : index
      %327 = vector.load %arg6[%c0_91, %c0_92, %c0_93] : memref<4x8x256xf32, #tpu.memory_space<vmem>>, vector<4x8x256xf32>
      %328 = vector.shape_cast %327 : vector<4x8x256xf32> to vector<32x256xf32>
      %329 = arith.truncf %328 : vector<32x256xf32> to vector<32x256xbf16>
      %cst_94 = arith.constant dense<0.000000e+00> : vector<32x768xf32>
      %330 = tpu.matmul %329, %1, %cst_94 {dimension_numbers = #tpu.dot_dimension_numbers<[1], [0], [0], [1], [0, 0, 1, 1], [], []>} : vector<32x256xbf16>, vector<256x768xbf16>, vector<32x768xf32> -> vector<32x768xf32>
      %331 = vector.broadcast %3 : vector<1x768xf32> to vector<32x768xf32>
      %332 = arith.addf %330, %331 : vector<32x768xf32>
      %333 = vector.extract_strided_slice %332 {offsets = [0, 0], sizes = [32, 384], strides = [1, 1]} : vector<32x768xf32> to vector<32x384xf32>
      %334 = vector.shape_cast %333 : vector<32x384xf32> to vector<4x8x384xf32>
      %335 = arith.truncf %334 : vector<4x8x384xf32> to vector<4x8x384xbf16>
      %c0_95 = arith.constant 0 : index
      %c0_96 = arith.constant 0 : index
      %c0_97 = arith.constant 0 : index
      %336 = vector.load %arg7[%c0_95, %c0_96, %c0_97] : memref<4x8x384xbf16, #tpu.memory_space<vmem>>, vector<4x8x384xbf16>
      tpu.vector_store %arg7[%c0_95, %c0_96, %c0_97], %335 {strides = array<i32>} : memref<4x8x384xbf16, #tpu.memory_space<vmem>>, vector<4x8x384xbf16>,
      %337 = vector.extract_strided_slice %332 {offsets = [0, 384], sizes = [32, 384], strides = [1, 1]} : vector<32x768xf32> to vector<32x384xf32>
      %338 = vector.shape_cast %337 : vector<32x384xf32> to vector<4x8x384xf32>
      %339 = arith.truncf %338 : vector<4x8x384xf32> to vector<4x8x384xbf16>
      %c0_98 = arith.constant 0 : index
      %c0_99 = arith.constant 0 : index
      %c0_100 = arith.constant 0 : index
      %340 = vector.load %arg8[%c0_98, %c0_99, %c0_100] : memref<4x8x384xbf16, #tpu.memory_space<vmem>>, vector<4x8x384xbf16>
      tpu.vector_store %arg8[%c0_98, %c0_99, %c0_100], %339 {strides = array<i32>} : memref<4x8x384xbf16, #tpu.memory_space<vmem>>, vector<4x8x384xbf16>,
    } else {
    }
    %c0_8 = arith.constant 0 : index
    %c0_9 = arith.constant 0 : index
    %c0_10 = arith.constant 0 : index
    %c0_11 = arith.constant 0 : index
    %10 = vector.load %arg3[%c0_8, %c0_9, %c0_10, %c0_11] : memref<1x2x128x384xbf16, #tpu.memory_space<vmem>>, vector<1x1x128x384xbf16>
    %11 = vector.shape_cast %10 : vector<1x1x128x384xbf16> to vector<128x384xbf16>
    %c0_12 = arith.constant 0 : index
    %c1 = arith.constant 1 : index
    %c0_13 = arith.constant 0 : index
    %c0_14 = arith.constant 0 : index
    %12 = vector.load %arg3[%c0_12, %c1, %c0_13, %c0_14] : memref<1x2x128x384xbf16, #tpu.memory_space<vmem>>, vector<1x1x128x384xbf16>
    %13 = vector.shape_cast %12 : vector<1x1x128x384xbf16> to vector<128x384xbf16>
    %c0_15 = arith.constant 0 : index
    %c0_16 = arith.constant 0 : index
    %c0_17 = arith.constant 0 : index
    %c0_18 = arith.constant 0 : index
    %14 = vector.load %arg5[%c0_15, %c0_16, %c0_17, %c0_18] : memref<1x2x1x384xf32, #tpu.memory_space<vmem>>, vector<1x1x1x384xf32>
    %15 = vector.shape_cast %14 : vector<1x1x1x384xf32> to vector<1x384xf32>
    %c0_19 = arith.constant 0 : index
    %c1_20 = arith.constant 1 : index
    %c0_21 = arith.constant 0 : index
    %c0_22 = arith.constant 0 : index
    %16 = vector.load %arg5[%c0_19, %c1_20, %c0_21, %c0_22] : memref<1x2x1x384xf32, #tpu.memory_space<vmem>>, vector<1x1x1x384xf32>
    %17 = vector.shape_cast %16 : vector<1x1x1x384xf32> to vector<1x384xf32>
    %cst = arith.constant 0.000000e+00 : f32
    %18 = vector.broadcast %cst : f32 to vector<8x128xf32>
    %c0_i32_23 = arith.constant 0 : i32
    %c3_i32 = arith.constant 3 : i32
    %19 = arith.subi %c3_i32, %c0_i32_23 : i32
    %20 = arith.index_cast %c0_i32_23 : i32 to index
    %c0_24 = arith.constant 0 : index
    %c0_25 = arith.constant 0 : index
    %21 = vector.load %arg7[%20, %c0_24, %c0_25] : memref<4x8x384xbf16, #tpu.memory_space<vmem>>, vector<1x8x384xbf16>
    %22 = vector.shape_cast %21 : vector<1x8x384xbf16> to vector<8x384xbf16>
    %23 = arith.extf %22 : vector<8x384xbf16> to vector<8x384xf32>
    %24 = arith.index_cast %19 : i32 to index
    %c0_26 = arith.constant 0 : index
    %c0_27 = arith.constant 0 : index
    %25 = vector.load %arg8[%24, %c0_26, %c0_27] : memref<4x8x384xbf16, #tpu.memory_space<vmem>>, vector<1x8x384xbf16>
    %26 = vector.shape_cast %25 : vector<1x8x384xbf16> to vector<8x384xbf16>
    %27 = arith.extf %26 : vector<8x384xbf16> to vector<8x384xf32>
    %28 = arith.truncf %18 : vector<8x128xf32> to vector<8x128xbf16>
    %cst_28 = arith.constant dense<0.000000e+00> : vector<8x384xf32>
    %29 = tpu.matmul %28, %11, %cst_28 {dimension_numbers = #tpu.dot_dimension_numbers<[1], [0], [0], [1], [0, 0, 1, 1], [], []>} : vector<8x128xbf16>, vector<128x384xbf16>, vector<8x384xf32> -> vector<8x384xf32>
    %30 = vector.broadcast %15 : vector<1x384xf32> to vector<8x384xf32>
    %31 = arith.addf %29, %30 : vector<8x384xf32>
    %32 = arith.truncf %18 : vector<8x128xf32> to vector<8x128xbf16>
    %cst_29 = arith.constant dense<0.000000e+00> : vector<8x384xf32>
    %33 = tpu.matmul %32, %13, %cst_29 {dimension_numbers = #tpu.dot_dimension_numbers<[1], [0], [0], [1], [0, 0, 1, 1], [], []>} : vector<8x128xbf16>, vector<128x384xbf16>, vector<8x384xf32> -> vector<8x384xf32>
    %34 = vector.broadcast %17 : vector<1x384xf32> to vector<8x384xf32>
    %35 = arith.addf %33, %34 : vector<8x384xf32>
    %36 = vector.extract_strided_slice %23 {offsets = [0, 0], sizes = [8, 128], strides = [1, 1]} : vector<8x384xf32> to vector<8x128xf32>
    %37 = vector.extract_strided_slice %31 {offsets = [0, 0], sizes = [8, 128], strides = [1, 1]} : vector<8x384xf32> to vector<8x128xf32>
    %38 = arith.addf %36, %37 : vector<8x128xf32>
    %39 = arith.negf %38 : vector<8x128xf32>
    %40 = math.exp %39 : vector<8x128xf32>
    %cst_30 = arith.constant 1.000000e+00 : f32
    %41 = vector.broadcast %cst_30 : f32 to vector<8x128xf32>
    %42 = arith.addf %41, %40 : vector<8x128xf32>
    %43 = arith.divf %41, %42 : vector<8x128xf32>
    %44 = vector.extract_strided_slice %23 {offsets = [0, 128], sizes = [8, 128], strides = [1, 1]} : vector<8x384xf32> to vector<8x128xf32>
    %45 = vector.extract_strided_slice %31 {offsets = [0, 128], sizes = [8, 128], strides = [1, 1]} : vector<8x384xf32> to vector<8x128xf32>
    %46 = arith.addf %44, %45 : vector<8x128xf32>
    %47 = arith.negf %46 : vector<8x128xf32>
    %48 = math.exp %47 : vector<8x128xf32>
    %cst_31 = arith.constant 1.000000e+00 : f32
    %49 = vector.broadcast %cst_31 : f32 to vector<8x128xf32>
    %50 = arith.addf %49, %48 : vector<8x128xf32>
    %51 = arith.divf %49, %50 : vector<8x128xf32>
    %52 = vector.extract_strided_slice %23 {offsets = [0, 256], sizes = [8, 128], strides = [1, 1]} : vector<8x384xf32> to vector<8x128xf32>
    %53 = vector.extract_strided_slice %31 {offsets = [0, 256], sizes = [8, 128], strides = [1, 1]} : vector<8x384xf32> to vector<8x128xf32>
    %54 = arith.mulf %43, %53 : vector<8x128xf32>
    %55 = arith.addf %52, %54 : vector<8x128xf32>
    %56 = math.tanh %55 : vector<8x128xf32>
    %cst_32 = arith.constant 1.000000e+00 : f32
    %57 = vector.broadcast %cst_32 : f32 to vector<8x128xf32>
    %58 = arith.subf %57, %51 : vector<8x128xf32>
    %59 = arith.mulf %58, %56 : vector<8x128xf32>
    %60 = arith.mulf %51, %18 : vector<8x128xf32>
    %61 = arith.addf %59, %60 : vector<8x128xf32>
    %62 = vector.extract_strided_slice %27 {offsets = [0, 0], sizes = [8, 128], strides = [1, 1]} : vector<8x384xf32> to vector<8x128xf32>
    %63 = vector.extract_strided_slice %35 {offsets = [0, 0], sizes = [8, 128], strides = [1, 1]} : vector<8x384xf32> to vector<8x128xf32>
    %64 = arith.addf %62, %63 : vector<8x128xf32>
    %65 = arith.negf %64 : vector<8x128xf32>
    %66 = math.exp %65 : vector<8x128xf32>
    %cst_33 = arith.constant 1.000000e+00 : f32
    %67 = vector.broadcast %cst_33 : f32 to vector<8x128xf32>
    %68 = arith.addf %67, %66 : vector<8x128xf32>
    %69 = arith.divf %67, %68 : vector<8x128xf32>
    %70 = vector.extract_strided_slice %27 {offsets = [0, 128], sizes = [8, 128], strides = [1, 1]} : vector<8x384xf32> to vector<8x128xf32>
    %71 = vector.extract_strided_slice %35 {offsets = [0, 128], sizes = [8, 128], strides = [1, 1]} : vector<8x384xf32> to vector<8x128xf32>
    %72 = arith.addf %70, %71 : vector<8x128xf32>
    %73 = arith.negf %72 : vector<8x128xf32>
    %74 = math.exp %73 : vector<8x128xf32>
    %cst_34 = arith.constant 1.000000e+00 : f32
    %75 = vector.broadcast %cst_34 : f32 to vector<8x128xf32>
    %76 = arith.addf %75, %74 : vector<8x128xf32>
    %77 = arith.divf %75, %76 : vector<8x128xf32>
    %78 = vector.extract_strided_slice %27 {offsets = [0, 256], sizes = [8, 128], strides = [1, 1]} : vector<8x384xf32> to vector<8x128xf32>
    %79 = vector.extract_strided_slice %35 {offsets = [0, 256], sizes = [8, 128], strides = [1, 1]} : vector<8x384xf32> to vector<8x128xf32>
    %80 = arith.mulf %69, %79 : vector<8x128xf32>
    %81 = arith.addf %78, %80 : vector<8x128xf32>
    %82 = math.tanh %81 : vector<8x128xf32>
    %cst_35 = arith.constant 1.000000e+00 : f32
    %83 = vector.broadcast %cst_35 : f32 to vector<8x128xf32>
    %84 = arith.subf %83, %77 : vector<8x128xf32>
    %85 = arith.mulf %84, %82 : vector<8x128xf32>
    %86 = arith.mulf %77, %18 : vector<8x128xf32>
    %87 = arith.addf %85, %86 : vector<8x128xf32>
    %88 = arith.index_cast %c0_i32_23 : i32 to index
    %c0_36 = arith.constant 0 : index
    %c0_37 = arith.constant 0 : index
    %89 = vector.load %arg6[%88, %c0_36, %c0_37] : memref<4x8x256xf32, #tpu.memory_space<vmem>>, vector<1x8x128xf32>
    %90 = vector.shape_cast %89 : vector<1x8x128xf32> to vector<8x128xf32>
    %91 = vector.shape_cast %61 : vector<8x128xf32> to vector<1x8x128xf32>
    tpu.vector_store %arg6[%88, %c0_36, %c0_37], %91 {strides = array<i32>} : memref<4x8x256xf32, #tpu.memory_space<vmem>>, vector<1x8x128xf32>,
    %92 = arith.index_cast %19 : i32 to index
    %c0_38 = arith.constant 0 : index
    %c128 = arith.constant 128 : index
    %93 = vector.load %arg6[%92, %c0_38, %c128] : memref<4x8x256xf32, #tpu.memory_space<vmem>>, vector<1x8x128xf32>
    %94 = vector.shape_cast %93 : vector<1x8x128xf32> to vector<8x128xf32>
    %95 = vector.shape_cast %87 : vector<8x128xf32> to vector<1x8x128xf32>
    tpu.vector_store %arg6[%92, %c0_38, %c128], %95 {strides = array<i32>} : memref<4x8x256xf32, #tpu.memory_space<vmem>>, vector<1x8x128xf32>,
    %c1_i32 = arith.constant 1 : i32
    %c3_i32_39 = arith.constant 3 : i32
    %96 = arith.subi %c3_i32_39, %c1_i32 : i32
    %97 = arith.index_cast %c1_i32 : i32 to index
    %c0_40 = arith.constant 0 : index
    %c0_41 = arith.constant 0 : index
    %98 = vector.load %arg7[%97, %c0_40, %c0_41] : memref<4x8x384xbf16, #tpu.memory_space<vmem>>, vector<1x8x384xbf16>
    %99 = vector.shape_cast %98 : vector<1x8x384xbf16> to vector<8x384xbf16>
    %100 = arith.extf %99 : vector<8x384xbf16> to vector<8x384xf32>
    %101 = arith.index_cast %96 : i32 to index
    %c0_42 = arith.constant 0 : index
    %c0_43 = arith.constant 0 : index
    %102 = vector.load %arg8[%101, %c0_42, %c0_43] : memref<4x8x384xbf16, #tpu.memory_space<vmem>>, vector<1x8x384xbf16>
    %103 = vector.shape_cast %102 : vector<1x8x384xbf16> to vector<8x384xbf16>
    %104 = arith.extf %103 : vector<8x384xbf16> to vector<8x384xf32>
    %105 = arith.truncf %61 : vector<8x128xf32> to vector<8x128xbf16>
    %cst_44 = arith.constant dense<0.000000e+00> : vector<8x384xf32>
    %106 = tpu.matmul %105, %11, %cst_44 {dimension_numbers = #tpu.dot_dimension_numbers<[1], [0], [0], [1], [0, 0, 1, 1], [], []>} : vector<8x128xbf16>, vector<128x384xbf16>, vector<8x384xf32> -> vector<8x384xf32>
    %107 = vector.broadcast %15 : vector<1x384xf32> to vector<8x384xf32>
    %108 = arith.addf %106, %107 : vector<8x384xf32>
    %109 = arith.truncf %87 : vector<8x128xf32> to vector<8x128xbf16>
    %cst_45 = arith.constant dense<0.000000e+00> : vector<8x384xf32>
    %110 = tpu.matmul %109, %13, %cst_45 {dimension_numbers = #tpu.dot_dimension_numbers<[1], [0], [0], [1], [0, 0, 1, 1], [], []>} : vector<8x128xbf16>, vector<128x384xbf16>, vector<8x384xf32> -> vector<8x384xf32>
    %111 = vector.broadcast %17 : vector<1x384xf32> to vector<8x384xf32>
    %112 = arith.addf %110, %111 : vector<8x384xf32>
    %113 = vector.extract_strided_slice %100 {offsets = [0, 0], sizes = [8, 128], strides = [1, 1]} : vector<8x384xf32> to vector<8x128xf32>
    %114 = vector.extract_strided_slice %108 {offsets = [0, 0], sizes = [8, 128], strides = [1, 1]} : vector<8x384xf32> to vector<8x128xf32>
    %115 = arith.addf %113, %114 : vector<8x128xf32>
    %116 = arith.negf %115 : vector<8x128xf32>
    %117 = math.exp %116 : vector<8x128xf32>
    %cst_46 = arith.constant 1.000000e+00 : f32
    %118 = vector.broadcast %cst_46 : f32 to vector<8x128xf32>
    %119 = arith.addf %118, %117 : vector<8x128xf32>
    %120 = arith.divf %118, %119 : vector<8x128xf32>
    %121 = vector.extract_strided_slice %100 {offsets = [0, 128], sizes = [8, 128], strides = [1, 1]} : vector<8x384xf32> to vector<8x128xf32>
    %122 = vector.extract_strided_slice %108 {offsets = [0, 128], sizes = [8, 128], strides = [1, 1]} : vector<8x384xf32> to vector<8x128xf32>
    %123 = arith.addf %121, %122 : vector<8x128xf32>
    %124 = arith.negf %123 : vector<8x128xf32>
    %125 = math.exp %124 : vector<8x128xf32>
    %cst_47 = arith.constant 1.000000e+00 : f32
    %126 = vector.broadcast %cst_47 : f32 to vector<8x128xf32>
    %127 = arith.addf %126, %125 : vector<8x128xf32>
    %128 = arith.divf %126, %127 : vector<8x128xf32>
    %129 = vector.extract_strided_slice %100 {offsets = [0, 256], sizes = [8, 128], strides = [1, 1]} : vector<8x384xf32> to vector<8x128xf32>
    %130 = vector.extract_strided_slice %108 {offsets = [0, 256], sizes = [8, 128], strides = [1, 1]} : vector<8x384xf32> to vector<8x128xf32>
    %131 = arith.mulf %120, %130 : vector<8x128xf32>
    %132 = arith.addf %129, %131 : vector<8x128xf32>
    %133 = math.tanh %132 : vector<8x128xf32>
    %cst_48 = arith.constant 1.000000e+00 : f32
    %134 = vector.broadcast %cst_48 : f32 to vector<8x128xf32>
    %135 = arith.subf %134, %128 : vector<8x128xf32>
    %136 = arith.mulf %135, %133 : vector<8x128xf32>
    %137 = arith.mulf %128, %61 : vector<8x128xf32>
    %138 = arith.addf %136, %137 : vector<8x128xf32>
    %139 = vector.extract_strided_slice %104 {offsets = [0, 0], sizes = [8, 128], strides = [1, 1]} : vector<8x384xf32> to vector<8x128xf32>
    %140 = vector.extract_strided_slice %112 {offsets = [0, 0], sizes = [8, 128], strides = [1, 1]} : vector<8x384xf32> to vector<8x128xf32>
    %141 = arith.addf %139, %140 : vector<8x128xf32>
    %142 = arith.negf %141 : vector<8x128xf32>
    %143 = math.exp %142 : vector<8x128xf32>
    %cst_49 = arith.constant 1.000000e+00 : f32
    %144 = vector.broadcast %cst_49 : f32 to vector<8x128xf32>
    %145 = arith.addf %144, %143 : vector<8x128xf32>
    %146 = arith.divf %144, %145 : vector<8x128xf32>
    %147 = vector.extract_strided_slice %104 {offsets = [0, 128], sizes = [8, 128], strides = [1, 1]} : vector<8x384xf32> to vector<8x128xf32>
    %148 = vector.extract_strided_slice %112 {offsets = [0, 128], sizes = [8, 128], strides = [1, 1]} : vector<8x384xf32> to vector<8x128xf32>
    %149 = arith.addf %147, %148 : vector<8x128xf32>
    %150 = arith.negf %149 : vector<8x128xf32>
    %151 = math.exp %150 : vector<8x128xf32>
    %cst_50 = arith.constant 1.000000e+00 : f32
    %152 = vector.broadcast %cst_50 : f32 to vector<8x128xf32>
    %153 = arith.addf %152, %151 : vector<8x128xf32>
    %154 = arith.divf %152, %153 : vector<8x128xf32>
    %155 = vector.extract_strided_slice %104 {offsets = [0, 256], sizes = [8, 128], strides = [1, 1]} : vector<8x384xf32> to vector<8x128xf32>
    %156 = vector.extract_strided_slice %112 {offsets = [0, 256], sizes = [8, 128], strides = [1, 1]} : vector<8x384xf32> to vector<8x128xf32>
    %157 = arith.mulf %146, %156 : vector<8x128xf32>
    %158 = arith.addf %155, %157 : vector<8x128xf32>
    %159 = math.tanh %158 : vector<8x128xf32>
    %cst_51 = arith.constant 1.000000e+00 : f32
    %160 = vector.broadcast %cst_51 : f32 to vector<8x128xf32>
    %161 = arith.subf %160, %154 : vector<8x128xf32>
    %162 = arith.mulf %161, %159 : vector<8x128xf32>
    %163 = arith.mulf %154, %87 : vector<8x128xf32>
    %164 = arith.addf %162, %163 : vector<8x128xf32>
    %165 = arith.index_cast %c1_i32 : i32 to index
    %c0_52 = arith.constant 0 : index
    %c0_53 = arith.constant 0 : index
    %166 = vector.load %arg6[%165, %c0_52, %c0_53] : memref<4x8x256xf32, #tpu.memory_space<vmem>>, vector<1x8x128xf32>
    %167 = vector.shape_cast %166 : vector<1x8x128xf32> to vector<8x128xf32>
    %168 = vector.shape_cast %138 : vector<8x128xf32> to vector<1x8x128xf32>
    tpu.vector_store %arg6[%165, %c0_52, %c0_53], %168 {strides = array<i32>} : memref<4x8x256xf32, #tpu.memory_space<vmem>>, vector<1x8x128xf32>,
    %169 = arith.index_cast %96 : i32 to index
    %c0_54 = arith.constant 0 : index
    %c128_55 = arith.constant 128 : index
    %170 = vector.load %arg6[%169, %c0_54, %c128_55] : memref<4x8x256xf32, #tpu.memory_space<vmem>>, vector<1x8x128xf32>
    %171 = vector.shape_cast %170 : vector<1x8x128xf32> to vector<8x128xf32>
    %172 = vector.shape_cast %164 : vector<8x128xf32> to vector<1x8x128xf32>
    tpu.vector_store %arg6[%169, %c0_54, %c128_55], %172 {strides = array<i32>} : memref<4x8x256xf32, #tpu.memory_space<vmem>>, vector<1x8x128xf32>,
    %c2_i32 = arith.constant 2 : i32
    %c3_i32_56 = arith.constant 3 : i32
    %173 = arith.subi %c3_i32_56, %c2_i32 : i32
    %174 = arith.index_cast %c2_i32 : i32 to index
    %c0_57 = arith.constant 0 : index
    %c0_58 = arith.constant 0 : index
    %175 = vector.load %arg7[%174, %c0_57, %c0_58] : memref<4x8x384xbf16, #tpu.memory_space<vmem>>, vector<1x8x384xbf16>
    %176 = vector.shape_cast %175 : vector<1x8x384xbf16> to vector<8x384xbf16>
    %177 = arith.extf %176 : vector<8x384xbf16> to vector<8x384xf32>
    %178 = arith.index_cast %173 : i32 to index
    %c0_59 = arith.constant 0 : index
    %c0_60 = arith.constant 0 : index
    %179 = vector.load %arg8[%178, %c0_59, %c0_60] : memref<4x8x384xbf16, #tpu.memory_space<vmem>>, vector<1x8x384xbf16>
    %180 = vector.shape_cast %179 : vector<1x8x384xbf16> to vector<8x384xbf16>
    %181 = arith.extf %180 : vector<8x384xbf16> to vector<8x384xf32>
    %182 = arith.truncf %138 : vector<8x128xf32> to vector<8x128xbf16>
    %cst_61 = arith.constant dense<0.000000e+00> : vector<8x384xf32>
    %183 = tpu.matmul %182, %11, %cst_61 {dimension_numbers = #tpu.dot_dimension_numbers<[1], [0], [0], [1], [0, 0, 1, 1], [], []>} : vector<8x128xbf16>, vector<128x384xbf16>, vector<8x384xf32> -> vector<8x384xf32>
    %184 = vector.broadcast %15 : vector<1x384xf32> to vector<8x384xf32>
    %185 = arith.addf %183, %184 : vector<8x384xf32>
    %186 = arith.truncf %164 : vector<8x128xf32> to vector<8x128xbf16>
    %cst_62 = arith.constant dense<0.000000e+00> : vector<8x384xf32>
    %187 = tpu.matmul %186, %13, %cst_62 {dimension_numbers = #tpu.dot_dimension_numbers<[1], [0], [0], [1], [0, 0, 1, 1], [], []>} : vector<8x128xbf16>, vector<128x384xbf16>, vector<8x384xf32> -> vector<8x384xf32>
    %188 = vector.broadcast %17 : vector<1x384xf32> to vector<8x384xf32>
    %189 = arith.addf %187, %188 : vector<8x384xf32>
    %190 = vector.extract_strided_slice %177 {offsets = [0, 0], sizes = [8, 128], strides = [1, 1]} : vector<8x384xf32> to vector<8x128xf32>
    %191 = vector.extract_strided_slice %185 {offsets = [0, 0], sizes = [8, 128], strides = [1, 1]} : vector<8x384xf32> to vector<8x128xf32>
    %192 = arith.addf %190, %191 : vector<8x128xf32>
    %193 = arith.negf %192 : vector<8x128xf32>
    %194 = math.exp %193 : vector<8x128xf32>
    %cst_63 = arith.constant 1.000000e+00 : f32
    %195 = vector.broadcast %cst_63 : f32 to vector<8x128xf32>
    %196 = arith.addf %195, %194 : vector<8x128xf32>
    %197 = arith.divf %195, %196 : vector<8x128xf32>
    %198 = vector.extract_strided_slice %177 {offsets = [0, 128], sizes = [8, 128], strides = [1, 1]} : vector<8x384xf32> to vector<8x128xf32>
    %199 = vector.extract_strided_slice %185 {offsets = [0, 128], sizes = [8, 128], strides = [1, 1]} : vector<8x384xf32> to vector<8x128xf32>
    %200 = arith.addf %198, %199 : vector<8x128xf32>
    %201 = arith.negf %200 : vector<8x128xf32>
    %202 = math.exp %201 : vector<8x128xf32>
    %cst_64 = arith.constant 1.000000e+00 : f32
    %203 = vector.broadcast %cst_64 : f32 to vector<8x128xf32>
    %204 = arith.addf %203, %202 : vector<8x128xf32>
    %205 = arith.divf %203, %204 : vector<8x128xf32>
    %206 = vector.extract_strided_slice %177 {offsets = [0, 256], sizes = [8, 128], strides = [1, 1]} : vector<8x384xf32> to vector<8x128xf32>
    %207 = vector.extract_strided_slice %185 {offsets = [0, 256], sizes = [8, 128], strides = [1, 1]} : vector<8x384xf32> to vector<8x128xf32>
    %208 = arith.mulf %197, %207 : vector<8x128xf32>
    %209 = arith.addf %206, %208 : vector<8x128xf32>
    %210 = math.tanh %209 : vector<8x128xf32>
    %cst_65 = arith.constant 1.000000e+00 : f32
    %211 = vector.broadcast %cst_65 : f32 to vector<8x128xf32>
    %212 = arith.subf %211, %205 : vector<8x128xf32>
    %213 = arith.mulf %212, %210 : vector<8x128xf32>
    %214 = arith.mulf %205, %138 : vector<8x128xf32>
    %215 = arith.addf %213, %214 : vector<8x128xf32>
    %216 = vector.extract_strided_slice %181 {offsets = [0, 0], sizes = [8, 128], strides = [1, 1]} : vector<8x384xf32> to vector<8x128xf32>
    %217 = vector.extract_strided_slice %189 {offsets = [0, 0], sizes = [8, 128], strides = [1, 1]} : vector<8x384xf32> to vector<8x128xf32>
    %218 = arith.addf %216, %217 : vector<8x128xf32>
    %219 = arith.negf %218 : vector<8x128xf32>
    %220 = math.exp %219 : vector<8x128xf32>
    %cst_66 = arith.constant 1.000000e+00 : f32
    %221 = vector.broadcast %cst_66 : f32 to vector<8x128xf32>
    %222 = arith.addf %221, %220 : vector<8x128xf32>
    %223 = arith.divf %221, %222 : vector<8x128xf32>
    %224 = vector.extract_strided_slice %181 {offsets = [0, 128], sizes = [8, 128], strides = [1, 1]} : vector<8x384xf32> to vector<8x128xf32>
    %225 = vector.extract_strided_slice %189 {offsets = [0, 128], sizes = [8, 128], strides = [1, 1]} : vector<8x384xf32> to vector<8x128xf32>
    %226 = arith.addf %224, %225 : vector<8x128xf32>
    %227 = arith.negf %226 : vector<8x128xf32>
    %228 = math.exp %227 : vector<8x128xf32>
    %cst_67 = arith.constant 1.000000e+00 : f32
    %229 = vector.broadcast %cst_67 : f32 to vector<8x128xf32>
    %230 = arith.addf %229, %228 : vector<8x128xf32>
    %231 = arith.divf %229, %230 : vector<8x128xf32>
    %232 = vector.extract_strided_slice %181 {offsets = [0, 256], sizes = [8, 128], strides = [1, 1]} : vector<8x384xf32> to vector<8x128xf32>
    %233 = vector.extract_strided_slice %189 {offsets = [0, 256], sizes = [8, 128], strides = [1, 1]} : vector<8x384xf32> to vector<8x128xf32>
    %234 = arith.mulf %223, %233 : vector<8x128xf32>
    %235 = arith.addf %232, %234 : vector<8x128xf32>
    %236 = math.tanh %235 : vector<8x128xf32>
    %cst_68 = arith.constant 1.000000e+00 : f32
    %237 = vector.broadcast %cst_68 : f32 to vector<8x128xf32>
    %238 = arith.subf %237, %231 : vector<8x128xf32>
    %239 = arith.mulf %238, %236 : vector<8x128xf32>
    %240 = arith.mulf %231, %164 : vector<8x128xf32>
    %241 = arith.addf %239, %240 : vector<8x128xf32>
    %242 = arith.index_cast %c2_i32 : i32 to index
    %c0_69 = arith.constant 0 : index
    %c0_70 = arith.constant 0 : index
    %243 = vector.load %arg6[%242, %c0_69, %c0_70] : memref<4x8x256xf32, #tpu.memory_space<vmem>>, vector<1x8x128xf32>
    %244 = vector.shape_cast %243 : vector<1x8x128xf32> to vector<8x128xf32>
    %245 = vector.shape_cast %215 : vector<8x128xf32> to vector<1x8x128xf32>
    tpu.vector_store %arg6[%242, %c0_69, %c0_70], %245 {strides = array<i32>} : memref<4x8x256xf32, #tpu.memory_space<vmem>>, vector<1x8x128xf32>,
    %246 = arith.index_cast %173 : i32 to index
    %c0_71 = arith.constant 0 : index
    %c128_72 = arith.constant 128 : index
    %247 = vector.load %arg6[%246, %c0_71, %c128_72] : memref<4x8x256xf32, #tpu.memory_space<vmem>>, vector<1x8x128xf32>
    %248 = vector.shape_cast %247 : vector<1x8x128xf32> to vector<8x128xf32>
    %249 = vector.shape_cast %241 : vector<8x128xf32> to vector<1x8x128xf32>
    tpu.vector_store %arg6[%246, %c0_71, %c128_72], %249 {strides = array<i32>} : memref<4x8x256xf32, #tpu.memory_space<vmem>>, vector<1x8x128xf32>,
    %c3_i32_73 = arith.constant 3 : i32
    %c3_i32_74 = arith.constant 3 : i32
    %250 = arith.subi %c3_i32_74, %c3_i32_73 : i32
    %251 = arith.index_cast %c3_i32_73 : i32 to index
    %c0_75 = arith.constant 0 : index
    %c0_76 = arith.constant 0 : index
    %252 = vector.load %arg7[%251, %c0_75, %c0_76] : memref<4x8x384xbf16, #tpu.memory_space<vmem>>, vector<1x8x384xbf16>
    %253 = vector.shape_cast %252 : vector<1x8x384xbf16> to vector<8x384xbf16>
    %254 = arith.extf %253 : vector<8x384xbf16> to vector<8x384xf32>
    %255 = arith.index_cast %250 : i32 to index
    %c0_77 = arith.constant 0 : index
    %c0_78 = arith.constant 0 : index
    %256 = vector.load %arg8[%255, %c0_77, %c0_78] : memref<4x8x384xbf16, #tpu.memory_space<vmem>>, vector<1x8x384xbf16>
    %257 = vector.shape_cast %256 : vector<1x8x384xbf16> to vector<8x384xbf16>
    %258 = arith.extf %257 : vector<8x384xbf16> to vector<8x384xf32>
    %259 = arith.truncf %215 : vector<8x128xf32> to vector<8x128xbf16>
    %cst_79 = arith.constant dense<0.000000e+00> : vector<8x384xf32>
    %260 = tpu.matmul %259, %11, %cst_79 {dimension_numbers = #tpu.dot_dimension_numbers<[1], [0], [0], [1], [0, 0, 1, 1], [], []>} : vector<8x128xbf16>, vector<128x384xbf16>, vector<8x384xf32> -> vector<8x384xf32>
    %261 = vector.broadcast %15 : vector<1x384xf32> to vector<8x384xf32>
    %262 = arith.addf %260, %261 : vector<8x384xf32>
    %263 = arith.truncf %241 : vector<8x128xf32> to vector<8x128xbf16>
    %cst_80 = arith.constant dense<0.000000e+00> : vector<8x384xf32>
    %264 = tpu.matmul %263, %13, %cst_80 {dimension_numbers = #tpu.dot_dimension_numbers<[1], [0], [0], [1], [0, 0, 1, 1], [], []>} : vector<8x128xbf16>, vector<128x384xbf16>, vector<8x384xf32> -> vector<8x384xf32>
    %265 = vector.broadcast %17 : vector<1x384xf32> to vector<8x384xf32>
    %266 = arith.addf %264, %265 : vector<8x384xf32>
    %267 = vector.extract_strided_slice %254 {offsets = [0, 0], sizes = [8, 128], strides = [1, 1]} : vector<8x384xf32> to vector<8x128xf32>
    %268 = vector.extract_strided_slice %262 {offsets = [0, 0], sizes = [8, 128], strides = [1, 1]} : vector<8x384xf32> to vector<8x128xf32>
    %269 = arith.addf %267, %268 : vector<8x128xf32>
    %270 = arith.negf %269 : vector<8x128xf32>
    %271 = math.exp %270 : vector<8x128xf32>
    %cst_81 = arith.constant 1.000000e+00 : f32
    %272 = vector.broadcast %cst_81 : f32 to vector<8x128xf32>
    %273 = arith.addf %272, %271 : vector<8x128xf32>
    %274 = arith.divf %272, %273 : vector<8x128xf32>
    %275 = vector.extract_strided_slice %254 {offsets = [0, 128], sizes = [8, 128], strides = [1, 1]} : vector<8x384xf32> to vector<8x128xf32>
    %276 = vector.extract_strided_slice %262 {offsets = [0, 128], sizes = [8, 128], strides = [1, 1]} : vector<8x384xf32> to vector<8x128xf32>
    %277 = arith.addf %275, %276 : vector<8x128xf32>
    %278 = arith.negf %277 : vector<8x128xf32>
    %279 = math.exp %278 : vector<8x128xf32>
    %cst_82 = arith.constant 1.000000e+00 : f32
    %280 = vector.broadcast %cst_82 : f32 to vector<8x128xf32>
    %281 = arith.addf %280, %279 : vector<8x128xf32>
    %282 = arith.divf %280, %281 : vector<8x128xf32>
    %283 = vector.extract_strided_slice %254 {offsets = [0, 256], sizes = [8, 128], strides = [1, 1]} : vector<8x384xf32> to vector<8x128xf32>
    %284 = vector.extract_strided_slice %262 {offsets = [0, 256], sizes = [8, 128], strides = [1, 1]} : vector<8x384xf32> to vector<8x128xf32>
    %285 = arith.mulf %274, %284 : vector<8x128xf32>
    %286 = arith.addf %283, %285 : vector<8x128xf32>
    %287 = math.tanh %286 : vector<8x128xf32>
    %cst_83 = arith.constant 1.000000e+00 : f32
    %288 = vector.broadcast %cst_83 : f32 to vector<8x128xf32>
    %289 = arith.subf %288, %282 : vector<8x128xf32>
    %290 = arith.mulf %289, %287 : vector<8x128xf32>
    %291 = arith.mulf %282, %215 : vector<8x128xf32>
    %292 = arith.addf %290, %291 : vector<8x128xf32>
    %293 = vector.extract_strided_slice %258 {offsets = [0, 0], sizes = [8, 128], strides = [1, 1]} : vector<8x384xf32> to vector<8x128xf32>
    %294 = vector.extract_strided_slice %266 {offsets = [0, 0], sizes = [8, 128], strides = [1, 1]} : vector<8x384xf32> to vector<8x128xf32>
    %295 = arith.addf %293, %294 : vector<8x128xf32>
    %296 = arith.negf %295 : vector<8x128xf32>
    %297 = math.exp %296 : vector<8x128xf32>
    %cst_84 = arith.constant 1.000000e+00 : f32
    %298 = vector.broadcast %cst_84 : f32 to vector<8x128xf32>
    %299 = arith.addf %298, %297 : vector<8x128xf32>
    %300 = arith.divf %298, %299 : vector<8x128xf32>
    %301 = vector.extract_strided_slice %258 {offsets = [0, 128], sizes = [8, 128], strides = [1, 1]} : vector<8x384xf32> to vector<8x128xf32>
    %302 = vector.extract_strided_slice %266 {offsets = [0, 128], sizes = [8, 128], strides = [1, 1]} : vector<8x384xf32> to vector<8x128xf32>
    %303 = arith.addf %301, %302 : vector<8x128xf32>
    %304 = arith.negf %303 : vector<8x128xf32>
    %305 = math.exp %304 : vector<8x128xf32>
    %cst_85 = arith.constant 1.000000e+00 : f32
    %306 = vector.broadcast %cst_85 : f32 to vector<8x128xf32>
    %307 = arith.addf %306, %305 : vector<8x128xf32>
    %308 = arith.divf %306, %307 : vector<8x128xf32>
    %309 = vector.extract_strided_slice %258 {offsets = [0, 256], sizes = [8, 128], strides = [1, 1]} : vector<8x384xf32> to vector<8x128xf32>
    %310 = vector.extract_strided_slice %266 {offsets = [0, 256], sizes = [8, 128], strides = [1, 1]} : vector<8x384xf32> to vector<8x128xf32>
    %311 = arith.mulf %300, %310 : vector<8x128xf32>
    %312 = arith.addf %309, %311 : vector<8x128xf32>
    %313 = math.tanh %312 : vector<8x128xf32>
    %cst_86 = arith.constant 1.000000e+00 : f32
    %314 = vector.broadcast %cst_86 : f32 to vector<8x128xf32>
    %315 = arith.subf %314, %308 : vector<8x128xf32>
    %316 = arith.mulf %315, %313 : vector<8x128xf32>
    %317 = arith.mulf %308, %241 : vector<8x128xf32>
    %318 = arith.addf %316, %317 : vector<8x128xf32>
    %319 = arith.index_cast %c3_i32_73 : i32 to index
    %c0_87 = arith.constant 0 : index
    %c0_88 = arith.constant 0 : index
    %320 = vector.load %arg6[%319, %c0_87, %c0_88] : memref<4x8x256xf32, #tpu.memory_space<vmem>>, vector<1x8x128xf32>
    %321 = vector.shape_cast %320 : vector<1x8x128xf32> to vector<8x128xf32>
    %322 = vector.shape_cast %292 : vector<8x128xf32> to vector<1x8x128xf32>
    tpu.vector_store %arg6[%319, %c0_87, %c0_88], %322 {strides = array<i32>} : memref<4x8x256xf32, #tpu.memory_space<vmem>>, vector<1x8x128xf32>,
    %323 = arith.index_cast %250 : i32 to index
    %c0_89 = arith.constant 0 : index
    %c128_90 = arith.constant 128 : index
    %324 = vector.load %arg6[%323, %c0_89, %c128_90] : memref<4x8x256xf32, #tpu.memory_space<vmem>>, vector<1x8x128xf32>
    %325 = vector.shape_cast %324 : vector<1x8x128xf32> to vector<8x128xf32>
    %326 = vector.shape_cast %318 : vector<8x128xf32> to vector<1x8x128xf32>
    tpu.vector_store %arg6[%323, %c0_89, %c128_90], %326 {strides = array<i32>} : memref<4x8x256xf32, #tpu.memory_space<vmem>>, vector<1x8x128xf32>,
    %c4_i32 = arith.constant 4 : i32
    return
  }
  func.func @transform_0(%arg0: i32) -> (i32, i32, i32) {
    %c0_i32 = arith.constant 0 : i32
    %c0_i32_0 = arith.constant 0 : i32
    %c0_i32_1 = arith.constant 0 : i32
    %c0_i32_2 = arith.constant 0 : i32
    return %c0_i32, %c0_i32_0, %c0_i32_1 : i32, i32, i32
  }
  func.func @transform_1(%arg0: i32) -> (i32, i32, i32) {
    %c0_i32 = arith.constant 0 : i32
    %c0_i32_0 = arith.constant 0 : i32
    %c0_i32_1 = arith.constant 0 : i32
    return %arg0, %c0_i32, %c0_i32_0 : i32, i32, i32
  }
  func.func @transform_2(%arg0: i32) -> (i32, i32, i32, i32) {
    %c0_i32 = arith.constant 0 : i32
    %c0_i32_0 = arith.constant 0 : i32
    %c0_i32_1 = arith.constant 0 : i32
    %c0_i32_2 = arith.constant 0 : i32
    return %arg0, %c0_i32, %c0_i32_0, %c0_i32_1 : i32, i32, i32, i32
  }
  func.func @transform_3(%arg0: i32) -> (i32, i32, i32) {
    %c0_i32 = arith.constant 0 : i32
    %c0_i32_0 = arith.constant 0 : i32
    %c0_i32_1 = arith.constant 0 : i32
    return %arg0, %c0_i32, %c0_i32_0 : i32, i32, i32
  }
  func.func @transform_4(%arg0: i32) -> (i32, i32, i32, i32) {
    %c0_i32 = arith.constant 0 : i32
    %c0_i32_0 = arith.constant 0 : i32
    %c0_i32_1 = arith.constant 0 : i32
    %c0_i32_2 = arith.constant 0 : i32
    return %arg0, %c0_i32, %c0_i32_0, %c0_i32_1 : i32, i32, i32, i32
  }
  func.func @transform_5(%arg0: i32) -> (i32, i32, i32) {
    %c0_i32 = arith.constant 0 : i32
    %c0_i32_0 = arith.constant 0 : i32
    %c0_i32_1 = arith.constant 0 : i32
    %c0_i32_2 = arith.constant 0 : i32
    return %c0_i32, %c0_i32_0, %c0_i32_1 : i32, i32, i32
  }
}

module attributes {stable_mosaic.version = 11 : i64} {
  func.func @gru_stack_kernel(%arg0: i32, %arg1: memref<4x8x256xf32, #tpu.memory_space<vmem>>, %arg2: memref<1x256x768xbf16, #tpu.memory_space<vmem>>, %arg3: memref<1x2x128x384xbf16, #tpu.memory_space<vmem>>, %arg4: memref<1x1x768xf32, #tpu.memory_space<vmem>>, %arg5: memref<1x2x1x384xf32, #tpu.memory_space<vmem>>, %arg6: memref<4x8x256xf32, #tpu.memory_space<vmem>>, %arg7: memref<4x8x384xbf16, #tpu.memory_space<vmem>>, %arg8: memref<4x8x384xbf16, #tpu.memory_space<vmem>>) attributes {dimension_semantics = [#tpu.dimension_semantics<arbitrary>], iteration_bounds = array<i64: 2>, scalar_prefetch = 0 : i64, scratch_operands = 2 : i64, tpu.core_type = #tpu.core_type<tc>, window_params = [{pipeline_mode = #tpu.pipeline_mode<synchronous>, transform_indices = @transform_0, window_bounds = array<i64: 4, 8, 256>}, {transform_indices = @transform_1, window_bounds = array<i64: 1, 256, 768>}, {transform_indices = @transform_2, window_bounds = array<i64: 1, 2, 128, 384>}, {transform_indices = @transform_3, window_bounds = array<i64: 1, 1, 768>}, {transform_indices = @transform_4, window_bounds = array<i64: 1, 2, 1, 384>}, {pipeline_mode = #tpu.pipeline_mode<synchronous>, transform_indices = @transform_5, window_bounds = array<i64: 4, 8, 256>}]} {
    %c0 = arith.constant 0 : index
    %c0_0 = arith.constant 0 : index
    %c0_1 = arith.constant 0 : index
    %0 = vector.load %arg2[%c0, %c0_0, %c0_1] : memref<1x256x768xbf16, #tpu.memory_space<vmem>>, vector<1x256x768xbf16>
    %1 = vector.shape_cast %0 : vector<1x256x768xbf16> to vector<256x768xbf16>
    %c0_2 = arith.constant 0 : index
    %c0_3 = arith.constant 0 : index
    %c0_4 = arith.constant 0 : index
    %2 = vector.load %arg4[%c0_2, %c0_3, %c0_4] : memref<1x1x768xf32, #tpu.memory_space<vmem>>, vector<1x1x768xf32>
    %3 = vector.shape_cast %2 : vector<1x1x768xf32> to vector<1x768xf32>
    %c0_i32 = arith.constant 0 : i32
    %4 = arith.cmpi eq, %arg0, %c0_i32 : i32
    %5 = arith.extui %4 : i1 to i32
    %c0_i32_5 = arith.constant 0 : i32
    %6 = arith.cmpi ne, %5, %c0_i32_5 : i32
    scf.if %6 {
      %c0_91 = arith.constant 0 : index
      %c0_92 = arith.constant 0 : index
      %c0_93 = arith.constant 0 : index
      %327 = vector.load %arg1[%c0_91, %c0_92, %c0_93] : memref<4x8x256xf32, #tpu.memory_space<vmem>>, vector<4x8x256xf32>
      %328 = vector.shape_cast %327 : vector<4x8x256xf32> to vector<32x256xf32>
      %329 = arith.truncf %328 : vector<32x256xf32> to vector<32x256xbf16>
      %cst_94 = arith.constant dense<0.000000e+00> : vector<32x768xf32>
      %330 = tpu.matmul %329, %1, %cst_94 {dimension_numbers = #tpu.dot_dimension_numbers<[1], [0], [0], [1], [0, 0, 1, 1], [], []>} : vector<32x256xbf16>, vector<256x768xbf16>, vector<32x768xf32> -> vector<32x768xf32>
      %331 = vector.broadcast %3 : vector<1x768xf32> to vector<32x768xf32>
      %332 = arith.addf %330, %331 : vector<32x768xf32>
      %333 = vector.extract_strided_slice %332 {offsets = [0, 0], sizes = [32, 384], strides = [1, 1]} : vector<32x768xf32> to vector<32x384xf32>
      %334 = vector.shape_cast %333 : vector<32x384xf32> to vector<4x8x384xf32>
      %335 = arith.truncf %334 : vector<4x8x384xf32> to vector<4x8x384xbf16>
      %c0_95 = arith.constant 0 : index
      %c0_96 = arith.constant 0 : index
      %c0_97 = arith.constant 0 : index
      %336 = vector.load %arg7[%c0_95, %c0_96, %c0_97] : memref<4x8x384xbf16, #tpu.memory_space<vmem>>, vector<4x8x384xbf16>
      tpu.vector_store %arg7[%c0_95, %c0_96, %c0_97], %335 {strides = array<i32>} : memref<4x8x384xbf16, #tpu.memory_space<vmem>>, vector<4x8x384xbf16>,
      %337 = vector.extract_strided_slice %332 {offsets = [0, 384], sizes = [32, 384], strides = [1, 1]} : vector<32x768xf32> to vector<32x384xf32>
      %338 = vector.shape_cast %337 : vector<32x384xf32> to vector<4x8x384xf32>
      %339 = arith.truncf %338 : vector<4x8x384xf32> to vector<4x8x384xbf16>
      %c0_98 = arith.constant 0 : index
      %c0_99 = arith.constant 0 : index
      %c0_100 = arith.constant 0 : index
      %340 = vector.load %arg8[%c0_98, %c0_99, %c0_100] : memref<4x8x384xbf16, #tpu.memory_space<vmem>>, vector<4x8x384xbf16>
      tpu.vector_store %arg8[%c0_98, %c0_99, %c0_100], %339 {strides = array<i32>} : memref<4x8x384xbf16, #tpu.memory_space<vmem>>, vector<4x8x384xbf16>,
    } else {
    }
    %c0_i32_6 = arith.constant 0 : i32
    %7 = arith.cmpi ne, %arg0, %c0_i32_6 : i32
    %8 = arith.extui %7 : i1 to i32
    %c0_i32_7 = arith.constant 0 : i32
    %9 = arith.cmpi ne, %8, %c0_i32_7 : i32
    scf.if %9 {
      %c0_91 = arith.constant 0 : index
      %c0_92 = arith.constant 0 : index
      %c0_93 = arith.constant 0 : index
      %327 = vector.load %arg6[%c0_91, %c0_92, %c0_93] : memref<4x8x256xf32, #tpu.memory_space<vmem>>, vector<4x8x256xf32>
      %328 = vector.shape_cast %327 : vector<4x8x256xf32> to vector<32x256xf32>
      %329 = arith.truncf %328 : vector<32x256xf32> to vector<32x256xbf16>
      %cst_94 = arith.constant dense<0.000000e+00> : vector<32x768xf32>
      %330 = tpu.matmul %329, %1, %cst_94 {dimension_numbers = #tpu.dot_dimension_numbers<[1], [0], [0], [1], [0, 0, 1, 1], [], []>} : vector<32x256xbf16>, vector<256x768xbf16>, vector<32x768xf32> -> vector<32x768xf32>
      %331 = vector.broadcast %3 : vector<1x768xf32> to vector<32x768xf32>
      %332 = arith.addf %330, %331 : vector<32x768xf32>
      %333 = vector.extract_strided_slice %332 {offsets = [0, 0], sizes = [32, 384], strides = [1, 1]} : vector<32x768xf32> to vector<32x384xf32>
      %334 = vector.shape_cast %333 : vector<32x384xf32> to vector<4x8x384xf32>
      %335 = arith.truncf %334 : vector<4x8x384xf32> to vector<4x8x384xbf16>
      %c0_95 = arith.constant 0 : index
      %c0_96 = arith.constant 0 : index
      %c0_97 = arith.constant 0 : index
      %336 = vector.load %arg7[%c0_95, %c0_96, %c0_97] : memref<4x8x384xbf16, #tpu.memory_space<vmem>>, vector<4x8x384xbf16>
      tpu.vector_store %arg7[%c0_95, %c0_96, %c0_97], %335 {strides = array<i32>} : memref<4x8x384xbf16, #tpu.memory_space<vmem>>, vector<4x8x384xbf16>,
      %337 = vector.extract_strided_slice %332 {offsets = [0, 384], sizes = [32, 384], strides = [1, 1]} : vector<32x768xf32> to vector<32x384xf32>
      %338 = vector.shape_cast %337 : vector<32x384xf32> to vector<4x8x384xf32>
      %339 = arith.truncf %338 : vector<4x8x384xf32> to vector<4x8x384xbf16>
      %c0_98 = arith.constant 0 : index
      %c0_99 = arith.constant 0 : index
      %c0_100 = arith.constant 0 : index
      %340 = vector.load %arg8[%c0_98, %c0_99, %c0_100] : memref<4x8x384xbf16, #tpu.memory_space<vmem>>, vector<4x8x384xbf16>
      tpu.vector_store %arg8[%c0_98, %c0_99, %c0_100], %339 {strides = array<i32>} : memref<4x8x384xbf16, #tpu.memory_space<vmem>>, vector<4x8x384xbf16>,
    } else {
    }
    %c0_8 = arith.constant 0 : index
    %c0_9 = arith.constant 0 : index
    %c0_10 = arith.constant 0 : index
    %c0_11 = arith.constant 0 : index
    %10 = vector.load %arg3[%c0_8, %c0_9, %c0_10, %c0_11] : memref<1x2x128x384xbf16, #tpu.memory_space<vmem>>, vector<1x1x128x384xbf16>
    %11 = vector.shape_cast %10 : vector<1x1x128x384xbf16> to vector<128x384xbf16>
    %c0_12 = arith.constant 0 : index
    %c1 = arith.constant 1 : index
    %c0_13 = arith.constant 0 : index
    %c0_14 = arith.constant 0 : index
    %12 = vector.load %arg3[%c0_12, %c1, %c0_13, %c0_14] : memref<1x2x128x384xbf16, #tpu.memory_space<vmem>>, vector<1x1x128x384xbf16>
    %13 = vector.shape_cast %12 : vector<1x1x128x384xbf16> to vector<128x384xbf16>
    %c0_15 = arith.constant 0 : index
    %c0_16 = arith.constant 0 : index
    %c0_17 = arith.constant 0 : index
    %c0_18 = arith.constant 0 : index
    %14 = vector.load %arg5[%c0_15, %c0_16, %c0_17, %c0_18] : memref<1x2x1x384xf32, #tpu.memory_space<vmem>>, vector<1x1x1x384xf32>
    %15 = vector.shape_cast %14 : vector<1x1x1x384xf32> to vector<1x384xf32>
    %c0_19 = arith.constant 0 : index
    %c1_20 = arith.constant 1 : index
    %c0_21 = arith.constant 0 : index
    %c0_22 = arith.constant 0 : index
    %16 = vector.load %arg5[%c0_19, %c1_20, %c0_21, %c0_22] : memref<1x2x1x384xf32, #tpu.memory_space<vmem>>, vector<1x1x1x384xf32>
    %17 = vector.shape_cast %16 : vector<1x1x1x384xf32> to vector<1x384xf32>
    %cst = arith.constant 0.000000e+00 : f32
    %18 = vector.broadcast %cst : f32 to vector<8x128xf32>
    %c0_i32_23 = arith.constant 0 : i32
    %c3_i32 = arith.constant 3 : i32
    %19 = arith.subi %c3_i32, %c0_i32_23 : i32
    %20 = arith.index_cast %c0_i32_23 : i32 to index
    %c0_24 = arith.constant 0 : index
    %c0_25 = arith.constant 0 : index
    %21 = vector.load %arg7[%20, %c0_24, %c0_25] : memref<4x8x384xbf16, #tpu.memory_space<vmem>>, vector<1x8x384xbf16>
    %22 = vector.shape_cast %21 : vector<1x8x384xbf16> to vector<8x384xbf16>
    %23 = arith.extf %22 : vector<8x384xbf16> to vector<8x384xf32>
    %24 = arith.index_cast %19 : i32 to index
    %c0_26 = arith.constant 0 : index
    %c0_27 = arith.constant 0 : index
    %25 = vector.load %arg8[%24, %c0_26, %c0_27] : memref<4x8x384xbf16, #tpu.memory_space<vmem>>, vector<1x8x384xbf16>
    %26 = vector.shape_cast %25 : vector<1x8x384xbf16> to vector<8x384xbf16>
    %27 = arith.extf %26 : vector<8x384xbf16> to vector<8x384xf32>
    %28 = arith.truncf %18 : vector<8x128xf32> to vector<8x128xbf16>
    %cst_28 = arith.constant dense<0.000000e+00> : vector<8x384xf32>
    %29 = tpu.matmul %28, %11, %cst_28 {dimension_numbers = #tpu.dot_dimension_numbers<[1], [0], [0], [1], [0, 0, 1, 1], [], []>} : vector<8x128xbf16>, vector<128x384xbf16>, vector<8x384xf32> -> vector<8x384xf32>
    %30 = vector.broadcast %15 : vector<1x384xf32> to vector<8x384xf32>
    %31 = arith.addf %29, %30 : vector<8x384xf32>
    %32 = arith.truncf %18 : vector<8x128xf32> to vector<8x128xbf16>
    %cst_29 = arith.constant dense<0.000000e+00> : vector<8x384xf32>
    %33 = tpu.matmul %32, %13, %cst_29 {dimension_numbers = #tpu.dot_dimension_numbers<[1], [0], [0], [1], [0, 0, 1, 1], [], []>} : vector<8x128xbf16>, vector<128x384xbf16>, vector<8x384xf32> -> vector<8x384xf32>
    %34 = vector.broadcast %17 : vector<1x384xf32> to vector<8x384xf32>
    %35 = arith.addf %33, %34 : vector<8x384xf32>
    %36 = vector.extract_strided_slice %23 {offsets = [0, 0], sizes = [8, 128], strides = [1, 1]} : vector<8x384xf32> to vector<8x128xf32>
    %37 = vector.extract_strided_slice %31 {offsets = [0, 0], sizes = [8, 128], strides = [1, 1]} : vector<8x384xf32> to vector<8x128xf32>
    %38 = arith.addf %36, %37 : vector<8x128xf32>
    %39 = arith.negf %38 : vector<8x128xf32>
    %40 = math.exp %39 : vector<8x128xf32>
    %cst_30 = arith.constant 1.000000e+00 : f32
    %41 = vector.broadcast %cst_30 : f32 to vector<8x128xf32>
    %42 = arith.addf %41, %40 : vector<8x128xf32>
    %43 = arith.divf %41, %42 : vector<8x128xf32>
    %44 = vector.extract_strided_slice %23 {offsets = [0, 128], sizes = [8, 128], strides = [1, 1]} : vector<8x384xf32> to vector<8x128xf32>
    %45 = vector.extract_strided_slice %31 {offsets = [0, 128], sizes = [8, 128], strides = [1, 1]} : vector<8x384xf32> to vector<8x128xf32>
    %46 = arith.addf %44, %45 : vector<8x128xf32>
    %47 = arith.negf %46 : vector<8x128xf32>
    %48 = math.exp %47 : vector<8x128xf32>
    %cst_31 = arith.constant 1.000000e+00 : f32
    %49 = vector.broadcast %cst_31 : f32 to vector<8x128xf32>
    %50 = arith.addf %49, %48 : vector<8x128xf32>
    %51 = arith.divf %49, %50 : vector<8x128xf32>
    %52 = vector.extract_strided_slice %23 {offsets = [0, 256], sizes = [8, 128], strides = [1, 1]} : vector<8x384xf32> to vector<8x128xf32>
    %53 = vector.extract_strided_slice %31 {offsets = [0, 256], sizes = [8, 128], strides = [1, 1]} : vector<8x384xf32> to vector<8x128xf32>
    %54 = arith.mulf %43, %53 : vector<8x128xf32>
    %55 = arith.addf %52, %54 : vector<8x128xf32>
    %56 = math.tanh %55 : vector<8x128xf32>
    %cst_32 = arith.constant 1.000000e+00 : f32
    %57 = vector.broadcast %cst_32 : f32 to vector<8x128xf32>
    %58 = arith.subf %57, %51 : vector<8x128xf32>
    %59 = arith.mulf %58, %56 : vector<8x128xf32>
    %60 = arith.mulf %51, %18 : vector<8x128xf32>
    %61 = arith.addf %59, %60 : vector<8x128xf32>
    %62 = vector.extract_strided_slice %27 {offsets = [0, 0], sizes = [8, 128], strides = [1, 1]} : vector<8x384xf32> to vector<8x128xf32>
    %63 = vector.extract_strided_slice %35 {offsets = [0, 0], sizes = [8, 128], strides = [1, 1]} : vector<8x384xf32> to vector<8x128xf32>
    %64 = arith.addf %62, %63 : vector<8x128xf32>
    %65 = arith.negf %64 : vector<8x128xf32>
    %66 = math.exp %65 : vector<8x128xf32>
    %cst_33 = arith.constant 1.000000e+00 : f32
    %67 = vector.broadcast %cst_33 : f32 to vector<8x128xf32>
    %68 = arith.addf %67, %66 : vector<8x128xf32>
    %69 = arith.divf %67, %68 : vector<8x128xf32>
    %70 = vector.extract_strided_slice %27 {offsets = [0, 128], sizes = [8, 128], strides = [1, 1]} : vector<8x384xf32> to vector<8x128xf32>
    %71 = vector.extract_strided_slice %35 {offsets = [0, 128], sizes = [8, 128], strides = [1, 1]} : vector<8x384xf32> to vector<8x128xf32>
    %72 = arith.addf %70, %71 : vector<8x128xf32>
    %73 = arith.negf %72 : vector<8x128xf32>
    %74 = math.exp %73 : vector<8x128xf32>
    %cst_34 = arith.constant 1.000000e+00 : f32
    %75 = vector.broadcast %cst_34 : f32 to vector<8x128xf32>
    %76 = arith.addf %75, %74 : vector<8x128xf32>
    %77 = arith.divf %75, %76 : vector<8x128xf32>
    %78 = vector.extract_strided_slice %27 {offsets = [0, 256], sizes = [8, 128], strides = [1, 1]} : vector<8x384xf32> to vector<8x128xf32>
    %79 = vector.extract_strided_slice %35 {offsets = [0, 256], sizes = [8, 128], strides = [1, 1]} : vector<8x384xf32> to vector<8x128xf32>
    %80 = arith.mulf %69, %79 : vector<8x128xf32>
    %81 = arith.addf %78, %80 : vector<8x128xf32>
    %82 = math.tanh %81 : vector<8x128xf32>
    %cst_35 = arith.constant 1.000000e+00 : f32
    %83 = vector.broadcast %cst_35 : f32 to vector<8x128xf32>
    %84 = arith.subf %83, %77 : vector<8x128xf32>
    %85 = arith.mulf %84, %82 : vector<8x128xf32>
    %86 = arith.mulf %77, %18 : vector<8x128xf32>
    %87 = arith.addf %85, %86 : vector<8x128xf32>
    %88 = arith.index_cast %c0_i32_23 : i32 to index
    %c0_36 = arith.constant 0 : index
    %c0_37 = arith.constant 0 : index
    %89 = vector.load %arg6[%88, %c0_36, %c0_37] : memref<4x8x256xf32, #tpu.memory_space<vmem>>, vector<1x8x128xf32>
    %90 = vector.shape_cast %89 : vector<1x8x128xf32> to vector<8x128xf32>
    %91 = vector.shape_cast %61 : vector<8x128xf32> to vector<1x8x128xf32>
    tpu.vector_store %arg6[%88, %c0_36, %c0_37], %91 {strides = array<i32>} : memref<4x8x256xf32, #tpu.memory_space<vmem>>, vector<1x8x128xf32>,
    %92 = arith.index_cast %19 : i32 to index
    %c0_38 = arith.constant 0 : index
    %c128 = arith.constant 128 : index
    %93 = vector.load %arg6[%92, %c0_38, %c128] : memref<4x8x256xf32, #tpu.memory_space<vmem>>, vector<1x8x128xf32>
    %94 = vector.shape_cast %93 : vector<1x8x128xf32> to vector<8x128xf32>
    %95 = vector.shape_cast %87 : vector<8x128xf32> to vector<1x8x128xf32>
    tpu.vector_store %arg6[%92, %c0_38, %c128], %95 {strides = array<i32>} : memref<4x8x256xf32, #tpu.memory_space<vmem>>, vector<1x8x128xf32>,
    %c1_i32 = arith.constant 1 : i32
    %c3_i32_39 = arith.constant 3 : i32
    %96 = arith.subi %c3_i32_39, %c1_i32 : i32
    %97 = arith.index_cast %c1_i32 : i32 to index
    %c0_40 = arith.constant 0 : index
    %c0_41 = arith.constant 0 : index
    %98 = vector.load %arg7[%97, %c0_40, %c0_41] : memref<4x8x384xbf16, #tpu.memory_space<vmem>>, vector<1x8x384xbf16>
    %99 = vector.shape_cast %98 : vector<1x8x384xbf16> to vector<8x384xbf16>
    %100 = arith.extf %99 : vector<8x384xbf16> to vector<8x384xf32>
    %101 = arith.index_cast %96 : i32 to index
    %c0_42 = arith.constant 0 : index
    %c0_43 = arith.constant 0 : index
    %102 = vector.load %arg8[%101, %c0_42, %c0_43] : memref<4x8x384xbf16, #tpu.memory_space<vmem>>, vector<1x8x384xbf16>
    %103 = vector.shape_cast %102 : vector<1x8x384xbf16> to vector<8x384xbf16>
    %104 = arith.extf %103 : vector<8x384xbf16> to vector<8x384xf32>
    %105 = arith.truncf %61 : vector<8x128xf32> to vector<8x128xbf16>
    %cst_44 = arith.constant dense<0.000000e+00> : vector<8x384xf32>
    %106 = tpu.matmul %105, %11, %cst_44 {dimension_numbers = #tpu.dot_dimension_numbers<[1], [0], [0], [1], [0, 0, 1, 1], [], []>} : vector<8x128xbf16>, vector<128x384xbf16>, vector<8x384xf32> -> vector<8x384xf32>
    %107 = vector.broadcast %15 : vector<1x384xf32> to vector<8x384xf32>
    %108 = arith.addf %106, %107 : vector<8x384xf32>
    %109 = arith.truncf %87 : vector<8x128xf32> to vector<8x128xbf16>
    %cst_45 = arith.constant dense<0.000000e+00> : vector<8x384xf32>
    %110 = tpu.matmul %109, %13, %cst_45 {dimension_numbers = #tpu.dot_dimension_numbers<[1], [0], [0], [1], [0, 0, 1, 1], [], []>} : vector<8x128xbf16>, vector<128x384xbf16>, vector<8x384xf32> -> vector<8x384xf32>
    %111 = vector.broadcast %17 : vector<1x384xf32> to vector<8x384xf32>
    %112 = arith.addf %110, %111 : vector<8x384xf32>
    %113 = vector.extract_strided_slice %100 {offsets = [0, 0], sizes = [8, 128], strides = [1, 1]} : vector<8x384xf32> to vector<8x128xf32>
    %114 = vector.extract_strided_slice %108 {offsets = [0, 0], sizes = [8, 128], strides = [1, 1]} : vector<8x384xf32> to vector<8x128xf32>
    %115 = arith.addf %113, %114 : vector<8x128xf32>
    %116 = arith.negf %115 : vector<8x128xf32>
    %117 = math.exp %116 : vector<8x128xf32>
    %cst_46 = arith.constant 1.000000e+00 : f32
    %118 = vector.broadcast %cst_46 : f32 to vector<8x128xf32>
    %119 = arith.addf %118, %117 : vector<8x128xf32>
    %120 = arith.divf %118, %119 : vector<8x128xf32>
    %121 = vector.extract_strided_slice %100 {offsets = [0, 128], sizes = [8, 128], strides = [1, 1]} : vector<8x384xf32> to vector<8x128xf32>
    %122 = vector.extract_strided_slice %108 {offsets = [0, 128], sizes = [8, 128], strides = [1, 1]} : vector<8x384xf32> to vector<8x128xf32>
    %123 = arith.addf %121, %122 : vector<8x128xf32>
    %124 = arith.negf %123 : vector<8x128xf32>
    %125 = math.exp %124 : vector<8x128xf32>
    %cst_47 = arith.constant 1.000000e+00 : f32
    %126 = vector.broadcast %cst_47 : f32 to vector<8x128xf32>
    %127 = arith.addf %126, %125 : vector<8x128xf32>
    %128 = arith.divf %126, %127 : vector<8x128xf32>
    %129 = vector.extract_strided_slice %100 {offsets = [0, 256], sizes = [8, 128], strides = [1, 1]} : vector<8x384xf32> to vector<8x128xf32>
    %130 = vector.extract_strided_slice %108 {offsets = [0, 256], sizes = [8, 128], strides = [1, 1]} : vector<8x384xf32> to vector<8x128xf32>
    %131 = arith.mulf %120, %130 : vector<8x128xf32>
    %132 = arith.addf %129, %131 : vector<8x128xf32>
    %133 = math.tanh %132 : vector<8x128xf32>
    %cst_48 = arith.constant 1.000000e+00 : f32
    %134 = vector.broadcast %cst_48 : f32 to vector<8x128xf32>
    %135 = arith.subf %134, %128 : vector<8x128xf32>
    %136 = arith.mulf %135, %133 : vector<8x128xf32>
    %137 = arith.mulf %128, %61 : vector<8x128xf32>
    %138 = arith.addf %136, %137 : vector<8x128xf32>
    %139 = vector.extract_strided_slice %104 {offsets = [0, 0], sizes = [8, 128], strides = [1, 1]} : vector<8x384xf32> to vector<8x128xf32>
    %140 = vector.extract_strided_slice %112 {offsets = [0, 0], sizes = [8, 128], strides = [1, 1]} : vector<8x384xf32> to vector<8x128xf32>
    %141 = arith.addf %139, %140 : vector<8x128xf32>
    %142 = arith.negf %141 : vector<8x128xf32>
    %143 = math.exp %142 : vector<8x128xf32>
    %cst_49 = arith.constant 1.000000e+00 : f32
    %144 = vector.broadcast %cst_49 : f32 to vector<8x128xf32>
    %145 = arith.addf %144, %143 : vector<8x128xf32>
    %146 = arith.divf %144, %145 : vector<8x128xf32>
    %147 = vector.extract_strided_slice %104 {offsets = [0, 128], sizes = [8, 128], strides = [1, 1]} : vector<8x384xf32> to vector<8x128xf32>
    %148 = vector.extract_strided_slice %112 {offsets = [0, 128], sizes = [8, 128], strides = [1, 1]} : vector<8x384xf32> to vector<8x128xf32>
    %149 = arith.addf %147, %148 : vector<8x128xf32>
    %150 = arith.negf %149 : vector<8x128xf32>
    %151 = math.exp %150 : vector<8x128xf32>
    %cst_50 = arith.constant 1.000000e+00 : f32
    %152 = vector.broadcast %cst_50 : f32 to vector<8x128xf32>
    %153 = arith.addf %152, %151 : vector<8x128xf32>
    %154 = arith.divf %152, %153 : vector<8x128xf32>
    %155 = vector.extract_strided_slice %104 {offsets = [0, 256], sizes = [8, 128], strides = [1, 1]} : vector<8x384xf32> to vector<8x128xf32>
    %156 = vector.extract_strided_slice %112 {offsets = [0, 256], sizes = [8, 128], strides = [1, 1]} : vector<8x384xf32> to vector<8x128xf32>
    %157 = arith.mulf %146, %156 : vector<8x128xf32>
    %158 = arith.addf %155, %157 : vector<8x128xf32>
    %159 = math.tanh %158 : vector<8x128xf32>
    %cst_51 = arith.constant 1.000000e+00 : f32
    %160 = vector.broadcast %cst_51 : f32 to vector<8x128xf32>
    %161 = arith.subf %160, %154 : vector<8x128xf32>
    %162 = arith.mulf %161, %159 : vector<8x128xf32>
    %163 = arith.mulf %154, %87 : vector<8x128xf32>
    %164 = arith.addf %162, %163 : vector<8x128xf32>
    %165 = arith.index_cast %c1_i32 : i32 to index
    %c0_52 = arith.constant 0 : index
    %c0_53 = arith.constant 0 : index
    %166 = vector.load %arg6[%165, %c0_52, %c0_53] : memref<4x8x256xf32, #tpu.memory_space<vmem>>, vector<1x8x128xf32>
    %167 = vector.shape_cast %166 : vector<1x8x128xf32> to vector<8x128xf32>
    %168 = vector.shape_cast %138 : vector<8x128xf32> to vector<1x8x128xf32>
    tpu.vector_store %arg6[%165, %c0_52, %c0_53], %168 {strides = array<i32>} : memref<4x8x256xf32, #tpu.memory_space<vmem>>, vector<1x8x128xf32>,
    %169 = arith.index_cast %96 : i32 to index
    %c0_54 = arith.constant 0 : index
    %c128_55 = arith.constant 128 : index
    %170 = vector.load %arg6[%169, %c0_54, %c128_55] : memref<4x8x256xf32, #tpu.memory_space<vmem>>, vector<1x8x128xf32>
    %171 = vector.shape_cast %170 : vector<1x8x128xf32> to vector<8x128xf32>
    %172 = vector.shape_cast %164 : vector<8x128xf32> to vector<1x8x128xf32>
    tpu.vector_store %arg6[%169, %c0_54, %c128_55], %172 {strides = array<i32>} : memref<4x8x256xf32, #tpu.memory_space<vmem>>, vector<1x8x128xf32>,
    %c2_i32 = arith.constant 2 : i32
    %c3_i32_56 = arith.constant 3 : i32
    %173 = arith.subi %c3_i32_56, %c2_i32 : i32
    %174 = arith.index_cast %c2_i32 : i32 to index
    %c0_57 = arith.constant 0 : index
    %c0_58 = arith.constant 0 : index
    %175 = vector.load %arg7[%174, %c0_57, %c0_58] : memref<4x8x384xbf16, #tpu.memory_space<vmem>>, vector<1x8x384xbf16>
    %176 = vector.shape_cast %175 : vector<1x8x384xbf16> to vector<8x384xbf16>
    %177 = arith.extf %176 : vector<8x384xbf16> to vector<8x384xf32>
    %178 = arith.index_cast %173 : i32 to index
    %c0_59 = arith.constant 0 : index
    %c0_60 = arith.constant 0 : index
    %179 = vector.load %arg8[%178, %c0_59, %c0_60] : memref<4x8x384xbf16, #tpu.memory_space<vmem>>, vector<1x8x384xbf16>
    %180 = vector.shape_cast %179 : vector<1x8x384xbf16> to vector<8x384xbf16>
    %181 = arith.extf %180 : vector<8x384xbf16> to vector<8x384xf32>
    %182 = arith.truncf %138 : vector<8x128xf32> to vector<8x128xbf16>
    %cst_61 = arith.constant dense<0.000000e+00> : vector<8x384xf32>
    %183 = tpu.matmul %182, %11, %cst_61 {dimension_numbers = #tpu.dot_dimension_numbers<[1], [0], [0], [1], [0, 0, 1, 1], [], []>} : vector<8x128xbf16>, vector<128x384xbf16>, vector<8x384xf32> -> vector<8x384xf32>
    %184 = vector.broadcast %15 : vector<1x384xf32> to vector<8x384xf32>
    %185 = arith.addf %183, %184 : vector<8x384xf32>
    %186 = arith.truncf %164 : vector<8x128xf32> to vector<8x128xbf16>
    %cst_62 = arith.constant dense<0.000000e+00> : vector<8x384xf32>
    %187 = tpu.matmul %186, %13, %cst_62 {dimension_numbers = #tpu.dot_dimension_numbers<[1], [0], [0], [1], [0, 0, 1, 1], [], []>} : vector<8x128xbf16>, vector<128x384xbf16>, vector<8x384xf32> -> vector<8x384xf32>
    %188 = vector.broadcast %17 : vector<1x384xf32> to vector<8x384xf32>
    %189 = arith.addf %187, %188 : vector<8x384xf32>
    %190 = vector.extract_strided_slice %177 {offsets = [0, 0], sizes = [8, 128], strides = [1, 1]} : vector<8x384xf32> to vector<8x128xf32>
    %191 = vector.extract_strided_slice %185 {offsets = [0, 0], sizes = [8, 128], strides = [1, 1]} : vector<8x384xf32> to vector<8x128xf32>
    %192 = arith.addf %190, %191 : vector<8x128xf32>
    %193 = arith.negf %192 : vector<8x128xf32>
    %194 = math.exp %193 : vector<8x128xf32>
    %cst_63 = arith.constant 1.000000e+00 : f32
    %195 = vector.broadcast %cst_63 : f32 to vector<8x128xf32>
    %196 = arith.addf %195, %194 : vector<8x128xf32>
    %197 = arith.divf %195, %196 : vector<8x128xf32>
    %198 = vector.extract_strided_slice %177 {offsets = [0, 128], sizes = [8, 128], strides = [1, 1]} : vector<8x384xf32> to vector<8x128xf32>
    %199 = vector.extract_strided_slice %185 {offsets = [0, 128], sizes = [8, 128], strides = [1, 1]} : vector<8x384xf32> to vector<8x128xf32>
    %200 = arith.addf %198, %199 : vector<8x128xf32>
    %201 = arith.negf %200 : vector<8x128xf32>
    %202 = math.exp %201 : vector<8x128xf32>
    %cst_64 = arith.constant 1.000000e+00 : f32
    %203 = vector.broadcast %cst_64 : f32 to vector<8x128xf32>
    %204 = arith.addf %203, %202 : vector<8x128xf32>
    %205 = arith.divf %203, %204 : vector<8x128xf32>
    %206 = vector.extract_strided_slice %177 {offsets = [0, 256], sizes = [8, 128], strides = [1, 1]} : vector<8x384xf32> to vector<8x128xf32>
    %207 = vector.extract_strided_slice %185 {offsets = [0, 256], sizes = [8, 128], strides = [1, 1]} : vector<8x384xf32> to vector<8x128xf32>
    %208 = arith.mulf %197, %207 : vector<8x128xf32>
    %209 = arith.addf %206, %208 : vector<8x128xf32>
    %210 = math.tanh %209 : vector<8x128xf32>
    %cst_65 = arith.constant 1.000000e+00 : f32
    %211 = vector.broadcast %cst_65 : f32 to vector<8x128xf32>
    %212 = arith.subf %211, %205 : vector<8x128xf32>
    %213 = arith.mulf %212, %210 : vector<8x128xf32>
    %214 = arith.mulf %205, %138 : vector<8x128xf32>
    %215 = arith.addf %213, %214 : vector<8x128xf32>
    %216 = vector.extract_strided_slice %181 {offsets = [0, 0], sizes = [8, 128], strides = [1, 1]} : vector<8x384xf32> to vector<8x128xf32>
    %217 = vector.extract_strided_slice %189 {offsets = [0, 0], sizes = [8, 128], strides = [1, 1]} : vector<8x384xf32> to vector<8x128xf32>
    %218 = arith.addf %216, %217 : vector<8x128xf32>
    %219 = arith.negf %218 : vector<8x128xf32>
    %220 = math.exp %219 : vector<8x128xf32>
    %cst_66 = arith.constant 1.000000e+00 : f32
    %221 = vector.broadcast %cst_66 : f32 to vector<8x128xf32>
    %222 = arith.addf %221, %220 : vector<8x128xf32>
    %223 = arith.divf %221, %222 : vector<8x128xf32>
    %224 = vector.extract_strided_slice %181 {offsets = [0, 128], sizes = [8, 128], strides = [1, 1]} : vector<8x384xf32> to vector<8x128xf32>
    %225 = vector.extract_strided_slice %189 {offsets = [0, 128], sizes = [8, 128], strides = [1, 1]} : vector<8x384xf32> to vector<8x128xf32>
    %226 = arith.addf %224, %225 : vector<8x128xf32>
    %227 = arith.negf %226 : vector<8x128xf32>
    %228 = math.exp %227 : vector<8x128xf32>
    %cst_67 = arith.constant 1.000000e+00 : f32
    %229 = vector.broadcast %cst_67 : f32 to vector<8x128xf32>
    %230 = arith.addf %229, %228 : vector<8x128xf32>
    %231 = arith.divf %229, %230 : vector<8x128xf32>
    %232 = vector.extract_strided_slice %181 {offsets = [0, 256], sizes = [8, 128], strides = [1, 1]} : vector<8x384xf32> to vector<8x128xf32>
    %233 = vector.extract_strided_slice %189 {offsets = [0, 256], sizes = [8, 128], strides = [1, 1]} : vector<8x384xf32> to vector<8x128xf32>
    %234 = arith.mulf %223, %233 : vector<8x128xf32>
    %235 = arith.addf %232, %234 : vector<8x128xf32>
    %236 = math.tanh %235 : vector<8x128xf32>
    %cst_68 = arith.constant 1.000000e+00 : f32
    %237 = vector.broadcast %cst_68 : f32 to vector<8x128xf32>
    %238 = arith.subf %237, %231 : vector<8x128xf32>
    %239 = arith.mulf %238, %236 : vector<8x128xf32>
    %240 = arith.mulf %231, %164 : vector<8x128xf32>
    %241 = arith.addf %239, %240 : vector<8x128xf32>
    %242 = arith.index_cast %c2_i32 : i32 to index
    %c0_69 = arith.constant 0 : index
    %c0_70 = arith.constant 0 : index
    %243 = vector.load %arg6[%242, %c0_69, %c0_70] : memref<4x8x256xf32, #tpu.memory_space<vmem>>, vector<1x8x128xf32>
    %244 = vector.shape_cast %243 : vector<1x8x128xf32> to vector<8x128xf32>
    %245 = vector.shape_cast %215 : vector<8x128xf32> to vector<1x8x128xf32>
    tpu.vector_store %arg6[%242, %c0_69, %c0_70], %245 {strides = array<i32>} : memref<4x8x256xf32, #tpu.memory_space<vmem>>, vector<1x8x128xf32>,
    %246 = arith.index_cast %173 : i32 to index
    %c0_71 = arith.constant 0 : index
    %c128_72 = arith.constant 128 : index
    %247 = vector.load %arg6[%246, %c0_71, %c128_72] : memref<4x8x256xf32, #tpu.memory_space<vmem>>, vector<1x8x128xf32>
    %248 = vector.shape_cast %247 : vector<1x8x128xf32> to vector<8x128xf32>
    %249 = vector.shape_cast %241 : vector<8x128xf32> to vector<1x8x128xf32>
    tpu.vector_store %arg6[%246, %c0_71, %c128_72], %249 {strides = array<i32>} : memref<4x8x256xf32, #tpu.memory_space<vmem>>, vector<1x8x128xf32>,
    %c3_i32_73 = arith.constant 3 : i32
    %c3_i32_74 = arith.constant 3 : i32
    %250 = arith.subi %c3_i32_74, %c3_i32_73 : i32
    %251 = arith.index_cast %c3_i32_73 : i32 to index
    %c0_75 = arith.constant 0 : index
    %c0_76 = arith.constant 0 : index
    %252 = vector.load %arg7[%251, %c0_75, %c0_76] : memref<4x8x384xbf16, #tpu.memory_space<vmem>>, vector<1x8x384xbf16>
    %253 = vector.shape_cast %252 : vector<1x8x384xbf16> to vector<8x384xbf16>
    %254 = arith.extf %253 : vector<8x384xbf16> to vector<8x384xf32>
    %255 = arith.index_cast %250 : i32 to index
    %c0_77 = arith.constant 0 : index
    %c0_78 = arith.constant 0 : index
    %256 = vector.load %arg8[%255, %c0_77, %c0_78] : memref<4x8x384xbf16, #tpu.memory_space<vmem>>, vector<1x8x384xbf16>
    %257 = vector.shape_cast %256 : vector<1x8x384xbf16> to vector<8x384xbf16>
    %258 = arith.extf %257 : vector<8x384xbf16> to vector<8x384xf32>
    %259 = arith.truncf %215 : vector<8x128xf32> to vector<8x128xbf16>
    %cst_79 = arith.constant dense<0.000000e+00> : vector<8x384xf32>
    %260 = tpu.matmul %259, %11, %cst_79 {dimension_numbers = #tpu.dot_dimension_numbers<[1], [0], [0], [1], [0, 0, 1, 1], [], []>} : vector<8x128xbf16>, vector<128x384xbf16>, vector<8x384xf32> -> vector<8x384xf32>
    %261 = vector.broadcast %15 : vector<1x384xf32> to vector<8x384xf32>
    %262 = arith.addf %260, %261 : vector<8x384xf32>
    %263 = arith.truncf %241 : vector<8x128xf32> to vector<8x128xbf16>
    %cst_80 = arith.constant dense<0.000000e+00> : vector<8x384xf32>
    %264 = tpu.matmul %263, %13, %cst_80 {dimension_numbers = #tpu.dot_dimension_numbers<[1], [0], [0], [1], [0, 0, 1, 1], [], []>} : vector<8x128xbf16>, vector<128x384xbf16>, vector<8x384xf32> -> vector<8x384xf32>
    %265 = vector.broadcast %17 : vector<1x384xf32> to vector<8x384xf32>
    %266 = arith.addf %264, %265 : vector<8x384xf32>
    %267 = vector.extract_strided_slice %254 {offsets = [0, 0], sizes = [8, 128], strides = [1, 1]} : vector<8x384xf32> to vector<8x128xf32>
    %268 = vector.extract_strided_slice %262 {offsets = [0, 0], sizes = [8, 128], strides = [1, 1]} : vector<8x384xf32> to vector<8x128xf32>
    %269 = arith.addf %267, %268 : vector<8x128xf32>
    %270 = arith.negf %269 : vector<8x128xf32>
    %271 = math.exp %270 : vector<8x128xf32>
    %cst_81 = arith.constant 1.000000e+00 : f32
    %272 = vector.broadcast %cst_81 : f32 to vector<8x128xf32>
    %273 = arith.addf %272, %271 : vector<8x128xf32>
    %274 = arith.divf %272, %273 : vector<8x128xf32>
    %275 = vector.extract_strided_slice %254 {offsets = [0, 128], sizes = [8, 128], strides = [1, 1]} : vector<8x384xf32> to vector<8x128xf32>
    %276 = vector.extract_strided_slice %262 {offsets = [0, 128], sizes = [8, 128], strides = [1, 1]} : vector<8x384xf32> to vector<8x128xf32>
    %277 = arith.addf %275, %276 : vector<8x128xf32>
    %278 = arith.negf %277 : vector<8x128xf32>
    %279 = math.exp %278 : vector<8x128xf32>
    %cst_82 = arith.constant 1.000000e+00 : f32
    %280 = vector.broadcast %cst_82 : f32 to vector<8x128xf32>
    %281 = arith.addf %280, %279 : vector<8x128xf32>
    %282 = arith.divf %280, %281 : vector<8x128xf32>
    %283 = vector.extract_strided_slice %254 {offsets = [0, 256], sizes = [8, 128], strides = [1, 1]} : vector<8x384xf32> to vector<8x128xf32>
    %284 = vector.extract_strided_slice %262 {offsets = [0, 256], sizes = [8, 128], strides = [1, 1]} : vector<8x384xf32> to vector<8x128xf32>
    %285 = arith.mulf %274, %284 : vector<8x128xf32>
    %286 = arith.addf %283, %285 : vector<8x128xf32>
    %287 = math.tanh %286 : vector<8x128xf32>
    %cst_83 = arith.constant 1.000000e+00 : f32
    %288 = vector.broadcast %cst_83 : f32 to vector<8x128xf32>
    %289 = arith.subf %288, %282 : vector<8x128xf32>
    %290 = arith.mulf %289, %287 : vector<8x128xf32>
    %291 = arith.mulf %282, %215 : vector<8x128xf32>
    %292 = arith.addf %290, %291 : vector<8x128xf32>
    %293 = vector.extract_strided_slice %258 {offsets = [0, 0], sizes = [8, 128], strides = [1, 1]} : vector<8x384xf32> to vector<8x128xf32>
    %294 = vector.extract_strided_slice %266 {offsets = [0, 0], sizes = [8, 128], strides = [1, 1]} : vector<8x384xf32> to vector<8x128xf32>
    %295 = arith.addf %293, %294 : vector<8x128xf32>
    %296 = arith.negf %295 : vector<8x128xf32>
    %297 = math.exp %296 : vector<8x128xf32>
    %cst_84 = arith.constant 1.000000e+00 : f32
    %298 = vector.broadcast %cst_84 : f32 to vector<8x128xf32>
    %299 = arith.addf %298, %297 : vector<8x128xf32>
    %300 = arith.divf %298, %299 : vector<8x128xf32>
    %301 = vector.extract_strided_slice %258 {offsets = [0, 128], sizes = [8, 128], strides = [1, 1]} : vector<8x384xf32> to vector<8x128xf32>
    %302 = vector.extract_strided_slice %266 {offsets = [0, 128], sizes = [8, 128], strides = [1, 1]} : vector<8x384xf32> to vector<8x128xf32>
    %303 = arith.addf %301, %302 : vector<8x128xf32>
    %304 = arith.negf %303 : vector<8x128xf32>
    %305 = math.exp %304 : vector<8x128xf32>
    %cst_85 = arith.constant 1.000000e+00 : f32
    %306 = vector.broadcast %cst_85 : f32 to vector<8x128xf32>
    %307 = arith.addf %306, %305 : vector<8x128xf32>
    %308 = arith.divf %306, %307 : vector<8x128xf32>
    %309 = vector.extract_strided_slice %258 {offsets = [0, 256], sizes = [8, 128], strides = [1, 1]} : vector<8x384xf32> to vector<8x128xf32>
    %310 = vector.extract_strided_slice %266 {offsets = [0, 256], sizes = [8, 128], strides = [1, 1]} : vector<8x384xf32> to vector<8x128xf32>
    %311 = arith.mulf %300, %310 : vector<8x128xf32>
    %312 = arith.addf %309, %311 : vector<8x128xf32>
    %313 = math.tanh %312 : vector<8x128xf32>
    %cst_86 = arith.constant 1.000000e+00 : f32
    %314 = vector.broadcast %cst_86 : f32 to vector<8x128xf32>
    %315 = arith.subf %314, %308 : vector<8x128xf32>
    %316 = arith.mulf %315, %313 : vector<8x128xf32>
    %317 = arith.mulf %308, %241 : vector<8x128xf32>
    %318 = arith.addf %316, %317 : vector<8x128xf32>
    %319 = arith.index_cast %c3_i32_73 : i32 to index
    %c0_87 = arith.constant 0 : index
    %c0_88 = arith.constant 0 : index
    %320 = vector.load %arg6[%319, %c0_87, %c0_88] : memref<4x8x256xf32, #tpu.memory_space<vmem>>, vector<1x8x128xf32>
    %321 = vector.shape_cast %320 : vector<1x8x128xf32> to vector<8x128xf32>
    %322 = vector.shape_cast %292 : vector<8x128xf32> to vector<1x8x128xf32>
    tpu.vector_store %arg6[%319, %c0_87, %c0_88], %322 {strides = array<i32>} : memref<4x8x256xf32, #tpu.memory_space<vmem>>, vector<1x8x128xf32>,
    %323 = arith.index_cast %250 : i32 to index
    %c0_89 = arith.constant 0 : index
    %c128_90 = arith.constant 128 : index
    %324 = vector.load %arg6[%323, %c0_89, %c128_90] : memref<4x8x256xf32, #tpu.memory_space<vmem>>, vector<1x8x128xf32>
    %325 = vector.shape_cast %324 : vector<1x8x128xf32> to vector<8x128xf32>
    %326 = vector.shape_cast %318 : vector<8x128xf32> to vector<1x8x128xf32>
    tpu.vector_store %arg6[%323, %c0_89, %c128_90], %326 {strides = array<i32>} : memref<4x8x256xf32, #tpu.memory_space<vmem>>, vector<1x8x128xf32>,
    %c4_i32 = arith.constant 4 : i32
    return
  }
  func.func @transform_0(%arg0: i32) -> (i32, i32, i32) {
    %c0_i32 = arith.constant 0 : i32
    %c0_i32_0 = arith.constant 0 : i32
    %c0_i32_1 = arith.constant 0 : i32
    %c0_i32_2 = arith.constant 0 : i32
    return %c0_i32, %c0_i32_0, %c0_i32_1 : i32, i32, i32
  }
  func.func @transform_1(%arg0: i32) -> (i32, i32, i32) {
    %c0_i32 = arith.constant 0 : i32
    %c0_i32_0 = arith.constant 0 : i32
    %c0_i32_1 = arith.constant 0 : i32
    return %arg0, %c0_i32, %c0_i32_0 : i32, i32, i32
  }
  func.func @transform_2(%arg0: i32) -> (i32, i32, i32, i32) {
    %c0_i32 = arith.constant 0 : i32
    %c0_i32_0 = arith.constant 0 : i32
    %c0_i32_1 = arith.constant 0 : i32
    %c0_i32_2 = arith.constant 0 : i32
    return %arg0, %c0_i32, %c0_i32_0, %c0_i32_1 : i32, i32, i32, i32
  }
  func.func @transform_3(%arg0: i32) -> (i32, i32, i32) {
    %c0_i32 = arith.constant 0 : i32
    %c0_i32_0 = arith.constant 0 : i32
    %c0_i32_1 = arith.constant 0 : i32
    return %arg0, %c0_i32, %c0_i32_0 : i32, i32, i32
  }
  func.func @transform_4(%arg0: i32) -> (i32, i32, i32, i32) {
    %c0_i32 = arith.constant 0 : i32
    %c0_i32_0 = arith.constant 0 : i32
    %c0_i32_1 = arith.constant 0 : i32
    %c0_i32_2 = arith.constant 0 : i32
    return %arg0, %c0_i32, %c0_i32_0, %c0_i32_1 : i32, i32, i32, i32
  }
  func.func @transform_5(%arg0: i32) -> (i32, i32, i32) {
    %c0_i32 = arith.constant 0 : i32
    %c0_i32_0 = arith.constant 0 : i32
    %c0_i32_1 = arith.constant 0 : i32
    %c0_i32_2 = arith.constant 0 : i32
    return %c0_i32, %c0_i32_0, %c0_i32_1 : i32, i32, i32
  }
}

</mosaic_0001>

<bundles_post_ra>
// kernel: tpu_custom_call.1
= control target key start
LH: loop header
LB: loop body
LE: loop exit
PB: predicated region body
PF: predicated region fallthrough
CT: control target
= control target key end

     0   :  { %s6033_s0 = inlined_call_operand.hbm [shape: f32[4,8,256], index: 0, kind: input, shape index: {}]   ;;  %s6034_s1 = inlined_call_operand.hbm [shape: bf16[2,256,768], index: 1, kind: input, shape index: {}]   ;;  %s6035_s2 = inlined_call_operand.hbm [shape: bf16[2,2,128,384], index: 2, kind: input, shape index: {}]   ;;  %s6036_s3 = inlined_call_operand.hbm [shape: f32[2,1,768], index: 3, kind: input, shape index: {}]   ;;  %s6037_s4 = inlined_call_operand.vmem [shape: f32[2,2,1,384], index: 4, kind: input, shape index: {}]   ;;  %s6038_s5 = inlined_call_operand.hbm [shape: f32[4,8,256], index: 5, kind: output, shape index: {}]  }
   0x1   :  { %6207 = sst [smem:[#allocation81_spill]] %s6034_s1 }
   0x2   :  { %10 = vsyncpa [#allocation5], 0 }
   0x3   :  { %11 = vsyncpa [#allocation8], 0 }
   0x4   :  { %13 = vsyncpa [#allocation8 + $0x1], 0 }
   0x5   :  { %14 = vsyncpa [#allocation11], 0 }
   0x6   :  { %16 = vsyncpa [#allocation11 + $0x1], 0 }
   0x7   :  { %17 = vsyncpa [#allocation6], 0  ;;  %s4543_s18 = smov 0   ;;  %s4545_s19 = smov 0  }
   0x8   :  { %s4547_s20 = smov 0   ;;  %s4549_s21 = smov 0  }
   0x9 LB: > { %6208 = sst [smem:[#allocation17_spill]] %s4491_s20  ;;  %s4564_s22 = sadd.s32 1, %s4495_s21   ;;  %s4495_s21 = sphi %s4549_s21, %s6446_s21   ;;  %s4491_s20 = sphi %s4547_s20, %s6443_s20   ;;  %s4487_s19 = sphi %s4545_s19, %s6445_s19   ;;  %s4483_s18 = sphi %s4543_s18, %s6444_s18  }
   0xa   : > { %s51_s23 = sadd.s32 1, %s4491_s20  ;;  %s48_s24 = ssub.s32 %s4495_s21, %s4564_s22 }
   0xb   : > { %p58_p0 = scmp.ne.s32.totalorder %s4491_s20, %s4487_s19  ;;  %p49_p1 = scmp.eq.s32.totalorder %s48_s24, 0 }
   0xc   : > { %p59_p2 = scmp.eq.s32.totalorder %s4495_s21, 0  ;;  %p4112_p3 = scmp.lt.s32.totalorder %s4495_s21, 2 }
   0xd   : > { %s4574_s25 = scalar_select %p49_p1, %s4491_s20, %s51_s23  }
   0xe   : > { %p60_p4 = por %p59_p2, %p58_p0  ;;  %s200_s26 = sand.u32 1, %s4495_s21  }
   0xf   : > { %6209 = sst [smem:[#allocation18_spill]] %s4574_s25  ;;  %s4578_s27 = sand.u32 1, %s4491_s20  }
  0x10   : > { %s4073_s28 = smul.u32 768, %s4578_s27  ;;  %p4581_p5 = pnand %p4112_p3, %p60_p4 }
  0x11   : > { %s4074_s30 = smul.u32 12288, %s4495_s21  ;;  %s6211_s1 = sld [smem:[#allocation81_spill]] }
  0x12   : > { %s6210_s29 = scalar_select %p4581_p5, 1, 0 }
  0x13   : > { %s204_s9 = scalar_lea.vmem [#allocation7], %s4073_s28  ;;  %s4593_s11 = scalar_lea.sflag [#allocation8], %s200_s26 }
  0x14   : > { %s211_s10 = sshll.u32 %s204_s9, 4  ;;  %p4599_p7 = pneg %p4581_p5  ;;  %s4591_s10 = int_to_ptr.vmem [resolvable:$true] %s211_s10 }
  0x16   : > { %s6212_s13 = scalar_select %p4599_p7, 1, 0 }
  0x17   : > { %s4589_s8 = scalar_lea.hbm %s6211_s1, %s4074_s30  ;;  %s4310_s16 = scalar_lea.hbm %s6211_s1, 24576 }
  0x18   : > { %s4305_s12 = scalar_lea.hbm %s4589_s8, 12288  ;;  %p4311_p10 = scmp.lt.u32.totalorder %s4589_s8, %s6211_s1 }
  0x19   : > { %p4306_p6 = scmp.ne.s32.totalorder %s4589_s8, %s4305_s12  ;;  %p4312_p11 = scmp.lt.u32.totalorder %s4310_s16, %s4305_s12 }
  0x1a   : > { %p4314_p13 = scmp.lt.u32.totalorder %s4305_s12, %s4589_s8 }
  0x1b   : > { %p4308_p8 = pnand %p4599_p7, %p4306_p6  ;;  %p4313_p12 = por %p4312_p11, %p4311_p10 }
  0x1d   : > { %p4309_p9 = pneg %p4308_p8  ;;  %p4315_p0 = por %p4314_p13, %p4313_p12 }
  0x1f   : > { %p4316_p1 = pnand %p4315_p0, %p4309_p9 }
  0x21   : > { %4319 = shalt.err (!%p4316_p1)
}
  0x22   : > { %s4320_s24 = scalar_lea.vmem %s4591_s10, 12288  ;;  %s4497_s26 = smov [#allocation7]  }
  0x23   : > { %p4321_p2 = scmp.ne.s32.totalorder %s4591_s10, %s4320_s24  ;;  %s4325_s28 = sshll.u32 %s4497_s26, 4  ;;  %s4326_s28 = int_to_ptr.vmem [resolvable:$false] %s4325_s28 }
  0x24   : > { %s4327_s30 = scalar_lea.vmem %s4326_s28, 24576  ;;  %p4328_p6 = scmp.lt.s32.totalorder %s4591_s10, %s4326_s28 }
  0x25   : > { %p4323_p3 = pnand %p4321_p2, %p4599_p7  ;;  %p4329_p8 = scmp.lt.s32.totalorder %s4327_s30, %s4320_s24 }
  0x27   : > { %p4324_p4 = pneg %p4323_p3  ;;  %p4330_p10 = por %p4329_p8, %p4328_p6 }
  0x29   : > { %p4331_p11 = pnand %p4330_p10, %p4324_p4 }
  0x2b   : > { %4334 = shalt.err (!%p4331_p11)
}
  0x2c   : > { %s4498_s6 = smov 384   ;;  %s4499_s7 = smov 24  }
  0x2d   : > { %4104 = dma.hbm_to_vmem [thread:$0]  (!%p4581_p5), %s4589_s8, 12288, %s4591_s10, %s4593_s11, %s4498_s6, %s4498_s6, %s4499_s7  }
  0x2e   : > { %s4624_s9 = sadd.s32 4294967295, %s4495_s21   ;;  %p64_p12 = scmp.ne.s32.totalorder %s4487_s19, %s4483_s18 }
  0x2f   : > { %p6039_p9 = scmp.eq.s32.totalorder %s4624_s9, 0  ;;  %p3410_p13 = scmp.ge.s32.totalorder %s4495_s21, 1 }
  0x30   : > { %p174_p0 = scmp.lt.s32.totalorder %s4495_s21, 3  ;;  %s4500_s8 = smov [#allocation4]  }
  0x31   : > { %p4634_p2 = por %p6039_p9, %p64_p12  ;;  %s186_s10 = sshll.u32 %s4500_s8, 4  ;;  %s187_s10 = int_to_ptr.vmem [resolvable:$true] %s186_s10 }
  0x32   : > { %p4638_p3 = pnand %p3410_p13, %p174_p0  ;;  %s4075_s15 = smul.u32 384, %s4578_s27 }
  0x33   : > { %s6213_s12 = scalar_select %p4634_p2, 1, 0 }
  0x34   : > { %s6214_s14 = scalar_select %p4638_p3, 1, 0 }
  0x35   : > { %p4097_p4 = pneg %p4638_p3  ;;  %s4076_s16 = smul.u32 6144, %s4495_s21 }
  0x36   : > { %s4335_s30 = scalar_lea.hbm %s6033_s0, 1024 }
  0x37   : > { %p4647_p6 = pnand %p4097_p4, %p6039_p9  ;;  %s4655_s24 = scalar_lea.hbm %s6035_s2, %s4076_s16 }
  0x38   : > { %p4336_p8 = scmp.ne.s32.totalorder %s6033_s0, %s4335_s30  ;;  %p4342_p13 = scmp.lt.u32.totalorder %s4335_s30, %s6033_s0 }
  0x39   : > { %p4337_p10 = pneg %p4647_p6 }
  0x3b   : > { %p4338_p11 = pnand %p4337_p10, %p4336_p8 }
  0x3d   : > { %p4339_p12 = pneg %p4338_p11 }
  0x3f   : > { %p4344_p0 = pnand %p4342_p13, %p4339_p12 }
  0x41   : > { %4347 = shalt.err (!%p4344_p0)
}
  0x42   : > { %s4348_s16 = scalar_lea.vmem %s187_s10, 1024  ;;  %p4356_p2 = scmp.lt.s32.totalorder %s187_s10, %s187_s10 }
  0x43   : > { %p4349_p4 = scmp.ne.s32.totalorder %s187_s10, %s4348_s16  ;;  %p4357_p3 = scmp.lt.s32.totalorder %s4348_s16, %s4348_s16 }
  0x45   : > { %p4351_p1 = pnand %p4349_p4, %p4337_p10  ;;  %p4358_p5 = por %p4357_p3, %p4356_p2 }
  0x47   : > { %p4352_p9 = pneg %p4351_p1 }
  0x49   : > { %p4359_p7 = pnand %p4358_p5, %p4352_p9 }
  0x4b   : > { %4362 = shalt.err (!%p4359_p7)
}
  0x4c   : > { %s4501_s17 = smov 256   ;;  %s4502_s1 = smov 16  }
  0x4d   : > { %4100 = dma.hbm_to_vmem [thread:$0]  (!%p4647_p6), %s6033_s0, 1024, %s187_s10, [#allocation5], %s4501_s17, %s4501_s17, %s4502_s1  }
  0x4e   : > { %s225_s28 = scalar_lea.vmem [#allocation9], %s4075_s15  ;;  %s4077_s6 = smul.u32 6, %s4578_s27 }
  0x4f   : > { %s232_s30 = sshll.u32 %s225_s28, 4  ;;  %s4363_s7 = scalar_lea.hbm %s4655_s24, 6144  ;;  %s4673_s30 = int_to_ptr.vmem [resolvable:$true] %s232_s30 }
  0x50   : > { %p4364_p5 = scmp.ne.s32.totalorder %s4655_s24, %s4363_s7  ;;  %p6216_p7 = scmp.ne.s32.totalorder %s6212_s13, 0 }
  0x51   : > { %s4368_s25 = scalar_lea.hbm %s6035_s2, 12288  ;;  %p4369_p2 = scmp.lt.u32.totalorder %s4655_s24, %s6035_s2 }
  0x52   : > { %p4366_p9 = pnand %p4364_p5, %p6216_p7  ;;  %p4370_p3 = scmp.lt.u32.totalorder %s4368_s25, %s4363_s7 }
  0x53   : > { %p4372_p8 = scmp.lt.u32.totalorder %s4363_s7, %s4655_s24 }
  0x54   : > { %p4367_p1 = pneg %p4366_p9  ;;  %p4371_p6 = por %p4370_p3, %p4369_p2 }
  0x56   : > { %p4373_p10 = por %p4372_p8, %p4371_p6 }
  0x58   : > { %p4374_p11 = pnand %p4373_p10, %p4367_p1 }
  0x5a   : > { %4377 = shalt.err (!%p4374_p11)
}
  0x5b   : > { %s4378_s10 = scalar_lea.vmem %s4673_s30, 6144  ;;  %s4503_s15 = smov [#allocation9]  }
  0x5c   : > { %p4379_p12 = scmp.ne.s32.totalorder %s4673_s30, %s4378_s10  ;;  %s4383_s17 = sshll.u32 %s4503_s15, 4  ;;  %s4384_s17 = int_to_ptr.vmem [resolvable:$false] %s4383_s17 }
  0x5d   : > { %s4385_s20 = scalar_lea.vmem %s4384_s17, 12288  ;;  %p4386_p4 = scmp.lt.s32.totalorder %s4673_s30, %s4384_s17 }
  0x5e   : > { %p4381_p13 = pnand %p4379_p12, %p6216_p7  ;;  %p4387_p5 = scmp.lt.s32.totalorder %s4385_s20, %s4378_s10 }
  0x60   : > { %p4382_p0 = pneg %p4381_p13  ;;  %p4388_p9 = por %p4387_p5, %p4386_p4 }
  0x62   : > { %p4389_p2 = pnand %p4388_p9, %p4382_p0 }
  0x64   : > { %4392 = shalt.err (!%p4389_p2)
}
  0x65   : > { %s4504_s25 = smov 192   ;;  %s4505_s1 = smov 12  }
  0x66   : > { %p6217_p1 = scmp.ne.s32.totalorder %s6210_s29, 0  ;;  %s4078_s23 = smul.u32 96, %s4495_s21 }
  0x67   : > { %s246_s26 = scalar_lea.vmem [#allocation10], %s4077_s6  ;;  %s243_s18 = scalar_lea.sflag [#allocation11], %s4578_s27 }
  0x68   : > { %4107 = dma.hbm_to_vmem [thread:$0]  (!%p6217_p1), %s4655_s24, 6144, %s4673_s30, %s4593_s11, %s4504_s25, %s4504_s25, %s4505_s1  }
  0x69   : > { %s254_s28 = sshll.u32 %s246_s26, 4  ;;  %s4704_s16 = scalar_lea.hbm %s6036_s3, %s4078_s23  ;;  %s255_s28 = int_to_ptr.vmem [resolvable:$true] %s254_s28 }
  0x6a   : > { %s4393_s10 = scalar_lea.hbm %s4704_s16, 96  ;;  %s4398_s24 = scalar_lea.hbm %s6036_s3, 192 }
  0x6b   : > { %p4394_p3 = scmp.ne.s32.totalorder %s4704_s16, %s4393_s10  ;;  %p4399_p10 = scmp.lt.u32.totalorder %s4704_s16, %s6036_s3 }
  0x6c   : > { %p4400_p11 = scmp.lt.u32.totalorder %s4398_s24, %s4393_s10  ;;  %p4402_p13 = scmp.lt.u32.totalorder %s4393_s10, %s4704_s16 }
  0x6d   : > { %p4396_p6 = pnand %p4394_p3, %p6216_p7 }
  0x6e   : > { %p4401_p12 = por %p4400_p11, %p4399_p10 }
  0x6f   : > { %p4397_p8 = pneg %p4396_p6 }
  0x70   : > { %p4403_p0 = por %p4402_p13, %p4401_p12 }
  0x72   : > { %p4404_p4 = pnand %p4403_p0, %p4397_p8 }
  0x74   : > { %4407 = shalt.err (!%p4404_p4)
}
  0x75   : > { %s4408_s27 = scalar_lea.vmem %s255_s28, 96  ;;  %s4506_s15 = smov [#allocation10]  }
  0x76   : > { %p4409_p5 = scmp.ne.s32.totalorder %s255_s28, %s4408_s27  ;;  %s4413_s17 = sshll.u32 %s4506_s15, 4  ;;  %s4414_s17 = int_to_ptr.vmem [resolvable:$false] %s4413_s17 }
  0x77   : > { %s4415_s20 = scalar_lea.vmem %s4414_s17, 192  ;;  %p4416_p3 = scmp.lt.s32.totalorder %s255_s28, %s4414_s17 }
  0x78   : > { %p4411_p9 = pnand %p4409_p5, %p6216_p7  ;;  %p4417_p6 = scmp.lt.s32.totalorder %s4415_s20, %s4408_s27 }
  0x7a   : > { %p4412_p2 = pneg %p4411_p9  ;;  %p4418_p1 = por %p4417_p6, %p4416_p3 }
  0x7c   : > { %p4419_p10 = pnand %p4418_p1, %p4412_p2 }
  0x7e   : > { %4422 = shalt.err (!%p4419_p10)
}
  0x7f   : > { %p6218_p11 = scmp.ne.s32.totalorder %s6210_s29, 0  ;;  %p6219_p8 = scmp.ne.s32.totalorder %s6214_s14, 0 }
  0x81   : > { %4110 = dma.hbm_to_vmem [thread:$0]  (!%p6218_p11), %s4704_s16, 96, %s255_s28, %s243_s18  }
  0x82   : > { %270 = sbr.rel (%p6219_p8) target bundleno = 2021 (0x7e5), region = 40 }
  0x89   : > { %p6220_p12 = scmp.eq.s32.totalorder %s4624_s9, 0 }
  0x8b   : > { %4466 = dma.done.wait (%p6220_p12), [#allocation5], 1024   ;;  %p6221_p7 = pmov %p6220_p12 }
  0x8c   : > { %s276_s13 = sand.u32 1, %s4624_s9   ;;  %s278_s25 = sand.u32 1, %s4487_s19  }
  0x8d   : > { %4468 = vsyncadd (%p6221_p7), [#allocation5], 4294966272  ;;  %s4079_s1 = smul.u32 768, %s278_s25  ;;  %s277_s23 = scalar_lea.sflag [#allocation8], %s276_s13 }
  0x8e   : > { %p6222_p1 = scmp.ne.s32.totalorder %s6213_s12, 0 }
  0x8f   : > { %s4732_s26 = scalar_lea.vmem [#allocation7], %s4079_s1 }
  0x90   : > { %4470 = dma.done.wait (%p6222_p1), %s277_s23, 18432  }
  0x91   : > { %4472 = vsyncadd (%p6222_p1), %s277_s23, 4294948864  ;;  %s4080_s29 = smul.u32 384, %s278_s25  ;;  %s295_s7 = scalar_lea.sflag [#allocation11], %s278_s25 }
  0x92   : > { %s4081_s14 = smul.u32 6, %s278_s25 }
  0x93   : > { %s4738_s28 = scalar_lea.vmem [#allocation9], %s4080_s29 }
  0x94   : > { %s4740_s8 = scalar_lea.vmem [#allocation10], %s4081_s14 }
  0x95   : > { %4474 = dma.done.wait (%p6222_p1), %s295_s7, 96  }
  0x96   : > { %4476 = vsyncadd (%p6222_p1), %s295_s7, 4294967200  ;;  %p334_p13 = scmp.lt.s32.totalorder %s4624_s9, 1  ;;  %v4754_v0 = vld [vmem:[%s4732_s26] sm:$0xff]  ;;  %v4757_v1 = vld [vmem:[%s4732_s26 + $0x8] sm:$0xff]  ;;  %p6285_p0 = scmp.ne.s32.totalorder %s4624_s9, 0 }
  0x97   : > { %6223 = vst [vmem:[#allocation19_spill] sm:$0xff] %v4757_v1  ;;  %v4760_v2 = vld [vmem:[%s4732_s26 + $0x10] sm:$0xff]  ;;  %v4763_v3 = vld [vmem:[%s4732_s26 + $0x18] sm:$0xff]  ;;  %v4766_v4 = vld [vmem:[%s4732_s26 + $0x20] sm:$0xff] }
  0x98   : > { %s335_s16 = scalar_select %p334_p13, %s4624_s9, 1  ;;  %6224 = vst [vmem:[#allocation20_spill] sm:$0xff] %v4760_v2  ;;  %6225 = vst [vmem:[#allocation21_spill] sm:$0xff] %v4766_v4  ;;  %v4769_v5 = vld [vmem:[%s4732_s26 + $0x28] sm:$0xff]  ;;  %v4772_v6 = vld [vmem:[%s4732_s26 + $0x30] sm:$0xff] }
  0x99   : > { %6226 = vst [vmem:[#allocation22_spill] sm:$0xff] %v4769_v5  ;;  %v4775_v7 = vld [vmem:[%s4732_s26 + $0x38] sm:$0xff]  ;;  %v4778_v8 = vld [vmem:[%s4732_s26 + $0x40] sm:$0xff]  ;;  %v4781_v9 = vld [vmem:[%s4732_s26 + $0x48] sm:$0xff] }
  0x9a   : > { %s4082_s12 = smul.u32 6, %s335_s16  ;;  %6227 = vst [vmem:[#allocation23_spill] sm:$0xff] %v4778_v8  ;;  %v4784_v10 = vld [vmem:[%s4732_s26 + $0x50] sm:$0xff]  ;;  %v4787_v11 = vld [vmem:[%s4732_s26 + $0x58] sm:$0xff]  ;;  %v4790_v12 = vld [vmem:[%s4732_s26 + $0x60] sm:$0xff] }
  0x9b   : > { %6228 = vst [vmem:[#allocation24_spill] sm:$0xff] %v4787_v11  ;;  %v4793_v13 = vld [vmem:[%s4732_s26 + $0x68] sm:$0xff]  ;;  %v4796_v14 = vld [vmem:[%s4732_s26 + $0x70] sm:$0xff]  ;;  %v4799_v15 = vld [vmem:[%s4732_s26 + $0x78] sm:$0xff] }
  0x9c   : > { %s4751_s21 = scalar_lea.vmem %s6037_s4, %s4082_s12  ;;  %6229 = vst [vmem:[#allocation25_spill] sm:$0xff] %v4796_v14  ;;  %v4802_v16 = vld [vmem:[%s4732_s26 + $0x80] sm:$0xff]  ;;  %v4805_v17 = vld [vmem:[%s4732_s26 + $0x88] sm:$0xff]  ;;  %v4808_v18 = vld [vmem:[%s4732_s26 + $0x90] sm:$0xff] }
  0x9d   : > { %6230 = vst [vmem:[#allocation26_spill] sm:$0xff] %v4805_v17  ;;  %v4811_v19 = vld [vmem:[%s4732_s26 + $0x98] sm:$0xff]  ;;  %v4814_v20 = vld [vmem:[%s4732_s26 + $0xa0] sm:$0xff]  ;;  %v4817_v21 = vld [vmem:[%s4732_s26 + $0xa8] sm:$0xff] }
  0x9e   : > { %6231 = vst [vmem:[#allocation27_spill] sm:$0xff] %v4811_v19  ;;  %6232 = vst [vmem:[#allocation28_spill] sm:$0xff] %v4814_v20  ;;  %v4820_v22 = vld [vmem:[%s4732_s26 + $0xb0] sm:$0xff]  ;;  %v4823_v23 = vld [vmem:[%s4732_s26 + $0xb8] sm:$0xff] }
  0x9f   : > { %6233 = vst [vmem:[#allocation29_spill] sm:$0xff] %v4823_v23  ;;  %v4826_v24 = vld [vmem:[%s4732_s26 + $0xc0] sm:$0xff]  ;;  %v4829_v25 = vld [vmem:[%s4732_s26 + $0xc8] sm:$0xff]  ;;  %v4832_v26 = vld [vmem:[%s4732_s26 + $0xd0] sm:$0xff] }
  0xa0   : > { %6234 = vst [vmem:[#allocation30_spill] sm:$0xff] %v4832_v26  ;;  %v4835_v27 = vld [vmem:[%s4732_s26 + $0xd8] sm:$0xff]  ;;  %v4838_v28 = vld [vmem:[%s4732_s26 + $0xe0] sm:$0xff]  ;;  %v4841_v29 = vld [vmem:[%s4732_s26 + $0xe8] sm:$0xff] }
  0xa1   : > { %6235 = vst [vmem:[#allocation31_spill] sm:$0xff] %v4841_v29  ;;  %v4844_v30 = vld [vmem:[%s4732_s26 + $0xf0] sm:$0xff]  ;;  %v4847_v31 = vld [vmem:[%s4732_s26 + $0xf8] sm:$0xff]  ;;  %v4850_v32 = vld [vmem:[%s4732_s26 + $0x100] sm:$0xff] }
  0xa2   : > { %6236 = vst [vmem:[#allocation32_spill] sm:$0xff] %v4850_v32  ;;  %v4853_v33 = vld [vmem:[%s4732_s26 + $0x108] sm:$0xff]  ;;  %v4856_v34 = vld [vmem:[%s4732_s26 + $0x110] sm:$0xff]  ;;  %v4859_v35 = vld [vmem:[%s4732_s26 + $0x118] sm:$0xff] }
  0xa3   : > { %6237 = vst [vmem:[#allocation33_spill] sm:$0xff] %v4859_v35  ;;  %v4862_v36 = vld [vmem:[%s4732_s26 + $0x120] sm:$0xff]  ;;  %v4865_v37 = vld [vmem:[%s4732_s26 + $0x128] sm:$0xff]  ;;  %v4868_v38 = vld [vmem:[%s4732_s26 + $0x130] sm:$0xff] }
  0xa4   : > { %6238 = vst [vmem:[#allocation34_spill] sm:$0xff] %v4868_v38  ;;  %v4871_v39 = vld [vmem:[%s4732_s26 + $0x138] sm:$0xff]  ;;  %v4874_v40 = vld [vmem:[%s4732_s26 + $0x140] sm:$0xff]  ;;  %v4877_v41 = vld [vmem:[%s4732_s26 + $0x148] sm:$0xff] }
  0xa5   : > { %6239 = vst [vmem:[#allocation35_spill] sm:$0xff] %v4877_v41  ;;  %v4880_v42 = vld [vmem:[%s4732_s26 + $0x150] sm:$0xff]  ;;  %v4883_v43 = vld [vmem:[%s4732_s26 + $0x158] sm:$0xff]  ;;  %v4886_v44 = vld [vmem:[%s4732_s26 + $0x160] sm:$0xff] }
  0xa6   : > { %6240 = vst [vmem:[#allocation36_spill] sm:$0xff] %v4886_v44  ;;  %v4889_v45 = vld [vmem:[%s4732_s26 + $0x168] sm:$0xff]  ;;  %v4892_v46 = vld [vmem:[%s4732_s26 + $0x170] sm:$0xff]  ;;  %v4895_v47 = vld [vmem:[%s4732_s26 + $0x178] sm:$0xff] }
  0xa7   : > { %6241 = vst [vmem:[#allocation37_spill] sm:$0xff] %v4895_v47  ;;  %v4898_v48 = vld [vmem:[%s4732_s26 + $0x180] sm:$0xff]  ;;  %v4901_v49 = vld [vmem:[%s4732_s26 + $0x188] sm:$0xff]  ;;  %v4904_v50 = vld [vmem:[%s4732_s26 + $0x190] sm:$0xff] }
  0xa8   : > { %6242 = vst [vmem:[#allocation38_spill] sm:$0xff] %v4904_v50  ;;  %v4907_v51 = vld [vmem:[%s4732_s26 + $0x198] sm:$0xff]  ;;  %v4910_v52 = vld [vmem:[%s4732_s26 + $0x1a0] sm:$0xff]  ;;  %v4913_v53 = vld [vmem:[%s4732_s26 + $0x1a8] sm:$0xff] }
  0xa9   : > { %6243 = vst [vmem:[#allocation39_spill] sm:$0xff] %v4913_v53  ;;  %v4916_v54 = vld [vmem:[%s4732_s26 + $0x1b0] sm:$0xff]  ;;  %v4919_v55 = vld [vmem:[%s4732_s26 + $0x1b8] sm:$0xff]  ;;  %v4922_v56 = vld [vmem:[%s4732_s26 + $0x1c0] sm:$0xff] }
  0xaa   : > { %6244 = vst [vmem:[#allocation40_spill] sm:$0xff] %v4919_v55  ;;  %6245 = vst [vmem:[#allocation41_spill] sm:$0xff] %v4922_v56  ;;  %v4925_v57 = vld [vmem:[%s4732_s26 + $0x1c8] sm:$0xff]  ;;  %v4928_v58 = vld [vmem:[%s4732_s26 + $0x1d0] sm:$0xff] }
  0xab   : > { %6246 = vst [vmem:[#allocation42_spill] sm:$0xff] %v4928_v58  ;;  %v4931_v59 = vld [vmem:[%s4732_s26 + $0x1d8] sm:$0xff]  ;;  %v4934_v60 = vld [vmem:[%s4732_s26 + $0x1e0] sm:$0xff]  ;;  %v4937_v61 = vld [vmem:[%s4732_s26 + $0x1e8] sm:$0xff] }
  0xac   : > { %6247 = vst [vmem:[#allocation43_spill] sm:$0xff] %v4931_v59  ;;  %6248 = vst [vmem:[#allocation44_spill] sm:$0xff] %v4934_v60  ;;  %v4940_v62 = vld [vmem:[%s4732_s26 + $0x1f0] sm:$0xff]  ;;  %v4943_v63 = vld [vmem:[%s4732_s26 + $0x1f8] sm:$0xff] }
  0xad   : > { %6249 = vst [vmem:[#allocation45_spill] sm:$0xff] %v4937_v61  ;;  %6250 = vst [vmem:[#allocation46_spill] sm:$0xff] %v4940_v62  ;;  %v4946_v56 = vld [vmem:[%s4732_s26 + $0x200] sm:$0xff]  ;;  %v4949_v50 = vld [vmem:[%s4732_s26 + $0x208] sm:$0xff] }
  0xae   : > { %6251 = vst [vmem:[#allocation47_spill] sm:$0xff] %v4943_v63  ;;  %6252 = vst [vmem:[#allocation48_spill] sm:$0xff] %v4946_v56  ;;  %v4952_v59 = vld [vmem:[%s4732_s26 + $0x210] sm:$0xff]  ;;  %v4955_v53 = vld [vmem:[%s4732_s26 + $0x218] sm:$0xff] }
  0xaf   : > { %6253 = vst [vmem:[#allocation49_spill] sm:$0xff] %v4949_v50  ;;  %6254 = vst [vmem:[#allocation50_spill] sm:$0xff] %v4952_v59  ;;  %v4958_v44 = vld [vmem:[%s4732_s26 + $0x220] sm:$0xff]  ;;  %v4961_v62 = vld [vmem:[%s4732_s26 + $0x228] sm:$0xff] }
  0xb0   : > { %6255 = vst [vmem:[#allocation51_spill] sm:$0xff] %v4955_v53  ;;  %6256 = vst [vmem:[#allocation52_spill] sm:$0xff] %v4958_v44  ;;  %v4964_v47 = vld [vmem:[%s4732_s26 + $0x230] sm:$0xff]  ;;  %v4967_v38 = vld [vmem:[%s4732_s26 + $0x238] sm:$0xff] }
  0xb1   : > { %6257 = vst [vmem:[#allocation53_spill] sm:$0xff] %v4961_v62  ;;  %6258 = vst [vmem:[#allocation54_spill] sm:$0xff] %v4964_v47  ;;  %v4970_v50 = vld [vmem:[%s4732_s26 + $0x240] sm:$0xff]  ;;  %v4973_v41 = vld [vmem:[%s4732_s26 + $0x248] sm:$0xff] }
  0xb2   : > { %6259 = vst [vmem:[#allocation55_spill] sm:$0xff] %v4967_v38  ;;  %6260 = vst [vmem:[#allocation56_spill] sm:$0xff] %v4970_v50  ;;  %v4976_v32 = vld [vmem:[%s4732_s26 + $0x250] sm:$0xff]  ;;  %v4979_v44 = vld [vmem:[%s4732_s26 + $0x258] sm:$0xff] }
  0xb3   : > { %6261 = vst [vmem:[#allocation57_spill] sm:$0xff] %v4973_v41  ;;  %6262 = vst [vmem:[#allocation58_spill] sm:$0xff] %v4976_v32  ;;  %v4982_v35 = vld [vmem:[%s4732_s26 + $0x260] sm:$0xff]  ;;  %v4985_v26 = vld [vmem:[%s4732_s26 + $0x268] sm:$0xff] }
  0xb4   : > { %6263 = vst [vmem:[#allocation59_spill] sm:$0xff] %v4979_v44  ;;  %6264 = vst [vmem:[#allocation60_spill] sm:$0xff] %v4982_v35  ;;  %v4988_v38 = vld [vmem:[%s4732_s26 + $0x270] sm:$0xff]  ;;  %v4991_v29 = vld [vmem:[%s4732_s26 + $0x278] sm:$0xff] }
  0xb5   : > { %6265 = vst [vmem:[#allocation61_spill] sm:$0xff] %v4985_v26  ;;  %6266 = vst [vmem:[#allocation62_spill] sm:$0xff] %v4988_v38  ;;  %v4994_v20 = vld [vmem:[%s4732_s26 + $0x280] sm:$0xff]  ;;  %v4997_v32 = vld [vmem:[%s4732_s26 + $0x288] sm:$0xff] }
  0xb6   : > { %6267 = vst [vmem:[#allocation63_spill] sm:$0xff] %v4991_v29  ;;  %6268 = vst [vmem:[#allocation64_spill] sm:$0xff] %v4994_v20  ;;  %v5000_v23 = vld [vmem:[%s4732_s26 + $0x290] sm:$0xff]  ;;  %v5003_v14 = vld [vmem:[%s4732_s26 + $0x298] sm:$0xff] }
  0xb7   : > { %6269 = vst [vmem:[#allocation65_spill] sm:$0xff] %v4997_v32  ;;  %6270 = vst [vmem:[#allocation66_spill] sm:$0xff] %v5000_v23  ;;  %v5006_v17 = vld [vmem:[%s4732_s26 + $0x2a0] sm:$0xff]  ;;  %v5009_v8 = vld [vmem:[%s4732_s26 + $0x2a8] sm:$0xff] }
  0xb8   : > { %6271 = vst [vmem:[#allocation67_spill] sm:$0xff] %v5003_v14  ;;  %6272 = vst [vmem:[#allocation68_spill] sm:$0xff] %v5006_v17  ;;  %v5012_v26 = vld [vmem:[%s4732_s26 + $0x2b0] sm:$0xff]  ;;  %v5015_v11 = vld [vmem:[%s4732_s26 + $0x2b8] sm:$0xff]  ;;  %439 = sbr.rel (%p6285_p0) target bundleno = 537 (0x219), region = 60 }
  0xb9   : > { %6273 = vst [vmem:[#allocation69_spill] sm:$0xff] %v5009_v8  ;;  %6274 = vst [vmem:[#allocation70_spill] sm:$0xff] %v5012_v26  ;;  %v5018_v2 = vld [vmem:[%s4732_s26 + $0x2c0] sm:$0xff]  ;;  %v5021_v5 = vld [vmem:[%s4732_s26 + $0x2c8] sm:$0xff]  ;;  %v3420_v26 = vcombine.high (!%p6285_p0), %v4754_v0, %v4763_v3 }
  0xba   : > { %6275 = vst [vmem:[#allocation71_spill] sm:$0xff] %v5015_v11  ;;  %6276 = vst [vmem:[#allocation72_spill] sm:$0xff] %v5018_v2  ;;  %v5024_v20 = vld [vmem:[%s4732_s26 + $0x2d0] sm:$0xff]  ;;  %v5027_v29 = vld [vmem:[%s4732_s26 + $0x2d8] sm:$0xff] }
  0xbb   : > { %6277 = vst [vmem:[#allocation73_spill] sm:$0xff] %v5021_v5  ;;  %6278 = vst [vmem:[#allocation74_spill] sm:$0xff] %v5024_v20  ;;  %v5030_v38 = vld [vmem:[%s4732_s26 + $0x2e0] sm:$0xff]  ;;  %v5033_v23 = vld [vmem:[%s4732_s26 + $0x2e8] sm:$0xff]  ;;  %v3422_v5 = vcombine.high (!%p6285_p0), %v4757_v1, %v4766_v4  ;;  %963 = vmatprep.subr.bf16.mxu0 (!%p6285_p0), %v3420_v26  ;;  %v3427_v20 = vcombine.low (!%p6285_p0), %v4775_v7, %v4784_v10  ;;  %v3433_v26 = vcombine.low (!%p6285_p0), %v4793_v13, %v4802_v16 }
  0xbc   : > { %6279 = vst [vmem:[#allocation75_spill] sm:$0xff] %v5027_v29  ;;  %6280 = vst [vmem:[#allocation76_spill] sm:$0xff] %v5030_v38  ;;  %v5036_v14 = vld [vmem:[%s4732_s26 + $0x2f0] sm:$0xff]  ;;  %v5039_v17 = vld [vmem:[%s4732_s26 + $0x2f8] sm:$0xff]  ;;  %v3419_v38 = vcombine.low (!%p6285_p0), %v4754_v0, %v4763_v3  ;;  %v3421_v29 = vcombine.low (!%p6285_p0), %v4757_v1, %v4766_v4  ;;  %v3432_v1 = vcombine.high (!%p6285_p0), %v4790_v12, %v4799_v15 }
  0xbd   : > { %6281 = vst [vmem:[#allocation77_spill] sm:$0xff] %v5033_v23  ;;  %6282 = vst [vmem:[#allocation78_spill] sm:$0xff] %v5036_v14  ;;  %v5042_v8 = vld [vmem:[%s4740_s8] sm:$0x3f]  ;;  %1016 = vmatprep.subr.bf16.mxu1 (!%p6285_p0), %v3422_v5  ;;  %v3425_v14 = vcombine.low (!%p6285_p0), %v4772_v6, %v4781_v9  ;;  %v3434_v4 = vcombine.high (!%p6285_p0), %v4793_v13, %v4802_v16  ;;  %v3431_v5 = vcombine.low (!%p6285_p0), %v4790_v12, %v4799_v15 }
  0xbe   : > { %6283 = vst [vmem:[#allocation79_spill] sm:$0xff] %v5039_v17  ;;  %6284 = vst [vmem:[#allocation80_spill] sm:$0xff] %v5042_v8  ;;  %v3426_v17 = vcombine.high (!%p6285_p0), %v4772_v6, %v4781_v9  ;;  %v3428_v8 = vcombine.high (!%p6285_p0), %v4775_v7, %v4784_v10  ;;  %964 = vmatpush1.bf16.msra.mxu0 (!%p6285_p0), %v3419_v38  ;;  %1017 = vmatpush1.bf16.msra.mxu1 (!%p6285_p0), %v3421_v29 }
  0xbf   : > { %v3443_v29 = vcombine.low %v4826_v24, %v4835_v27  ;;  %v3445_v38 = vcombine.low %v4829_v25, %v4838_v28 }
  0xc0   : > { %965 = vmatprep.subr.bf16.mxu0 %v3426_v17  ;;  %1018 = vmatprep.subr.bf16.mxu1 %v3428_v8  ;;  %v3438_v17 = vcombine.high %v4808_v18, %v4817_v21  ;;  %v3440_v8 = vcombine.high %v4811_v19, %v4820_v22 }
  0xc2   : > { %966 = vmatpush1.bf16.msra.mxu0 %v3425_v14  ;;  %1019 = vmatpush1.bf16.msra.mxu1 %v3427_v20  ;;  %v3437_v14 = vcombine.low %v4808_v18, %v4817_v21  ;;  %v3439_v20 = vcombine.low %v4811_v19, %v4820_v22 }
  0xc3   : > { %967 = vmatprep.subr.bf16.mxu0 %v3432_v1  ;;  %1020 = vmatprep.subr.bf16.mxu1 %v3434_v4  ;;  %v3444_v1 = vcombine.high %v4826_v24, %v4835_v27  ;;  %v3446_v4 = vcombine.high %v4829_v25, %v4838_v28 }
  0xc6   : > { %968 = vmatpush1.bf16.msra.mxu0 %v3431_v5  ;;  %1021 = vmatpush1.bf16.msra.mxu1 %v3433_v26  ;;  %v441_v5 = vld [vmem:[#allocation4 + $0x8] sm:$0xff]  ;;  %v443_v26 = vld [vmem:[#allocation4 + $0x18] sm:$0xff] }
  0xc7   : > { %969 = vmatprep.subr.bf16.mxu0 %v3438_v17  ;;  %1022 = vmatprep.subr.bf16.mxu1 %v3440_v8  ;;  %v3450_v17 = vcombine.high %v4844_v30, %v4853_v33  ;;  %v3452_v8 = vcombine.high %v4847_v31, %v4856_v34  ;;  %v5090_v19 = vpack.c.bf16 %v443_v26, %v441_v5 }
  0xc8   : > { %v3462_v5 = vcombine.high %v4880_v42, %v4889_v45  ;;  %v3464_v26 = vcombine.high %v4883_v43, %v4892_v46 }
  0xc9   : > { %995 = vmatprep.mubr.bf16.mxu0 %v5090_v19  ;;  %1048 = vmatprep.mubr.bf16.mxu1 %v5090_v19 }
  0xca   : > { %970 = vmatpush1.bf16.msra.mxu0 %v3437_v14  ;;  %1023 = vmatpush1.bf16.msra.mxu1 %v3439_v20  ;;  %v3449_v14 = vcombine.low %v4844_v30, %v4853_v33  ;;  %v3451_v20 = vcombine.low %v4847_v31, %v4856_v34 }
  0xcb   : > { %971 = vmatprep.subr.bf16.mxu0 %v3444_v1  ;;  %1024 = vmatprep.subr.bf16.mxu1 %v3446_v4  ;;  %v3456_v1 = vcombine.high %v4862_v36, %v4871_v39  ;;  %v3458_v4 = vcombine.high %v4865_v37, %v4874_v40 }
  0xce   : > { %972 = vmatpush1.bf16.msra.mxu0 %v3443_v29  ;;  %1025 = vmatpush1.bf16.msra.mxu1 %v3445_v38  ;;  %v3455_v29 = vcombine.low %v4862_v36, %v4871_v39  ;;  %v3457_v38 = vcombine.low %v4865_v37, %v4874_v40 }
  0xcf   : > { %973 = vmatprep.subr.bf16.mxu0 %v3450_v17  ;;  %1026 = vmatprep.subr.bf16.mxu1 %v3452_v8  ;;  %v3461_v17 = vcombine.low %v4880_v42, %v4889_v45  ;;  %v3463_v8 = vcombine.low %v4883_v43, %v4892_v46 }
  0xd2   : > { %974 = vmatpush1.bf16.msra.mxu0 %v3449_v14  ;;  %1027 = vmatpush1.bf16.msra.mxu1 %v3451_v20  ;;  %v3468_v14 = vcombine.high %v4898_v48, %v4907_v51  ;;  %v3470_v20 = vcombine.high %v4901_v49, %v4910_v52 }
  0xd3   : > { %975 = vmatprep.subr.bf16.mxu0 %v3456_v1  ;;  %1028 = vmatprep.subr.bf16.mxu1 %v3458_v4  ;;  %v3467_v1 = vcombine.low %v4898_v48, %v4907_v51  ;;  %v3469_v4 = vcombine.low %v4901_v49, %v4910_v52 }
  0xd6   : > { %976 = vmatpush1.bf16.msra.mxu0 %v3455_v29  ;;  %1029 = vmatpush1.bf16.msra.mxu1 %v3457_v38  ;;  %v3474_v29 = vcombine.high %v4916_v54, %v4925_v57  ;;  %v3476_v38 = vcombine.high %v4919_v55, %v4928_v58 }
  0xd7   : > { %977 = vmatprep.subr.bf16.mxu0 %v3462_v5  ;;  %1030 = vmatprep.subr.bf16.mxu1 %v3464_v26  ;;  %v3473_v5 = vcombine.low %v4916_v54, %v4925_v57  ;;  %v3475_v26 = vcombine.low %v4919_v55, %v4928_v58 }
  0xda   : > { %978 = vmatpush1.bf16.msra.mxu0 %v3461_v17  ;;  %1031 = vmatpush1.bf16.msra.mxu1 %v3463_v8  ;;  %v3480_v17 = vcombine.high %v4934_v60, %v4943_v63  ;;  %v3482_v8 = vcombine.high %v4937_v61, %v4946_v56 }
  0xdb   : > { %979 = vmatprep.subr.bf16.mxu0 %v3468_v14  ;;  %1032 = vmatprep.subr.bf16.mxu1 %v3470_v20  ;;  %v3479_v14 = vcombine.low %v4934_v60, %v4943_v63  ;;  %v3481_v20 = vcombine.low %v4937_v61, %v4946_v56 }
  0xde   : > { %980 = vmatpush1.bf16.msra.mxu0 %v3467_v1  ;;  %1033 = vmatpush1.bf16.msra.mxu1 %v3469_v4  ;;  %v3486_v1 = vcombine.high %v4952_v59, %v4961_v62  ;;  %v3488_v4 = vcombine.high %v4955_v53, %v4964_v47 }
  0xdf   : > { %981 = vmatprep.subr.bf16.mxu0 %v3474_v29  ;;  %1034 = vmatprep.subr.bf16.mxu1 %v3476_v38  ;;  %v3485_v29 = vcombine.low %v4952_v59, %v4961_v62  ;;  %v3487_v38 = vcombine.low %v4955_v53, %v4964_v47 }
  0xe2   : > { %982 = vmatpush1.bf16.msra.mxu0 %v3473_v5  ;;  %1035 = vmatpush1.bf16.msra.mxu1 %v3475_v26  ;;  %v3492_v5 = vcombine.high %v4970_v50, %v4979_v44  ;;  %v3494_v26 = vcombine.high %v4973_v41, %v4982_v35 }
  0xe3   : > { %983 = vmatprep.subr.bf16.mxu0 %v3480_v17  ;;  %1036 = vmatprep.subr.bf16.mxu1 %v3482_v8  ;;  %v3491_v17 = vcombine.low %v4970_v50, %v4979_v44  ;;  %v3493_v8 = vcombine.low %v4973_v41, %v4982_v35  ;;  %v6289_v41 = vld [vmem:[#allocation68_spill] sm:$0xff] }
  0xe4   : > { %v447_v50 = vld [vmem:[#allocation4 + $0x38] sm:$0xff] }
  0xe6   : > { %984 = vmatpush1.bf16.msra.mxu0 %v3479_v14  ;;  %1037 = vmatpush1.bf16.msra.mxu1 %v3481_v20  ;;  %v6286_v14 = vld [vmem:[#allocation62_spill] sm:$0xff] }
  0xe7   : > { %985 = vmatprep.subr.bf16.mxu0 %v3486_v1  ;;  %1038 = vmatprep.subr.bf16.mxu1 %v3488_v4  ;;  %v3498_v20 = vcombine.high %v6286_v14, %v4997_v32  ;;  %v6287_v1 = vld [vmem:[#allocation66_spill] sm:$0xff]  ;;  %v6288_v4 = vld [vmem:[#allocation63_spill] sm:$0xff] }
  0xe8   : > { %v3500_v53 = vcombine.high %v6288_v4, %v6287_v1 }
  0xea   : > { %986 = vmatpush1.bf16.msra.mxu0 %v3485_v29  ;;  %1039 = vmatpush1.bf16.msra.mxu1 %v3487_v38  ;;  %v3497_v29 = vcombine.low %v6286_v14, %v4997_v32  ;;  %v3499_v38 = vcombine.low %v6288_v4, %v6287_v1  ;;  %v6291_v14 = vld [vmem:[#allocation74_spill] sm:$0xff]  ;;  %v6293_v1 = vld [vmem:[#allocation75_spill] sm:$0xff] }
  0xeb   : > { %987 = vmatprep.subr.bf16.mxu0 %v3492_v5  ;;  %1040 = vmatprep.subr.bf16.mxu1 %v3494_v26  ;;  %v3504_v5 = vcombine.high %v6289_v41, %v5015_v11  ;;  %v6290_v26 = vld [vmem:[#allocation69_spill] sm:$0xff]  ;;  %v445_v32 = vld [vmem:[#allocation4 + $0x28] sm:$0xff] }
  0xec   : > { %v3506_v35 = vcombine.high %v6290_v26, %v5018_v2 }
  0xee   : > { %988 = vmatpush1.bf16.msra.mxu0 %v3491_v17  ;;  %1041 = vmatpush1.bf16.msra.mxu1 %v3493_v8  ;;  %v3503_v17 = vcombine.low %v6289_v41, %v5015_v11  ;;  %v3505_v8 = vcombine.low %v6290_v26, %v5018_v2  ;;  %v440_v41 = vld [vmem:[#allocation4] sm:$0xff]  ;;  %v442_v11 = vld [vmem:[#allocation4 + $0x10] sm:$0xff] }
  0xef   : > { %989 = vmatprep.subr.bf16.mxu0 %v3498_v20  ;;  %1042 = vmatprep.subr.bf16.mxu1 %v3500_v53  ;;  %v3510_v20 = vcombine.high %v6291_v14, %v5033_v23  ;;  %v6292_v53 = vld [vmem:[#allocation78_spill] sm:$0xff]  ;;  %v5180_v2 = vpack.c.bf16 %v442_v11, %v440_v41 }
  0xf0   : > { %v3512_v4 = vcombine.high %v6293_v1, %v6292_v53 }
  0xf2   : > { %990 = vmatpush1.bf16.msra.mxu0 %v3497_v29  ;;  %1043 = vmatpush1.bf16.msra.mxu1 %v3499_v38  ;;  %v3509_v29 = vcombine.low %v6291_v14, %v5033_v23  ;;  %v3511_v38 = vcombine.low %v6293_v1, %v6292_v53  ;;  %v6297_v14 = vld [vmem:[#allocation23_spill] sm:$0xff]  ;;  %v451_v1 = vpack.c.bf16 %v447_v50, %v445_v32  ;;  %v6300_v50 = vld [vmem:[#allocation29_spill] sm:$0xff] }
  0xf3   : > { %991 = vmatprep.subr.bf16.mxu0 %v3504_v5  ;;  %1044 = vmatprep.subr.bf16.mxu1 %v3506_v35  ;;  %v6294_v5 = vld [vmem:[#allocation22_spill] sm:$0xff]  ;;  %v6295_v35 = vld [vmem:[#allocation20_spill] sm:$0xff] }
  0xf4   : > { %v3424_v26 = vcombine.high %v6295_v35, %v6294_v5 }
  0xf6   : > { %992 = vmatpush1.bf16.msra.mxu0 %v3503_v17  ;;  %1045 = vmatpush1.bf16.msra.mxu1 %v3505_v8  ;;  %v3423_v17 = vcombine.low %v6295_v35, %v6294_v5  ;;  %v6296_v8 = vld [vmem:[#allocation24_spill] sm:$0xff] }
  0xf7   : > { %993 = vmatprep.subr.bf16.mxu0 %v3510_v20  ;;  %1046 = vmatprep.subr.bf16.mxu1 %v3512_v4  ;;  %v3430_v53 = vcombine.high %v6297_v14, %v6296_v8  ;;  %v3429_v11 = vcombine.low %v6297_v14, %v6296_v8  ;;  %v444_v20 = vld [vmem:[#allocation4 + $0x20] sm:$0xff]  ;;  %v446_v4 = vld [vmem:[#allocation4 + $0x30] sm:$0xff] }
  0xf8   : > { %v5192_v5 = vpack.c.bf16 %v446_v4, %v444_v20  ;;  %v6301_v35 = vld [vmem:[#allocation28_spill] sm:$0xff]  ;;  %v6302_v8 = vld [vmem:[#allocation31_spill] sm:$0xff]  ;;  %v6303_v14 = vld [vmem:[#allocation30_spill] sm:$0xff] }
  0xf9   : > { %v6304_v20 = vld [vmem:[#allocation33_spill] sm:$0xff]  ;;  %v6305_v4 = vld [vmem:[#allocation32_spill] sm:$0xff] }
  0xfa   : > { %994 = vmatpush1.bf16.msra.mxu0 %v3509_v29  ;;  %1047 = vmatpush1.bf16.msra.mxu1 %v3511_v38  ;;  %v6298_v29 = vld [vmem:[#allocation26_spill] sm:$0xff]  ;;  %v6299_v38 = vld [vmem:[#allocation25_spill] sm:$0xff] }
  0xfb   : > { %1069 = vmatprep.subr.bf16.mxu0 %v3424_v26  ;;  %4009 = vmatprep.subr.bf16.mxu1 %v3424_v26  ;;  %v3436_v41 = vcombine.high %v6299_v38, %v6298_v29  ;;  %v3435_v32 = vcombine.low %v6299_v38, %v6298_v29  ;;  %v3442_v26 = vcombine.high %v6301_v35, %v6300_v50 }
  0xfc   : > { %v3454_v29 = vcombine.high %v6305_v4, %v6304_v20  ;;  %v3453_v38 = vcombine.low %v6305_v4, %v6304_v20  ;;  %v6312_v20 = vld [vmem:[#allocation43_spill] sm:$0xff]  ;;  %v6313_v4 = vld [vmem:[#allocation41_spill] sm:$0xff] }
  0xfd   : > { %996 = vmatmul.mubr.bf16.vlgmr.msra.gmra.mrb[0].mxu0 %v5180_v2  ;;  %1049 = vmatmul.mubr.bf16.vlgmr.msra.gmra.mrb[0].mxu1 %v5180_v2 }
  0xfe   : > { %1070 = vmatpush1.bf16.msra.mxu0 %v3423_v17  ;;  %4025 = vmatpush1.bf16.msra.mxu1 %v3423_v17  ;;  %v3441_v17 = vcombine.low %v6301_v35, %v6300_v50  ;;  %v6308_v50 = vld [vmem:[#allocation37_spill] sm:$0xff]  ;;  %v6309_v35 = vld [vmem:[#allocation36_spill] sm:$0xff] }
  0xff   : > { %1071 = vmatprep.subr.bf16.mxu0 %v3430_v53  ;;  %4010 = vmatprep.subr.bf16.mxu1 %v3430_v53  ;;  %v3448_v53 = vcombine.high %v6303_v14, %v6302_v8 }
 0x100   : > { %1005 = vmatprep.mubr.bf16.mxu0 %v451_v1  ;;  %1058 = vmatprep.mubr.bf16.mxu1 %v451_v1 }
 0x102   : > { %1072 = vmatpush1.bf16.msra.mxu0 %v3429_v11  ;;  %4026 = vmatpush1.bf16.msra.mxu1 %v3429_v11  ;;  %v3447_v11 = vcombine.low %v6303_v14, %v6302_v8  ;;  %v6310_v8 = vld [vmem:[#allocation39_spill] sm:$0xff]  ;;  %v6311_v14 = vld [vmem:[#allocation38_spill] sm:$0xff] }
 0x103   : > { %1073 = vmatprep.subr.bf16.mxu0 %v3436_v41  ;;  %4011 = vmatprep.subr.bf16.mxu1 %v3436_v41  ;;  %v6306_v41 = vld [vmem:[#allocation35_spill] sm:$0xff] }
 0x105   : > { %1006 = vmatmul.mubr.bf16.gmra.mrb[4].mxu0 %v5192_v5  ;;  %1059 = vmatmul.mubr.bf16.gmra.mrb[4].mxu1 %v5192_v5 }
 0x106   : > { %1074 = vmatpush1.bf16.msra.mxu0 %v3435_v32  ;;  %4027 = vmatpush1.bf16.msra.mxu1 %v3435_v32 }
 0x107   : > { %1075 = vmatprep.subr.bf16.mxu0 %v3442_v26  ;;  %4012 = vmatprep.subr.bf16.mxu1 %v3442_v26  ;;  %v3466_v26 = vcombine.high %v6309_v35, %v6308_v50 }
 0x108   : > { %1101 = vmatprep.mubr.bf16.mxu0 %v5090_v19  ;;  %1111 = vmatprep.mubr.bf16.mxu1 %v451_v1  ;;  %v6307_v19 = vld [vmem:[#allocation34_spill] sm:$0xff] }
 0x109   : > { %v3460_v1 = vcombine.high %v6307_v19, %v6306_v41  ;;  %v3459_v32 = vcombine.low %v6307_v19, %v6306_v41  ;;  %v6314_v41 = vld [vmem:[#allocation49_spill] sm:$0xff]  ;;  %v6315_v19 = vld [vmem:[#allocation46_spill] sm:$0xff] }
 0x10a   : > { %1076 = vmatpush1.bf16.msra.mxu0 %v3441_v17  ;;  %4028 = vmatpush1.bf16.msra.mxu1 %v3441_v17  ;;  %v3465_v17 = vcombine.low %v6309_v35, %v6308_v50  ;;  %v6316_v50 = vld [vmem:[#allocation55_spill] sm:$0xff]  ;;  %v6317_v35 = vld [vmem:[#allocation52_spill] sm:$0xff] }
 0x10b   : > { %1077 = vmatprep.subr.bf16.mxu0 %v3448_v53  ;;  %4013 = vmatprep.subr.bf16.mxu1 %v3448_v53  ;;  %v3472_v53 = vcombine.high %v6311_v14, %v6310_v8 }
 0x10e   : > { %1078 = vmatpush1.bf16.msra.mxu0 %v3447_v11  ;;  %4029 = vmatpush1.bf16.msra.mxu1 %v3447_v11  ;;  %v3471_v11 = vcombine.low %v6311_v14, %v6310_v8  ;;  %v6318_v8 = vld [vmem:[#allocation61_spill] sm:$0xff]  ;;  %v6319_v14 = vld [vmem:[#allocation58_spill] sm:$0xff] }
 0x10f   : > { %1079 = vmatprep.subr.bf16.mxu0 %v3454_v29  ;;  %4014 = vmatprep.subr.bf16.mxu1 %v3454_v29  ;;  %v3478_v29 = vcombine.high %v6313_v4, %v6312_v20 }
 0x112   : > { %1080 = vmatpush1.bf16.msra.mxu0 %v3453_v38  ;;  %4030 = vmatpush1.bf16.msra.mxu1 %v3453_v38  ;;  %v3477_v38 = vcombine.low %v6313_v4, %v6312_v20  ;;  %v6320_v20 = vld [vmem:[#allocation67_spill] sm:$0xff]  ;;  %v6321_v4 = vld [vmem:[#allocation64_spill] sm:$0xff] }
 0x113   : > { %1081 = vmatprep.subr.bf16.mxu0 %v3460_v1  ;;  %4015 = vmatprep.subr.bf16.mxu1 %v3460_v1  ;;  %v3484_v1 = vcombine.high %v6315_v19, %v6314_v41 }
 0x116   : > { %1082 = vmatpush1.bf16.msra.mxu0 %v3459_v32  ;;  %4031 = vmatpush1.bf16.msra.mxu1 %v3459_v32  ;;  %v3483_v32 = vcombine.low %v6315_v19, %v6314_v41  ;;  %v6322_v41 = vld [vmem:[#allocation73_spill] sm:$0xff]  ;;  %v6323_v19 = vld [vmem:[#allocation70_spill] sm:$0xff] }
 0x117   : > { %1083 = vmatprep.subr.bf16.mxu0 %v3466_v26  ;;  %4016 = vmatprep.subr.bf16.mxu1 %v3466_v26  ;;  %v3490_v26 = vcombine.high %v6317_v35, %v6316_v50 }
 0x11a   : > { %1084 = vmatpush1.bf16.msra.mxu0 %v3465_v17  ;;  %4032 = vmatpush1.bf16.msra.mxu1 %v3465_v17  ;;  %v3489_v17 = vcombine.low %v6317_v35, %v6316_v50  ;;  %v6324_v50 = vld [vmem:[#allocation79_spill] sm:$0xff]  ;;  %v6325_v35 = vld [vmem:[#allocation76_spill] sm:$0xff] }
 0x11b   : > { %1085 = vmatprep.subr.bf16.mxu0 %v3472_v53  ;;  %4017 = vmatprep.subr.bf16.mxu1 %v3472_v53  ;;  %v3496_v53 = vcombine.high %v6319_v14, %v6318_v8 }
 0x11e   : > { %1086 = vmatpush1.bf16.msra.mxu0 %v3471_v11  ;;  %4033 = vmatpush1.bf16.msra.mxu1 %v3471_v11  ;;  %v3495_v11 = vcombine.low %v6319_v14, %v6318_v8  ;;  %v453_v8 = vlaneseq }
 0x11f   : > { %1087 = vmatprep.subr.bf16.mxu0 %v3478_v29  ;;  %4018 = vmatprep.subr.bf16.mxu1 %v3478_v29  ;;  %v3502_v29 = vcombine.high %v6321_v4, %v6320_v20 }
 0x120   : > { %v454_v14 = vshrl.u32 %v453_v8, 7 }
 0x122   : > { %1088 = vmatpush1.bf16.msra.mxu0 %v3477_v38  ;;  %4034 = vmatpush1.bf16.msra.mxu1 %v3477_v38  ;;  %v3501_v38 = vcombine.low %v6321_v4, %v6320_v20  ;;  %v459_v20 = vsub.s32 1, %v454_v14  ;;  %v6326_v4 = vld [vmem:[#allocation80_spill] sm:$0xff] }
 0x123   : > { %1089 = vmatprep.subr.bf16.mxu0 %v3484_v1  ;;  %4019 = vmatprep.subr.bf16.mxu1 %v3484_v1  ;;  %v3508_v1 = vcombine.high %v6323_v19, %v6322_v41 }
 0x126   : > { %1090 = vmatpush1.bf16.msra.mxu0 %v3483_v32  ;;  %4035 = vmatpush1.bf16.msra.mxu1 %v3483_v32  ;;  %v3507_v32 = vcombine.low %v6323_v19, %v6322_v41  ;;  %v460_v41 = vrot.slane %v6326_v4, %v459_v20 }
 0x127   : > { %1091 = vmatprep.subr.bf16.mxu0 %v3490_v26  ;;  %4020 = vmatprep.subr.bf16.mxu1 %v3490_v26  ;;  %v3514_v26 = vcombine.high %v6325_v35, %v6324_v50 }
 0x12a   : > { %1092 = vmatpush1.bf16.msra.mxu0 %v3489_v17  ;;  %4036 = vmatpush1.bf16.msra.mxu1 %v3489_v17  ;;  %v3513_v17 = vcombine.low %v6325_v35, %v6324_v50 }
 0x12b   : > { %1093 = vmatprep.subr.bf16.mxu0 %v3496_v53  ;;  %4021 = vmatprep.subr.bf16.mxu1 %v3496_v53  ;;  %v455_v53 = vsub.s32 0, %v454_v14 }
 0x12e   : > { %1094 = vmatpush1.bf16.msra.mxu0 %v3495_v11  ;;  %4037 = vmatpush1.bf16.msra.mxu1 %v3495_v11  ;;  %v463_v11 = vsub.s32 2, %v454_v14 }
 0x12f   : > { %1095 = vmatprep.subr.bf16.mxu0 %v3502_v29  ;;  %4022 = vmatprep.subr.bf16.mxu1 %v3502_v29  ;;  %v456_v29 = vrot.slane %v6326_v4, %v455_v53 }
 0x132   : > { %1096 = vmatpush1.bf16.msra.mxu0 %v3501_v38  ;;  %4038 = vmatpush1.bf16.msra.mxu1 %v3501_v38  ;;  %v464_v38 = vrot.slane %v6326_v4, %v463_v11 }
 0x133   : > { %1097 = vmatprep.subr.bf16.mxu0 %v3508_v1  ;;  %4023 = vmatprep.subr.bf16.mxu1 %v3508_v1 }
 0x136   : > { %1098 = vmatpush1.bf16.msra.mxu0 %v3507_v32  ;;  %4039 = vmatpush1.bf16.msra.mxu1 %v3507_v32 }
 0x137   : > { %1099 = vmatprep.subr.bf16.mxu0 %v3514_v26  ;;  %4024 = vmatprep.subr.bf16.mxu1 %v3514_v26 }
 0x13a   : > { %1100 = vmatpush1.bf16.msra.mxu0 %v3513_v17  ;;  %4040 = vmatpush1.bf16.msra.mxu1 %v3513_v17 }
 0x13d   : > { %1102 = vmatmul.mubr.bf16.vlgmr.msra.gmra.mrb[8].mxu0 %v5180_v2  ;;  %1112 = vmatmul.mubr.bf16.vlgmr.msra.gmra.mrb[8].mxu1 %v5192_v5 }
 0x1d0   : > { %v997_v19 = vpop.f32.mrb[0].mxu0  ;;  %v1050_v1 = vpop.f32.mrb[0].mxu1 }
 0x1d1   : > { %v998_v32 = vadd.f32 %v997_v19, %v456_v29  ;;  %v1051_v50 = vadd.f32 %v1050_v1, %v464_v38  ;;  %v999_v35 = vpop.f32.mrb[1].mxu0  ;;  %v1052_v26 = vpop.f32.mrb[1].mxu1 }
 0x1d2   : > { %v1000_v2 = vadd.f32 %v999_v35, %v460_v41  ;;  %v1001_v17 = vpop.f32.mrb[2].mxu0  ;;  %v1054_v5 = vpop.f32.mrb[2].mxu1 }
 0x1d3   : > { %v3746_v23 = vpack.c.bf16 %v1051_v50, %v1051_v50  ;;  %v1002_v8 = vadd.f32 %v1001_v17, %v456_v29  ;;  %v1055_v44 = vadd.f32 %v1054_v5, %v464_v38  ;;  %v1003_v47 = vpop.f32.mrb[3].mxu0  ;;  %v1056_v59 = vpop.f32.mrb[3].mxu1 }
 0x1d4   : > { %v3745_v62 = vpack.c.bf16 %v1000_v2, %v998_v32  ;;  %v1004_v53 = vadd.f32 %v1003_v47, %v460_v41 }
 0x1d5   : > { %1175 = vst [vmem:[#allocation2 + $0x8] sm:$0xf] %v3746_v23  ;;  %v3748_v11 = vpack.c.bf16 %v1055_v44, %v1055_v44 }
 0x1d6   : > { %1174 = vst [vmem:[#allocation2] sm:$0xff] %v3745_v62  ;;  %v3747_v20 = vpack.c.bf16 %v1004_v53, %v1002_v8  ;;  %v467_v8 = vsub.s32 3, %v454_v14  ;;  %v471_v53 = vsub.s32 4, %v454_v14 }
 0x1d7   : > { %1177 = vst [vmem:[#allocation2 + $0x14] sm:$0xf] %v3748_v11  ;;  %v475_v11 = vsub.s32 5, %v454_v14 }
 0x1d8   : > { %1176 = vst [vmem:[#allocation2 + $0xc] sm:$0xff] %v3747_v20  ;;  %v1007_v19 = vpop.f32.mrb[4].mxu0  ;;  %v1060_v1 = vpop.f32.mrb[4].mxu1  ;;  %v468_v20 = vrot.slane %v6326_v4, %v467_v8 }
 0x1d9   : > { %v1008_v61 = vadd.f32 %v1007_v19, %v456_v29  ;;  %v1061_v56 = vadd.f32 %v1060_v1, %v464_v38  ;;  %v1009_v35 = vpop.f32.mrb[5].mxu0  ;;  %v1062_v60 = vpop.f32.mrb[5].mxu1  ;;  %v472_v19 = vrot.slane %v6326_v4, %v471_v53 }
 0x1da   : > { %v1010_v63 = vadd.f32 %v1009_v35, %v460_v41  ;;  %v1011_v50 = vpop.f32.mrb[6].mxu0  ;;  %v1064_v17 = vpop.f32.mrb[6].mxu1  ;;  %v1053_v1 = vadd.f32 %v1052_v26, %v468_v20 }
 0x1db   : > { %v3750_v5 = vpack.c.bf16 %v1061_v56, %v1061_v56  ;;  %v1012_v55 = vadd.f32 %v1011_v50, %v456_v29  ;;  %v1065_v58 = vadd.f32 %v1064_v17, %v464_v38  ;;  %v1013_v32 = vpop.f32.mrb[7].mxu0  ;;  %v1066_v47 = vpop.f32.mrb[7].mxu1  ;;  %v476_v56 = vrot.slane %v6326_v4, %v475_v11 }
 0x1dc   : > { %v3749_v23 = vpack.c.bf16 %v1010_v63, %v1008_v61  ;;  %v1014_v44 = vadd.f32 %v1013_v32, %v460_v41  ;;  %v1063_v61 = vadd.f32 %v1062_v60, %v468_v20  ;;  %v1067_v50 = vadd.f32 %v1066_v47, %v468_v20 }
 0x1dd   : > { %1179 = vst [vmem:[#allocation2 + $0x20] sm:$0xf] %v3750_v5  ;;  %v3752_v62 = vpack.c.bf16 %v1065_v58, %v1065_v58 }
 0x1de   : > { %1178 = vst [vmem:[#allocation2 + $0x18] sm:$0xff] %v3749_v23  ;;  %v3751_v2 = vpack.c.bf16 %v1014_v44, %v1012_v55  ;;  %v1057_v55 = vadd.f32 %v1056_v59, %v468_v20 }
 0x1df   : > { %1181 = vst [vmem:[#allocation2 + $0x2c] sm:$0xf] %v3752_v62 }
 0x1e0   : > { %1180 = vst [vmem:[#allocation2 + $0x24] sm:$0xff] %v3751_v2 }
 0x210   : > { %v1103_v29 = vpop.f32.mrb[8].mxu0  ;;  %v1113_v38 = vpop.f32.mrb[8].mxu1 }
 0x211   : > { %v1104_v63 = vadd.f32 %v1103_v29, %v472_v19  ;;  %v1114_v41 = vadd.f32 %v1113_v38, %v472_v19  ;;  %v1105_v58 = vpop.f32.mrb[9].mxu0  ;;  %v1115_v35 = vpop.f32.mrb[9].mxu1 }
 0x212   : > { %v1106_v17 = vadd.f32 %v1105_v58, %v476_v56  ;;  %v1116_v5 = vadd.f32 %v1115_v35, %v476_v56  ;;  %v1107_v32 = vpop.f32.mrb[10].mxu0  ;;  %v1117_v14 = vpop.f32.mrb[10].mxu1 }
 0x213   : > { %v3753_v23 = vpack.c.bf16 %v1104_v63, %v1053_v1  ;;  %v3757_v44 = vpack.c.bf16 %v1114_v41, %v1063_v61  ;;  %v1108_v62 = vadd.f32 %v1107_v32, %v472_v19  ;;  %v1118_v2 = vadd.f32 %v1117_v14, %v472_v19  ;;  %v1109_v8 = vpop.f32.mrb[11].mxu0  ;;  %v1119_v4 = vpop.f32.mrb[11].mxu1 }
 0x214   : > { %v3754_v53 = vpack.c.bf16 %v1106_v17, %v1106_v17  ;;  %v3758_v11 = vpack.c.bf16 %v1116_v5, %v1116_v5  ;;  %v1110_v26 = vadd.f32 %v1109_v8, %v476_v56  ;;  %v1120_v60 = vadd.f32 %v1119_v4, %v476_v56 }
 0x215   : > { %1234 = vst [vmem:[#allocation3] sm:$0xff] %v3753_v23  ;;  %1238 = vst [vmem:[#allocation3 + $0x18] sm:$0xff] %v3757_v44  ;;  %v3755_v29 = vpack.c.bf16 %v1108_v62, %v1057_v55  ;;  %v3759_v38 = vpack.c.bf16 %v1118_v2, %v1067_v50 }
 0x216   : > { %1235 = vst [vmem:[#allocation3 + $0x8] sm:$0xf] %v3754_v53  ;;  %1239 = vst [vmem:[#allocation3 + $0x20] sm:$0xf] %v3758_v11  ;;  %v3756_v59 = vpack.c.bf16 %v1110_v26, %v1110_v26  ;;  %v3760_v47 = vpack.c.bf16 %v1120_v60, %v1120_v60 }
 0x217   : > { %1236 = vst [vmem:[#allocation3 + $0xc] sm:$0xff] %v3755_v29  ;;  %1240 = vst [vmem:[#allocation3 + $0x24] sm:$0xff] %v3759_v38 }
 0x218   : > { %1237 = vst [vmem:[#allocation3 + $0x14] sm:$0xf] %v3756_v59  ;;  %1241 = vst [vmem:[#allocation3 + $0x2c] sm:$0xf] %v3760_v47 }
 0x219 PF: > { %p6327_p4 = scmp.eq.s32.totalorder %s4624_s9, 0 }
 0x21a   : > { %v3533_v20 = vcombine.high (!%p6327_p4), %v4754_v0, %v4763_v3  ;;  %v6328_v19 = vld [vmem:[#allocation21_spill] sm:$0xff] (!%p6327_p4)  ;;  %v6329_v56 = vld [vmem:[#allocation19_spill] sm:$0xff] (!%p6327_p4)  ;;  %v3532_v61 = vcombine.low (!%p6327_p4), %v4754_v0, %v4763_v3  ;;  %v3539_v41 = vcombine.high (!%p6327_p4), %v4772_v6, %v4781_v9  ;;  %v3541_v58 = vcombine.high (!%p6327_p4), %v4775_v7, %v4784_v10  ;;  %v6339_v60 = vld [vmem:[#allocation54_spill] sm:$0xff] (!%p6327_p4) }
 0x21b   : > { %1245 = sbr.rel (%p6327_p4) target bundleno = 889 (0x379), region = 64  ;;  %v3535_v1 = vcombine.high (!%p6327_p4), %v6329_v56, %v6328_v19  ;;  %v3534_v63 = vcombine.low (!%p6327_p4), %v6329_v56, %v6328_v19  ;;  %v3538_v35 = vcombine.low (!%p6327_p4), %v4772_v6, %v4781_v9  ;;  %v3540_v55 = vcombine.low (!%p6327_p4), %v4775_v7, %v4784_v10  ;;  %v6330_v7 = vld [vmem:[#allocation27_spill] sm:$0xff] (!%p6327_p4)  ;;  %v6336_v8 = vld [vmem:[#allocation45_spill] sm:$0xff] (!%p6327_p4)  ;;  %v6342_v19 = vld [vmem:[#allocation56_spill] sm:$0xff] (!%p6327_p4) }
 0x21c   : > { %1769 = vmatprep.subr.bf16.mxu0 (!%p6327_p4), %v3533_v20  ;;  %v3545_v0 = vcombine.high (!%p6327_p4), %v4790_v12, %v4799_v15  ;;  %v3547_v3 = vcombine.high (!%p6327_p4), %v4793_v13, %v4802_v16  ;;  %v3544_v50 = vcombine.low (!%p6327_p4), %v4790_v12, %v4799_v15  ;;  %v3546_v17 = vcombine.low (!%p6327_p4), %v4793_v13, %v4802_v16  ;;  %v6340_v29 = vld [vmem:[#allocation51_spill] sm:$0xff] (!%p6327_p4) }
 0x21d   : > { %1822 = vmatprep.subr.bf16.mxu1 (!%p6327_p4), %v3535_v1  ;;  %1770 = vmatpush1.bf16.msra.mxu0 (!%p6327_p4), %v3532_v61  ;;  %v3551_v6 = vcombine.high (!%p6327_p4), %v4808_v18, %v4817_v21  ;;  %v3553_v9 = vcombine.high (!%p6327_p4), %v6330_v7, %v4820_v22  ;;  %v3550_v10 = vcombine.low (!%p6327_p4), %v4808_v18, %v4817_v21  ;;  %v1247_v18 = vld [vmem:[#allocation12 + $0x8] sm:$0xff] (!%p6327_p4)  ;;  %v1249_v21 = vld [vmem:[#allocation12 + $0x18] sm:$0xff] (!%p6327_p4)  ;;  %v6341_v20 = vld [vmem:[#allocation59_spill] sm:$0xff] (!%p6327_p4) }
 0x21e   : > { %1823 = vmatpush1.bf16.msra.mxu1 (!%p6327_p4), %v3534_v63  ;;  %1771 = vmatprep.subr.bf16.mxu0 (!%p6327_p4), %v3539_v41  ;;  %v3552_v5 = vcombine.low (!%p6327_p4), %v6330_v7, %v4820_v22  ;;  %v3557_v12 = vcombine.high (!%p6327_p4), %v4826_v24, %v4835_v27  ;;  %v3559_v13 = vcombine.high (!%p6327_p4), %v4829_v25, %v4838_v28  ;;  %v6343_v1 = vld [vmem:[#allocation60_spill] sm:$0xff] (!%p6327_p4)  ;;  %v6344_v61 = vld [vmem:[#allocation57_spill] sm:$0xff] (!%p6327_p4) }
 0x21f   : > { %1824 = vmatprep.subr.bf16.mxu1 (!%p6327_p4), %v3541_v58  ;;  %v3556_v15 = vcombine.low (!%p6327_p4), %v4826_v24, %v4835_v27  ;;  %v3558_v16 = vcombine.low (!%p6327_p4), %v4829_v25, %v4838_v28  ;;  %v3563_v22 = vcombine.high (!%p6327_p4), %v4844_v30, %v4853_v33  ;;  %v3565_v32 = vcombine.high (!%p6327_p4), %v4847_v31, %v4856_v34 }
 0x220   : > { %v5305_v14 = vpack.c.bf16 (!%p6327_p4), %v1249_v21, %v1247_v18  ;;  %v3562_v24 = vcombine.low (!%p6327_p4), %v4844_v30, %v4853_v33  ;;  %v3564_v25 = vcombine.low (!%p6327_p4), %v4847_v31, %v4856_v34  ;;  %v3569_v27 = vcombine.high (!%p6327_p4), %v4862_v36, %v4871_v39  ;;  %v6353_v21 = vld [vmem:[#allocation77_spill] sm:$0xff] (!%p6327_p4) }
 0x221   : > { %1772 = vmatpush1.bf16.msra.mxu0 (!%p6327_p4), %v3538_v35  ;;  %v3571_v28 = vcombine.high (!%p6327_p4), %v4865_v37, %v4874_v40  ;;  %v3568_v30 = vcombine.low (!%p6327_p4), %v4862_v36, %v4871_v39  ;;  %v3570_v31 = vcombine.low (!%p6327_p4), %v4865_v37, %v4874_v40  ;;  %v3575_v33 = vcombine.high (!%p6327_p4), %v4880_v42, %v4889_v45  ;;  %v6345_v35 = vld [vmem:[#allocation65_spill] sm:$0xff] (!%p6327_p4) }
 0x222   : > { %1825 = vmatpush1.bf16.msra.mxu1 %v3540_v55  ;;  %1773 = vmatprep.subr.bf16.mxu0 %v3545_v0  ;;  %v3577_v34 = vcombine.high %v4883_v43, %v4892_v46  ;;  %v3574_v23 = vcombine.low %v4880_v42, %v4889_v45  ;;  %v3576_v44 = vcombine.low %v4883_v43, %v4892_v46  ;;  %v6331_v43 = vld [vmem:[#allocation42_spill] sm:$0xff]  ;;  %v6332_v45 = vld [vmem:[#allocation40_spill] sm:$0xff] }
 0x223   : > { %1826 = vmatprep.subr.bf16.mxu1 %v3547_v3  ;;  %1801 = vmatprep.mubr.bf16.mxu0 %v5305_v14  ;;  %v3581_v36 = vcombine.high %v4898_v48, %v4907_v51  ;;  %v3583_v37 = vcombine.high %v4901_v49, %v4910_v52  ;;  %v3580_v39 = vcombine.low %v4898_v48, %v4907_v51  ;;  %v6333_v48 = vld [vmem:[#allocation47_spill] sm:$0xff]  ;;  %v6346_v55 = vld [vmem:[#allocation62_spill] sm:$0xff] }
 0x224   : > { %1854 = vmatprep.mubr.bf16.mxu1 %v5305_v14  ;;  %v3582_v40 = vcombine.low %v4901_v49, %v4910_v52  ;;  %v3587_v42 = vcombine.high %v4916_v54, %v4925_v57  ;;  %v3589_v46 = vcombine.high %v6332_v45, %v6331_v43  ;;  %v3586_v62 = vcombine.low %v4916_v54, %v4925_v57  ;;  %v6334_v49 = vld [vmem:[#allocation44_spill] sm:$0xff]  ;;  %v6337_v54 = vld [vmem:[#allocation53_spill] sm:$0xff]  ;;  %v6338_v57 = vld [vmem:[#allocation50_spill] sm:$0xff] }
 0x225   : > { %1774 = vmatpush1.bf16.msra.mxu0 %v3544_v50  ;;  %v3588_v2 = vcombine.low %v6332_v45, %v6331_v43  ;;  %v3593_v51 = vcombine.high %v6334_v49, %v6333_v48  ;;  %v6335_v52 = vld [vmem:[#allocation48_spill] sm:$0xff]  ;;  %v3592_v53 = vcombine.low %v6334_v49, %v6333_v48  ;;  %v3599_v26 = vcombine.high %v6338_v57, %v6337_v54  ;;  %v6347_v3 = vld [vmem:[#allocation66_spill] sm:$0xff]  ;;  %v6348_v50 = vld [vmem:[#allocation63_spill] sm:$0xff] }
 0x226   : > { %1827 = vmatpush1.bf16.msra.mxu1 %v3546_v17  ;;  %1775 = vmatprep.subr.bf16.mxu0 %v3551_v6  ;;  %v3595_v4 = vcombine.high %v6336_v8, %v6335_v52  ;;  %v3594_v11 = vcombine.low %v6336_v8, %v6335_v52  ;;  %v3601_v38 = vcombine.high %v6340_v29, %v6339_v60  ;;  %v6360_v43 = vld [vmem:[#allocation23_spill] sm:$0xff]  ;;  %v1252_v48 = vld [vmem:[#allocation12 + $0x30] sm:$0xff]  ;;  %v6361_v49 = vld [vmem:[#allocation26_spill] sm:$0xff] }
 0x227   : > { %1828 = vmatprep.subr.bf16.mxu1 %v3553_v9  ;;  %v3598_v59 = vcombine.low %v6338_v57, %v6337_v54  ;;  %v3600_v47 = vcombine.low %v6340_v29, %v6339_v60  ;;  %v3605_v56 = vcombine.high %v6342_v19, %v6341_v20  ;;  %v3607_v63 = vcombine.high %v6344_v61, %v6343_v1  ;;  %v6349_v9 = vld [vmem:[#allocation71_spill] sm:$0xff]  ;;  %v6366_v60 = vld [vmem:[#allocation30_spill] sm:$0xff] }
 0x228   : > { %v3604_v41 = vcombine.low %v6342_v19, %v6341_v20  ;;  %v3606_v58 = vcombine.low %v6344_v61, %v6343_v1  ;;  %v3611_v0 = vcombine.high %v6346_v55, %v6345_v35  ;;  %v3613_v17 = vcombine.high %v6348_v50, %v6347_v3 }
 0x229   : > { %1776 = vmatpush1.bf16.msra.mxu0 %v3550_v10  ;;  %v3610_v6 = vcombine.low %v6346_v55, %v6345_v35  ;;  %v3612_v7 = vcombine.low %v6348_v50, %v6347_v3  ;;  %v6350_v10 = vld [vmem:[#allocation68_spill] sm:$0xff]  ;;  %v6373_v55 = vld [vmem:[#allocation39_spill] sm:$0xff] }
 0x22a   : > { %1829 = vmatpush1.bf16.msra.mxu1 %v3552_v5  ;;  %1777 = vmatprep.subr.bf16.mxu0 %v3557_v12  ;;  %v3617_v5 = vcombine.high %v6350_v10, %v6349_v9  ;;  %v6351_v12 = vld [vmem:[#allocation72_spill] sm:$0xff] }
 0x22b   : > { %1830 = vmatprep.subr.bf16.mxu1 %v3559_v13  ;;  %v6352_v13 = vld [vmem:[#allocation69_spill] sm:$0xff] }
 0x22c   : > { %v3618_v18 = vcombine.low %v6352_v13, %v6351_v12 }
 0x22d   : > { %1778 = vmatpush1.bf16.msra.mxu0 %v3556_v15  ;;  %v3619_v15 = vcombine.high %v6352_v13, %v6351_v12 }
 0x22e   : > { %1831 = vmatpush1.bf16.msra.mxu1 %v3558_v16  ;;  %1779 = vmatprep.subr.bf16.mxu0 %v3563_v22  ;;  %v3616_v16 = vcombine.low %v6350_v10, %v6349_v9  ;;  %v6354_v22 = vld [vmem:[#allocation74_spill] sm:$0xff]  ;;  %v6377_v10 = vld [vmem:[#allocation49_spill] sm:$0xff] }
 0x22f   : > { %1832 = vmatprep.subr.bf16.mxu1 %v3565_v32  ;;  %v3623_v32 = vcombine.high %v6354_v22, %v6353_v21 }
 0x231   : > { %1780 = vmatpush1.bf16.msra.mxu0 %v3562_v24  ;;  %v6355_v24 = vld [vmem:[#allocation78_spill] sm:$0xff] }
 0x232   : > { %1833 = vmatpush1.bf16.msra.mxu1 %v3564_v25  ;;  %1781 = vmatprep.subr.bf16.mxu0 %v3569_v27  ;;  %v6356_v25 = vld [vmem:[#allocation75_spill] sm:$0xff] }
 0x233   : > { %1834 = vmatprep.subr.bf16.mxu1 %v3571_v28  ;;  %v3625_v27 = vcombine.high %v6356_v25, %v6355_v24  ;;  %v3622_v28 = vcombine.low %v6354_v22, %v6353_v21  ;;  %v6381_v22 = vld [vmem:[#allocation61_spill] sm:$0xff] }
 0x235   : > { %1782 = vmatpush1.bf16.msra.mxu0 %v3568_v30  ;;  %v3624_v30 = vcombine.low %v6356_v25, %v6355_v24 }
 0x236   : > { %1835 = vmatpush1.bf16.msra.mxu1 %v3570_v31  ;;  %1783 = vmatprep.subr.bf16.mxu0 %v3575_v33  ;;  %v1246_v31 = vld [vmem:[#allocation12] sm:$0xff]  ;;  %v1248_v33 = vld [vmem:[#allocation12 + $0x10] sm:$0xff] }
 0x237   : > { %1836 = vmatprep.subr.bf16.mxu1 %v3577_v34  ;;  %v6357_v34 = vld [vmem:[#allocation22_spill] sm:$0xff] }
 0x239   : > { %1784 = vmatpush1.bf16.msra.mxu0 %v3574_v23  ;;  %v6358_v23 = vld [vmem:[#allocation20_spill] sm:$0xff] }
 0x23a   : > { %1837 = vmatpush1.bf16.msra.mxu1 %v3576_v44  ;;  %1785 = vmatprep.subr.bf16.mxu0 %v3581_v36  ;;  %v3537_v44 = vcombine.high %v6358_v23, %v6357_v34  ;;  %v5395_v36 = vpack.c.bf16 %v1248_v33, %v1246_v31  ;;  %v6385_v33 = vld [vmem:[#allocation73_spill] sm:$0xff] }
 0x23b   : > { %1838 = vmatprep.subr.bf16.mxu1 %v3583_v37  ;;  %v1251_v37 = vld [vmem:[#allocation12 + $0x28] sm:$0xff] }
 0x23d   : > { %1786 = vmatpush1.bf16.msra.mxu0 %v3580_v39  ;;  %v1253_v39 = vld [vmem:[#allocation12 + $0x38] sm:$0xff] }
 0x23e   : > { %1839 = vmatpush1.bf16.msra.mxu1 %v3582_v40  ;;  %1787 = vmatprep.subr.bf16.mxu0 %v3587_v42  ;;  %v3536_v40 = vcombine.low %v6358_v23, %v6357_v34  ;;  %v6359_v42 = vld [vmem:[#allocation24_spill] sm:$0xff]  ;;  %v6386_v34 = vld [vmem:[#allocation70_spill] sm:$0xff] }
 0x23f   : > { %1840 = vmatprep.subr.bf16.mxu1 %v3589_v46  ;;  %v3543_v45 = vcombine.high %v6360_v43, %v6359_v42  ;;  %v1257_v46 = vpack.c.bf16 %v1253_v39, %v1251_v37  ;;  %v3621_v23 = vcombine.high %v6386_v34, %v6385_v33  ;;  %v6387_v37 = vld [vmem:[#allocation79_spill] sm:$0xff]  ;;  %v6388_v39 = vld [vmem:[#allocation76_spill] sm:$0xff] }
 0x241   : > { %1788 = vmatpush1.bf16.msra.mxu0 %v3586_v62  ;;  %v3542_v62 = vcombine.low %v6360_v43, %v6359_v42  ;;  %v3626_v42 = vcombine.low %v6388_v39, %v6387_v37  ;;  %v1259_v43 = vlaneseq }
 0x242   : > { %1841 = vmatpush1.bf16.msra.mxu1 %v3588_v2  ;;  %1789 = vmatprep.subr.bf16.mxu0 %v3593_v51  ;;  %v1250_v2 = vld [vmem:[#allocation12 + $0x20] sm:$0xff]  ;;  %v6362_v51 = vld [vmem:[#allocation25_spill] sm:$0xff] }
 0x243   : > { %1842 = vmatprep.subr.bf16.mxu1 %v3595_v4  ;;  %v3549_v52 = vcombine.high %v6362_v51, %v6361_v49  ;;  %v5407_v8 = vpack.c.bf16 %v1252_v48, %v1250_v2  ;;  %v3548_v4 = vcombine.low %v6362_v51, %v6361_v49  ;;  %v6389_v48 = vld [vmem:[#allocation80_spill] sm:$0xff] }
 0x245   : > { %1790 = vmatpush1.bf16.msra.mxu0 %v3592_v53  ;;  %v6363_v53 = vld [vmem:[#allocation29_spill] sm:$0xff] }
 0x246   : > { %1843 = vmatpush1.bf16.msra.mxu1 %v3594_v11  ;;  %1791 = vmatprep.subr.bf16.mxu0 %v3599_v26  ;;  %v6364_v11 = vld [vmem:[#allocation28_spill] sm:$0xff]  ;;  %v6365_v26 = vld [vmem:[#allocation31_spill] sm:$0xff] }
 0x247   : > { %1844 = vmatprep.subr.bf16.mxu1 %v3601_v38  ;;  %v3555_v54 = vcombine.high %v6364_v11, %v6363_v53  ;;  %v3554_v57 = vcombine.low %v6364_v11, %v6363_v53  ;;  %v3561_v29 = vcombine.high %v6366_v60, %v6365_v26  ;;  %v3560_v38 = vcombine.low %v6366_v60, %v6365_v26 }
 0x249   : > { %1792 = vmatpush1.bf16.msra.mxu0 %v3598_v59  ;;  %v6367_v59 = vld [vmem:[#allocation33_spill] sm:$0xff] }
 0x24a   : > { %1845 = vmatpush1.bf16.msra.mxu1 %v3600_v47  ;;  %1793 = vmatprep.subr.bf16.mxu0 %v3605_v56  ;;  %v6368_v47 = vld [vmem:[#allocation32_spill] sm:$0xff]  ;;  %v6369_v56 = vld [vmem:[#allocation35_spill] sm:$0xff] }
 0x24b   : > { %1846 = vmatprep.subr.bf16.mxu1 %v3607_v63  ;;  %v3567_v20 = vcombine.high %v6368_v47, %v6367_v59  ;;  %v3566_v19 = vcombine.low %v6368_v47, %v6367_v59  ;;  %v6371_v63 = vld [vmem:[#allocation37_spill] sm:$0xff] }
 0x24d   : > { %1794 = vmatpush1.bf16.msra.mxu0 %v3604_v41  ;;  %v6372_v41 = vld [vmem:[#allocation36_spill] sm:$0xff] }
 0x24e   : > { %1847 = vmatpush1.bf16.msra.mxu1 %v3606_v58  ;;  %1795 = vmatprep.subr.bf16.mxu0 %v3611_v0  ;;  %v3579_v58 = vcombine.high %v6372_v41, %v6371_v63  ;;  %v3578_v35 = vcombine.low %v6372_v41, %v6371_v63  ;;  %v6374_v0 = vld [vmem:[#allocation38_spill] sm:$0xff] }
 0x24f   : > { %1848 = vmatprep.subr.bf16.mxu1 %v3613_v17  ;;  %v3585_v3 = vcombine.high %v6374_v0, %v6373_v55  ;;  %v3584_v50 = vcombine.low %v6374_v0, %v6373_v55  ;;  %v6375_v17 = vld [vmem:[#allocation43_spill] sm:$0xff] }
 0x251   : > { %1796 = vmatpush1.bf16.msra.mxu0 %v3610_v6  ;;  %v6376_v6 = vld [vmem:[#allocation41_spill] sm:$0xff] }
 0x252   : > { %1849 = vmatpush1.bf16.msra.mxu1 %v3612_v7  ;;  %1797 = vmatprep.subr.bf16.mxu0 %v3617_v5  ;;  %v3591_v7 = vcombine.high %v6376_v6, %v6375_v17  ;;  %v3590_v9 = vcombine.low %v6376_v6, %v6375_v17  ;;  %v6378_v5 = vld [vmem:[#allocation46_spill] sm:$0xff] }
 0x253   : > { %1850 = vmatprep.subr.bf16.mxu1 %v3619_v15  ;;  %v3597_v12 = vcombine.high %v6378_v5, %v6377_v10  ;;  %v3596_v13 = vcombine.low %v6378_v5, %v6377_v10  ;;  %v6379_v15 = vld [vmem:[#allocation55_spill] sm:$0xff] }
 0x255   : > { %1798 = vmatpush1.bf16.msra.mxu0 %v3616_v16  ;;  %v6380_v16 = vld [vmem:[#allocation52_spill] sm:$0xff] }
 0x256   : > { %1851 = vmatpush1.bf16.msra.mxu1 %v3618_v18  ;;  %1799 = vmatprep.subr.bf16.mxu0 %v3623_v32  ;;  %v3603_v18 = vcombine.high %v6380_v16, %v6379_v15  ;;  %v3602_v21 = vcombine.low %v6380_v16, %v6379_v15  ;;  %v6382_v32 = vld [vmem:[#allocation58_spill] sm:$0xff] }
 0x257   : > { %1852 = vmatprep.subr.bf16.mxu1 %v3625_v27  ;;  %v3609_v24 = vcombine.high %v6382_v32, %v6381_v22  ;;  %v3608_v25 = vcombine.low %v6382_v32, %v6381_v22  ;;  %v6383_v27 = vld [vmem:[#allocation67_spill] sm:$0xff] }
 0x259   : > { %1800 = vmatpush1.bf16.msra.mxu0 %v3622_v28  ;;  %v6384_v28 = vld [vmem:[#allocation64_spill] sm:$0xff] }
 0x25a   : > { %1853 = vmatpush1.bf16.msra.mxu1 %v3624_v30  ;;  %1875 = vmatprep.subr.bf16.mxu0 %v3537_v44  ;;  %v3615_v30 = vcombine.high %v6384_v28, %v6383_v27  ;;  %v3614_v31 = vcombine.low %v6384_v28, %v6383_v27 }
 0x25b   : > { %4041 = vmatprep.subr.bf16.mxu1 %v3537_v44  ;;  %v3620_v44 = vcombine.low %v6386_v34, %v6385_v33 }
 0x25c   : > { %1802 = vmatmul.mubr.bf16.vlgmr.msra.gmra.mrb[0].mxu0 %v5395_v36 }
 0x25d   : > { %1855 = vmatmul.mubr.bf16.vlgmr.msra.gmra.mrb[0].mxu1 %v5395_v36  ;;  %1876 = vmatpush1.bf16.msra.mxu0 %v3536_v40 }
 0x25e   : > { %4057 = vmatpush1.bf16.msra.mxu1 %v3536_v40  ;;  %1877 = vmatprep.subr.bf16.mxu0 %v3543_v45  ;;  %v3627_v40 = vcombine.high %v6388_v39, %v6387_v37 }
 0x25f   : > { %4042 = vmatprep.subr.bf16.mxu1 %v3543_v45  ;;  %1811 = vmatprep.mubr.bf16.mxu0 %v1257_v46  ;;  %v1260_v45 = vshrl.u32 %v1259_v43, 7 }
 0x260   : > { %1864 = vmatprep.mubr.bf16.mxu1 %v1257_v46 }
 0x261   : > { %1878 = vmatpush1.bf16.msra.mxu0 %v3542_v62  ;;  %v1265_v2 = vsub.s32 1, %v1260_v45  ;;  %v1273_v16 = vsub.s32 3, %v1260_v45 }
 0x262   : > { %4058 = vmatpush1.bf16.msra.mxu1 %v3542_v62  ;;  %1879 = vmatprep.subr.bf16.mxu0 %v3549_v52  ;;  %v1269_v62 = vsub.s32 2, %v1260_v45 }
 0x263   : > { %4043 = vmatprep.subr.bf16.mxu1 %v3549_v52  ;;  %v1266_v52 = vrot.slane %v6389_v48, %v1265_v2  ;;  %v1274_v22 = vrot.slane %v6389_v48, %v1273_v16 }
 0x264   : > { %1812 = vmatmul.mubr.bf16.gmra.mrb[4].mxu0 %v5407_v8  ;;  %v1270_v51 = vrot.slane %v6389_v48, %v1269_v62 }
 0x265   : > { %1865 = vmatmul.mubr.bf16.gmra.mrb[4].mxu1 %v5407_v8  ;;  %1880 = vmatpush1.bf16.msra.mxu0 %v3548_v4 }
 0x266   : > { %4059 = vmatpush1.bf16.msra.mxu1 %v3548_v4  ;;  %1881 = vmatprep.subr.bf16.mxu0 %v3555_v54 }
 0x267   : > { %4044 = vmatprep.subr.bf16.mxu1 %v3555_v54  ;;  %1907 = vmatprep.mubr.bf16.mxu0 %v5305_v14  ;;  %v6370_v14 = vld [vmem:[#allocation34_spill] sm:$0xff] }
 0x268   : > { %1917 = vmatprep.mubr.bf16.mxu1 %v1257_v46  ;;  %v3573_v1 = vcombine.high %v6370_v14, %v6369_v56  ;;  %v3572_v61 = vcombine.low %v6370_v14, %v6369_v56  ;;  %v1261_v46 = vsub.s32 0, %v1260_v45 }
 0x269   : > { %1882 = vmatpush1.bf16.msra.mxu0 %v3554_v57 }
 0x26a   : > { %4060 = vmatpush1.bf16.msra.mxu1 %v3554_v57  ;;  %1883 = vmatprep.subr.bf16.mxu0 %v3561_v29  ;;  %v1262_v49 = vrot.slane %v6389_v48, %v1261_v46 }
 0x26b   : > { %4045 = vmatprep.subr.bf16.mxu1 %v3561_v29 }
 0x26d   : > { %1884 = vmatpush1.bf16.msra.mxu0 %v3560_v38 }
 0x26e   : > { %4061 = vmatpush1.bf16.msra.mxu1 %v3560_v38  ;;  %1885 = vmatprep.subr.bf16.mxu0 %v3567_v20 }
 0x26f   : > { %4046 = vmatprep.subr.bf16.mxu1 %v3567_v20 }
 0x271   : > { %1886 = vmatpush1.bf16.msra.mxu0 %v3566_v19 }
 0x272   : > { %4062 = vmatpush1.bf16.msra.mxu1 %v3566_v19  ;;  %1887 = vmatprep.subr.bf16.mxu0 %v3573_v1 }
 0x273   : > { %4047 = vmatprep.subr.bf16.mxu1 %v3573_v1 }
 0x275   : > { %1888 = vmatpush1.bf16.msra.mxu0 %v3572_v61 }
 0x276   : > { %4063 = vmatpush1.bf16.msra.mxu1 %v3572_v61  ;;  %1889 = vmatprep.subr.bf16.mxu0 %v3579_v58 }
 0x277   : > { %4048 = vmatprep.subr.bf16.mxu1 %v3579_v58 }
 0x279   : > { %1890 = vmatpush1.bf16.msra.mxu0 %v3578_v35 }
 0x27a   : > { %4064 = vmatpush1.bf16.msra.mxu1 %v3578_v35  ;;  %1891 = vmatprep.subr.bf16.mxu0 %v3585_v3 }
 0x27b   : > { %4049 = vmatprep.subr.bf16.mxu1 %v3585_v3 }
 0x27d   : > { %1892 = vmatpush1.bf16.msra.mxu0 %v3584_v50 }
 0x27e   : > { %4065 = vmatpush1.bf16.msra.mxu1 %v3584_v50  ;;  %1893 = vmatprep.subr.bf16.mxu0 %v3591_v7 }
 0x27f   : > { %4050 = vmatprep.subr.bf16.mxu1 %v3591_v7 }
 0x281   : > { %1894 = vmatpush1.bf16.msra.mxu0 %v3590_v9 }
 0x282   : > { %4066 = vmatpush1.bf16.msra.mxu1 %v3590_v9  ;;  %1895 = vmatprep.subr.bf16.mxu0 %v3597_v12 }
 0x283   : > { %4051 = vmatprep.subr.bf16.mxu1 %v3597_v12 }
 0x285   : > { %1896 = vmatpush1.bf16.msra.mxu0 %v3596_v13 }
 0x286   : > { %4067 = vmatpush1.bf16.msra.mxu1 %v3596_v13  ;;  %1897 = vmatprep.subr.bf16.mxu0 %v3603_v18 }
 0x287   : > { %4052 = vmatprep.subr.bf16.mxu1 %v3603_v18  ;;  %v1277_v18 = vsub.s32 4, %v1260_v45 }
 0x289   : > { %1898 = vmatpush1.bf16.msra.mxu0 %v3602_v21  ;;  %v1278_v32 = vrot.slane %v6389_v48, %v1277_v18 }
 0x28a   : > { %4068 = vmatpush1.bf16.msra.mxu1 %v3602_v21  ;;  %1899 = vmatprep.subr.bf16.mxu0 %v3609_v24  ;;  %v1281_v21 = vsub.s32 5, %v1260_v45 }
 0x28b   : > { %4053 = vmatprep.subr.bf16.mxu1 %v3609_v24 }
 0x28c   : > { %v1282_v24 = vrot.slane %v6389_v48, %v1281_v21 }
 0x28d   : > { %1900 = vmatpush1.bf16.msra.mxu0 %v3608_v25 }
 0x28e   : > { %4069 = vmatpush1.bf16.msra.mxu1 %v3608_v25  ;;  %1901 = vmatprep.subr.bf16.mxu0 %v3615_v30 }
 0x28f   : > { %4054 = vmatprep.subr.bf16.mxu1 %v3615_v30 }
 0x291   : > { %1902 = vmatpush1.bf16.msra.mxu0 %v3614_v31 }
 0x292   : > { %4070 = vmatpush1.bf16.msra.mxu1 %v3614_v31  ;;  %1903 = vmatprep.subr.bf16.mxu0 %v3621_v23 }
 0x293   : > { %4055 = vmatprep.subr.bf16.mxu1 %v3621_v23 }
 0x295   : > { %1904 = vmatpush1.bf16.msra.mxu0 %v3620_v44 }
 0x296   : > { %4071 = vmatpush1.bf16.msra.mxu1 %v3620_v44  ;;  %1905 = vmatprep.subr.bf16.mxu0 %v3627_v40 }
 0x297   : > { %4056 = vmatprep.subr.bf16.mxu1 %v3627_v40 }
 0x299   : > { %1906 = vmatpush1.bf16.msra.mxu0 %v3626_v42 }
 0x29a   : > { %4072 = vmatpush1.bf16.msra.mxu1 %v3626_v42 }
 0x29c   : > { %1908 = vmatmul.mubr.bf16.vlgmr.msra.gmra.mrb[8].mxu0 %v5395_v36 }
 0x29d   : > { %1918 = vmatmul.mubr.bf16.vlgmr.msra.gmra.mrb[8].mxu1 %v5407_v8 }
 0x32f   : > { %v1803_v4 = vpop.f32.mrb[0].mxu0 }
 0x330   : > { %v1856_v53 = vpop.f32.mrb[0].mxu1  ;;  %v1804_v11 = vadd.f32 %v1803_v4, %v1262_v49  ;;  %v1805_v57 = vpop.f32.mrb[1].mxu0 }
 0x331   : > { %v1857_v54 = vadd.f32 %v1856_v53, %v1270_v51  ;;  %v1858_v26 = vpop.f32.mrb[1].mxu1  ;;  %v1806_v36 = vadd.f32 %v1805_v57, %v1266_v52  ;;  %v1807_v60 = vpop.f32.mrb[2].mxu0 }
 0x332   : > { %v1860_v8 = vpop.f32.mrb[2].mxu1  ;;  %v1808_v38 = vadd.f32 %v1807_v60, %v1262_v49  ;;  %v1809_v47 = vpop.f32.mrb[3].mxu0  ;;  %v1859_v28 = vadd.f32 %v1858_v26, %v1274_v22 }
 0x333   : > { %v3762_v29 = vpack.c.bf16 %v1857_v54, %v1857_v54  ;;  %v1861_v59 = vadd.f32 %v1860_v8, %v1270_v51  ;;  %v1862_v20 = vpop.f32.mrb[3].mxu1  ;;  %v3761_v19 = vpack.c.bf16 %v1806_v36, %v1804_v11  ;;  %v1810_v56 = vadd.f32 %v1809_v47, %v1266_v52 }
 0x334   : > { %v1863_v44 = vadd.f32 %v1862_v20, %v1274_v22 }
 0x335   : > { %1981 = vst [vmem:[#allocation2 + $0x8] sm:$0xf] %v3762_v29  ;;  %v3764_v14 = vpack.c.bf16 %v1861_v59, %v1861_v59  ;;  %1980 = vst [vmem:[#allocation2] sm:$0xff] %v3761_v19  ;;  %v3763_v1 = vpack.c.bf16 %v1810_v56, %v1808_v38 }
 0x337   : > { %1983 = vst [vmem:[#allocation2 + $0x14] sm:$0xf] %v3764_v14  ;;  %1982 = vst [vmem:[#allocation2 + $0xc] sm:$0xff] %v3763_v1  ;;  %v1813_v61 = vpop.f32.mrb[4].mxu0 }
 0x338   : > { %v1866_v63 = vpop.f32.mrb[4].mxu1  ;;  %v1814_v41 = vadd.f32 %v1813_v61, %v1262_v49  ;;  %v1815_v35 = vpop.f32.mrb[5].mxu0 }
 0x339   : > { %v1867_v58 = vadd.f32 %v1866_v63, %v1270_v51  ;;  %v1868_v55 = vpop.f32.mrb[5].mxu1  ;;  %v1816_v0 = vadd.f32 %v1815_v35, %v1266_v52  ;;  %v1817_v3 = vpop.f32.mrb[6].mxu0 }
 0x33a   : > { %v1870_v50 = vpop.f32.mrb[6].mxu1  ;;  %v1818_v6 = vadd.f32 %v1817_v3, %v1262_v49  ;;  %v1819_v9 = vpop.f32.mrb[7].mxu0  ;;  %v1869_v30 = vadd.f32 %v1868_v55, %v1274_v22 }
 0x33b   : > { %v3766_v17 = vpack.c.bf16 %v1867_v58, %v1867_v58  ;;  %v1871_v7 = vadd.f32 %v1870_v50, %v1270_v51  ;;  %v1872_v10 = vpop.f32.mrb[7].mxu1  ;;  %v3765_v5 = vpack.c.bf16 %v1816_v0, %v1814_v41  ;;  %v1820_v12 = vadd.f32 %v1819_v9, %v1266_v52 }
 0x33c   : > { %v1873_v37 = vadd.f32 %v1872_v10, %v1274_v22 }
 0x33d   : > { %1985 = vst [vmem:[#allocation2 + $0x20] sm:$0xf] %v3766_v17  ;;  %v3768_v13 = vpack.c.bf16 %v1871_v7, %v1871_v7  ;;  %1984 = vst [vmem:[#allocation2 + $0x18] sm:$0xff] %v3765_v5  ;;  %v3767_v15 = vpack.c.bf16 %v1820_v12, %v1818_v6 }
 0x33f   : > { %1987 = vst [vmem:[#allocation2 + $0x2c] sm:$0xf] %v3768_v13  ;;  %1986 = vst [vmem:[#allocation2 + $0x24] sm:$0xff] %v3767_v15 }
 0x36f   : > { %v1909_v25 = vpop.f32.mrb[8].mxu0 }
 0x370   : > { %v1919_v27 = vpop.f32.mrb[8].mxu1  ;;  %v1910_v31 = vadd.f32 %v1909_v25, %v1278_v32  ;;  %v1911_v34 = vpop.f32.mrb[9].mxu0 }
 0x371   : > { %v1920_v33 = vadd.f32 %v1919_v27, %v1278_v32  ;;  %v1921_v23 = vpop.f32.mrb[9].mxu1  ;;  %v1912_v39 = vadd.f32 %v1911_v34, %v1282_v24  ;;  %v1913_v42 = vpop.f32.mrb[10].mxu0 }
 0x372   : > { %v1922_v40 = vadd.f32 %v1921_v23, %v1282_v24  ;;  %v1923_v43 = vpop.f32.mrb[10].mxu1  ;;  %v3769_v45 = vpack.c.bf16 %v1910_v31, %v1859_v28  ;;  %v1914_v62 = vadd.f32 %v1913_v42, %v1278_v32  ;;  %v1915_v49 = vpop.f32.mrb[11].mxu0 }
 0x373   : > { %v3773_v46 = vpack.c.bf16 %v1920_v33, %v1869_v30  ;;  %v1924_v2 = vadd.f32 %v1923_v43, %v1278_v32  ;;  %v1925_v48 = vpop.f32.mrb[11].mxu1  ;;  %v3770_v51 = vpack.c.bf16 %v1912_v39, %v1912_v39  ;;  %v1916_v4 = vadd.f32 %v1915_v49, %v1282_v24 }
 0x374   : > { %v3774_v52 = vpack.c.bf16 %v1922_v40, %v1922_v40  ;;  %v1926_v53 = vadd.f32 %v1925_v48, %v1282_v24  ;;  %2040 = vst [vmem:[#allocation3] sm:$0xff] %v3769_v45  ;;  %v3771_v11 = vpack.c.bf16 %v1914_v62, %v1863_v44 }
 0x375   : > { %2044 = vst [vmem:[#allocation3 + $0x18] sm:$0xff] %v3773_v46  ;;  %v3775_v54 = vpack.c.bf16 %v1924_v2, %v1873_v37  ;;  %2041 = vst [vmem:[#allocation3 + $0x8] sm:$0xf] %v3770_v51  ;;  %v3772_v57 = vpack.c.bf16 %v1916_v4, %v1916_v4 }
 0x376   : > { %2045 = vst [vmem:[#allocation3 + $0x20] sm:$0xf] %v3774_v52  ;;  %v3776_v26 = vpack.c.bf16 %v1926_v53, %v1926_v53  ;;  %2042 = vst [vmem:[#allocation3 + $0xc] sm:$0xff] %v3771_v11 }
 0x377   : > { %2046 = vst [vmem:[#allocation3 + $0x24] sm:$0xff] %v3775_v54  ;;  %2043 = vst [vmem:[#allocation3 + $0x14] sm:$0xf] %v3772_v57 }
 0x378   : > { %2047 = vst [vmem:[#allocation3 + $0x2c] sm:$0xf] %v3776_v26 }
 0x379 PF: > { %v5475_v36 = vld [vmem:[%s4738_s28 + $0x4] ss:$12 sps:$4 sm:$0xff]   ;;  %v5478_v60 = vld [vmem:[%s4738_s28] ss:$12 sps:$4 sm:$0xff]   ;;  %v6173_v8 = vmov 0.0   ;;  %v6171_v29 = vmov 0   ;;  %v2128_v45 = vlaneseq }
 0x37a   : > { %3849 = vmatprep.subr.bf16.mxu1 %v6173_v8  ;;  %2303 = vmatprep.mubr.bf16.mxu0 %v6171_v29  ;;  %v5484_v38 = vld [vmem:[%s4738_s28 + $0x1c] ss:$12 sps:$4 sm:$0xff]   ;;  %vm4509_vm0 = vmmov 0   ;;  %v5490_v59 = vld [vmem:[%s4738_s28 + $0x18] ss:$12 sps:$4 sm:$0xff]   ;;  %s4510_s11 = smov [#allocation12]  }
 0x37b   : > { %2271 = vmatprep.subr.bf16.mxu0 %v5475_v36  ;;  %3865 = vmatprep.mubr.msk.bf16.mxu1 %vm4509_vm0, %v6173_v8  ;;  %v5494_v47 = vld [vmem:[%s4738_s28 + $0x34] ss:$12 sps:$4 sm:$0xff]   ;;  %v5498_v20 = vld [vmem:[%s4738_s28 + $0x30] ss:$12 sps:$4 sm:$0xff]   ;;  %v5502_v19 = vld [vmem:[%s4738_s28 + $0x4c] ss:$12 sps:$4 sm:$0xff]  }
 0x37c   : > { %2272 = vmatpush1.bf16.msra.mxu0 %v5478_v60  ;;  %v5505_v56 = vld [vmem:[%s4738_s28 + $0x8] ss:$12 sps:$4 sm:$0xff]   ;;  %v5512_v1 = vld [vmem:[%s4738_s28 + $0x64] ss:$12 sps:$4 sm:$0xff]   ;;  %v5517_v61 = vld [vmem:[%s4738_s28 + $0x20] ss:$12 sps:$4 sm:$0xff]  }
 0x37d   : > { %2273 = vmatprep.subr.bf16.mxu0 %v5484_v38  ;;  %v5509_v14 = vld [vmem:[%s4738_s28 + $0x48] ss:$12 sps:$4 sm:$0xff]   ;;  %6390 = vst [vmem:[#allocation21_spill] sm:$0xff] %v5512_v1  ;;  %3850 = vmatpush3.bf16.msra.mxu1 %v5505_v56  ;;  %v5521_v63 = vld [vmem:[%s4738_s28 + $0x60] ss:$12 sps:$4 sm:$0xff]   ;;  %v5729_v46 = vshrl.u32 %v2128_v45, 7 }
 0x37e   : > { %3851 = vmatprep.subr.bf16.mxu1 %v6173_v8  ;;  %6391 = vst [vmem:[#allocation19_spill] sm:$0xff] %v5521_v63  ;;  %v5525_v41 = vld [vmem:[%s4738_s28 + $0x7c] ss:$12 sps:$4 sm:$0xff]   ;;  %v5530_v58 = vld [vmem:[%s4738_s28 + $0x38] ss:$12 sps:$4 sm:$0xff]   ;;  %s3289_s24 = sshll.u32 %s4510_s11, 4  ;;  %s3290_s24 = int_to_ptr.vmem [resolvable:$true] %s3289_s24 }
 0x37f   : > { %6392 = vst [vmem:[#allocation27_spill] sm:$0xff] %v5525_v41  ;;  %v5535_v35 = vld [vmem:[%s4738_s28 + $0x78] ss:$12 sps:$4 sm:$0xff]   ;;  %v5539_v55 = vld [vmem:[%s4738_s28 + $0x94] ss:$12 sps:$4 sm:$0xff]   ;;  %v2130_v62 = vsub.s32 0, %v5729_v46  ;;  %p4430_p6 = scmp.lt.s32.totalorder %s3290_s24, %s3290_s24 }
 0x380   : > { %2274 = vmatpush1.bf16.msra.mxu0 %v5490_v59  ;;  %6393 = vst [vmem:[#allocation42_spill] sm:$0xff] %v5535_v35  ;;  %6394 = vst [vmem:[#allocation40_spill] sm:$0xff] %v5539_v55  ;;  %v5543_v0 = vld [vmem:[%s4738_s28 + $0x50] ss:$12 sps:$4 sm:$0xff]   ;;  %v5551_v50 = vld [vmem:[%s4738_s28 + $0xac] ss:$12 sps:$4 sm:$0xff]  }
 0x381   : > { %2275 = vmatprep.subr.bf16.mxu0 %v5494_v47  ;;  %3852 = vmatpush3.bf16.msra.mxu1 %v5517_v61  ;;  %6395 = vst [vmem:[#allocation47_spill] sm:$0xff] %v5543_v0  ;;  %v5547_v3 = vld [vmem:[%s4738_s28 + $0x90] ss:$12 sps:$4 sm:$0xff]   ;;  %6397 = vst [vmem:[#allocation48_spill] sm:$0xff] %v5551_v50  ;;  %v5556_v17 = vld [vmem:[%s4738_s28 + $0x68] ss:$12 sps:$4 sm:$0xff]  }
 0x382   : > { %3853 = vmatprep.subr.bf16.mxu1 %v6173_v8  ;;  %6396 = vst [vmem:[#allocation44_spill] sm:$0xff] %v5547_v3  ;;  %6398 = vst [vmem:[#allocation45_spill] sm:$0xff] %v5556_v17  ;;  %v5561_v6 = vld [vmem:[%s4738_s28 + $0xa8] ss:$12 sps:$4 sm:$0xff]   ;;  %v5564_v7 = vld [vmem:[%s4738_s28 + $0xc4] ss:$12 sps:$4 sm:$0xff]  }
 0x383   : > { %6399 = vst [vmem:[#allocation53_spill] sm:$0xff] %v5561_v6  ;;  %6400 = vst [vmem:[#allocation50_spill] sm:$0xff] %v5564_v7  ;;  %v5569_v9 = vld [vmem:[%s4738_s28 + $0x80] ss:$12 sps:$4 sm:$0xff]   ;;  %v5577_v5 = vld [vmem:[%s4738_s28 + $0xdc] ss:$12 sps:$4 sm:$0xff]  }
 0x384   : > { %2276 = vmatpush1.bf16.msra.mxu0 %v5498_v20  ;;  %6401 = vst [vmem:[#allocation54_spill] sm:$0xff] %v5569_v9  ;;  %v5573_v10 = vld [vmem:[%s4738_s28 + $0xc0] ss:$12 sps:$4 sm:$0xff]   ;;  %v5582_v12 = vld [vmem:[%s4738_s28 + $0x98] ss:$12 sps:$4 sm:$0xff]   ;;  %v2134_v49 = vsub.s32 1, %v5729_v46 }
 0x385   : > { %2277 = vmatprep.subr.bf16.mxu0 %v5502_v19  ;;  %3854 = vmatpush3.bf16.msra.mxu1 %v5530_v58  ;;  %6402 = vst [vmem:[#allocation51_spill] sm:$0xff] %v5582_v12  ;;  %v5587_v13 = vld [vmem:[%s4738_s28 + $0xd8] ss:$12 sps:$4 sm:$0xff]   ;;  %v5591_v15 = vld [vmem:[%s4738_s28 + $0xf4] ss:$12 sps:$4 sm:$0xff]   ;;  %p4114_p5 = scmp.eq.s32.totalorder %s4624_s9, 1 }
 0x386   : > { %3855 = vmatprep.subr.bf16.mxu1 %v6173_v8  ;;  %v5597_v16 = vld [vmem:[%s4738_s28 + $0xb0] ss:$12 sps:$4 sm:$0xff]   ;;  %v5606_v21 = vld [vmem:[%s4738_s28 + $0x10c] ss:$12 sps:$4 sm:$0xff]   ;;  %v5610_v22 = vld [vmem:[%s4738_s28 + $0xc8] ss:$12 sps:$4 sm:$0xff]  }
 0x387   : > { %6403 = vst [vmem:[#allocation59_spill] sm:$0xff] %v5597_v16  ;;  %v5602_v18 = vld [vmem:[%s4738_s28 + $0xf0] ss:$12 sps:$4 sm:$0xff]   ;;  %v5615_v32 = vld [vmem:[%s4738_s28 + $0x108] ss:$12 sps:$4 sm:$0xff]   ;;  %v2116_v48 = vld [vmem:[#allocation2] sm:$0xff] }
 0x388   : > { %2278 = vmatpush1.bf16.msra.mxu0 %v5509_v14  ;;  %v5620_v24 = vld [vmem:[%s4738_s28 + $0x124] ss:$12 sps:$4 sm:$0xff]   ;;  %v5624_v25 = vld [vmem:[%s4738_s28 + $0xe0] ss:$12 sps:$4 sm:$0xff]   ;;  %v5635_v28 = vld [vmem:[%s4738_s28 + $0x13c] ss:$12 sps:$4 sm:$0xff]   ;;  %v2118_v4 = vunpack.c.l.bf16 %v2116_v48  ;;  %v2119_v57 = vunpack.c.h.bf16 %v2116_v48 }
 0x389   : > { %2279 = vmatprep.subr.bf16.mxu0 %v5512_v1  ;;  %3856 = vmatpush3.bf16.msra.mxu1 %v5543_v0  ;;  %v5631_v27 = vld [vmem:[%s4738_s28 + $0x120] ss:$12 sps:$4 sm:$0xff]   ;;  %v5639_v30 = vld [vmem:[%s4738_s28 + $0xf8] ss:$12 sps:$4 sm:$0xff]   ;;  %v5652_v34 = vld [vmem:[%s4738_s28 + $0x110] ss:$12 sps:$4 sm:$0xff]  }
 0x38a   : > { %3857 = vmatprep.subr.bf16.mxu1 %v6173_v8  ;;  %v5644_v31 = vld [vmem:[%s4738_s28 + $0x138] ss:$12 sps:$4 sm:$0xff]   ;;  %v5648_v33 = vld [vmem:[%s4738_s28 + $0x154] ss:$12 sps:$4 sm:$0xff]   ;;  %v5657_v23 = vld [vmem:[%s4738_s28 + $0x150] ss:$12 sps:$4 sm:$0xff]  }
 0x38b   : > { %v5661_v44 = vld [vmem:[%s4738_s28 + $0x16c] ss:$12 sps:$4 sm:$0xff]   ;;  %v5665_v37 = vld [vmem:[%s4738_s28 + $0x128] ss:$12 sps:$4 sm:$0xff]   ;;  %v5690_v43 = vld [vmem:[%s4738_s28 + $0x170] ss:$12 sps:$4 sm:$0xff]  }
 0x38c   : > { %2280 = vmatpush1.bf16.msra.mxu0 %v5521_v63  ;;  %v5670_v39 = vld [vmem:[%s4738_s28 + $0x168] ss:$12 sps:$4 sm:$0xff]   ;;  %v5675_v40 = vld [vmem:[%s4738_s28 + $0x140] ss:$12 sps:$4 sm:$0xff]   ;;  %v5681_v42 = vld [vmem:[%s4738_s28 + $0x158] ss:$12 sps:$4 sm:$0xff]  }
 0x38d   : > { %2281 = vmatprep.subr.bf16.mxu0 %v5525_v41  ;;  %3858 = vmatpush3.bf16.msra.mxu1 %v5556_v17  ;;  %v2113_v2 = vld [vmem:[%s4751_s21] sm:$0x7]  ;;  %s4423_s30 = scalar_lea.vmem %s3290_s24, 1024 }
 0x38e   : > { %3859 = vmatprep.subr.bf16.mxu1 %v6173_v8  ;;  %v5734_v51 = vrot.slane %v2113_v2, %v2130_v62  ;;  %v5736_v52 = vrot.slane %v2113_v2, %v2134_v49  ;;  %p4424_p9 = scmp.ne.s32.totalorder %s3290_s24, %s4423_s30  ;;  %p4431_p10 = scmp.lt.s32.totalorder %s4423_s30, %s4423_s30 }
 0x390   : > { %2282 = vmatpush1.bf16.msra.mxu0 %v5535_v35  ;;  %6404 = vst [vmem:[#allocation56_spill] sm:$0xff] %v5734_v51  ;;  %6405 = vst [vmem:[#allocation60_spill] sm:$0xff] %v5736_v52  ;;  %p4425_p2 = pnand %p4424_p9, %p4114_p5  ;;  %p4432_p11 = por %p4431_p10, %p4430_p6 }
 0x391   : > { %2283 = vmatprep.subr.bf16.mxu0 %v5539_v55  ;;  %3860 = vmatpush3.bf16.msra.mxu1 %v5569_v9 }
 0x392   : > { %3861 = vmatprep.subr.bf16.mxu1 %v6173_v8  ;;  %p4426_p3 = pneg %p4425_p2 }
 0x394   : > { %2284 = vmatpush1.bf16.msra.mxu0 %v5547_v3  ;;  %p4433_p8 = pnand %p4432_p11, %p4426_p3 }
 0x395   : > { %2285 = vmatprep.subr.bf16.mxu0 %v5551_v50  ;;  %3862 = vmatpush3.bf16.msra.mxu1 %v5582_v12 }
 0x396   : > { %3863 = vmatprep.subr.bf16.mxu1 %v6173_v8 }
 0x398   : > { %2286 = vmatpush1.bf16.msra.mxu0 %v5561_v6 }
 0x399   : > { %2496 = vmatprep.subr.bf16.mxu0 %v5564_v7  ;;  %3864 = vmatpush3.bf16.msra.mxu1 %v5597_v16 }
 0x39a   : > { %3869 = vmatprep.subr.bf16.mxu1 %v6173_v8 }
 0x39b   : > { %2304 = vmatmul.mubr.bf16.vlgmr.msra.gmra.mrb[0].mxu0 %v6171_v29 }
 0x39c   : > { %2497 = vmatpush1.bf16.msra.mxu0 %v5573_v10  ;;  %2528 = vmatprep.mubr.bf16.mxu0 %v6171_v29 }
 0x39d   : > { %2498 = vmatprep.subr.bf16.mxu0 %v5577_v5  ;;  %3866 = vmatmul.mubr.bf16.vlgmr.msra.gmra.mrb[0].mxu1 %v6171_v29 }
 0x39e   : > { %3870 = vmatpush3.bf16.msra.mxu1 %v5610_v22  ;;  %3885 = vmatprep.mubr.msk.bf16.mxu1 %vm4509_vm0, %v6173_v8 }
 0x39f   : > { %3871 = vmatprep.subr.bf16.mxu1 %v6173_v8 }
 0x3a0   : > { %2499 = vmatpush1.bf16.msra.mxu0 %v5587_v13 }
 0x3a1   : > { %2500 = vmatprep.subr.bf16.mxu0 %v5591_v15 }
 0x3a2   : > { %3872 = vmatpush3.bf16.msra.mxu1 %v5624_v25 }
 0x3a3   : > { %3873 = vmatprep.subr.bf16.mxu1 %v6173_v8 }
 0x3a4   : > { %2501 = vmatpush1.bf16.msra.mxu0 %v5602_v18 }
 0x3a5   : > { %2502 = vmatprep.subr.bf16.mxu0 %v5606_v21 }
 0x3a6   : > { %3874 = vmatpush3.bf16.msra.mxu1 %v5639_v30 }
 0x3a7   : > { %3875 = vmatprep.subr.bf16.mxu1 %v6173_v8 }
 0x3a8   : > { %2503 = vmatpush1.bf16.msra.mxu0 %v5615_v32 }
 0x3a9   : > { %2504 = vmatprep.subr.bf16.mxu0 %v5620_v24 }
 0x3aa   : > { %3876 = vmatpush3.bf16.msra.mxu1 %v5652_v34 }
 0x3ab   : > { %3877 = vmatprep.subr.bf16.mxu1 %v6173_v8 }
 0x3ac   : > { %2505 = vmatpush1.bf16.msra.mxu0 %v5631_v27 }
 0x3ad   : > { %2506 = vmatprep.subr.bf16.mxu0 %v5635_v28 }
 0x3ae   : > { %3878 = vmatpush3.bf16.msra.mxu1 %v5665_v37 }
 0x3af   : > { %3879 = vmatprep.subr.bf16.mxu1 %v6173_v8 }
 0x3b0   : > { %2507 = vmatpush1.bf16.msra.mxu0 %v5644_v31 }
 0x3b1   : > { %2508 = vmatprep.subr.bf16.mxu0 %v5648_v33 }
 0x3b2   : > { %3880 = vmatpush3.bf16.msra.mxu1 %v5675_v40 }
 0x3b3   : > { %3881 = vmatprep.subr.bf16.mxu1 %v6173_v8 }
 0x3b4   : > { %2509 = vmatpush1.bf16.msra.mxu0 %v5657_v23 }
 0x3b5   : > { %2510 = vmatprep.subr.bf16.mxu0 %v5661_v44 }
 0x3b6   : > { %3882 = vmatpush3.bf16.msra.mxu1 %v5681_v42 }
 0x3b7   : > { %3883 = vmatprep.subr.bf16.mxu1 %v6173_v8 }
 0x3b8   : > { %2511 = vmatpush1.bf16.msra.mxu0 %v5670_v39 }
 0x3b9   : > { %2635 = vmatprep.subr.bf16.mxu0 %v5475_v36 }
 0x3ba   : > { %3884 = vmatpush3.bf16.msra.mxu1 %v5690_v43 }
 0x3bb   : > { %2529 = vmatmul.mubr.bf16.vlgmr.msra.gmra.mrb[4].mxu0 %v6171_v29  ;;  %3889 = vmatprep.subr.bf16.mxu1 %v6173_v8 }
 0x3bc   : > { %2636 = vmatpush1.bf16.msra.mxu0 %v5478_v60  ;;  %2667 = vmatprep.mubr.bf16.mxu0 %v6171_v29 }
 0x3bd   : > { %2637 = vmatprep.subr.bf16.mxu0 %v5484_v38  ;;  %3886 = vmatmul.mubr.bf16.vlgmr.msra.gmra.mrb[4].mxu1 %v6171_v29 }
 0x3be   : > { %3890 = vmatpush3.bf16.msra.mxu1 %v5505_v56  ;;  %3905 = vmatprep.mubr.msk.bf16.mxu1 %vm4509_vm0, %v6173_v8 }
 0x3bf   : > { %3891 = vmatprep.subr.bf16.mxu1 %v6173_v8 }
 0x3c0   : > { %2638 = vmatpush1.bf16.msra.mxu0 %v5490_v59 }
 0x3c1   : > { %2639 = vmatprep.subr.bf16.mxu0 %v5494_v47 }
 0x3c2   : > { %3892 = vmatpush3.bf16.msra.mxu1 %v5517_v61 }
 0x3c3   : > { %3893 = vmatprep.subr.bf16.mxu1 %v6173_v8 }
 0x3c4   : > { %2640 = vmatpush1.bf16.msra.mxu0 %v5498_v20 }
 0x3c5   : > { %2641 = vmatprep.subr.bf16.mxu0 %v5502_v19 }
 0x3c6   : > { %3894 = vmatpush3.bf16.msra.mxu1 %v5530_v58 }
 0x3c7   : > { %3895 = vmatprep.subr.bf16.mxu1 %v6173_v8 }
 0x3c8   : > { %2642 = vmatpush1.bf16.msra.mxu0 %v5509_v14 }
 0x3c9   : > { %2643 = vmatprep.subr.bf16.mxu0 %v5512_v1 }
 0x3ca   : > { %3896 = vmatpush3.bf16.msra.mxu1 %v5543_v0 }
 0x3cb   : > { %3897 = vmatprep.subr.bf16.mxu1 %v6173_v8 }
 0x3cc   : > { %2644 = vmatpush1.bf16.msra.mxu0 %v5521_v63 }
 0x3cd   : > { %2645 = vmatprep.subr.bf16.mxu0 %v5525_v41 }
 0x3ce   : > { %3898 = vmatpush3.bf16.msra.mxu1 %v5556_v17 }
 0x3cf   : > { %3899 = vmatprep.subr.bf16.mxu1 %v6173_v8 }
 0x3d0   : > { %2646 = vmatpush1.bf16.msra.mxu0 %v5535_v35 }
 0x3d1   : > { %2647 = vmatprep.subr.bf16.mxu0 %v5539_v55 }
 0x3d2   : > { %3900 = vmatpush3.bf16.msra.mxu1 %v5569_v9 }
 0x3d3   : > { %3901 = vmatprep.subr.bf16.mxu1 %v6173_v8 }
 0x3d4   : > { %2648 = vmatpush1.bf16.msra.mxu0 %v5547_v3 }
 0x3d5   : > { %2649 = vmatprep.subr.bf16.mxu0 %v5551_v50 }
 0x3d6   : > { %3902 = vmatpush3.bf16.msra.mxu1 %v5582_v12 }
 0x3d7   : > { %3903 = vmatprep.subr.bf16.mxu1 %v6173_v8 }
 0x3d8   : > { %2650 = vmatpush1.bf16.msra.mxu0 %v5561_v6 }
 0x3d9   : > { %2717 = vmatprep.subr.bf16.mxu0 %v5564_v7 }
 0x3da   : > { %3904 = vmatpush3.bf16.msra.mxu1 %v5597_v16 }
 0x3db   : > { %3909 = vmatprep.subr.bf16.mxu1 %v6173_v8 }
 0x46e   : > { %v2305_v53 = vpop.f32.mrb[0].mxu0 }
 0x46f   : > { %v2306_v11 = vadd.f32 %v2305_v53, %v5734_v51  ;;  %v2307_v54 = vpop.f32.mrb[1].mxu0  ;;  %v2138_v53 = vsub.s32 2, %v5729_v46 }
 0x470   : > { %v2308_v26 = vadd.f32 %v2307_v54, %v5736_v52  ;;  %v2309_v45 = vpop.f32.mrb[2].mxu0  ;;  %v2346_v6 = vpop.f32.mrb[0].mxu1 }
 0x471   : > { %v2577_v29 = vadd.f32 %v2306_v11, %v2118_v4  ;;  %v2310_v8 = vpop.f32.mrb[3].mxu0  ;;  %v3867_v12 = vpop.f32.mrb[1].mxu1  ;;  %v5741_v48 = vrot.slane %v2113_v2, %v2138_v53  ;;  %v5743_v4 = vld [vmem:[#allocation2 + $0x8] ss:$12 sps:$4 sm:$0xff]  }
 0x472   : > { %v2584_v16 = vadd.f32 %v2308_v26, %v2119_v57  ;;  %v2349_v3 = vpop.f32.mrb[2].mxu1  ;;  %6407 = vst [vmem:[#allocation65_spill] sm:$0xff] %v5743_v4  ;;  %v3676_v8 = vld [vmem:[%s4751_s21 + $0x3] sm:$0x7]  ;;  %v2122_v11 = vld [vmem:[#allocation3 + $0x24] sm:$0xff]  ;;  %v2120_v12 = vunpack.c.l.bf16 %v5743_v4 }
 0x473   : > { %v3725_v7 = vmul.f32 -1.442695, %v2577_v29  ;;  %v3868_v55 = vpop.f32.mrb[3].mxu1  ;;  %6406 = vst [vmem:[#allocation57_spill] sm:$0xff] %v5741_v48  ;;  %v5748_v3 = vrot.slane %v3676_v8, %v2130_v62  ;;  %v2125_v26 = vunpack.c.h.bf16 %v2122_v11 }
 0x474   : > { %v3726_v50 = vmul.f32 -1.442695, %v2584_v16 }
 0x475   : > { %4225 = vpow2.f32 %v3725_v7  ;;  %v2347_v7 = vadd.f32 %v2346_v6, %v5741_v48  ;;  %6408 = vst [vmem:[#allocation62_spill] sm:$0xff] %v5748_v3 }
 0x476   : > { %4227 = vpow2.f32 %v3726_v50  ;;  %v5750_v50 = vrot.slane %v3676_v8, %v2134_v49 }
 0x47f   : > { %v4226_v9 = vpop.eup %4225 }
 0x480   : > { %v2581_v35 = vadd.f32 1.0, %v4226_v9  ;;  %v4228_v54 = vpop.eup %4227 }
 0x481   : > { %v2588_v29 = vadd.f32 1.0, %v4228_v54 }
 0x482   : > { %4229 = vrcp.f32 %v2581_v35  ;;  %v2124_v35 = vunpack.c.l.bf16 %v2122_v11 }
 0x483   : > { %4231 = vrcp.f32 %v2588_v29 }
 0x48c   : > { %v4230_v55 = vpop.eup %4229 }
 0x48d   : > { %v2591_v9 = vmul.f32 %v4230_v55, %v2347_v7  ;;  %v4232_v49 = vpop.eup %4231 }
 0x48e   : > { %v2530_v16 = vpop.f32.mrb[4].mxu0  ;;  %v2594_v51 = vsub.f32 1.0, %v4232_v49  ;;  %v2596_v11 = vmul.f32 0.0, %v4232_v49 }
 0x48f   : > { %v2592_v46 = vadd.f32 %v2591_v9, %v2120_v12  ;;  %v2531_v2 = vadd.f32 %v2530_v16, %v5748_v3  ;;  %v2532_v57 = vpop.f32.mrb[5].mxu0 }
 0x490   : > { %v2533_v45 = vadd.f32 %v2532_v57, %v5750_v50  ;;  %v2534_v6 = vpop.f32.mrb[6].mxu0  ;;  %v2571_v52 = vpop.f32.mrb[4].mxu1 }
 0x491   : > { %4233 = vtanh.f32 %v2592_v46  ;;  %v2598_v54 = vadd.f32 %v2531_v2, %v2124_v35  ;;  %v2535_v48 = vpop.f32.mrb[7].mxu0  ;;  %v3887_v7 = vpop.f32.mrb[5].mxu1  ;;  %v6410_v35 = vmov 0  }
 0x492   : > { %v2605_v4 = vadd.f32 %v2533_v45, %v2125_v26  ;;  %v2574_v55 = vpop.f32.mrb[6].mxu1  ;;  %v5770_v26 = vld [vmem:[#allocation3 + $0x20] ss:$12 sps:$4 sm:$0xff]  }
 0x493   : > { %v3727_v62 = vmul.f32 -1.442695, %v2598_v54  ;;  %v3888_v12 = vpop.f32.mrb[7].mxu1 }
 0x494   : > { %v3728_v29 = vmul.f32 -1.442695, %v2605_v4  ;;  %v5763_v4 = vrot.slane %v3676_v8, %v2138_v53  ;;  %v2126_v8 = vunpack.c.h.bf16 %v5770_v26 }
 0x495   : > { %4235 = vpow2.f32 %v3727_v62 }
 0x496   : > { %4237 = vpow2.f32 %v3728_v29  ;;  %v2572_v53 = vadd.f32 %v2571_v52, %v5763_v4 }
 0x49b   : > { %v4234_v9 = vpop.eup %4233 }
 0x49c   : > { %v2595_v16 = vmul.f32 %v4234_v9, %v2594_v51  ;;  %v6409_v51 = vmov 0.0  }
 0x49e   : > { %v5754_v3 = vadd.f32 %v2596_v11, %v2595_v16  ;;  %v6411_v16 = vld [vmem:[#allocation42_spill] sm:$0xff] }
 0x49f   : > { %v4236_v57 = vpop.eup %4235  ;;  %v6412_v11 = vld [vmem:[#allocation54_spill] sm:$0xff] }
 0x4a0   : > { %v2602_v46 = vadd.f32 1.0, %v4236_v57  ;;  %2619 = vst [vmem:[#allocation12] sm:$0xff] %v5754_v3  ;;  %v2634_v48 = vpack.c.bf16 %v5754_v3, %v5754_v3  ;;  %v4238_v2 = vpop.eup %4237  ;;  %v6413_v57 = vld [vmem:[#allocation40_spill] sm:$0xff] }
 0x4a1   : > { %v2609_v45 = vadd.f32 1.0, %v4238_v2  ;;  %v6416_v2 = vld [vmem:[#allocation48_spill] sm:$0xff] }
 0x4a2   : > { %4239 = vrcp.f32 %v2602_v46  ;;  %2668 = vmatmul.mubr.bf16.vlgmr.msra.gmra.mrb[8].mxu0 %v2634_v48  ;;  %3906 = vmatmul.mubr.bf16.vlgmr.msra.gmra.mrb[8].mxu1 %v2634_v48  ;;  %v6414_v46 = vld [vmem:[#allocation44_spill] sm:$0xff]  ;;  %v6415_v48 = vld [vmem:[#allocation51_spill] sm:$0xff] }
 0x4a3   : > { %2718 = vmatpush1.bf16.msra.mxu0 %v5573_v10  ;;  %3910 = vmatpush3.bf16.msra.mxu1 %v5610_v22  ;;  %4241 = vrcp.f32 %v2609_v45  ;;  %v6417_v45 = vld [vmem:[#allocation53_spill] sm:$0xff] }
 0x4a4   : > { %2719 = vmatprep.subr.bf16.mxu0 %v5577_v5  ;;  %3911 = vmatprep.subr.bf16.mxu1 %v6409_v51 }
 0x4a5   : > { %2749 = vmatprep.mubr.bf16.mxu0 %v6410_v35  ;;  %3925 = vmatprep.mubr.msk.bf16.mxu1 %vm4509_vm0, %v6409_v51 }
 0x4a7   : > { %2720 = vmatpush1.bf16.msra.mxu0 %v5587_v13  ;;  %3912 = vmatpush3.bf16.msra.mxu1 %v5624_v25 }
 0x4a8   : > { %2721 = vmatprep.subr.bf16.mxu0 %v5591_v15  ;;  %3913 = vmatprep.subr.bf16.mxu1 %v6409_v51 }
 0x4ab   : > { %2722 = vmatpush1.bf16.msra.mxu0 %v5602_v18  ;;  %3914 = vmatpush3.bf16.msra.mxu1 %v5639_v30 }
 0x4ac   : > { %v4240_v6 = vpop.eup %4239  ;;  %2723 = vmatprep.subr.bf16.mxu0 %v5606_v21  ;;  %3915 = vmatprep.subr.bf16.mxu1 %v6409_v51 }
 0x4ad   : > { %v2612_v54 = vmul.f32 %v4240_v6, %v2572_v53  ;;  %v4242_v52 = vpop.eup %4241  ;;  %v6418_v53 = vld [vmem:[#allocation59_spill] sm:$0xff] }
 0x4ae   : > { %v2615_v49 = vsub.f32 1.0, %v4242_v52  ;;  %v2617_v55 = vmul.f32 0.0, %v4242_v52  ;;  %v2623_v6 = vld [vmem:[#allocation2 + $0xc] sm:$0xff] }
 0x4af   : > { %v2613_v62 = vadd.f32 %v2612_v54, %v2126_v8  ;;  %2724 = vmatpush1.bf16.msra.mxu0 %v5615_v32  ;;  %3916 = vmatpush3.bf16.msra.mxu1 %v5652_v34  ;;  %v6419_v8 = vld [vmem:[#allocation50_spill] sm:$0xff]  ;;  %v2625_v54 = vunpack.c.l.bf16 %v2623_v6 }
 0x4b0   : > { %2725 = vmatprep.subr.bf16.mxu0 %v5620_v24  ;;  %3917 = vmatprep.subr.bf16.mxu1 %v6409_v51 }
 0x4b1   : > { %4243 = vtanh.f32 %v2613_v62 }
 0x4b3   : > { %2726 = vmatpush1.bf16.msra.mxu0 %v5631_v27  ;;  %3918 = vmatpush3.bf16.msra.mxu1 %v5665_v37 }
 0x4b4   : > { %2727 = vmatprep.subr.bf16.mxu0 %v5635_v28  ;;  %3919 = vmatprep.subr.bf16.mxu1 %v6409_v51 }
 0x4b7   : > { %2728 = vmatpush1.bf16.msra.mxu0 %v5644_v31  ;;  %3920 = vmatpush3.bf16.msra.mxu1 %v5675_v40 }
 0x4b8   : > { %2729 = vmatprep.subr.bf16.mxu0 %v5648_v33  ;;  %3921 = vmatprep.subr.bf16.mxu1 %v6409_v51 }
 0x4bb   : > { %v4244_v29 = vpop.eup %4243  ;;  %2730 = vmatpush1.bf16.msra.mxu0 %v5657_v23  ;;  %3922 = vmatpush3.bf16.msra.mxu1 %v5681_v42 }
 0x4bc   : > { %2731 = vmatprep.subr.bf16.mxu0 %v5661_v44  ;;  %3923 = vmatprep.subr.bf16.mxu1 %v6409_v51  ;;  %v2616_v7 = vmul.f32 %v4244_v29, %v2615_v49  ;;  %v6420_v49 = vld [vmem:[#allocation56_spill] sm:$0xff] }
 0x4be   : > { %v5796_v12 = vadd.f32 %v2617_v55, %v2616_v7 }
 0x4bf   : > { %2732 = vmatpush1.bf16.msra.mxu0 %v5670_v39  ;;  %3924 = vmatpush3.bf16.msra.mxu1 %v5690_v43 }
 0x4c0   : > { %2621 = vst [vmem:[#allocation12 + $0x38] sm:$0xff] %v5796_v12  ;;  %v2716_v9 = vpack.c.bf16 %v5796_v12, %v5796_v12  ;;  %2857 = vmatprep.subr.bf16.mxu0 %v5475_v36  ;;  %3929 = vmatprep.subr.bf16.mxu1 %v6409_v51 }
 0x4c2   : > { %2750 = vmatmul.mubr.bf16.vlgmr.msra.gmra.mrb[12].mxu0 %v2716_v9  ;;  %3926 = vmatmul.mubr.bf16.vlgmr.msra.gmra.mrb[12].mxu1 %v2716_v9  ;;  %v2626_v9 = vunpack.c.h.bf16 %v2623_v6 }
 0x4c3   : > { %2858 = vmatpush1.bf16.msra.mxu0 %v5478_v60  ;;  %3930 = vmatpush3.bf16.msra.mxu1 %v5505_v56 }
 0x4c4   : > { %2859 = vmatprep.subr.bf16.mxu0 %v5484_v38  ;;  %3931 = vmatprep.subr.bf16.mxu1 %v6409_v51 }
 0x4c5   : > { %2889 = vmatprep.mubr.bf16.mxu0 %v6410_v35  ;;  %3945 = vmatprep.mubr.msk.bf16.mxu1 %vm4509_vm0, %v6409_v51 }
 0x4c7   : > { %2860 = vmatpush1.bf16.msra.mxu0 %v5490_v59  ;;  %3932 = vmatpush3.bf16.msra.mxu1 %v5517_v61 }
 0x4c8   : > { %2861 = vmatprep.subr.bf16.mxu0 %v5494_v47  ;;  %3933 = vmatprep.subr.bf16.mxu1 %v6409_v51 }
 0x4cb   : > { %2862 = vmatpush1.bf16.msra.mxu0 %v5498_v20  ;;  %3934 = vmatpush3.bf16.msra.mxu1 %v5530_v58 }
 0x4cc   : > { %2863 = vmatprep.subr.bf16.mxu0 %v5502_v19  ;;  %3935 = vmatprep.subr.bf16.mxu1 %v6409_v51 }
 0x4cf   : > { %2864 = vmatpush1.bf16.msra.mxu0 %v5509_v14  ;;  %3936 = vmatpush3.bf16.msra.mxu1 %v5543_v0  ;;  %v6423_v0 = vld [vmem:[#allocation57_spill] sm:$0xff] }
 0x4d0   : > { %2865 = vmatprep.subr.bf16.mxu0 %v5512_v1  ;;  %3937 = vmatprep.subr.bf16.mxu1 %v6409_v51 }
 0x4d3   : > { %2866 = vmatpush1.bf16.msra.mxu0 %v5521_v63  ;;  %3938 = vmatpush3.bf16.msra.mxu1 %v5556_v17 }
 0x4d4   : > { %2867 = vmatprep.subr.bf16.mxu0 %v5525_v41  ;;  %3939 = vmatprep.subr.bf16.mxu1 %v6409_v51 }
 0x4d7   : > { %2868 = vmatpush1.bf16.msra.mxu0 %v6411_v16  ;;  %3940 = vmatpush3.bf16.msra.mxu1 %v6412_v11 }
 0x4d8   : > { %2869 = vmatprep.subr.bf16.mxu0 %v6413_v57  ;;  %3941 = vmatprep.subr.bf16.mxu1 %v6409_v51 }
 0x4db   : > { %2870 = vmatpush1.bf16.msra.mxu0 %v6414_v46  ;;  %3942 = vmatpush3.bf16.msra.mxu1 %v6415_v48 }
 0x4dc   : > { %2871 = vmatprep.subr.bf16.mxu0 %v6416_v2  ;;  %3943 = vmatprep.subr.bf16.mxu1 %v6409_v51  ;;  %v6421_v2 = vld [vmem:[#allocation60_spill] sm:$0xff] }
 0x4df   : > { %2872 = vmatpush1.bf16.msra.mxu0 %v6417_v45  ;;  %3944 = vmatpush3.bf16.msra.mxu1 %v6418_v53 }
 0x4e0   : > { %2939 = vmatprep.subr.bf16.mxu0 %v6419_v8  ;;  %3949 = vmatprep.subr.bf16.mxu1 %v6409_v51 }
 0x575   : > { %v2669_v62 = vpop.f32.mrb[8].mxu0  ;;  %v2710_v52 = vpop.f32.mrb[8].mxu1 }
 0x576   : > { %v2670_v29 = vadd.f32 %v2669_v62, %v6420_v49  ;;  %v2671_v7 = vpop.f32.mrb[9].mxu0  ;;  %v3907_v55 = vpop.f32.mrb[9].mxu1  ;;  %v2629_v49 = vld [vmem:[#allocation3 + $0x18] sm:$0xff] }
 0x577   : > { %v2672_v48 = vadd.f32 %v2671_v7, %v6421_v2  ;;  %v2673_v46 = vpop.f32.mrb[10].mxu0  ;;  %v2713_v57 = vpop.f32.mrb[10].mxu1  ;;  %v6422_v55 = vld [vmem:[#allocation65_spill] sm:$0xff]  ;;  %v2711_v7 = vadd.f32 %v2710_v52, %v6423_v0 }
 0x578   : > { %v2798_v45 = vadd.f32 %v2670_v29, %v2625_v54  ;;  %v2674_v11 = vpop.f32.mrb[11].mxu0  ;;  %v3908_v53 = vpop.f32.mrb[11].mxu1  ;;  %v2627_v6 = vunpack.c.h.bf16 %v6422_v55 }
 0x579   : > { %v2805_v8 = vadd.f32 %v2672_v48, %v2626_v9  ;;  %v2631_v11 = vunpack.c.l.bf16 %v2629_v49 }
 0x57a   : > { %v3729_v16 = vmul.f32 -1.442695, %v2798_v45 }
 0x57b   : > { %v3730_v41 = vmul.f32 -1.442695, %v2805_v8 }
 0x57c   : > { %4245 = vpow2.f32 %v3729_v16  ;;  %v6424_v16 = vld [vmem:[#allocation62_spill] sm:$0xff] }
 0x57d   : > { %4247 = vpow2.f32 %v3730_v41 }
 0x586   : > { %v4246_v17 = vpop.eup %4245 }
 0x587   : > { %v2802_v63 = vadd.f32 1.0, %v4246_v17  ;;  %v4248_v1 = vpop.eup %4247  ;;  %v2632_v17 = vunpack.c.h.bf16 %v2629_v49 }
 0x588   : > { %v2809_v62 = vadd.f32 1.0, %v4248_v1 }
 0x589   : > { %4249 = vrcp.f32 %v2802_v63 }
 0x58a   : > { %4251 = vrcp.f32 %v2809_v62 }
 0x593   : > { %v4250_v46 = vpop.eup %4249 }
 0x594   : > { %v2812_v57 = vmul.f32 %v4250_v46, %v2711_v7  ;;  %v4252_v62 = vpop.eup %4251 }
 0x595   : > { %v2751_v53 = vpop.f32.mrb[12].mxu0  ;;  %v2792_v45 = vpop.f32.mrb[12].mxu1  ;;  %v2815_v2 = vsub.f32 1.0, %v4252_v62 }
 0x596   : > { %v2813_v48 = vadd.f32 %v2812_v57, %v2627_v6  ;;  %v2752_v8 = vadd.f32 %v2751_v53, %v6424_v16  ;;  %v2753_v41 = vpop.f32.mrb[13].mxu0  ;;  %v3927_v54 = vpop.f32.mrb[13].mxu1  ;;  %v2817_v53 = vmul.f32 %v4252_v62, %v5754_v3  ;;  %v6438_v62 = vld [vmem:[#allocation50_spill] sm:$0xff] }
 0x597   : > { %v2754_v63 = vadd.f32 %v2753_v41, %v5750_v50  ;;  %v2755_v1 = vpop.f32.mrb[14].mxu0  ;;  %v2795_v29 = vpop.f32.mrb[14].mxu1 }
 0x598   : > { %4253 = vtanh.f32 %v2813_v48  ;;  %v2819_v9 = vadd.f32 %v2752_v8, %v2631_v11  ;;  %v2756_v55 = vpop.f32.mrb[15].mxu0  ;;  %v3928_v52 = vpop.f32.mrb[15].mxu1  ;;  %v2793_v48 = vadd.f32 %v2792_v45, %v5763_v4 }
 0x599   : > { %v2826_v7 = vadd.f32 %v2754_v63, %v2632_v17 }
 0x59a   : > { %v3731_v0 = vmul.f32 -1.442695, %v2819_v9 }
 0x59b   : > { %v3732_v46 = vmul.f32 -1.442695, %v2826_v7  ;;  %v6437_v7 = vld [vmem:[#allocation59_spill] sm:$0xff] }
 0x59c   : > { %4255 = vpow2.f32 %v3731_v0 }
 0x59d   : > { %4257 = vpow2.f32 %v3732_v46  ;;  %v2845_v46 = vld [vmem:[#allocation2 + $0x18] sm:$0xff] }
 0x5a2   : > { %v4254_v6 = vpop.eup %4253 }
 0x5a3   : > { %v2816_v57 = vmul.f32 %v4254_v6, %v2815_v2  ;;  %v2633_v2 = vunpack.c.l.bf16 %v5770_v26  ;;  %v2847_v6 = vunpack.c.l.bf16 %v2845_v46 }
 0x5a5   : > { %v5847_v49 = vadd.f32 %v2817_v53, %v2816_v57 }
 0x5a6   : > { %v4256_v41 = vpop.eup %4255 }
 0x5a7   : > { %v2823_v54 = vadd.f32 1.0, %v4256_v41  ;;  %2841 = vst [vmem:[#allocation12 + $0x10] sm:$0xff] %v5847_v49  ;;  %v2856_v11 = vpack.c.bf16 %v5847_v49, %v5847_v49  ;;  %v4258_v0 = vpop.eup %4257  ;;  %v6439_v41 = vld [vmem:[#allocation56_spill] sm:$0xff] }
 0x5a8   : > { %v2830_v3 = vadd.f32 1.0, %v4258_v0 }
 0x5a9   : > { %4259 = vrcp.f32 %v2823_v54  ;;  %2890 = vmatmul.mubr.bf16.vlgmr.msra.gmra.mrb[16].mxu0 %v2856_v11  ;;  %3946 = vmatmul.mubr.bf16.vlgmr.msra.gmra.mrb[16].mxu1 %v2856_v11 }
 0x5aa   : > { %2940 = vmatpush1.bf16.msra.mxu0 %v5573_v10  ;;  %3950 = vmatpush3.bf16.msra.mxu1 %v5610_v22  ;;  %4261 = vrcp.f32 %v2830_v3  ;;  %v2848_v3 = vunpack.c.h.bf16 %v2845_v46 }
 0x5ab   : > { %2941 = vmatprep.subr.bf16.mxu0 %v5577_v5  ;;  %3951 = vmatprep.subr.bf16.mxu1 %v6409_v51 }
 0x5ac   : > { %2971 = vmatprep.mubr.bf16.mxu0 %v6410_v35  ;;  %3965 = vmatprep.mubr.msk.bf16.mxu1 %vm4509_vm0, %v6409_v51 }
 0x5ae   : > { %2942 = vmatpush1.bf16.msra.mxu0 %v5587_v13  ;;  %3952 = vmatpush3.bf16.msra.mxu1 %v5624_v25 }
 0x5af   : > { %2943 = vmatprep.subr.bf16.mxu0 %v5591_v15  ;;  %3953 = vmatprep.subr.bf16.mxu1 %v6409_v51 }
 0x5b2   : > { %2944 = vmatpush1.bf16.msra.mxu0 %v5602_v18  ;;  %3954 = vmatpush3.bf16.msra.mxu1 %v5639_v30 }
 0x5b3   : > { %v4260_v8 = vpop.eup %4259  ;;  %2945 = vmatprep.subr.bf16.mxu0 %v5606_v21  ;;  %3955 = vmatprep.subr.bf16.mxu1 %v6409_v51 }
 0x5b4   : > { %v2833_v17 = vmul.f32 %v4260_v8, %v2793_v48  ;;  %v4262_v26 = vpop.eup %4261 }
 0x5b5   : > { %v2836_v45 = vsub.f32 1.0, %v4262_v26  ;;  %v2838_v9 = vmul.f32 %v4262_v26, %v5796_v12  ;;  %v6436_v12 = vld [vmem:[#allocation53_spill] sm:$0xff] }
 0x5b6   : > { %v2834_v63 = vadd.f32 %v2833_v17, %v2633_v2  ;;  %2946 = vmatpush1.bf16.msra.mxu0 %v5615_v32  ;;  %3956 = vmatpush3.bf16.msra.mxu1 %v5652_v34  ;;  %v6440_v2 = vld [vmem:[#allocation60_spill] sm:$0xff] }
 0x5b7   : > { %2947 = vmatprep.subr.bf16.mxu0 %v5620_v24  ;;  %3957 = vmatprep.subr.bf16.mxu1 %v6409_v51 }
 0x5b8   : > { %4263 = vtanh.f32 %v2834_v63 }
 0x5ba   : > { %2948 = vmatpush1.bf16.msra.mxu0 %v5631_v27  ;;  %3958 = vmatpush3.bf16.msra.mxu1 %v5665_v37 }
 0x5bb   : > { %2949 = vmatprep.subr.bf16.mxu0 %v5635_v28  ;;  %3959 = vmatprep.subr.bf16.mxu1 %v6409_v51 }
 0x5be   : > { %2950 = vmatpush1.bf16.msra.mxu0 %v5644_v31  ;;  %3960 = vmatpush3.bf16.msra.mxu1 %v5675_v40 }
 0x5bf   : > { %2951 = vmatprep.subr.bf16.mxu0 %v5648_v33  ;;  %3961 = vmatprep.subr.bf16.mxu1 %v6409_v51 }
 0x5c2   : > { %v4264_v1 = vpop.eup %4263  ;;  %2952 = vmatpush1.bf16.msra.mxu0 %v5657_v23  ;;  %3962 = vmatpush3.bf16.msra.mxu1 %v5681_v42 }
 0x5c3   : > { %2953 = vmatprep.subr.bf16.mxu0 %v5661_v44  ;;  %3963 = vmatprep.subr.bf16.mxu1 %v6409_v51  ;;  %v2837_v29 = vmul.f32 %v4264_v1, %v2836_v45 }
 0x5c5   : > { %v5886_v55 = vadd.f32 %v2838_v9, %v2837_v29 }
 0x5c6   : > { %2954 = vmatpush1.bf16.msra.mxu0 %v5670_v39  ;;  %3964 = vmatpush3.bf16.msra.mxu1 %v5690_v43 }
 0x5c7   : > { %2843 = vst [vmem:[#allocation12 + $0x28] sm:$0xff] %v5886_v55  ;;  %v2938_v52 = vpack.c.bf16 %v5886_v55, %v5886_v55  ;;  %3076 = vmatprep.subr.bf16.mxu0 %v5475_v36  ;;  %3969 = vmatprep.subr.bf16.mxu1 %v6409_v51  ;;  %v6425_v36 = vld [vmem:[#allocation47_spill] sm:$0xff] }
 0x5c9   : > { %2972 = vmatmul.mubr.bf16.vlgmr.msra.gmra.mrb[20].mxu0 %v2938_v52  ;;  %3966 = vmatmul.mubr.bf16.vlgmr.msra.gmra.mrb[20].mxu1 %v2938_v52 }
 0x5ca   : > { %3077 = vmatpush1.bf16.msra.mxu0 %v5478_v60  ;;  %3970 = vmatpush3.bf16.msra.mxu1 %v5505_v56  ;;  %v6426_v60 = vld [vmem:[#allocation21_spill] sm:$0xff]  ;;  %v6432_v56 = vld [vmem:[#allocation40_spill] sm:$0xff] }
 0x5cb   : > { %3078 = vmatprep.subr.bf16.mxu0 %v5484_v38  ;;  %3971 = vmatprep.subr.bf16.mxu1 %v6409_v51  ;;  %v6427_v38 = vld [vmem:[#allocation19_spill] sm:$0xff] }
 0x5cc   : > { %3108 = vmatprep.mubr.bf16.mxu0 %v6410_v35  ;;  %3985 = vmatprep.mubr.msk.bf16.mxu1 %vm4509_vm0, %v6409_v51 }
 0x5ce   : > { %3079 = vmatpush1.bf16.msra.mxu0 %v5490_v59  ;;  %3972 = vmatpush3.bf16.msra.mxu1 %v5517_v61  ;;  %v6428_v59 = vld [vmem:[#allocation45_spill] sm:$0xff]  ;;  %v6434_v61 = vld [vmem:[#allocation51_spill] sm:$0xff] }
 0x5cf   : > { %3080 = vmatprep.subr.bf16.mxu0 %v5494_v47  ;;  %3973 = vmatprep.subr.bf16.mxu1 %v6409_v51  ;;  %v6429_v47 = vld [vmem:[#allocation27_spill] sm:$0xff] }
 0x5d2   : > { %3081 = vmatpush1.bf16.msra.mxu0 %v5498_v20  ;;  %3974 = vmatpush3.bf16.msra.mxu1 %v5530_v58  ;;  %v6430_v20 = vld [vmem:[#allocation42_spill] sm:$0xff]  ;;  %v6435_v58 = vld [vmem:[#allocation48_spill] sm:$0xff] }
 0x5d3   : > { %3082 = vmatprep.subr.bf16.mxu0 %v5502_v19  ;;  %3975 = vmatprep.subr.bf16.mxu1 %v6409_v51  ;;  %v6431_v19 = vld [vmem:[#allocation54_spill] sm:$0xff] }
 0x5d6   : > { %3083 = vmatpush1.bf16.msra.mxu0 %v5509_v14  ;;  %3976 = vmatpush3.bf16.msra.mxu1 %v6425_v36  ;;  %v6433_v14 = vld [vmem:[#allocation44_spill] sm:$0xff] }
 0x5d7   : > { %3084 = vmatprep.subr.bf16.mxu0 %v6426_v60  ;;  %3977 = vmatprep.subr.bf16.mxu1 %v6409_v51 }
 0x5da   : > { %3085 = vmatpush1.bf16.msra.mxu0 %v6427_v38  ;;  %3978 = vmatpush3.bf16.msra.mxu1 %v6428_v59  ;;  %v5932_v38 = vld [vmem:[#allocation2 + $0x20] ss:$12 sps:$4 sm:$0xff]  }
 0x5db   : > { %3086 = vmatprep.subr.bf16.mxu0 %v6429_v47  ;;  %3979 = vmatprep.subr.bf16.mxu1 %v6409_v51  ;;  %v2851_v47 = vld [vmem:[#allocation3 + $0xc] sm:$0xff] }
 0x5de   : > { %3087 = vmatpush1.bf16.msra.mxu0 %v6430_v20  ;;  %3980 = vmatpush3.bf16.msra.mxu1 %v6431_v19  ;;  %v2849_v20 = vunpack.c.l.bf16 %v5932_v38  ;;  %v6441_v19 = vld [vmem:[#allocation57_spill] sm:$0xff] }
 0x5df   : > { %3088 = vmatprep.subr.bf16.mxu0 %v6432_v56  ;;  %3981 = vmatprep.subr.bf16.mxu1 %v6409_v51 }
 0x5e2   : > { %3089 = vmatpush1.bf16.msra.mxu0 %v6433_v14  ;;  %3982 = vmatpush3.bf16.msra.mxu1 %v6434_v61 }
 0x5e3   : > { %3090 = vmatprep.subr.bf16.mxu0 %v6435_v58  ;;  %3983 = vmatprep.subr.bf16.mxu1 %v6409_v51  ;;  %v2853_v58 = vunpack.c.l.bf16 %v2851_v47 }
 0x5e6   : > { %3091 = vmatpush1.bf16.msra.mxu0 %v6436_v12  ;;  %3984 = vmatpush3.bf16.msra.mxu1 %v6437_v7 }
 0x5e7   : > { %3158 = vmatprep.subr.bf16.mxu0 %v6438_v62  ;;  %3989 = vmatprep.subr.bf16.mxu1 %v6409_v51 }
 0x67c   : > { %v2891_v57 = vpop.f32.mrb[16].mxu0  ;;  %v2932_v53 = vpop.f32.mrb[16].mxu1 }
 0x67d   : > { %v2892_v54 = vadd.f32 %v2891_v57, %v6439_v41  ;;  %v2893_v11 = vpop.f32.mrb[17].mxu0  ;;  %v3947_v0 = vpop.f32.mrb[17].mxu1  ;;  %v2933_v56 = vadd.f32 %v2932_v53, %v6441_v19 }
 0x67e   : > { %v2894_v48 = vadd.f32 %v2893_v11, %v6440_v2  ;;  %v2895_v8 = vpop.f32.mrb[18].mxu0  ;;  %v2935_v17 = vpop.f32.mrb[18].mxu1 }
 0x67f   : > { %v3020_v63 = vadd.f32 %v2892_v54, %v2847_v6  ;;  %v2896_v26 = vpop.f32.mrb[19].mxu0  ;;  %v3948_v45 = vpop.f32.mrb[19].mxu1  ;;  %v2854_v54 = vunpack.c.h.bf16 %v2851_v47 }
 0x680   : > { %v3027_v29 = vadd.f32 %v2894_v48, %v2848_v3 }
 0x681   : > { %v3733_v1 = vmul.f32 -1.442695, %v3020_v63 }
 0x682   : > { %v3734_v9 = vmul.f32 -1.442695, %v3027_v29 }
 0x683   : > { %4265 = vpow2.f32 %v3733_v1 }
 0x684   : > { %4267 = vpow2.f32 %v3734_v9 }
 0x68d   : > { %v4266_v52 = vpop.eup %4265 }
 0x68e   : > { %v3024_v36 = vadd.f32 1.0, %v4266_v52  ;;  %v4268_v60 = vpop.eup %4267 }
 0x68f   : > { %v3031_v59 = vadd.f32 1.0, %v4268_v60 }
 0x690   : > { %4269 = vrcp.f32 %v3024_v36 }
 0x691   : > { %4271 = vrcp.f32 %v3031_v59 }
 0x69a   : > { %v4270_v14 = vpop.eup %4269 }
 0x69b   : > { %v3034_v61 = vmul.f32 %v4270_v14, %v2933_v56  ;;  %v4272_v26 = vpop.eup %4271 }
 0x69c   : > { %v2973_v12 = vpop.f32.mrb[20].mxu0  ;;  %v3014_v7 = vpop.f32.mrb[20].mxu1  ;;  %v3037_v1 = vsub.f32 1.0, %v4272_v26  ;;  %v3039_v52 = vmul.f32 %v4272_v26, %v5847_v49 }
 0x69d   : > { %v3035_v62 = vadd.f32 %v3034_v61, %v2849_v20  ;;  %v2974_v46 = vadd.f32 %v2973_v12, %v6424_v16  ;;  %v2975_v6 = vpop.f32.mrb[21].mxu0  ;;  %v3967_v57 = vpop.f32.mrb[21].mxu1  ;;  %v5953_v20 = vld [vmem:[#allocation3 + $0x8] ss:$12 sps:$4 sm:$0xff]  }
 0x69e   : > { %v2976_v11 = vadd.f32 %v2975_v6, %v5750_v50  ;;  %v2977_v0 = vpop.f32.mrb[22].mxu0  ;;  %v3017_v3 = vpop.f32.mrb[22].mxu1  ;;  %v3069_v6 = vunpack.c.h.bf16 %v5932_v38 }
 0x69f   : > { %4273 = vtanh.f32 %v3035_v62  ;;  %v3041_v48 = vadd.f32 %v2974_v46, %v2853_v58  ;;  %v2978_v8 = vpop.f32.mrb[23].mxu0  ;;  %v3968_v53 = vpop.f32.mrb[23].mxu1  ;;  %v3070_v46 = vld [vmem:[#allocation3] sm:$0xff] }
 0x6a0   : > { %v3048_v63 = vadd.f32 %v2976_v11, %v2854_v54  ;;  %v3072_v11 = vunpack.c.l.bf16 %v3070_v46 }
 0x6a1   : > { %v3735_v17 = vmul.f32 -1.442695, %v3041_v48 }
 0x6a2   : > { %v3736_v45 = vmul.f32 -1.442695, %v3048_v63  ;;  %v3073_v63 = vunpack.c.h.bf16 %v3070_v46 }
 0x6a3   : > { %4275 = vpow2.f32 %v3735_v17 }
 0x6a4   : > { %4277 = vpow2.f32 %v3736_v45 }
 0x6a9   : > { %v4274_v29 = vpop.eup %4273 }
 0x6aa   : > { %v3038_v9 = vmul.f32 %v4274_v29, %v3037_v1 }
 0x6ac   : > { %v5939_v36 = vadd.f32 %v3039_v52, %v3038_v9 }
 0x6ad   : > { %v4276_v60 = vpop.eup %4275 }
 0x6ae   : > { %v3045_v59 = vadd.f32 1.0, %v4276_v60  ;;  %3062 = vst [vmem:[#allocation12 + $0x20] sm:$0xff] %v5939_v36  ;;  %v3075_v47 = vpack.c.bf16 %v5939_v36, %v5939_v36  ;;  %v4278_v49 = vpop.eup %4277 }
 0x6b0   : > { %4279 = vrcp.f32 %v3045_v59  ;;  %3109 = vmatmul.mubr.bf16.vlgmr.msra.gmra.mrb[24].mxu0 %v3075_v47  ;;  %3986 = vmatmul.mubr.bf16.vlgmr.msra.gmra.mrb[24].mxu1 %v3075_v47 }
 0x6b1   : > { %3159 = vmatpush1.bf16.msra.mxu0 %v5573_v10  ;;  %3990 = vmatpush3.bf16.msra.mxu1 %v5610_v22  ;;  %v3052_v10 = vadd.f32 1.0, %v4278_v49  ;;  %v3015_v22 = vadd.f32 %v3014_v7, %v5763_v4 }
 0x6b2   : > { %3160 = vmatprep.subr.bf16.mxu0 %v5577_v5  ;;  %3991 = vmatprep.subr.bf16.mxu1 %v6409_v51  ;;  %v2855_v5 = vunpack.c.h.bf16 %v5953_v20 }
 0x6b3   : > { %3190 = vmatprep.mubr.bf16.mxu0 %v6410_v35  ;;  %4005 = vmatprep.mubr.msk.bf16.mxu1 %vm4509_vm0, %v6409_v51  ;;  %4281 = vrcp.f32 %v3052_v10 }
 0x6b5   : > { %3161 = vmatpush1.bf16.msra.mxu0 %v5587_v13  ;;  %3992 = vmatpush3.bf16.msra.mxu1 %v5624_v25 }
 0x6b6   : > { %3162 = vmatprep.subr.bf16.mxu0 %v5591_v15  ;;  %3993 = vmatprep.subr.bf16.mxu1 %v6409_v51 }
 0x6b9   : > { %3163 = vmatpush1.bf16.msra.mxu0 %v5602_v18  ;;  %3994 = vmatpush3.bf16.msra.mxu1 %v5639_v30  ;;  %v3065_v30 = vld [vmem:[#allocation2 + $0x24] sm:$0xff] }
 0x6ba   : > { %v4280_v35 = vpop.eup %4279  ;;  %3164 = vmatprep.subr.bf16.mxu0 %v5606_v21  ;;  %3995 = vmatprep.subr.bf16.mxu1 %v6409_v51 }
 0x6bb   : > { %v3055_v13 = vmul.f32 %v4280_v35, %v3015_v22 }
 0x6bd   : > { %v3056_v25 = vadd.f32 %v3055_v13, %v2855_v5  ;;  %3165 = vmatpush1.bf16.msra.mxu0 %v5615_v32  ;;  %3996 = vmatpush3.bf16.msra.mxu1 %v5652_v34  ;;  %v4282_v15 = vpop.eup %4281 }
 0x6be   : > { %3166 = vmatprep.subr.bf16.mxu0 %v5620_v24  ;;  %3997 = vmatprep.subr.bf16.mxu1 %v6409_v51  ;;  %v3058_v18 = vsub.f32 1.0, %v4282_v15  ;;  %v3060_v24 = vmul.f32 %v4282_v15, %v5886_v55 }
 0x6bf   : > { %4283 = vtanh.f32 %v3056_v25  ;;  %v3074_v25 = vunpack.c.l.bf16 %v5953_v20 }
 0x6c1   : > { %3167 = vmatpush1.bf16.msra.mxu0 %v5631_v27  ;;  %3998 = vmatpush3.bf16.msra.mxu1 %v5665_v37 }
 0x6c2   : > { %3168 = vmatprep.subr.bf16.mxu0 %v5635_v28  ;;  %3999 = vmatprep.subr.bf16.mxu1 %v6409_v51 }
 0x6c5   : > { %3169 = vmatpush1.bf16.msra.mxu0 %v5644_v31  ;;  %4000 = vmatpush3.bf16.msra.mxu1 %v5675_v40  ;;  %v3067_v31 = vunpack.c.l.bf16 %v3065_v30  ;;  %v3068_v40 = vunpack.c.h.bf16 %v3065_v30 }
 0x6c6   : > { %3170 = vmatprep.subr.bf16.mxu0 %v5648_v33  ;;  %4001 = vmatprep.subr.bf16.mxu1 %v6409_v51 }
 0x6c9   : > { %v4284_v21 = vpop.eup %4283  ;;  %3171 = vmatpush1.bf16.msra.mxu0 %v5657_v23  ;;  %4002 = vmatpush3.bf16.msra.mxu1 %v5681_v42 }
 0x6ca   : > { %3172 = vmatprep.subr.bf16.mxu0 %v5661_v44  ;;  %4003 = vmatprep.subr.bf16.mxu1 %v6409_v51  ;;  %v3059_v32 = vmul.f32 %v4284_v21, %v3058_v18 }
 0x6cc   : > { %v5980_v27 = vadd.f32 %v3060_v24, %v3059_v32 }
 0x6cd   : > { %3173 = vmatpush1.bf16.msra.mxu0 %v5670_v39  ;;  %4004 = vmatpush3.bf16.msra.mxu1 %v5690_v43 }
 0x6ce   : > { %3063 = vst [vmem:[#allocation12 + $0x18] sm:$0xff] %v5980_v27  ;;  %v3157_v28 = vpack.c.bf16 %v5980_v27, %v5980_v27 }
 0x6d0   : > { %3191 = vmatmul.mubr.bf16.vlgmr.msra.gmra.mrb[28].mxu0 %v3157_v28  ;;  %4006 = vmatmul.mubr.bf16.vlgmr.msra.gmra.mrb[28].mxu1 %v3157_v28 }
 0x783   : > { %v3110_v33 = vpop.f32.mrb[24].mxu0  ;;  %v3151_v34 = vpop.f32.mrb[24].mxu1 }
 0x784   : > { %v3111_v23 = vadd.f32 %v3110_v33, %v6439_v41  ;;  %v3112_v44 = vpop.f32.mrb[25].mxu0  ;;  %v3987_v37 = vpop.f32.mrb[25].mxu1 }
 0x785   : > { %v3113_v39 = vadd.f32 %v3112_v44, %v6440_v2  ;;  %v3114_v42 = vpop.f32.mrb[26].mxu0  ;;  %v3154_v43 = vpop.f32.mrb[26].mxu1  ;;  %v3152_v2 = vadd.f32 %v3151_v34, %v6441_v19 }
 0x786   : > { %v3239_v51 = vadd.f32 %v3111_v23, %v3067_v31  ;;  %v3115_v55 = vpop.f32.mrb[27].mxu0  ;;  %v3988_v56 = vpop.f32.mrb[27].mxu1 }
 0x787   : > { %v3246_v61 = vadd.f32 %v3113_v39, %v3068_v40 }
 0x788   : > { %v3737_v14 = vmul.f32 -1.442695, %v3239_v51 }
 0x789   : > { %v3738_v58 = vmul.f32 -1.442695, %v3246_v61 }
 0x78a   : > { %4285 = vpow2.f32 %v3737_v14 }
 0x78b   : > { %4287 = vpow2.f32 %v3738_v58 }
 0x794   : > { %v4286_v12 = vpop.eup %4285 }
 0x795   : > { %v3243_v7 = vadd.f32 1.0, %v4286_v12  ;;  %v4288_v62 = vpop.eup %4287 }
 0x796   : > { %v3250_v41 = vadd.f32 1.0, %v4288_v62 }
 0x797   : > { %4289 = vrcp.f32 %v3243_v7 }
 0x798   : > { %4291 = vrcp.f32 %v3250_v41 }
 0x7a1   : > { %v4290_v57 = vpop.eup %4289 }
 0x7a2   : > { %v3253_v54 = vmul.f32 %v4290_v57, %v3152_v2  ;;  %v4292_v60 = vpop.eup %4291 }
 0x7a3   : > { %v3192_v0 = vpop.f32.mrb[28].mxu0  ;;  %v3233_v3 = vpop.f32.mrb[28].mxu1  ;;  %v3256_v47 = vsub.f32 1.0, %v4292_v60 }
 0x7a4   : > { %v3254_v48 = vadd.f32 %v3253_v54, %v3069_v6  ;;  %v3193_v8 = vadd.f32 %v3192_v0, %v6424_v16  ;;  %v3194_v53 = vpop.f32.mrb[29].mxu0  ;;  %v4007_v17 = vpop.f32.mrb[29].mxu1  ;;  %v3258_v16 = vmul.f32 %v4292_v60, %v5939_v36  ;;  %v3234_v15 = vadd.f32 %v3233_v3, %v5763_v4 }
 0x7a5   : > { %v3195_v26 = vadd.f32 %v3194_v53, %v5750_v50  ;;  %v3196_v45 = vpop.f32.mrb[30].mxu0  ;;  %v3236_v1 = vpop.f32.mrb[30].mxu1 }
 0x7a6   : > { %4293 = vtanh.f32 %v3254_v48  ;;  %v3260_v38 = vadd.f32 %v3193_v8, %v3072_v11  ;;  %v3197_v29 = vpop.f32.mrb[31].mxu0  ;;  %v4008_v19 = vpop.f32.mrb[31].mxu1 }
 0x7a7   : > { %v3267_v52 = vadd.f32 %v3195_v26, %v3073_v63 }
 0x7a8   : > { %v3739_v9 = vmul.f32 -1.442695, %v3260_v38 }
 0x7a9   : > { %v3740_v59 = vmul.f32 -1.442695, %v3267_v52 }
 0x7aa   : > { %4295 = vpow2.f32 %v3739_v9 }
 0x7ab   : > { %4297 = vpow2.f32 %v3740_v59 }
 0x7b0   : > { %v4294_v49 = vpop.eup %4293 }
 0x7b1   : > { %v3257_v10 = vmul.f32 %v4294_v49, %v3256_v47 }
 0x7b3   : > { %v3259_v5 = vadd.f32 %v3258_v16, %v3257_v10 }
 0x7b4   : > { %v4296_v22 = vpop.eup %4295 }
 0x7b5   : > { %3281 = vst [vmem:[#allocation12 + $0x30] sm:$0xff] %v3259_v5  ;;  %v3264_v50 = vadd.f32 1.0, %v4296_v22  ;;  %v4298_v35 = vpop.eup %4297 }
 0x7b6   : > { %v3271_v13 = vadd.f32 1.0, %v4298_v35 }
 0x7b7   : > { %4299 = vrcp.f32 %v3264_v50 }
 0x7b8   : > { %4301 = vrcp.f32 %v3271_v13 }
 0x7c1   : > { %v4300_v18 = vpop.eup %4299 }
 0x7c2   : > { %v3274_v21 = vmul.f32 %v4300_v18, %v3234_v15  ;;  %v4302_v36 = vpop.eup %4301 }
 0x7c3   : > { %v3277_v24 = vsub.f32 1.0, %v4302_v36  ;;  %v3279_v31 = vmul.f32 %v4302_v36, %v5980_v27 }
 0x7c4   : > { %v3275_v32 = vadd.f32 %v3274_v21, %v3074_v25 }
 0x7c6   : > { %4303 = vtanh.f32 %v3275_v32 }
 0x7d0   : > { %v4304_v28 = vpop.eup %4303 }
 0x7d1   : > { %v3278_v30 = vmul.f32 %v4304_v28, %v3277_v24 }
 0x7d3   : > { %v3280_v33 = vadd.f32 %v3279_v31, %v3278_v30 }
 0x7d5   : > { %3282 = vst [vmem:[#allocation12 + $0x8] sm:$0xff] %v3280_v33 }
 0x7d6   : > { %4436 = shalt.err (!%p4433_p8)
}
 0x7d7   : > { %s4437_s15 = scalar_lea.hbm %s6038_s5, 1024 }
 0x7d8   : > { %p4438_p12 = scmp.ne.s32.totalorder %s6038_s5, %s4437_s15  ;;  %p4443_p13 = scmp.lt.u32.totalorder %s4437_s15, %s6038_s5 }
 0x7da   : > { %p4439_p7 = pnand %p4438_p12, %p4114_p5 }
 0x7dc   : > { %p4440_p1 = pneg %p4439_p7 }
 0x7de   : > { %p4445_p0 = pnand %p4443_p13, %p4440_p1 }
 0x7e0   : > { %4448 = shalt.err (!%p4445_p0)
}
 0x7e1   : > { %s4511_s1 = smov 256   ;;  %s4512_s23 = smov 16  }
 0x7e2   : > { %4094 = dma.vmem_to_hbm [thread:$0]  (%p4114_p5), %s3290_s24, 1024, %s6038_s5, [#allocation6], %s4511_s1, %s4511_s1, %s4512_s23  }
 0x7e3   : > { %4478 = dma.done.wait (%p4114_p5), [#allocation6], 1024  }
 0x7e4   : > { %4480 = vsyncadd (%p4114_p5), [#allocation6], 4294966272 }
 0x7e5 PF: > { %s6442_s14 = sld [smem:[#allocation17_spill]]  ;;  %s6443_s20 = sld [smem:[#allocation18_spill]] }
 0x7e6   : > { %p20_p4 = scmp.ge.s32.totalorder %s4564_s22, 4   ;;  %s6444_s18 = smov %s4487_s19 }
 0x7e7   : > { %s6446_s21 = smov %s4564_s22 }
 0x7e8   :  { %22 = sbr.rel (!%p20_p4) target bundleno = 9 (0x9), region = 128 }
 0x7eb   : > { %s6445_s19 = smov %s6442_s14 }
 0x7ef   :  { %3305 = vsyncpa [#allocation5], 1 }
 0x7f0   :  { %3307 = vsyncpa [#allocation5 + $0x1], 1 }
 0x7f1   :  { %3308 = vsyncpa [#allocation8], 1 }
 0x7f2   :  { %3310 = vsyncpa [#allocation8 + $0x1], 1 }
 0x7f3   :  { %3311 = vsyncpa [#allocation11], 1 }
 0x7f4   :  { %3313 = vsyncpa [#allocation11 + $0x1], 1 }
 0x7f5   :  { %3314 = vsyncpa [#allocation6], 1 }
 0x7f6   :  { %3316 = vsyncpa [#allocation6 + $0x1], 1 }

// kernel: tpu_custom_call.1
= control target key start
LH: loop header
LB: loop body
LE: loop exit
PB: predicated region body
PF: predicated region fallthrough
CT: control target
= control target key end

     0   :  { %s6033_s0 = inlined_call_operand.hbm [shape: f32[4,8,256], index: 0, kind: input, shape index: {}]   ;;  %s6034_s1 = inlined_call_operand.hbm [shape: bf16[2,256,768], index: 1, kind: input, shape index: {}]   ;;  %s6035_s2 = inlined_call_operand.hbm [shape: bf16[2,2,128,384], index: 2, kind: input, shape index: {}]   ;;  %s6036_s3 = inlined_call_operand.hbm [shape: f32[2,1,768], index: 3, kind: input, shape index: {}]   ;;  %s6037_s4 = inlined_call_operand.vmem [shape: f32[2,2,1,384], index: 4, kind: input, shape index: {}]   ;;  %s6038_s5 = inlined_call_operand.hbm [shape: f32[4,8,256], index: 5, kind: output, shape index: {}]  }
   0x1   :  { %6207 = sst [smem:[#allocation81_spill]] %s6034_s1 }
   0x2   :  { %10 = vsyncpa [#allocation5], 0 }
   0x3   :  { %11 = vsyncpa [#allocation8], 0 }
   0x4   :  { %13 = vsyncpa [#allocation8 + $0x1], 0 }
   0x5   :  { %14 = vsyncpa [#allocation11], 0 }
   0x6   :  { %16 = vsyncpa [#allocation11 + $0x1], 0 }
   0x7   :  { %17 = vsyncpa [#allocation6], 0  ;;  %s4543_s18 = smov 0   ;;  %s4545_s19 = smov 0  }
   0x8   :  { %s4547_s20 = smov 0   ;;  %s4549_s21 = smov 0  }
   0x9 LB: > { %6208 = sst [smem:[#allocation17_spill]] %s4491_s20  ;;  %s4564_s22 = sadd.s32 1, %s4495_s21   ;;  %s4495_s21 = sphi %s4549_s21, %s6446_s21   ;;  %s4491_s20 = sphi %s4547_s20, %s6443_s20   ;;  %s4487_s19 = sphi %s4545_s19, %s6445_s19   ;;  %s4483_s18 = sphi %s4543_s18, %s6444_s18  }
   0xa   : > { %s51_s23 = sadd.s32 1, %s4491_s20  ;;  %s48_s24 = ssub.s32 %s4495_s21, %s4564_s22 }
   0xb   : > { %p58_p0 = scmp.ne.s32.totalorder %s4491_s20, %s4487_s19  ;;  %p49_p1 = scmp.eq.s32.totalorder %s48_s24, 0 }
   0xc   : > { %p59_p2 = scmp.eq.s32.totalorder %s4495_s21, 0  ;;  %p4112_p3 = scmp.lt.s32.totalorder %s4495_s21, 2 }
   0xd   : > { %s4574_s25 = scalar_select %p49_p1, %s4491_s20, %s51_s23  }
   0xe   : > { %p60_p4 = por %p59_p2, %p58_p0  ;;  %s200_s26 = sand.u32 1, %s4495_s21  }
   0xf   : > { %6209 = sst [smem:[#allocation18_spill]] %s4574_s25  ;;  %s4578_s27 = sand.u32 1, %s4491_s20  }
  0x10   : > { %s4073_s28 = smul.u32 768, %s4578_s27  ;;  %p4581_p5 = pnand %p4112_p3, %p60_p4 }
  0x11   : > { %s4074_s30 = smul.u32 12288, %s4495_s21  ;;  %s6211_s1 = sld [smem:[#allocation81_spill]] }
  0x12   : > { %s6210_s29 = scalar_select %p4581_p5, 1, 0 }
  0x13   : > { %s204_s9 = scalar_lea.vmem [#allocation7], %s4073_s28  ;;  %s4593_s11 = scalar_lea.sflag [#allocation8], %s200_s26 }
  0x14   : > { %s211_s10 = sshll.u32 %s204_s9, 4  ;;  %p4599_p7 = pneg %p4581_p5  ;;  %s4591_s10 = int_to_ptr.vmem [resolvable:$true] %s211_s10 }
  0x16   : > { %s6212_s13 = scalar_select %p4599_p7, 1, 0 }
  0x17   : > { %s4589_s8 = scalar_lea.hbm %s6211_s1, %s4074_s30  ;;  %s4310_s16 = scalar_lea.hbm %s6211_s1, 24576 }
  0x18   : > { %s4305_s12 = scalar_lea.hbm %s4589_s8, 12288  ;;  %p4311_p10 = scmp.lt.u32.totalorder %s4589_s8, %s6211_s1 }
  0x19   : > { %p4306_p6 = scmp.ne.s32.totalorder %s4589_s8, %s4305_s12  ;;  %p4312_p11 = scmp.lt.u32.totalorder %s4310_s16, %s4305_s12 }
  0x1a   : > { %p4314_p13 = scmp.lt.u32.totalorder %s4305_s12, %s4589_s8 }
  0x1b   : > { %p4308_p8 = pnand %p4599_p7, %p4306_p6  ;;  %p4313_p12 = por %p4312_p11, %p4311_p10 }
  0x1d   : > { %p4309_p9 = pneg %p4308_p8  ;;  %p4315_p0 = por %p4314_p13, %p4313_p12 }
  0x1f   : > { %p4316_p1 = pnand %p4315_p0, %p4309_p9 }
  0x21   : > { %4319 = shalt.err (!%p4316_p1)
}
  0x22   : > { %s4320_s24 = scalar_lea.vmem %s4591_s10, 12288  ;;  %s4497_s26 = smov [#allocation7]  }
  0x23   : > { %p4321_p2 = scmp.ne.s32.totalorder %s4591_s10, %s4320_s24  ;;  %s4325_s28 = sshll.u32 %s4497_s26, 4  ;;  %s4326_s28 = int_to_ptr.vmem [resolvable:$false] %s4325_s28 }
  0x24   : > { %s4327_s30 = scalar_lea.vmem %s4326_s28, 24576  ;;  %p4328_p6 = scmp.lt.s32.totalorder %s4591_s10, %s4326_s28 }
  0x25   : > { %p4323_p3 = pnand %p4321_p2, %p4599_p7  ;;  %p4329_p8 = scmp.lt.s32.totalorder %s4327_s30, %s4320_s24 }
  0x27   : > { %p4324_p4 = pneg %p4323_p3  ;;  %p4330_p10 = por %p4329_p8, %p4328_p6 }
  0x29   : > { %p4331_p11 = pnand %p4330_p10, %p4324_p4 }
  0x2b   : > { %4334 = shalt.err (!%p4331_p11)
}
  0x2c   : > { %s4498_s6 = smov 384   ;;  %s4499_s7 = smov 24  }
  0x2d   : > { %4104 = dma.hbm_to_vmem [thread:$0]  (!%p4581_p5), %s4589_s8, 12288, %s4591_s10, %s4593_s11, %s4498_s6, %s4498_s6, %s4499_s7  }
  0x2e   : > { %s4624_s9 = sadd.s32 4294967295, %s4495_s21   ;;  %p64_p12 = scmp.ne.s32.totalorder %s4487_s19, %s4483_s18 }
  0x2f   : > { %p6039_p9 = scmp.eq.s32.totalorder %s4624_s9, 0  ;;  %p3410_p13 = scmp.ge.s32.totalorder %s4495_s21, 1 }
  0x30   : > { %p174_p0 = scmp.lt.s32.totalorder %s4495_s21, 3  ;;  %s4500_s8 = smov [#allocation4]  }
  0x31   : > { %p4634_p2 = por %p6039_p9, %p64_p12  ;;  %s186_s10 = sshll.u32 %s4500_s8, 4  ;;  %s187_s10 = int_to_ptr.vmem [resolvable:$true] %s186_s10 }
  0x32   : > { %p4638_p3 = pnand %p3410_p13, %p174_p0  ;;  %s4075_s15 = smul.u32 384, %s4578_s27 }
  0x33   : > { %s6213_s12 = scalar_select %p4634_p2, 1, 0 }
  0x34   : > { %s6214_s14 = scalar_select %p4638_p3, 1, 0 }
  0x35   : > { %p4097_p4 = pneg %p4638_p3  ;;  %s4076_s16 = smul.u32 6144, %s4495_s21 }
  0x36   : > { %s4335_s30 = scalar_lea.hbm %s6033_s0, 1024 }
  0x37   : > { %p4647_p6 = pnand %p4097_p4, %p6039_p9  ;;  %s4655_s24 = scalar_lea.hbm %s6035_s2, %s4076_s16 }
  0x38   : > { %p4336_p8 = scmp.ne.s32.totalorder %s6033_s0, %s4335_s30  ;;  %p4342_p13 = scmp.lt.u32.totalorder %s4335_s30, %s6033_s0 }
  0x39   : > { %p4337_p10 = pneg %p4647_p6 }
  0x3b   : > { %p4338_p11 = pnand %p4337_p10, %p4336_p8 }
  0x3d   : > { %p4339_p12 = pneg %p4338_p11 }
  0x3f   : > { %p4344_p0 = pnand %p4342_p13, %p4339_p12 }
  0x41   : > { %4347 = shalt.err (!%p4344_p0)
}
  0x42   : > { %s4348_s16 = scalar_lea.vmem %s187_s10, 1024  ;;  %p4356_p2 = scmp.lt.s32.totalorder %s187_s10, %s187_s10 }
  0x43   : > { %p4349_p4 = scmp.ne.s32.totalorder %s187_s10, %s4348_s16  ;;  %p4357_p3 = scmp.lt.s32.totalorder %s4348_s16, %s4348_s16 }
  0x45   : > { %p4351_p1 = pnand %p4349_p4, %p4337_p10  ;;  %p4358_p5 = por %p4357_p3, %p4356_p2 }
  0x47   : > { %p4352_p9 = pneg %p4351_p1 }
  0x49   : > { %p4359_p7 = pnand %p4358_p5, %p4352_p9 }
  0x4b   : > { %4362 = shalt.err (!%p4359_p7)
}
  0x4c   : > { %s4501_s17 = smov 256   ;;  %s4502_s1 = smov 16  }
  0x4d   : > { %4100 = dma.hbm_to_vmem [thread:$0]  (!%p4647_p6), %s6033_s0, 1024, %s187_s10, [#allocation5], %s4501_s17, %s4501_s17, %s4502_s1  }
  0x4e   : > { %s225_s28 = scalar_lea.vmem [#allocation9], %s4075_s15  ;;  %s4077_s6 = smul.u32 6, %s4578_s27 }
  0x4f   : > { %s232_s30 = sshll.u32 %s225_s28, 4  ;;  %s4363_s7 = scalar_lea.hbm %s4655_s24, 6144  ;;  %s4673_s30 = int_to_ptr.vmem [resolvable:$true] %s232_s30 }
  0x50   : > { %p4364_p5 = scmp.ne.s32.totalorder %s4655_s24, %s4363_s7  ;;  %p6216_p7 = scmp.ne.s32.totalorder %s6212_s13, 0 }
  0x51   : > { %s4368_s25 = scalar_lea.hbm %s6035_s2, 12288  ;;  %p4369_p2 = scmp.lt.u32.totalorder %s4655_s24, %s6035_s2 }
  0x52   : > { %p4366_p9 = pnand %p4364_p5, %p6216_p7  ;;  %p4370_p3 = scmp.lt.u32.totalorder %s4368_s25, %s4363_s7 }
  0x53   : > { %p4372_p8 = scmp.lt.u32.totalorder %s4363_s7, %s4655_s24 }
  0x54   : > { %p4367_p1 = pneg %p4366_p9  ;;  %p4371_p6 = por %p4370_p3, %p4369_p2 }
  0x56   : > { %p4373_p10 = por %p4372_p8, %p4371_p6 }
  0x58   : > { %p4374_p11 = pnand %p4373_p10, %p4367_p1 }
  0x5a   : > { %4377 = shalt.err (!%p4374_p11)
}
  0x5b   : > { %s4378_s10 = scalar_lea.vmem %s4673_s30, 6144  ;;  %s4503_s15 = smov [#allocation9]  }
  0x5c   : > { %p4379_p12 = scmp.ne.s32.totalorder %s4673_s30, %s4378_s10  ;;  %s4383_s17 = sshll.u32 %s4503_s15, 4  ;;  %s4384_s17 = int_to_ptr.vmem [resolvable:$false] %s4383_s17 }
  0x5d   : > { %s4385_s20 = scalar_lea.vmem %s4384_s17, 12288  ;;  %p4386_p4 = scmp.lt.s32.totalorder %s4673_s30, %s4384_s17 }
  0x5e   : > { %p4381_p13 = pnand %p4379_p12, %p6216_p7  ;;  %p4387_p5 = scmp.lt.s32.totalorder %s4385_s20, %s4378_s10 }
  0x60   : > { %p4382_p0 = pneg %p4381_p13  ;;  %p4388_p9 = por %p4387_p5, %p4386_p4 }
  0x62   : > { %p4389_p2 = pnand %p4388_p9, %p4382_p0 }
  0x64   : > { %4392 = shalt.err (!%p4389_p2)
}
  0x65   : > { %s4504_s25 = smov 192   ;;  %s4505_s1 = smov 12  }
  0x66   : > { %p6217_p1 = scmp.ne.s32.totalorder %s6210_s29, 0  ;;  %s4078_s23 = smul.u32 96, %s4495_s21 }
  0x67   : > { %s246_s26 = scalar_lea.vmem [#allocation10], %s4077_s6  ;;  %s243_s18 = scalar_lea.sflag [#allocation11], %s4578_s27 }
  0x68   : > { %4107 = dma.hbm_to_vmem [thread:$0]  (!%p6217_p1), %s4655_s24, 6144, %s4673_s30, %s4593_s11, %s4504_s25, %s4504_s25, %s4505_s1  }
  0x69   : > { %s254_s28 = sshll.u32 %s246_s26, 4  ;;  %s4704_s16 = scalar_lea.hbm %s6036_s3, %s4078_s23  ;;  %s255_s28 = int_to_ptr.vmem [resolvable:$true] %s254_s28 }
  0x6a   : > { %s4393_s10 = scalar_lea.hbm %s4704_s16, 96  ;;  %s4398_s24 = scalar_lea.hbm %s6036_s3, 192 }
  0x6b   : > { %p4394_p3 = scmp.ne.s32.totalorder %s4704_s16, %s4393_s10  ;;  %p4399_p10 = scmp.lt.u32.totalorder %s4704_s16, %s6036_s3 }
  0x6c   : > { %p4400_p11 = scmp.lt.u32.totalorder %s4398_s24, %s4393_s10  ;;  %p4402_p13 = scmp.lt.u32.totalorder %s4393_s10, %s4704_s16 }
  0x6d   : > { %p4396_p6 = pnand %p4394_p3, %p6216_p7 }
  0x6e   : > { %p4401_p12 = por %p4400_p11, %p4399_p10 }
  0x6f   : > { %p4397_p8 = pneg %p4396_p6 }
  0x70   : > { %p4403_p0 = por %p4402_p13, %p4401_p12 }
  0x72   : > { %p4404_p4 = pnand %p4403_p0, %p4397_p8 }
  0x74   : > { %4407 = shalt.err (!%p4404_p4)
}
  0x75   : > { %s4408_s27 = scalar_lea.vmem %s255_s28, 96  ;;  %s4506_s15 = smov [#allocation10]  }
  0x76   : > { %p4409_p5 = scmp.ne.s32.totalorder %s255_s28, %s4408_s27  ;;  %s4413_s17 = sshll.u32 %s4506_s15, 4  ;;  %s4414_s17 = int_to_ptr.vmem [resolvable:$false] %s4413_s17 }
  0x77   : > { %s4415_s20 = scalar_lea.vmem %s4414_s17, 192  ;;  %p4416_p3 = scmp.lt.s32.totalorder %s255_s28, %s4414_s17 }
  0x78   : > { %p4411_p9 = pnand %p4409_p5, %p6216_p7  ;;  %p4417_p6 = scmp.lt.s32.totalorder %s4415_s20, %s4408_s27 }
  0x7a   : > { %p4412_p2 = pneg %p4411_p9  ;;  %p4418_p1 = por %p4417_p6, %p4416_p3 }
  0x7c   : > { %p4419_p10 = pnand %p4418_p1, %p4412_p2 }
  0x7e   : > { %4422 = shalt.err (!%p4419_p10)
}
  0x7f   : > { %p6218_p11 = scmp.ne.s32.totalorder %s6210_s29, 0  ;;  %p6219_p8 = scmp.ne.s32.totalorder %s6214_s14, 0 }
  0x81   : > { %4110 = dma.hbm_to_vmem [thread:$0]  (!%p6218_p11), %s4704_s16, 96, %s255_s28, %s243_s18  }
  0x82   : > { %270 = sbr.rel (%p6219_p8) target bundleno = 2021 (0x7e5), region = 40 }
  0x89   : > { %p6220_p12 = scmp.eq.s32.totalorder %s4624_s9, 0 }
  0x8b   : > { %4466 = dma.done.wait (%p6220_p12), [#allocation5], 1024   ;;  %p6221_p7 = pmov %p6220_p12 }
  0x8c   : > { %s276_s13 = sand.u32 1, %s4624_s9   ;;  %s278_s25 = sand.u32 1, %s4487_s19  }
  0x8d   : > { %4468 = vsyncadd (%p6221_p7), [#allocation5], 4294966272  ;;  %s4079_s1 = smul.u32 768, %s278_s25  ;;  %s277_s23 = scalar_lea.sflag [#allocation8], %s276_s13 }
  0x8e   : > { %p6222_p1 = scmp.ne.s32.totalorder %s6213_s12, 0 }
  0x8f   : > { %s4732_s26 = scalar_lea.vmem [#allocation7], %s4079_s1 }
  0x90   : > { %4470 = dma.done.wait (%p6222_p1), %s277_s23, 18432  }
  0x91   : > { %4472 = vsyncadd (%p6222_p1), %s277_s23, 4294948864  ;;  %s4080_s29 = smul.u32 384, %s278_s25  ;;  %s295_s7 = scalar_lea.sflag [#allocation11], %s278_s25 }
  0x92   : > { %s4081_s14 = smul.u32 6, %s278_s25 }
  0x93   : > { %s4738_s28 = scalar_lea.vmem [#allocation9], %s4080_s29 }
  0x94   : > { %s4740_s8 = scalar_lea.vmem [#allocation10], %s4081_s14 }
  0x95   : > { %4474 = dma.done.wait (%p6222_p1), %s295_s7, 96  }
  0x96   : > { %4476 = vsyncadd (%p6222_p1), %s295_s7, 4294967200  ;;  %p334_p13 = scmp.lt.s32.totalorder %s4624_s9, 1  ;;  %v4754_v0 = vld [vmem:[%s4732_s26] sm:$0xff]  ;;  %v4757_v1 = vld [vmem:[%s4732_s26 + $0x8] sm:$0xff]  ;;  %p6285_p0 = scmp.ne.s32.totalorder %s4624_s9, 0 }
  0x97   : > { %6223 = vst [vmem:[#allocation19_spill] sm:$0xff] %v4757_v1  ;;  %v4760_v2 = vld [vmem:[%s4732_s26 + $0x10] sm:$0xff]  ;;  %v4763_v3 = vld [vmem:[%s4732_s26 + $0x18] sm:$0xff]  ;;  %v4766_v4 = vld [vmem:[%s4732_s26 + $0x20] sm:$0xff] }
  0x98   : > { %s335_s16 = scalar_select %p334_p13, %s4624_s9, 1  ;;  %6224 = vst [vmem:[#allocation20_spill] sm:$0xff] %v4760_v2  ;;  %6225 = vst [vmem:[#allocation21_spill] sm:$0xff] %v4766_v4  ;;  %v4769_v5 = vld [vmem:[%s4732_s26 + $0x28] sm:$0xff]  ;;  %v4772_v6 = vld [vmem:[%s4732_s26 + $0x30] sm:$0xff] }
  0x99   : > { %6226 = vst [vmem:[#allocation22_spill] sm:$0xff] %v4769_v5  ;;  %v4775_v7 = vld [vmem:[%s4732_s26 + $0x38] sm:$0xff]  ;;  %v4778_v8 = vld [vmem:[%s4732_s26 + $0x40] sm:$0xff]  ;;  %v4781_v9 = vld [vmem:[%s4732_s26 + $0x48] sm:$0xff] }
  0x9a   : > { %s4082_s12 = smul.u32 6, %s335_s16  ;;  %6227 = vst [vmem:[#allocation23_spill] sm:$0xff] %v4778_v8  ;;  %v4784_v10 = vld [vmem:[%s4732_s26 + $0x50] sm:$0xff]  ;;  %v4787_v11 = vld [vmem:[%s4732_s26 + $0x58] sm:$0xff]  ;;  %v4790_v12 = vld [vmem:[%s4732_s26 + $0x60] sm:$0xff] }
  0x9b   : > { %6228 = vst [vmem:[#allocation24_spill] sm:$0xff] %v4787_v11  ;;  %v4793_v13 = vld [vmem:[%s4732_s26 + $0x68] sm:$0xff]  ;;  %v4796_v14 = vld [vmem:[%s4732_s26 + $0x70] sm:$0xff]  ;;  %v4799_v15 = vld [vmem:[%s4732_s26 + $0x78] sm:$0xff] }
  0x9c   : > { %s4751_s21 = scalar_lea.vmem %s6037_s4, %s4082_s12  ;;  %6229 = vst [vmem:[#allocation25_spill] sm:$0xff] %v4796_v14  ;;  %v4802_v16 = vld [vmem:[%s4732_s26 + $0x80] sm:$0xff]  ;;  %v4805_v17 = vld [vmem:[%s4732_s26 + $0x88] sm:$0xff]  ;;  %v4808_v18 = vld [vmem:[%s4732_s26 + $0x90] sm:$0xff] }
  0x9d   : > { %6230 = vst [vmem:[#allocation26_spill] sm:$0xff] %v4805_v17  ;;  %v4811_v19 = vld [vmem:[%s4732_s26 + $0x98] sm:$0xff]  ;;  %v4814_v20 = vld [vmem:[%s4732_s26 + $0xa0] sm:$0xff]  ;;  %v4817_v21 = vld [vmem:[%s4732_s26 + $0xa8] sm:$0xff] }
  0x9e   : > { %6231 = vst [vmem:[#allocation27_spill] sm:$0xff] %v4811_v19  ;;  %6232 = vst [vmem:[#allocation28_spill] sm:$0xff] %v4814_v20  ;;  %v4820_v22 = vld [vmem:[%s4732_s26 + $0xb0] sm:$0xff]  ;;  %v4823_v23 = vld [vmem:[%s4732_s26 + $0xb8] sm:$0xff] }
  0x9f   : > { %6233 = vst [vmem:[#allocation29_spill] sm:$0xff] %v4823_v23  ;;  %v4826_v24 = vld [vmem:[%s4732_s26 + $0xc0] sm:$0xff]  ;;  %v4829_v25 = vld [vmem:[%s4732_s26 + $0xc8] sm:$0xff]  ;;  %v4832_v26 = vld [vmem:[%s4732_s26 + $0xd0] sm:$0xff] }
  0xa0   : > { %6234 = vst [vmem:[#allocation30_spill] sm:$0xff] %v4832_v26  ;;  %v4835_v27 = vld [vmem:[%s4732_s26 + $0xd8] sm:$0xff]  ;;  %v4838_v28 = vld [vmem:[%s4732_s26 + $0xe0] sm:$0xff]  ;;  %v4841_v29 = vld [vmem:[%s4732_s26 + $0xe8] sm:$0xff] }
  0xa1   : > { %6235 = vst [vmem:[#allocation31_spill] sm:$0xff] %v4841_v29  ;;  %v4844_v30 = vld [vmem:[%s4732_s26 + $0xf0] sm:$0xff]  ;;  %v4847_v31 = vld [vmem:[%s4732_s26 + $0xf8] sm:$0xff]  ;;  %v4850_v32 = vld [vmem:[%s4732_s26 + $0x100] sm:$0xff] }
  0xa2   : > { %6236 = vst [vmem:[#allocation32_spill] sm:$0xff] %v4850_v32  ;;  %v4853_v33 = vld [vmem:[%s4732_s26 + $0x108] sm:$0xff]  ;;  %v4856_v34 = vld [vmem:[%s4732_s26 + $0x110] sm:$0xff]  ;;  %v4859_v35 = vld [vmem:[%s4732_s26 + $0x118] sm:$0xff] }
  0xa3   : > { %6237 = vst [vmem:[#allocation33_spill] sm:$0xff] %v4859_v35  ;;  %v4862_v36 = vld [vmem:[%s4732_s26 + $0x120] sm:$0xff]  ;;  %v4865_v37 = vld [vmem:[%s4732_s26 + $0x128] sm:$0xff]  ;;  %v4868_v38 = vld [vmem:[%s4732_s26 + $0x130] sm:$0xff] }
  0xa4   : > { %6238 = vst [vmem:[#allocation34_spill] sm:$0xff] %v4868_v38  ;;  %v4871_v39 = vld [vmem:[%s4732_s26 + $0x138] sm:$0xff]  ;;  %v4874_v40 = vld [vmem:[%s4732_s26 + $0x140] sm:$0xff]  ;;  %v4877_v41 = vld [vmem:[%s4732_s26 + $0x148] sm:$0xff] }
  0xa5   : > { %6239 = vst [vmem:[#allocation35_spill] sm:$0xff] %v4877_v41  ;;  %v4880_v42 = vld [vmem:[%s4732_s26 + $0x150] sm:$0xff]  ;;  %v4883_v43 = vld [vmem:[%s4732_s26 + $0x158] sm:$0xff]  ;;  %v4886_v44 = vld [vmem:[%s4732_s26 + $0x160] sm:$0xff] }
  0xa6   : > { %6240 = vst [vmem:[#allocation36_spill] sm:$0xff] %v4886_v44  ;;  %v4889_v45 = vld [vmem:[%s4732_s26 + $0x168] sm:$0xff]  ;;  %v4892_v46 = vld [vmem:[%s4732_s26 + $0x170] sm:$0xff]  ;;  %v4895_v47 = vld [vmem:[%s4732_s26 + $0x178] sm:$0xff] }
  0xa7   : > { %6241 = vst [vmem:[#allocation37_spill] sm:$0xff] %v4895_v47  ;;  %v4898_v48 = vld [vmem:[%s4732_s26 + $0x180] sm:$0xff]  ;;  %v4901_v49 = vld [vmem:[%s4732_s26 + $0x188] sm:$0xff]  ;;  %v4904_v50 = vld [vmem:[%s4732_s26 + $0x190] sm:$0xff] }
  0xa8   : > { %6242 = vst [vmem:[#allocation38_spill] sm:$0xff] %v4904_v50  ;;  %v4907_v51 = vld [vmem:[%s4732_s26 + $0x198] sm:$0xff]  ;;  %v4910_v52 = vld [vmem:[%s4732_s26 + $0x1a0] sm:$0xff]  ;;  %v4913_v53 = vld [vmem:[%s4732_s26 + $0x1a8] sm:$0xff] }
  0xa9   : > { %6243 = vst [vmem:[#allocation39_spill] sm:$0xff] %v4913_v53  ;;  %v4916_v54 = vld [vmem:[%s4732_s26 + $0x1b0] sm:$0xff]  ;;  %v4919_v55 = vld [vmem:[%s4732_s26 + $0x1b8] sm:$0xff]  ;;  %v4922_v56 = vld [vmem:[%s4732_s26 + $0x1c0] sm:$0xff] }
  0xaa   : > { %6244 = vst [vmem:[#allocation40_spill] sm:$0xff] %v4919_v55  ;;  %6245 = vst [vmem:[#allocation41_spill] sm:$0xff] %v4922_v56  ;;  %v4925_v57 = vld [vmem:[%s4732_s26 + $0x1c8] sm:$0xff]  ;;  %v4928_v58 = vld [vmem:[%s4732_s26 + $0x1d0] sm:$0xff] }
  0xab   : > { %6246 = vst [vmem:[#allocation42_spill] sm:$0xff] %v4928_v58  ;;  %v4931_v59 = vld [vmem:[%s4732_s26 + $0x1d8] sm:$0xff]  ;;  %v4934_v60 = vld [vmem:[%s4732_s26 + $0x1e0] sm:$0xff]  ;;  %v4937_v61 = vld [vmem:[%s4732_s26 + $0x1e8] sm:$0xff] }
  0xac   : > { %6247 = vst [vmem:[#allocation43_spill] sm:$0xff] %v4931_v59  ;;  %6248 = vst [vmem:[#allocation44_spill] sm:$0xff] %v4934_v60  ;;  %v4940_v62 = vld [vmem:[%s4732_s26 + $0x1f0] sm:$0xff]  ;;  %v4943_v63 = vld [vmem:[%s4732_s26 + $0x1f8] sm:$0xff] }
  0xad   : > { %6249 = vst [vmem:[#allocation45_spill] sm:$0xff] %v4937_v61  ;;  %6250 = vst [vmem:[#allocation46_spill] sm:$0xff] %v4940_v62  ;;  %v4946_v56 = vld [vmem:[%s4732_s26 + $0x200] sm:$0xff]  ;;  %v4949_v50 = vld [vmem:[%s4732_s26 + $0x208] sm:$0xff] }
  0xae   : > { %6251 = vst [vmem:[#allocation47_spill] sm:$0xff] %v4943_v63  ;;  %6252 = vst [vmem:[#allocation48_spill] sm:$0xff] %v4946_v56  ;;  %v4952_v59 = vld [vmem:[%s4732_s26 + $0x210] sm:$0xff]  ;;  %v4955_v53 = vld [vmem:[%s4732_s26 + $0x218] sm:$0xff] }
  0xaf   : > { %6253 = vst [vmem:[#allocation49_spill] sm:$0xff] %v4949_v50  ;;  %6254 = vst [vmem:[#allocation50_spill] sm:$0xff] %v4952_v59  ;;  %v4958_v44 = vld [vmem:[%s4732_s26 + $0x220] sm:$0xff]  ;;  %v4961_v62 = vld [vmem:[%s4732_s26 + $0x228] sm:$0xff] }
  0xb0   : > { %6255 = vst [vmem:[#allocation51_spill] sm:$0xff] %v4955_v53  ;;  %6256 = vst [vmem:[#allocation52_spill] sm:$0xff] %v4958_v44  ;;  %v4964_v47 = vld [vmem:[%s4732_s26 + $0x230] sm:$0xff]  ;;  %v4967_v38 = vld [vmem:[%s4732_s26 + $0x238] sm:$0xff] }
  0xb1   : > { %6257 = vst [vmem:[#allocation53_spill] sm:$0xff] %v4961_v62  ;;  %6258 = vst [vmem:[#allocation54_spill] sm:$0xff] %v4964_v47  ;;  %v4970_v50 = vld [vmem:[%s4732_s26 + $0x240] sm:$0xff]  ;;  %v4973_v41 = vld [vmem:[%s4732_s26 + $0x248] sm:$0xff] }
  0xb2   : > { %6259 = vst [vmem:[#allocation55_spill] sm:$0xff] %v4967_v38  ;;  %6260 = vst [vmem:[#allocation56_spill] sm:$0xff] %v4970_v50  ;;  %v4976_v32 = vld [vmem:[%s4732_s26 + $0x250] sm:$0xff]  ;;  %v4979_v44 = vld [vmem:[%s4732_s26 + $0x258] sm:$0xff] }
  0xb3   : > { %6261 = vst [vmem:[#allocation57_spill] sm:$0xff] %v4973_v41  ;;  %6262 = vst [vmem:[#allocation58_spill] sm:$0xff] %v4976_v32  ;;  %v4982_v35 = vld [vmem:[%s4732_s26 + $0x260] sm:$0xff]  ;;  %v4985_v26 = vld [vmem:[%s4732_s26 + $0x268] sm:$0xff] }
  0xb4   : > { %6263 = vst [vmem:[#allocation59_spill] sm:$0xff] %v4979_v44  ;;  %6264 = vst [vmem:[#allocation60_spill] sm:$0xff] %v4982_v35  ;;  %v4988_v38 = vld [vmem:[%s4732_s26 + $0x270] sm:$0xff]  ;;  %v4991_v29 = vld [vmem:[%s4732_s26 + $0x278] sm:$0xff] }
  0xb5   : > { %6265 = vst [vmem:[#allocation61_spill] sm:$0xff] %v4985_v26  ;;  %6266 = vst [vmem:[#allocation62_spill] sm:$0xff] %v4988_v38  ;;  %v4994_v20 = vld [vmem:[%s4732_s26 + $0x280] sm:$0xff]  ;;  %v4997_v32 = vld [vmem:[%s4732_s26 + $0x288] sm:$0xff] }
  0xb6   : > { %6267 = vst [vmem:[#allocation63_spill] sm:$0xff] %v4991_v29  ;;  %6268 = vst [vmem:[#allocation64_spill] sm:$0xff] %v4994_v20  ;;  %v5000_v23 = vld [vmem:[%s4732_s26 + $0x290] sm:$0xff]  ;;  %v5003_v14 = vld [vmem:[%s4732_s26 + $0x298] sm:$0xff] }
  0xb7   : > { %6269 = vst [vmem:[#allocation65_spill] sm:$0xff] %v4997_v32  ;;  %6270 = vst [vmem:[#allocation66_spill] sm:$0xff] %v5000_v23  ;;  %v5006_v17 = vld [vmem:[%s4732_s26 + $0x2a0] sm:$0xff]  ;;  %v5009_v8 = vld [vmem:[%s4732_s26 + $0x2a8] sm:$0xff] }
  0xb8   : > { %6271 = vst [vmem:[#allocation67_spill] sm:$0xff] %v5003_v14  ;;  %6272 = vst [vmem:[#allocation68_spill] sm:$0xff] %v5006_v17  ;;  %v5012_v26 = vld [vmem:[%s4732_s26 + $0x2b0] sm:$0xff]  ;;  %v5015_v11 = vld [vmem:[%s4732_s26 + $0x2b8] sm:$0xff]  ;;  %439 = sbr.rel (%p6285_p0) target bundleno = 537 (0x219), region = 60 }
  0xb9   : > { %6273 = vst [vmem:[#allocation69_spill] sm:$0xff] %v5009_v8  ;;  %6274 = vst [vmem:[#allocation70_spill] sm:$0xff] %v5012_v26  ;;  %v5018_v2 = vld [vmem:[%s4732_s26 + $0x2c0] sm:$0xff]  ;;  %v5021_v5 = vld [vmem:[%s4732_s26 + $0x2c8] sm:$0xff]  ;;  %v3420_v26 = vcombine.high (!%p6285_p0), %v4754_v0, %v4763_v3 }
  0xba   : > { %6275 = vst [vmem:[#allocation71_spill] sm:$0xff] %v5015_v11  ;;  %6276 = vst [vmem:[#allocation72_spill] sm:$0xff] %v5018_v2  ;;  %v5024_v20 = vld [vmem:[%s4732_s26 + $0x2d0] sm:$0xff]  ;;  %v5027_v29 = vld [vmem:[%s4732_s26 + $0x2d8] sm:$0xff] }
  0xbb   : > { %6277 = vst [vmem:[#allocation73_spill] sm:$0xff] %v5021_v5  ;;  %6278 = vst [vmem:[#allocation74_spill] sm:$0xff] %v5024_v20  ;;  %v5030_v38 = vld [vmem:[%s4732_s26 + $0x2e0] sm:$0xff]  ;;  %v5033_v23 = vld [vmem:[%s4732_s26 + $0x2e8] sm:$0xff]  ;;  %v3422_v5 = vcombine.high (!%p6285_p0), %v4757_v1, %v4766_v4  ;;  %963 = vmatprep.subr.bf16.mxu0 (!%p6285_p0), %v3420_v26  ;;  %v3427_v20 = vcombine.low (!%p6285_p0), %v4775_v7, %v4784_v10  ;;  %v3433_v26 = vcombine.low (!%p6285_p0), %v4793_v13, %v4802_v16 }
  0xbc   : > { %6279 = vst [vmem:[#allocation75_spill] sm:$0xff] %v5027_v29  ;;  %6280 = vst [vmem:[#allocation76_spill] sm:$0xff] %v5030_v38  ;;  %v5036_v14 = vld [vmem:[%s4732_s26 + $0x2f0] sm:$0xff]  ;;  %v5039_v17 = vld [vmem:[%s4732_s26 + $0x2f8] sm:$0xff]  ;;  %v3419_v38 = vcombine.low (!%p6285_p0), %v4754_v0, %v4763_v3  ;;  %v3421_v29 = vcombine.low (!%p6285_p0), %v4757_v1, %v4766_v4  ;;  %v3432_v1 = vcombine.high (!%p6285_p0), %v4790_v12, %v4799_v15 }
  0xbd   : > { %6281 = vst [vmem:[#allocation77_spill] sm:$0xff] %v5033_v23  ;;  %6282 = vst [vmem:[#allocation78_spill] sm:$0xff] %v5036_v14  ;;  %v5042_v8 = vld [vmem:[%s4740_s8] sm:$0x3f]  ;;  %1016 = vmatprep.subr.bf16.mxu1 (!%p6285_p0), %v3422_v5  ;;  %v3425_v14 = vcombine.low (!%p6285_p0), %v4772_v6, %v4781_v9  ;;  %v3434_v4 = vcombine.high (!%p6285_p0), %v4793_v13, %v4802_v16  ;;  %v3431_v5 = vcombine.low (!%p6285_p0), %v4790_v12, %v4799_v15 }
  0xbe   : > { %6283 = vst [vmem:[#allocation79_spill] sm:$0xff] %v5039_v17  ;;  %6284 = vst [vmem:[#allocation80_spill] sm:$0xff] %v5042_v8  ;;  %v3426_v17 = vcombine.high (!%p6285_p0), %v4772_v6, %v4781_v9  ;;  %v3428_v8 = vcombine.high (!%p6285_p0), %v4775_v7, %v4784_v10  ;;  %964 = vmatpush1.bf16.msra.mxu0 (!%p6285_p0), %v3419_v38  ;;  %1017 = vmatpush1.bf16.msra.mxu1 (!%p6285_p0), %v3421_v29 }
  0xbf   : > { %v3443_v29 = vcombine.low %v4826_v24, %v4835_v27  ;;  %v3445_v38 = vcombine.low %v4829_v25, %v4838_v28 }
  0xc0   : > { %965 = vmatprep.subr.bf16.mxu0 %v3426_v17  ;;  %1018 = vmatprep.subr.bf16.mxu1 %v3428_v8  ;;  %v3438_v17 = vcombine.high %v4808_v18, %v4817_v21  ;;  %v3440_v8 = vcombine.high %v4811_v19, %v4820_v22 }
  0xc2   : > { %966 = vmatpush1.bf16.msra.mxu0 %v3425_v14  ;;  %1019 = vmatpush1.bf16.msra.mxu1 %v3427_v20  ;;  %v3437_v14 = vcombine.low %v4808_v18, %v4817_v21  ;;  %v3439_v20 = vcombine.low %v4811_v19, %v4820_v22 }
  0xc3   : > { %967 = vmatprep.subr.bf16.mxu0 %v3432_v1  ;;  %1020 = vmatprep.subr.bf16.mxu1 %v3434_v4  ;;  %v3444_v1 = vcombine.high %v4826_v24, %v4835_v27  ;;  %v3446_v4 = vcombine.high %v4829_v25, %v4838_v28 }
  0xc6   : > { %968 = vmatpush1.bf16.msra.mxu0 %v3431_v5  ;;  %1021 = vmatpush1.bf16.msra.mxu1 %v3433_v26  ;;  %v441_v5 = vld [vmem:[#allocation4 + $0x8] sm:$0xff]  ;;  %v443_v26 = vld [vmem:[#allocation4 + $0x18] sm:$0xff] }
  0xc7   : > { %969 = vmatprep.subr.bf16.mxu0 %v3438_v17  ;;  %1022 = vmatprep.subr.bf16.mxu1 %v3440_v8  ;;  %v3450_v17 = vcombine.high %v4844_v30, %v4853_v33  ;;  %v3452_v8 = vcombine.high %v4847_v31, %v4856_v34  ;;  %v5090_v19 = vpack.c.bf16 %v443_v26, %v441_v5 }
  0xc8   : > { %v3462_v5 = vcombine.high %v4880_v42, %v4889_v45  ;;  %v3464_v26 = vcombine.high %v4883_v43, %v4892_v46 }
  0xc9   : > { %995 = vmatprep.mubr.bf16.mxu0 %v5090_v19  ;;  %1048 = vmatprep.mubr.bf16.mxu1 %v5090_v19 }
  0xca   : > { %970 = vmatpush1.bf16.msra.mxu0 %v3437_v14  ;;  %1023 = vmatpush1.bf16.msra.mxu1 %v3439_v20  ;;  %v3449_v14 = vcombine.low %v4844_v30, %v4853_v33  ;;  %v3451_v20 = vcombine.low %v4847_v31, %v4856_v34 }
  0xcb   : > { %971 = vmatprep.subr.bf16.mxu0 %v3444_v1  ;;  %1024 = vmatprep.subr.bf16.mxu1 %v3446_v4  ;;  %v3456_v1 = vcombine.high %v4862_v36, %v4871_v39  ;;  %v3458_v4 = vcombine.high %v4865_v37, %v4874_v40 }
  0xce   : > { %972 = vmatpush1.bf16.msra.mxu0 %v3443_v29  ;;  %1025 = vmatpush1.bf16.msra.mxu1 %v3445_v38  ;;  %v3455_v29 = vcombine.low %v4862_v36, %v4871_v39  ;;  %v3457_v38 = vcombine.low %v4865_v37, %v4874_v40 }
  0xcf   : > { %973 = vmatprep.subr.bf16.mxu0 %v3450_v17  ;;  %1026 = vmatprep.subr.bf16.mxu1 %v3452_v8  ;;  %v3461_v17 = vcombine.low %v4880_v42, %v4889_v45  ;;  %v3463_v8 = vcombine.low %v4883_v43, %v4892_v46 }
  0xd2   : > { %974 = vmatpush1.bf16.msra.mxu0 %v3449_v14  ;;  %1027 = vmatpush1.bf16.msra.mxu1 %v3451_v20  ;;  %v3468_v14 = vcombine.high %v4898_v48, %v4907_v51  ;;  %v3470_v20 = vcombine.high %v4901_v49, %v4910_v52 }
  0xd3   : > { %975 = vmatprep.subr.bf16.mxu0 %v3456_v1  ;;  %1028 = vmatprep.subr.bf16.mxu1 %v3458_v4  ;;  %v3467_v1 = vcombine.low %v4898_v48, %v4907_v51  ;;  %v3469_v4 = vcombine.low %v4901_v49, %v4910_v52 }
  0xd6   : > { %976 = vmatpush1.bf16.msra.mxu0 %v3455_v29  ;;  %1029 = vmatpush1.bf16.msra.mxu1 %v3457_v38  ;;  %v3474_v29 = vcombine.high %v4916_v54, %v4925_v57  ;;  %v3476_v38 = vcombine.high %v4919_v55, %v4928_v58 }
  0xd7   : > { %977 = vmatprep.subr.bf16.mxu0 %v3462_v5  ;;  %1030 = vmatprep.subr.bf16.mxu1 %v3464_v26  ;;  %v3473_v5 = vcombine.low %v4916_v54, %v4925_v57  ;;  %v3475_v26 = vcombine.low %v4919_v55, %v4928_v58 }
  0xda   : > { %978 = vmatpush1.bf16.msra.mxu0 %v3461_v17  ;;  %1031 = vmatpush1.bf16.msra.mxu1 %v3463_v8  ;;  %v3480_v17 = vcombine.high %v4934_v60, %v4943_v63  ;;  %v3482_v8 = vcombine.high %v4937_v61, %v4946_v56 }
  0xdb   : > { %979 = vmatprep.subr.bf16.mxu0 %v3468_v14  ;;  %1032 = vmatprep.subr.bf16.mxu1 %v3470_v20  ;;  %v3479_v14 = vcombine.low %v4934_v60, %v4943_v63  ;;  %v3481_v20 = vcombine.low %v4937_v61, %v4946_v56 }
  0xde   : > { %980 = vmatpush1.bf16.msra.mxu0 %v3467_v1  ;;  %1033 = vmatpush1.bf16.msra.mxu1 %v3469_v4  ;;  %v3486_v1 = vcombine.high %v4952_v59, %v4961_v62  ;;  %v3488_v4 = vcombine.high %v4955_v53, %v4964_v47 }
  0xdf   : > { %981 = vmatprep.subr.bf16.mxu0 %v3474_v29  ;;  %1034 = vmatprep.subr.bf16.mxu1 %v3476_v38  ;;  %v3485_v29 = vcombine.low %v4952_v59, %v4961_v62  ;;  %v3487_v38 = vcombine.low %v4955_v53, %v4964_v47 }
  0xe2   : > { %982 = vmatpush1.bf16.msra.mxu0 %v3473_v5  ;;  %1035 = vmatpush1.bf16.msra.mxu1 %v3475_v26  ;;  %v3492_v5 = vcombine.high %v4970_v50, %v4979_v44  ;;  %v3494_v26 = vcombine.high %v4973_v41, %v4982_v35 }
  0xe3   : > { %983 = vmatprep.subr.bf16.mxu0 %v3480_v17  ;;  %1036 = vmatprep.subr.bf16.mxu1 %v3482_v8  ;;  %v3491_v17 = vcombine.low %v4970_v50, %v4979_v44  ;;  %v3493_v8 = vcombine.low %v4973_v41, %v4982_v35  ;;  %v6289_v41 = vld [vmem:[#allocation68_spill] sm:$0xff] }
  0xe4   : > { %v447_v50 = vld [vmem:[#allocation4 + $0x38] sm:$0xff] }
  0xe6   : > { %984 = vmatpush1.bf16.msra.mxu0 %v3479_v14  ;;  %1037 = vmatpush1.bf16.msra.mxu1 %v3481_v20  ;;  %v6286_v14 = vld [vmem:[#allocation62_spill] sm:$0xff] }
  0xe7   : > { %985 = vmatprep.subr.bf16.mxu0 %v3486_v1  ;;  %1038 = vmatprep.subr.bf16.mxu1 %v3488_v4  ;;  %v3498_v20 = vcombine.high %v6286_v14, %v4997_v32  ;;  %v6287_v1 = vld [vmem:[#allocation66_spill] sm:$0xff]  ;;  %v6288_v4 = vld [vmem:[#allocation63_spill] sm:$0xff] }
  0xe8   : > { %v3500_v53 = vcombine.high %v6288_v4, %v6287_v1 }
  0xea   : > { %986 = vmatpush1.bf16.msra.mxu0 %v3485_v29  ;;  %1039 = vmatpush1.bf16.msra.mxu1 %v3487_v38  ;;  %v3497_v29 = vcombine.low %v6286_v14, %v4997_v32  ;;  %v3499_v38 = vcombine.low %v6288_v4, %v6287_v1  ;;  %v6291_v14 = vld [vmem:[#allocation74_spill] sm:$0xff]  ;;  %v6293_v1 = vld [vmem:[#allocation75_spill] sm:$0xff] }
  0xeb   : > { %987 = vmatprep.subr.bf16.mxu0 %v3492_v5  ;;  %1040 = vmatprep.subr.bf16.mxu1 %v3494_v26  ;;  %v3504_v5 = vcombine.high %v6289_v41, %v5015_v11  ;;  %v6290_v26 = vld [vmem:[#allocation69_spill] sm:$0xff]  ;;  %v445_v32 = vld [vmem:[#allocation4 + $0x28] sm:$0xff] }
  0xec   : > { %v3506_v35 = vcombine.high %v6290_v26, %v5018_v2 }
  0xee   : > { %988 = vmatpush1.bf16.msra.mxu0 %v3491_v17  ;;  %1041 = vmatpush1.bf16.msra.mxu1 %v3493_v8  ;;  %v3503_v17 = vcombine.low %v6289_v41, %v5015_v11  ;;  %v3505_v8 = vcombine.low %v6290_v26, %v5018_v2  ;;  %v440_v41 = vld [vmem:[#allocation4] sm:$0xff]  ;;  %v442_v11 = vld [vmem:[#allocation4 + $0x10] sm:$0xff] }
  0xef   : > { %989 = vmatprep.subr.bf16.mxu0 %v3498_v20  ;;  %1042 = vmatprep.subr.bf16.mxu1 %v3500_v53  ;;  %v3510_v20 = vcombine.high %v6291_v14, %v5033_v23  ;;  %v6292_v53 = vld [vmem:[#allocation78_spill] sm:$0xff]  ;;  %v5180_v2 = vpack.c.bf16 %v442_v11, %v440_v41 }
  0xf0   : > { %v3512_v4 = vcombine.high %v6293_v1, %v6292_v53 }
  0xf2   : > { %990 = vmatpush1.bf16.msra.mxu0 %v3497_v29  ;;  %1043 = vmatpush1.bf16.msra.mxu1 %v3499_v38  ;;  %v3509_v29 = vcombine.low %v6291_v14, %v5033_v23  ;;  %v3511_v38 = vcombine.low %v6293_v1, %v6292_v53  ;;  %v6297_v14 = vld [vmem:[#allocation23_spill] sm:$0xff]  ;;  %v451_v1 = vpack.c.bf16 %v447_v50, %v445_v32  ;;  %v6300_v50 = vld [vmem:[#allocation29_spill] sm:$0xff] }
  0xf3   : > { %991 = vmatprep.subr.bf16.mxu0 %v3504_v5  ;;  %1044 = vmatprep.subr.bf16.mxu1 %v3506_v35  ;;  %v6294_v5 = vld [vmem:[#allocation22_spill] sm:$0xff]  ;;  %v6295_v35 = vld [vmem:[#allocation20_spill] sm:$0xff] }
  0xf4   : > { %v3424_v26 = vcombine.high %v6295_v35, %v6294_v5 }
  0xf6   : > { %992 = vmatpush1.bf16.msra.mxu0 %v3503_v17  ;;  %1045 = vmatpush1.bf16.msra.mxu1 %v3505_v8  ;;  %v3423_v17 = vcombine.low %v6295_v35, %v6294_v5  ;;  %v6296_v8 = vld [vmem:[#allocation24_spill] sm:$0xff] }
  0xf7   : > { %993 = vmatprep.subr.bf16.mxu0 %v3510_v20  ;;  %1046 = vmatprep.subr.bf16.mxu1 %v3512_v4  ;;  %v3430_v53 = vcombine.high %v6297_v14, %v6296_v8  ;;  %v3429_v11 = vcombine.low %v6297_v14, %v6296_v8  ;;  %v444_v20 = vld [vmem:[#allocation4 + $0x20] sm:$0xff]  ;;  %v446_v4 = vld [vmem:[#allocation4 + $0x30] sm:$0xff] }
  0xf8   : > { %v5192_v5 = vpack.c.bf16 %v446_v4, %v444_v20  ;;  %v6301_v35 = vld [vmem:[#allocation28_spill] sm:$0xff]  ;;  %v6302_v8 = vld [vmem:[#allocation31_spill] sm:$0xff]  ;;  %v6303_v14 = vld [vmem:[#allocation30_spill] sm:$0xff] }
  0xf9   : > { %v6304_v20 = vld [vmem:[#allocation33_spill] sm:$0xff]  ;;  %v6305_v4 = vld [vmem:[#allocation32_spill] sm:$0xff] }
  0xfa   : > { %994 = vmatpush1.bf16.msra.mxu0 %v3509_v29  ;;  %1047 = vmatpush1.bf16.msra.mxu1 %v3511_v38  ;;  %v6298_v29 = vld [vmem:[#allocation26_spill] sm:$0xff]  ;;  %v6299_v38 = vld [vmem:[#allocation25_spill] sm:$0xff] }
  0xfb   : > { %1069 = vmatprep.subr.bf16.mxu0 %v3424_v26  ;;  %4009 = vmatprep.subr.bf16.mxu1 %v3424_v26  ;;  %v3436_v41 = vcombine.high %v6299_v38, %v6298_v29  ;;  %v3435_v32 = vcombine.low %v6299_v38, %v6298_v29  ;;  %v3442_v26 = vcombine.high %v6301_v35, %v6300_v50 }
  0xfc   : > { %v3454_v29 = vcombine.high %v6305_v4, %v6304_v20  ;;  %v3453_v38 = vcombine.low %v6305_v4, %v6304_v20  ;;  %v6312_v20 = vld [vmem:[#allocation43_spill] sm:$0xff]  ;;  %v6313_v4 = vld [vmem:[#allocation41_spill] sm:$0xff] }
  0xfd   : > { %996 = vmatmul.mubr.bf16.vlgmr.msra.gmra.mrb[0].mxu0 %v5180_v2  ;;  %1049 = vmatmul.mubr.bf16.vlgmr.msra.gmra.mrb[0].mxu1 %v5180_v2 }
  0xfe   : > { %1070 = vmatpush1.bf16.msra.mxu0 %v3423_v17  ;;  %4025 = vmatpush1.bf16.msra.mxu1 %v3423_v17  ;;  %v3441_v17 = vcombine.low %v6301_v35, %v6300_v50  ;;  %v6308_v50 = vld [vmem:[#allocation37_spill] sm:$0xff]  ;;  %v6309_v35 = vld [vmem:[#allocation36_spill] sm:$0xff] }
  0xff   : > { %1071 = vmatprep.subr.bf16.mxu0 %v3430_v53  ;;  %4010 = vmatprep.subr.bf16.mxu1 %v3430_v53  ;;  %v3448_v53 = vcombine.high %v6303_v14, %v6302_v8 }
 0x100   : > { %1005 = vmatprep.mubr.bf16.mxu0 %v451_v1  ;;  %1058 = vmatprep.mubr.bf16.mxu1 %v451_v1 }
 0x102   : > { %1072 = vmatpush1.bf16.msra.mxu0 %v3429_v11  ;;  %4026 = vmatpush1.bf16.msra.mxu1 %v3429_v11  ;;  %v3447_v11 = vcombine.low %v6303_v14, %v6302_v8  ;;  %v6310_v8 = vld [vmem:[#allocation39_spill] sm:$0xff]  ;;  %v6311_v14 = vld [vmem:[#allocation38_spill] sm:$0xff] }
 0x103   : > { %1073 = vmatprep.subr.bf16.mxu0 %v3436_v41  ;;  %4011 = vmatprep.subr.bf16.mxu1 %v3436_v41  ;;  %v6306_v41 = vld [vmem:[#allocation35_spill] sm:$0xff] }
 0x105   : > { %1006 = vmatmul.mubr.bf16.gmra.mrb[4].mxu0 %v5192_v5  ;;  %1059 = vmatmul.mubr.bf16.gmra.mrb[4].mxu1 %v5192_v5 }
 0x106   : > { %1074 = vmatpush1.bf16.msra.mxu0 %v3435_v32  ;;  %4027 = vmatpush1.bf16.msra.mxu1 %v3435_v32 }
 0x107   : > { %1075 = vmatprep.subr.bf16.mxu0 %v3442_v26  ;;  %4012 = vmatprep.subr.bf16.mxu1 %v3442_v26  ;;  %v3466_v26 = vcombine.high %v6309_v35, %v6308_v50 }
 0x108   : > { %1101 = vmatprep.mubr.bf16.mxu0 %v5090_v19  ;;  %1111 = vmatprep.mubr.bf16.mxu1 %v451_v1  ;;  %v6307_v19 = vld [vmem:[#allocation34_spill] sm:$0xff] }
 0x109   : > { %v3460_v1 = vcombine.high %v6307_v19, %v6306_v41  ;;  %v3459_v32 = vcombine.low %v6307_v19, %v6306_v41  ;;  %v6314_v41 = vld [vmem:[#allocation49_spill] sm:$0xff]  ;;  %v6315_v19 = vld [vmem:[#allocation46_spill] sm:$0xff] }
 0x10a   : > { %1076 = vmatpush1.bf16.msra.mxu0 %v3441_v17  ;;  %4028 = vmatpush1.bf16.msra.mxu1 %v3441_v17  ;;  %v3465_v17 = vcombine.low %v6309_v35, %v6308_v50  ;;  %v6316_v50 = vld [vmem:[#allocation55_spill] sm:$0xff]  ;;  %v6317_v35 = vld [vmem:[#allocation52_spill] sm:$0xff] }
 0x10b   : > { %1077 = vmatprep.subr.bf16.mxu0 %v3448_v53  ;;  %4013 = vmatprep.subr.bf16.mxu1 %v3448_v53  ;;  %v3472_v53 = vcombine.high %v6311_v14, %v6310_v8 }
 0x10e   : > { %1078 = vmatpush1.bf16.msra.mxu0 %v3447_v11  ;;  %4029 = vmatpush1.bf16.msra.mxu1 %v3447_v11  ;;  %v3471_v11 = vcombine.low %v6311_v14, %v6310_v8  ;;  %v6318_v8 = vld [vmem:[#allocation61_spill] sm:$0xff]  ;;  %v6319_v14 = vld [vmem:[#allocation58_spill] sm:$0xff] }
 0x10f   : > { %1079 = vmatprep.subr.bf16.mxu0 %v3454_v29  ;;  %4014 = vmatprep.subr.bf16.mxu1 %v3454_v29  ;;  %v3478_v29 = vcombine.high %v6313_v4, %v6312_v20 }
 0x112   : > { %1080 = vmatpush1.bf16.msra.mxu0 %v3453_v38  ;;  %4030 = vmatpush1.bf16.msra.mxu1 %v3453_v38  ;;  %v3477_v38 = vcombine.low %v6313_v4, %v6312_v20  ;;  %v6320_v20 = vld [vmem:[#allocation67_spill] sm:$0xff]  ;;  %v6321_v4 = vld [vmem:[#allocation64_spill] sm:$0xff] }
 0x113   : > { %1081 = vmatprep.subr.bf16.mxu0 %v3460_v1  ;;  %4015 = vmatprep.subr.bf16.mxu1 %v3460_v1  ;;  %v3484_v1 = vcombine.high %v6315_v19, %v6314_v41 }
 0x116   : > { %1082 = vmatpush1.bf16.msra.mxu0 %v3459_v32  ;;  %4031 = vmatpush1.bf16.msra.mxu1 %v3459_v32  ;;  %v3483_v32 = vcombine.low %v6315_v19, %v6314_v41  ;;  %v6322_v41 = vld [vmem:[#allocation73_spill] sm:$0xff]  ;;  %v6323_v19 = vld [vmem:[#allocation70_spill] sm:$0xff] }
 0x117   : > { %1083 = vmatprep.subr.bf16.mxu0 %v3466_v26  ;;  %4016 = vmatprep.subr.bf16.mxu1 %v3466_v26  ;;  %v3490_v26 = vcombine.high %v6317_v35, %v6316_v50 }
 0x11a   : > { %1084 = vmatpush1.bf16.msra.mxu0 %v3465_v17  ;;  %4032 = vmatpush1.bf16.msra.mxu1 %v3465_v17  ;;  %v3489_v17 = vcombine.low %v6317_v35, %v6316_v50  ;;  %v6324_v50 = vld [vmem:[#allocation79_spill] sm:$0xff]  ;;  %v6325_v35 = vld [vmem:[#allocation76_spill] sm:$0xff] }
 0x11b   : > { %1085 = vmatprep.subr.bf16.mxu0 %v3472_v53  ;;  %4017 = vmatprep.subr.bf16.mxu1 %v3472_v53  ;;  %v3496_v53 = vcombine.high %v6319_v14, %v6318_v8 }
 0x11e   : > { %1086 = vmatpush1.bf16.msra.mxu0 %v3471_v11  ;;  %4033 = vmatpush1.bf16.msra.mxu1 %v3471_v11  ;;  %v3495_v11 = vcombine.low %v6319_v14, %v6318_v8  ;;  %v453_v8 = vlaneseq }
 0x11f   : > { %1087 = vmatprep.subr.bf16.mxu0 %v3478_v29  ;;  %4018 = vmatprep.subr.bf16.mxu1 %v3478_v29  ;;  %v3502_v29 = vcombine.high %v6321_v4, %v6320_v20 }
 0x120   : > { %v454_v14 = vshrl.u32 %v453_v8, 7 }
 0x122   : > { %1088 = vmatpush1.bf16.msra.mxu0 %v3477_v38  ;;  %4034 = vmatpush1.bf16.msra.mxu1 %v3477_v38  ;;  %v3501_v38 = vcombine.low %v6321_v4, %v6320_v20  ;;  %v459_v20 = vsub.s32 1, %v454_v14  ;;  %v6326_v4 = vld [vmem:[#allocation80_spill] sm:$0xff] }
 0x123   : > { %1089 = vmatprep.subr.bf16.mxu0 %v3484_v1  ;;  %4019 = vmatprep.subr.bf16.mxu1 %v3484_v1  ;;  %v3508_v1 = vcombine.high %v6323_v19, %v6322_v41 }
 0x126   : > { %1090 = vmatpush1.bf16.msra.mxu0 %v3483_v32  ;;  %4035 = vmatpush1.bf16.msra.mxu1 %v3483_v32  ;;  %v3507_v32 = vcombine.low %v6323_v19, %v6322_v41  ;;  %v460_v41 = vrot.slane %v6326_v4, %v459_v20 }
 0x127   : > { %1091 = vmatprep.subr.bf16.mxu0 %v3490_v26  ;;  %4020 = vmatprep.subr.bf16.mxu1 %v3490_v26  ;;  %v3514_v26 = vcombine.high %v6325_v35, %v6324_v50 }
 0x12a   : > { %1092 = vmatpush1.bf16.msra.mxu0 %v3489_v17  ;;  %4036 = vmatpush1.bf16.msra.mxu1 %v3489_v17  ;;  %v3513_v17 = vcombine.low %v6325_v35, %v6324_v50 }
 0x12b   : > { %1093 = vmatprep.subr.bf16.mxu0 %v3496_v53  ;;  %4021 = vmatprep.subr.bf16.mxu1 %v3496_v53  ;;  %v455_v53 = vsub.s32 0, %v454_v14 }
 0x12e   : > { %1094 = vmatpush1.bf16.msra.mxu0 %v3495_v11  ;;  %4037 = vmatpush1.bf16.msra.mxu1 %v3495_v11  ;;  %v463_v11 = vsub.s32 2, %v454_v14 }
 0x12f   : > { %1095 = vmatprep.subr.bf16.mxu0 %v3502_v29  ;;  %4022 = vmatprep.subr.bf16.mxu1 %v3502_v29  ;;  %v456_v29 = vrot.slane %v6326_v4, %v455_v53 }
 0x132   : > { %1096 = vmatpush1.bf16.msra.mxu0 %v3501_v38  ;;  %4038 = vmatpush1.bf16.msra.mxu1 %v3501_v38  ;;  %v464_v38 = vrot.slane %v6326_v4, %v463_v11 }
 0x133   : > { %1097 = vmatprep.subr.bf16.mxu0 %v3508_v1  ;;  %4023 = vmatprep.subr.bf16.mxu1 %v3508_v1 }
 0x136   : > { %1098 = vmatpush1.bf16.msra.mxu0 %v3507_v32  ;;  %4039 = vmatpush1.bf16.msra.mxu1 %v3507_v32 }
 0x137   : > { %1099 = vmatprep.subr.bf16.mxu0 %v3514_v26  ;;  %4024 = vmatprep.subr.bf16.mxu1 %v3514_v26 }
 0x13a   : > { %1100 = vmatpush1.bf16.msra.mxu0 %v3513_v17  ;;  %4040 = vmatpush1.bf16.msra.mxu1 %v3513_v17 }
 0x13d   : > { %1102 = vmatmul.mubr.bf16.vlgmr.msra.gmra.mrb[8].mxu0 %v5180_v2  ;;  %1112 = vmatmul.mubr.bf16.vlgmr.msra.gmra.mrb[8].mxu1 %v5192_v5 }
 0x1d0   : > { %v997_v19 = vpop.f32.mrb[0].mxu0  ;;  %v1050_v1 = vpop.f32.mrb[0].mxu1 }
 0x1d1   : > { %v998_v32 = vadd.f32 %v997_v19, %v456_v29  ;;  %v1051_v50 = vadd.f32 %v1050_v1, %v464_v38  ;;  %v999_v35 = vpop.f32.mrb[1].mxu0  ;;  %v1052_v26 = vpop.f32.mrb[1].mxu1 }
 0x1d2   : > { %v1000_v2 = vadd.f32 %v999_v35, %v460_v41  ;;  %v1001_v17 = vpop.f32.mrb[2].mxu0  ;;  %v1054_v5 = vpop.f32.mrb[2].mxu1 }
 0x1d3   : > { %v3746_v23 = vpack.c.bf16 %v1051_v50, %v1051_v50  ;;  %v1002_v8 = vadd.f32 %v1001_v17, %v456_v29  ;;  %v1055_v44 = vadd.f32 %v1054_v5, %v464_v38  ;;  %v1003_v47 = vpop.f32.mrb[3].mxu0  ;;  %v1056_v59 = vpop.f32.mrb[3].mxu1 }
 0x1d4   : > { %v3745_v62 = vpack.c.bf16 %v1000_v2, %v998_v32  ;;  %v1004_v53 = vadd.f32 %v1003_v47, %v460_v41 }
 0x1d5   : > { %1175 = vst [vmem:[#allocation2 + $0x8] sm:$0xf] %v3746_v23  ;;  %v3748_v11 = vpack.c.bf16 %v1055_v44, %v1055_v44 }
 0x1d6   : > { %1174 = vst [vmem:[#allocation2] sm:$0xff] %v3745_v62  ;;  %v3747_v20 = vpack.c.bf16 %v1004_v53, %v1002_v8  ;;  %v467_v8 = vsub.s32 3, %v454_v14  ;;  %v471_v53 = vsub.s32 4, %v454_v14 }
 0x1d7   : > { %1177 = vst [vmem:[#allocation2 + $0x14] sm:$0xf] %v3748_v11  ;;  %v475_v11 = vsub.s32 5, %v454_v14 }
 0x1d8   : > { %1176 = vst [vmem:[#allocation2 + $0xc] sm:$0xff] %v3747_v20  ;;  %v1007_v19 = vpop.f32.mrb[4].mxu0  ;;  %v1060_v1 = vpop.f32.mrb[4].mxu1  ;;  %v468_v20 = vrot.slane %v6326_v4, %v467_v8 }
 0x1d9   : > { %v1008_v61 = vadd.f32 %v1007_v19, %v456_v29  ;;  %v1061_v56 = vadd.f32 %v1060_v1, %v464_v38  ;;  %v1009_v35 = vpop.f32.mrb[5].mxu0  ;;  %v1062_v60 = vpop.f32.mrb[5].mxu1  ;;  %v472_v19 = vrot.slane %v6326_v4, %v471_v53 }
 0x1da   : > { %v1010_v63 = vadd.f32 %v1009_v35, %v460_v41  ;;  %v1011_v50 = vpop.f32.mrb[6].mxu0  ;;  %v1064_v17 = vpop.f32.mrb[6].mxu1  ;;  %v1053_v1 = vadd.f32 %v1052_v26, %v468_v20 }
 0x1db   : > { %v3750_v5 = vpack.c.bf16 %v1061_v56, %v1061_v56  ;;  %v1012_v55 = vadd.f32 %v1011_v50, %v456_v29  ;;  %v1065_v58 = vadd.f32 %v1064_v17, %v464_v38  ;;  %v1013_v32 = vpop.f32.mrb[7].mxu0  ;;  %v1066_v47 = vpop.f32.mrb[7].mxu1  ;;  %v476_v56 = vrot.slane %v6326_v4, %v475_v11 }
 0x1dc   : > { %v3749_v23 = vpack.c.bf16 %v1010_v63, %v1008_v61  ;;  %v1014_v44 = vadd.f32 %v1013_v32, %v460_v41  ;;  %v1063_v61 = vadd.f32 %v1062_v60, %v468_v20  ;;  %v1067_v50 = vadd.f32 %v1066_v47, %v468_v20 }
 0x1dd   : > { %1179 = vst [vmem:[#allocation2 + $0x20] sm:$0xf] %v3750_v5  ;;  %v3752_v62 = vpack.c.bf16 %v1065_v58, %v1065_v58 }
 0x1de   : > { %1178 = vst [vmem:[#allocation2 + $0x18] sm:$0xff] %v3749_v23  ;;  %v3751_v2 = vpack.c.bf16 %v1014_v44, %v1012_v55  ;;  %v1057_v55 = vadd.f32 %v1056_v59, %v468_v20 }
 0x1df   : > { %1181 = vst [vmem:[#allocation2 + $0x2c] sm:$0xf] %v3752_v62 }
 0x1e0   : > { %1180 = vst [vmem:[#allocation2 + $0x24] sm:$0xff] %v3751_v2 }
 0x210   : > { %v1103_v29 = vpop.f32.mrb[8].mxu0  ;;  %v1113_v38 = vpop.f32.mrb[8].mxu1 }
 0x211   : > { %v1104_v63 = vadd.f32 %v1103_v29, %v472_v19  ;;  %v1114_v41 = vadd.f32 %v1113_v38, %v472_v19  ;;  %v1105_v58 = vpop.f32.mrb[9].mxu0  ;;  %v1115_v35 = vpop.f32.mrb[9].mxu1 }
 0x212   : > { %v1106_v17 = vadd.f32 %v1105_v58, %v476_v56  ;;  %v1116_v5 = vadd.f32 %v1115_v35, %v476_v56  ;;  %v1107_v32 = vpop.f32.mrb[10].mxu0  ;;  %v1117_v14 = vpop.f32.mrb[10].mxu1 }
 0x213   : > { %v3753_v23 = vpack.c.bf16 %v1104_v63, %v1053_v1  ;;  %v3757_v44 = vpack.c.bf16 %v1114_v41, %v1063_v61  ;;  %v1108_v62 = vadd.f32 %v1107_v32, %v472_v19  ;;  %v1118_v2 = vadd.f32 %v1117_v14, %v472_v19  ;;  %v1109_v8 = vpop.f32.mrb[11].mxu0  ;;  %v1119_v4 = vpop.f32.mrb[11].mxu1 }
 0x214   : > { %v3754_v53 = vpack.c.bf16 %v1106_v17, %v1106_v17  ;;  %v3758_v11 = vpack.c.bf16 %v1116_v5, %v1116_v5  ;;  %v1110_v26 = vadd.f32 %v1109_v8, %v476_v56  ;;  %v1120_v60 = vadd.f32 %v1119_v4, %v476_v56 }
 0x215   : > { %1234 = vst [vmem:[#allocation3] sm:$0xff] %v3753_v23  ;;  %1238 = vst [vmem:[#allocation3 + $0x18] sm:$0xff] %v3757_v44  ;;  %v3755_v29 = vpack.c.bf16 %v1108_v62, %v1057_v55  ;;  %v3759_v38 = vpack.c.bf16 %v1118_v2, %v1067_v50 }
 0x216   : > { %1235 = vst [vmem:[#allocation3 + $0x8] sm:$0xf] %v3754_v53  ;;  %1239 = vst [vmem:[#allocation3 + $0x20] sm:$0xf] %v3758_v11  ;;  %v3756_v59 = vpack.c.bf16 %v1110_v26, %v1110_v26  ;;  %v3760_v47 = vpack.c.bf16 %v1120_v60, %v1120_v60 }
 0x217   : > { %1236 = vst [vmem:[#allocation3 + $0xc] sm:$0xff] %v3755_v29  ;;  %1240 = vst [vmem:[#allocation3 + $0x24] sm:$0xff] %v3759_v38 }
 0x218   : > { %1237 = vst [vmem:[#allocation3 + $0x14] sm:$0xf] %v3756_v59  ;;  %1241 = vst [vmem:[#allocation3 + $0x2c] sm:$0xf] %v3760_v47 }
 0x219 PF: > { %p6327_p4 = scmp.eq.s32.totalorder %s4624_s9, 0 }
 0x21a   : > { %v3533_v20 = vcombine.high (!%p6327_p4), %v4754_v0, %v4763_v3  ;;  %v6328_v19 = vld [vmem:[#allocation21_spill] sm:$0xff] (!%p6327_p4)  ;;  %v6329_v56 = vld [vmem:[#allocation19_spill] sm:$0xff] (!%p6327_p4)  ;;  %v3532_v61 = vcombine.low (!%p6327_p4), %v4754_v0, %v4763_v3  ;;  %v3539_v41 = vcombine.high (!%p6327_p4), %v4772_v6, %v4781_v9  ;;  %v3541_v58 = vcombine.high (!%p6327_p4), %v4775_v7, %v4784_v10  ;;  %v6339_v60 = vld [vmem:[#allocation54_spill] sm:$0xff] (!%p6327_p4) }
 0x21b   : > { %1245 = sbr.rel (%p6327_p4) target bundleno = 889 (0x379), region = 64  ;;  %v3535_v1 = vcombine.high (!%p6327_p4), %v6329_v56, %v6328_v19  ;;  %v3534_v63 = vcombine.low (!%p6327_p4), %v6329_v56, %v6328_v19  ;;  %v3538_v35 = vcombine.low (!%p6327_p4), %v4772_v6, %v4781_v9  ;;  %v3540_v55 = vcombine.low (!%p6327_p4), %v4775_v7, %v4784_v10  ;;  %v6330_v7 = vld [vmem:[#allocation27_spill] sm:$0xff] (!%p6327_p4)  ;;  %v6336_v8 = vld [vmem:[#allocation45_spill] sm:$0xff] (!%p6327_p4)  ;;  %v6342_v19 = vld [vmem:[#allocation56_spill] sm:$0xff] (!%p6327_p4) }
 0x21c   : > { %1769 = vmatprep.subr.bf16.mxu0 (!%p6327_p4), %v3533_v20  ;;  %v3545_v0 = vcombine.high (!%p6327_p4), %v4790_v12, %v4799_v15  ;;  %v3547_v3 = vcombine.high (!%p6327_p4), %v4793_v13, %v4802_v16  ;;  %v3544_v50 = vcombine.low (!%p6327_p4), %v4790_v12, %v4799_v15  ;;  %v3546_v17 = vcombine.low (!%p6327_p4), %v4793_v13, %v4802_v16  ;;  %v6340_v29 = vld [vmem:[#allocation51_spill] sm:$0xff] (!%p6327_p4) }
 0x21d   : > { %1822 = vmatprep.subr.bf16.mxu1 (!%p6327_p4), %v3535_v1  ;;  %1770 = vmatpush1.bf16.msra.mxu0 (!%p6327_p4), %v3532_v61  ;;  %v3551_v6 = vcombine.high (!%p6327_p4), %v4808_v18, %v4817_v21  ;;  %v3553_v9 = vcombine.high (!%p6327_p4), %v6330_v7, %v4820_v22  ;;  %v3550_v10 = vcombine.low (!%p6327_p4), %v4808_v18, %v4817_v21  ;;  %v1247_v18 = vld [vmem:[#allocation12 + $0x8] sm:$0xff] (!%p6327_p4)  ;;  %v1249_v21 = vld [vmem:[#allocation12 + $0x18] sm:$0xff] (!%p6327_p4)  ;;  %v6341_v20 = vld [vmem:[#allocation59_spill] sm:$0xff] (!%p6327_p4) }
 0x21e   : > { %1823 = vmatpush1.bf16.msra.mxu1 (!%p6327_p4), %v3534_v63  ;;  %1771 = vmatprep.subr.bf16.mxu0 (!%p6327_p4), %v3539_v41  ;;  %v3552_v5 = vcombine.low (!%p6327_p4), %v6330_v7, %v4820_v22  ;;  %v3557_v12 = vcombine.high (!%p6327_p4), %v4826_v24, %v4835_v27  ;;  %v3559_v13 = vcombine.high (!%p6327_p4), %v4829_v25, %v4838_v28  ;;  %v6343_v1 = vld [vmem:[#allocation60_spill] sm:$0xff] (!%p6327_p4)  ;;  %v6344_v61 = vld [vmem:[#allocation57_spill] sm:$0xff] (!%p6327_p4) }
 0x21f   : > { %1824 = vmatprep.subr.bf16.mxu1 (!%p6327_p4), %v3541_v58  ;;  %v3556_v15 = vcombine.low (!%p6327_p4), %v4826_v24, %v4835_v27  ;;  %v3558_v16 = vcombine.low (!%p6327_p4), %v4829_v25, %v4838_v28  ;;  %v3563_v22 = vcombine.high (!%p6327_p4), %v4844_v30, %v4853_v33  ;;  %v3565_v32 = vcombine.high (!%p6327_p4), %v4847_v31, %v4856_v34 }
 0x220   : > { %v5305_v14 = vpack.c.bf16 (!%p6327_p4), %v1249_v21, %v1247_v18  ;;  %v3562_v24 = vcombine.low (!%p6327_p4), %v4844_v30, %v4853_v33  ;;  %v3564_v25 = vcombine.low (!%p6327_p4), %v4847_v31, %v4856_v34  ;;  %v3569_v27 = vcombine.high (!%p6327_p4), %v4862_v36, %v4871_v39  ;;  %v6353_v21 = vld [vmem:[#allocation77_spill] sm:$0xff] (!%p6327_p4) }
 0x221   : > { %1772 = vmatpush1.bf16.msra.mxu0 (!%p6327_p4), %v3538_v35  ;;  %v3571_v28 = vcombine.high (!%p6327_p4), %v4865_v37, %v4874_v40  ;;  %v3568_v30 = vcombine.low (!%p6327_p4), %v4862_v36, %v4871_v39  ;;  %v3570_v31 = vcombine.low (!%p6327_p4), %v4865_v37, %v4874_v40  ;;  %v3575_v33 = vcombine.high (!%p6327_p4), %v4880_v42, %v4889_v45  ;;  %v6345_v35 = vld [vmem:[#allocation65_spill] sm:$0xff] (!%p6327_p4) }
 0x222   : > { %1825 = vmatpush1.bf16.msra.mxu1 %v3540_v55  ;;  %1773 = vmatprep.subr.bf16.mxu0 %v3545_v0  ;;  %v3577_v34 = vcombine.high %v4883_v43, %v4892_v46  ;;  %v3574_v23 = vcombine.low %v4880_v42, %v4889_v45  ;;  %v3576_v44 = vcombine.low %v4883_v43, %v4892_v46  ;;  %v6331_v43 = vld [vmem:[#allocation42_spill] sm:$0xff]  ;;  %v6332_v45 = vld [vmem:[#allocation40_spill] sm:$0xff] }
 0x223   : > { %1826 = vmatprep.subr.bf16.mxu1 %v3547_v3  ;;  %1801 = vmatprep.mubr.bf16.mxu0 %v5305_v14  ;;  %v3581_v36 = vcombine.high %v4898_v48, %v4907_v51  ;;  %v3583_v37 = vcombine.high %v4901_v49, %v4910_v52  ;;  %v3580_v39 = vcombine.low %v4898_v48, %v4907_v51  ;;  %v6333_v48 = vld [vmem:[#allocation47_spill] sm:$0xff]  ;;  %v6346_v55 = vld [vmem:[#allocation62_spill] sm:$0xff] }
 0x224   : > { %1854 = vmatprep.mubr.bf16.mxu1 %v5305_v14  ;;  %v3582_v40 = vcombine.low %v4901_v49, %v4910_v52  ;;  %v3587_v42 = vcombine.high %v4916_v54, %v4925_v57  ;;  %v3589_v46 = vcombine.high %v6332_v45, %v6331_v43  ;;  %v3586_v62 = vcombine.low %v4916_v54, %v4925_v57  ;;  %v6334_v49 = vld [vmem:[#allocation44_spill] sm:$0xff]  ;;  %v6337_v54 = vld [vmem:[#allocation53_spill] sm:$0xff]  ;;  %v6338_v57 = vld [vmem:[#allocation50_spill] sm:$0xff] }
 0x225   : > { %1774 = vmatpush1.bf16.msra.mxu0 %v3544_v50  ;;  %v3588_v2 = vcombine.low %v6332_v45, %v6331_v43  ;;  %v3593_v51 = vcombine.high %v6334_v49, %v6333_v48  ;;  %v6335_v52 = vld [vmem:[#allocation48_spill] sm:$0xff]  ;;  %v3592_v53 = vcombine.low %v6334_v49, %v6333_v48  ;;  %v3599_v26 = vcombine.high %v6338_v57, %v6337_v54  ;;  %v6347_v3 = vld [vmem:[#allocation66_spill] sm:$0xff]  ;;  %v6348_v50 = vld [vmem:[#allocation63_spill] sm:$0xff] }
 0x226   : > { %1827 = vmatpush1.bf16.msra.mxu1 %v3546_v17  ;;  %1775 = vmatprep.subr.bf16.mxu0 %v3551_v6  ;;  %v3595_v4 = vcombine.high %v6336_v8, %v6335_v52  ;;  %v3594_v11 = vcombine.low %v6336_v8, %v6335_v52  ;;  %v3601_v38 = vcombine.high %v6340_v29, %v6339_v60  ;;  %v6360_v43 = vld [vmem:[#allocation23_spill] sm:$0xff]  ;;  %v1252_v48 = vld [vmem:[#allocation12 + $0x30] sm:$0xff]  ;;  %v6361_v49 = vld [vmem:[#allocation26_spill] sm:$0xff] }
 0x227   : > { %1828 = vmatprep.subr.bf16.mxu1 %v3553_v9  ;;  %v3598_v59 = vcombine.low %v6338_v57, %v6337_v54  ;;  %v3600_v47 = vcombine.low %v6340_v29, %v6339_v60  ;;  %v3605_v56 = vcombine.high %v6342_v19, %v6341_v20  ;;  %v3607_v63 = vcombine.high %v6344_v61, %v6343_v1  ;;  %v6349_v9 = vld [vmem:[#allocation71_spill] sm:$0xff]  ;;  %v6366_v60 = vld [vmem:[#allocation30_spill] sm:$0xff] }
 0x228   : > { %v3604_v41 = vcombine.low %v6342_v19, %v6341_v20  ;;  %v3606_v58 = vcombine.low %v6344_v61, %v6343_v1  ;;  %v3611_v0 = vcombine.high %v6346_v55, %v6345_v35  ;;  %v3613_v17 = vcombine.high %v6348_v50, %v6347_v3 }
 0x229   : > { %1776 = vmatpush1.bf16.msra.mxu0 %v3550_v10  ;;  %v3610_v6 = vcombine.low %v6346_v55, %v6345_v35  ;;  %v3612_v7 = vcombine.low %v6348_v50, %v6347_v3  ;;  %v6350_v10 = vld [vmem:[#allocation68_spill] sm:$0xff]  ;;  %v6373_v55 = vld [vmem:[#allocation39_spill] sm:$0xff] }
 0x22a   : > { %1829 = vmatpush1.bf16.msra.mxu1 %v3552_v5  ;;  %1777 = vmatprep.subr.bf16.mxu0 %v3557_v12  ;;  %v3617_v5 = vcombine.high %v6350_v10, %v6349_v9  ;;  %v6351_v12 = vld [vmem:[#allocation72_spill] sm:$0xff] }
 0x22b   : > { %1830 = vmatprep.subr.bf16.mxu1 %v3559_v13  ;;  %v6352_v13 = vld [vmem:[#allocation69_spill] sm:$0xff] }
 0x22c   : > { %v3618_v18 = vcombine.low %v6352_v13, %v6351_v12 }
 0x22d   : > { %1778 = vmatpush1.bf16.msra.mxu0 %v3556_v15  ;;  %v3619_v15 = vcombine.high %v6352_v13, %v6351_v12 }
 0x22e   : > { %1831 = vmatpush1.bf16.msra.mxu1 %v3558_v16  ;;  %1779 = vmatprep.subr.bf16.mxu0 %v3563_v22  ;;  %v3616_v16 = vcombine.low %v6350_v10, %v6349_v9  ;;  %v6354_v22 = vld [vmem:[#allocation74_spill] sm:$0xff]  ;;  %v6377_v10 = vld [vmem:[#allocation49_spill] sm:$0xff] }
 0x22f   : > { %1832 = vmatprep.subr.bf16.mxu1 %v3565_v32  ;;  %v3623_v32 = vcombine.high %v6354_v22, %v6353_v21 }
 0x231   : > { %1780 = vmatpush1.bf16.msra.mxu0 %v3562_v24  ;;  %v6355_v24 = vld [vmem:[#allocation78_spill] sm:$0xff] }
 0x232   : > { %1833 = vmatpush1.bf16.msra.mxu1 %v3564_v25  ;;  %1781 = vmatprep.subr.bf16.mxu0 %v3569_v27  ;;  %v6356_v25 = vld [vmem:[#allocation75_spill] sm:$0xff] }
 0x233   : > { %1834 = vmatprep.subr.bf16.mxu1 %v3571_v28  ;;  %v3625_v27 = vcombine.high %v6356_v25, %v6355_v24  ;;  %v3622_v28 = vcombine.low %v6354_v22, %v6353_v21  ;;  %v6381_v22 = vld [vmem:[#allocation61_spill] sm:$0xff] }
 0x235   : > { %1782 = vmatpush1.bf16.msra.mxu0 %v3568_v30  ;;  %v3624_v30 = vcombine.low %v6356_v25, %v6355_v24 }
 0x236   : > { %1835 = vmatpush1.bf16.msra.mxu1 %v3570_v31  ;;  %1783 = vmatprep.subr.bf16.mxu0 %v3575_v33  ;;  %v1246_v31 = vld [vmem:[#allocation12] sm:$0xff]  ;;  %v1248_v33 = vld [vmem:[#allocation12 + $0x10] sm:$0xff] }
 0x237   : > { %1836 = vmatprep.subr.bf16.mxu1 %v3577_v34  ;;  %v6357_v34 = vld [vmem:[#allocation22_spill] sm:$0xff] }
 0x239   : > { %1784 = vmatpush1.bf16.msra.mxu0 %v3574_v23  ;;  %v6358_v23 = vld [vmem:[#allocation20_spill] sm:$0xff] }
 0x23a   : > { %1837 = vmatpush1.bf16.msra.mxu1 %v3576_v44  ;;  %1785 = vmatprep.subr.bf16.mxu0 %v3581_v36  ;;  %v3537_v44 = vcombine.high %v6358_v23, %v6357_v34  ;;  %v5395_v36 = vpack.c.bf16 %v1248_v33, %v1246_v31  ;;  %v6385_v33 = vld [vmem:[#allocation73_spill] sm:$0xff] }
 0x23b   : > { %1838 = vmatprep.subr.bf16.mxu1 %v3583_v37  ;;  %v1251_v37 = vld [vmem:[#allocation12 + $0x28] sm:$0xff] }
 0x23d   : > { %1786 = vmatpush1.bf16.msra.mxu0 %v3580_v39  ;;  %v1253_v39 = vld [vmem:[#allocation12 + $0x38] sm:$0xff] }
 0x23e   : > { %1839 = vmatpush1.bf16.msra.mxu1 %v3582_v40  ;;  %1787 = vmatprep.subr.bf16.mxu0 %v3587_v42  ;;  %v3536_v40 = vcombine.low %v6358_v23, %v6357_v34  ;;  %v6359_v42 = vld [vmem:[#allocation24_spill] sm:$0xff]  ;;  %v6386_v34 = vld [vmem:[#allocation70_spill] sm:$0xff] }
 0x23f   : > { %1840 = vmatprep.subr.bf16.mxu1 %v3589_v46  ;;  %v3543_v45 = vcombine.high %v6360_v43, %v6359_v42  ;;  %v1257_v46 = vpack.c.bf16 %v1253_v39, %v1251_v37  ;;  %v3621_v23 = vcombine.high %v6386_v34, %v6385_v33  ;;  %v6387_v37 = vld [vmem:[#allocation79_spill] sm:$0xff]  ;;  %v6388_v39 = vld [vmem:[#allocation76_spill] sm:$0xff] }
 0x241   : > { %1788 = vmatpush1.bf16.msra.mxu0 %v3586_v62  ;;  %v3542_v62 = vcombine.low %v6360_v43, %v6359_v42  ;;  %v3626_v42 = vcombine.low %v6388_v39, %v6387_v37  ;;  %v1259_v43 = vlaneseq }
 0x242   : > { %1841 = vmatpush1.bf16.msra.mxu1 %v3588_v2  ;;  %1789 = vmatprep.subr.bf16.mxu0 %v3593_v51  ;;  %v1250_v2 = vld [vmem:[#allocation12 + $0x20] sm:$0xff]  ;;  %v6362_v51 = vld [vmem:[#allocation25_spill] sm:$0xff] }
 0x243   : > { %1842 = vmatprep.subr.bf16.mxu1 %v3595_v4  ;;  %v3549_v52 = vcombine.high %v6362_v51, %v6361_v49  ;;  %v5407_v8 = vpack.c.bf16 %v1252_v48, %v1250_v2  ;;  %v3548_v4 = vcombine.low %v6362_v51, %v6361_v49  ;;  %v6389_v48 = vld [vmem:[#allocation80_spill] sm:$0xff] }
 0x245   : > { %1790 = vmatpush1.bf16.msra.mxu0 %v3592_v53  ;;  %v6363_v53 = vld [vmem:[#allocation29_spill] sm:$0xff] }
 0x246   : > { %1843 = vmatpush1.bf16.msra.mxu1 %v3594_v11  ;;  %1791 = vmatprep.subr.bf16.mxu0 %v3599_v26  ;;  %v6364_v11 = vld [vmem:[#allocation28_spill] sm:$0xff]  ;;  %v6365_v26 = vld [vmem:[#allocation31_spill] sm:$0xff] }
 0x247   : > { %1844 = vmatprep.subr.bf16.mxu1 %v3601_v38  ;;  %v3555_v54 = vcombine.high %v6364_v11, %v6363_v53  ;;  %v3554_v57 = vcombine.low %v6364_v11, %v6363_v53  ;;  %v3561_v29 = vcombine.high %v6366_v60, %v6365_v26  ;;  %v3560_v38 = vcombine.low %v6366_v60, %v6365_v26 }
 0x249   : > { %1792 = vmatpush1.bf16.msra.mxu0 %v3598_v59  ;;  %v6367_v59 = vld [vmem:[#allocation33_spill] sm:$0xff] }
 0x24a   : > { %1845 = vmatpush1.bf16.msra.mxu1 %v3600_v47  ;;  %1793 = vmatprep.subr.bf16.mxu0 %v3605_v56  ;;  %v6368_v47 = vld [vmem:[#allocation32_spill] sm:$0xff]  ;;  %v6369_v56 = vld [vmem:[#allocation35_spill] sm:$0xff] }
 0x24b   : > { %1846 = vmatprep.subr.bf16.mxu1 %v3607_v63  ;;  %v3567_v20 = vcombine.high %v6368_v47, %v6367_v59  ;;  %v3566_v19 = vcombine.low %v6368_v47, %v6367_v59  ;;  %v6371_v63 = vld [vmem:[#allocation37_spill] sm:$0xff] }
 0x24d   : > { %1794 = vmatpush1.bf16.msra.mxu0 %v3604_v41  ;;  %v6372_v41 = vld [vmem:[#allocation36_spill] sm:$0xff] }
 0x24e   : > { %1847 = vmatpush1.bf16.msra.mxu1 %v3606_v58  ;;  %1795 = vmatprep.subr.bf16.mxu0 %v3611_v0  ;;  %v3579_v58 = vcombine.high %v6372_v41, %v6371_v63  ;;  %v3578_v35 = vcombine.low %v6372_v41, %v6371_v63  ;;  %v6374_v0 = vld [vmem:[#allocation38_spill] sm:$0xff] }
 0x24f   : > { %1848 = vmatprep.subr.bf16.mxu1 %v3613_v17  ;;  %v3585_v3 = vcombine.high %v6374_v0, %v6373_v55  ;;  %v3584_v50 = vcombine.low %v6374_v0, %v6373_v55  ;;  %v6375_v17 = vld [vmem:[#allocation43_spill] sm:$0xff] }
 0x251   : > { %1796 = vmatpush1.bf16.msra.mxu0 %v3610_v6  ;;  %v6376_v6 = vld [vmem:[#allocation41_spill] sm:$0xff] }
 0x252   : > { %1849 = vmatpush1.bf16.msra.mxu1 %v3612_v7  ;;  %1797 = vmatprep.subr.bf16.mxu0 %v3617_v5  ;;  %v3591_v7 = vcombine.high %v6376_v6, %v6375_v17  ;;  %v3590_v9 = vcombine.low %v6376_v6, %v6375_v17  ;;  %v6378_v5 = vld [vmem:[#allocation46_spill] sm:$0xff] }
 0x253   : > { %1850 = vmatprep.subr.bf16.mxu1 %v3619_v15  ;;  %v3597_v12 = vcombine.high %v6378_v5, %v6377_v10  ;;  %v3596_v13 = vcombine.low %v6378_v5, %v6377_v10  ;;  %v6379_v15 = vld [vmem:[#allocation55_spill] sm:$0xff] }
 0x255   : > { %1798 = vmatpush1.bf16.msra.mxu0 %v3616_v16  ;;  %v6380_v16 = vld [vmem:[#allocation52_spill] sm:$0xff] }
 0x256   : > { %1851 = vmatpush1.bf16.msra.mxu1 %v3618_v18  ;;  %1799 = vmatprep.subr.bf16.mxu0 %v3623_v32  ;;  %v3603_v18 = vcombine.high %v6380_v16, %v6379_v15  ;;  %v3602_v21 = vcombine.low %v6380_v16, %v6379_v15  ;;  %v6382_v32 = vld [vmem:[#allocation58_spill] sm:$0xff] }
 0x257   : > { %1852 = vmatprep.subr.bf16.mxu1 %v3625_v27  ;;  %v3609_v24 = vcombine.high %v6382_v32, %v6381_v22  ;;  %v3608_v25 = vcombine.low %v6382_v32, %v6381_v22  ;;  %v6383_v27 = vld [vmem:[#allocation67_spill] sm:$0xff] }
 0x259   : > { %1800 = vmatpush1.bf16.msra.mxu0 %v3622_v28  ;;  %v6384_v28 = vld [vmem:[#allocation64_spill] sm:$0xff] }
 0x25a   : > { %1853 = vmatpush1.bf16.msra.mxu1 %v3624_v30  ;;  %1875 = vmatprep.subr.bf16.mxu0 %v3537_v44  ;;  %v3615_v30 = vcombine.high %v6384_v28, %v6383_v27  ;;  %v3614_v31 = vcombine.low %v6384_v28, %v6383_v27 }
 0x25b   : > { %4041 = vmatprep.subr.bf16.mxu1 %v3537_v44  ;;  %v3620_v44 = vcombine.low %v6386_v34, %v6385_v33 }
 0x25c   : > { %1802 = vmatmul.mubr.bf16.vlgmr.msra.gmra.mrb[0].mxu0 %v5395_v36 }
 0x25d   : > { %1855 = vmatmul.mubr.bf16.vlgmr.msra.gmra.mrb[0].mxu1 %v5395_v36  ;;  %1876 = vmatpush1.bf16.msra.mxu0 %v3536_v40 }
 0x25e   : > { %4057 = vmatpush1.bf16.msra.mxu1 %v3536_v40  ;;  %1877 = vmatprep.subr.bf16.mxu0 %v3543_v45  ;;  %v3627_v40 = vcombine.high %v6388_v39, %v6387_v37 }
 0x25f   : > { %4042 = vmatprep.subr.bf16.mxu1 %v3543_v45  ;;  %1811 = vmatprep.mubr.bf16.mxu0 %v1257_v46  ;;  %v1260_v45 = vshrl.u32 %v1259_v43, 7 }
 0x260   : > { %1864 = vmatprep.mubr.bf16.mxu1 %v1257_v46 }
 0x261   : > { %1878 = vmatpush1.bf16.msra.mxu0 %v3542_v62  ;;  %v1265_v2 = vsub.s32 1, %v1260_v45  ;;  %v1273_v16 = vsub.s32 3, %v1260_v45 }
 0x262   : > { %4058 = vmatpush1.bf16.msra.mxu1 %v3542_v62  ;;  %1879 = vmatprep.subr.bf16.mxu0 %v3549_v52  ;;  %v1269_v62 = vsub.s32 2, %v1260_v45 }
 0x263   : > { %4043 = vmatprep.subr.bf16.mxu1 %v3549_v52  ;;  %v1266_v52 = vrot.slane %v6389_v48, %v1265_v2  ;;  %v1274_v22 = vrot.slane %v6389_v48, %v1273_v16 }
 0x264   : > { %1812 = vmatmul.mubr.bf16.gmra.mrb[4].mxu0 %v5407_v8  ;;  %v1270_v51 = vrot.slane %v6389_v48, %v1269_v62 }
 0x265   : > { %1865 = vmatmul.mubr.bf16.gmra.mrb[4].mxu1 %v5407_v8  ;;  %1880 = vmatpush1.bf16.msra.mxu0 %v3548_v4 }
 0x266   : > { %4059 = vmatpush1.bf16.msra.mxu1 %v3548_v4  ;;  %1881 = vmatprep.subr.bf16.mxu0 %v3555_v54 }
 0x267   : > { %4044 = vmatprep.subr.bf16.mxu1 %v3555_v54  ;;  %1907 = vmatprep.mubr.bf16.mxu0 %v5305_v14  ;;  %v6370_v14 = vld [vmem:[#allocation34_spill] sm:$0xff] }
 0x268   : > { %1917 = vmatprep.mubr.bf16.mxu1 %v1257_v46  ;;  %v3573_v1 = vcombine.high %v6370_v14, %v6369_v56  ;;  %v3572_v61 = vcombine.low %v6370_v14, %v6369_v56  ;;  %v1261_v46 = vsub.s32 0, %v1260_v45 }
 0x269   : > { %1882 = vmatpush1.bf16.msra.mxu0 %v3554_v57 }
 0x26a   : > { %4060 = vmatpush1.bf16.msra.mxu1 %v3554_v57  ;;  %1883 = vmatprep.subr.bf16.mxu0 %v3561_v29  ;;  %v1262_v49 = vrot.slane %v6389_v48, %v1261_v46 }
 0x26b   : > { %4045 = vmatprep.subr.bf16.mxu1 %v3561_v29 }
 0x26d   : > { %1884 = vmatpush1.bf16.msra.mxu0 %v3560_v38 }
 0x26e   : > { %4061 = vmatpush1.bf16.msra.mxu1 %v3560_v38  ;;  %1885 = vmatprep.subr.bf16.mxu0 %v3567_v20 }
 0x26f   : > { %4046 = vmatprep.subr.bf16.mxu1 %v3567_v20 }
 0x271   : > { %1886 = vmatpush1.bf16.msra.mxu0 %v3566_v19 }
 0x272   : > { %4062 = vmatpush1.bf16.msra.mxu1 %v3566_v19  ;;  %1887 = vmatprep.subr.bf16.mxu0 %v3573_v1 }
 0x273   : > { %4047 = vmatprep.subr.bf16.mxu1 %v3573_v1 }
 0x275   : > { %1888 = vmatpush1.bf16.msra.mxu0 %v3572_v61 }
 0x276   : > { %4063 = vmatpush1.bf16.msra.mxu1 %v3572_v61  ;;  %1889 = vmatprep.subr.bf16.mxu0 %v3579_v58 }
 0x277   : > { %4048 = vmatprep.subr.bf16.mxu1 %v3579_v58 }
 0x279   : > { %1890 = vmatpush1.bf16.msra.mxu0 %v3578_v35 }
 0x27a   : > { %4064 = vmatpush1.bf16.msra.mxu1 %v3578_v35  ;;  %1891 = vmatprep.subr.bf16.mxu0 %v3585_v3 }
 0x27b   : > { %4049 = vmatprep.subr.bf16.mxu1 %v3585_v3 }
 0x27d   : > { %1892 = vmatpush1.bf16.msra.mxu0 %v3584_v50 }
 0x27e   : > { %4065 = vmatpush1.bf16.msra.mxu1 %v3584_v50  ;;  %1893 = vmatprep.subr.bf16.mxu0 %v3591_v7 }
 0x27f   : > { %4050 = vmatprep.subr.bf16.mxu1 %v3591_v7 }
 0x281   : > { %1894 = vmatpush1.bf16.msra.mxu0 %v3590_v9 }
 0x282   : > { %4066 = vmatpush1.bf16.msra.mxu1 %v3590_v9  ;;  %1895 = vmatprep.subr.bf16.mxu0 %v3597_v12 }
 0x283   : > { %4051 = vmatprep.subr.bf16.mxu1 %v3597_v12 }
 0x285   : > { %1896 = vmatpush1.bf16.msra.mxu0 %v3596_v13 }
 0x286   : > { %4067 = vmatpush1.bf16.msra.mxu1 %v3596_v13  ;;  %1897 = vmatprep.subr.bf16.mxu0 %v3603_v18 }
 0x287   : > { %4052 = vmatprep.subr.bf16.mxu1 %v3603_v18  ;;  %v1277_v18 = vsub.s32 4, %v1260_v45 }
 0x289   : > { %1898 = vmatpush1.bf16.msra.mxu0 %v3602_v21  ;;  %v1278_v32 = vrot.slane %v6389_v48, %v1277_v18 }
 0x28a   : > { %4068 = vmatpush1.bf16.msra.mxu1 %v3602_v21  ;;  %1899 = vmatprep.subr.bf16.mxu0 %v3609_v24  ;;  %v1281_v21 = vsub.s32 5, %v1260_v45 }
 0x28b   : > { %4053 = vmatprep.subr.bf16.mxu1 %v3609_v24 }
 0x28c   : > { %v1282_v24 = vrot.slane %v6389_v48, %v1281_v21 }
 0x28d   : > { %1900 = vmatpush1.bf16.msra.mxu0 %v3608_v25 }
 0x28e   : > { %4069 = vmatpush1.bf16.msra.mxu1 %v3608_v25  ;;  %1901 = vmatprep.subr.bf16.mxu0 %v3615_v30 }
 0x28f   : > { %4054 = vmatprep.subr.bf16.mxu1 %v3615_v30 }
 0x291   : > { %1902 = vmatpush1.bf16.msra.mxu0 %v3614_v31 }
 0x292   : > { %4070 = vmatpush1.bf16.msra.mxu1 %v3614_v31  ;;  %1903 = vmatprep.subr.bf16.mxu0 %v3621_v23 }
 0x293   : > { %4055 = vmatprep.subr.bf16.mxu1 %v3621_v23 }
 0x295   : > { %1904 = vmatpush1.bf16.msra.mxu0 %v3620_v44 }
 0x296   : > { %4071 = vmatpush1.bf16.msra.mxu1 %v3620_v44  ;;  %1905 = vmatprep.subr.bf16.mxu0 %v3627_v40 }
 0x297   : > { %4056 = vmatprep.subr.bf16.mxu1 %v3627_v40 }
 0x299   : > { %1906 = vmatpush1.bf16.msra.mxu0 %v3626_v42 }
 0x29a   : > { %4072 = vmatpush1.bf16.msra.mxu1 %v3626_v42 }
 0x29c   : > { %1908 = vmatmul.mubr.bf16.vlgmr.msra.gmra.mrb[8].mxu0 %v5395_v36 }
 0x29d   : > { %1918 = vmatmul.mubr.bf16.vlgmr.msra.gmra.mrb[8].mxu1 %v5407_v8 }
 0x32f   : > { %v1803_v4 = vpop.f32.mrb[0].mxu0 }
 0x330   : > { %v1856_v53 = vpop.f32.mrb[0].mxu1  ;;  %v1804_v11 = vadd.f32 %v1803_v4, %v1262_v49  ;;  %v1805_v57 = vpop.f32.mrb[1].mxu0 }
 0x331   : > { %v1857_v54 = vadd.f32 %v1856_v53, %v1270_v51  ;;  %v1858_v26 = vpop.f32.mrb[1].mxu1  ;;  %v1806_v36 = vadd.f32 %v1805_v57, %v1266_v52  ;;  %v1807_v60 = vpop.f32.mrb[2].mxu0 }
 0x332   : > { %v1860_v8 = vpop.f32.mrb[2].mxu1  ;;  %v1808_v38 = vadd.f32 %v1807_v60, %v1262_v49  ;;  %v1809_v47 = vpop.f32.mrb[3].mxu0  ;;  %v1859_v28 = vadd.f32 %v1858_v26, %v1274_v22 }
 0x333   : > { %v3762_v29 = vpack.c.bf16 %v1857_v54, %v1857_v54  ;;  %v1861_v59 = vadd.f32 %v1860_v8, %v1270_v51  ;;  %v1862_v20 = vpop.f32.mrb[3].mxu1  ;;  %v3761_v19 = vpack.c.bf16 %v1806_v36, %v1804_v11  ;;  %v1810_v56 = vadd.f32 %v1809_v47, %v1266_v52 }
 0x334   : > { %v1863_v44 = vadd.f32 %v1862_v20, %v1274_v22 }
 0x335   : > { %1981 = vst [vmem:[#allocation2 + $0x8] sm:$0xf] %v3762_v29  ;;  %v3764_v14 = vpack.c.bf16 %v1861_v59, %v1861_v59  ;;  %1980 = vst [vmem:[#allocation2] sm:$0xff] %v3761_v19  ;;  %v3763_v1 = vpack.c.bf16 %v1810_v56, %v1808_v38 }
 0x337   : > { %1983 = vst [vmem:[#allocation2 + $0x14] sm:$0xf] %v3764_v14  ;;  %1982 = vst [vmem:[#allocation2 + $0xc] sm:$0xff] %v3763_v1  ;;  %v1813_v61 = vpop.f32.mrb[4].mxu0 }
 0x338   : > { %v1866_v63 = vpop.f32.mrb[4].mxu1  ;;  %v1814_v41 = vadd.f32 %v1813_v61, %v1262_v49  ;;  %v1815_v35 = vpop.f32.mrb[5].mxu0 }
 0x339   : > { %v1867_v58 = vadd.f32 %v1866_v63, %v1270_v51  ;;  %v1868_v55 = vpop.f32.mrb[5].mxu1  ;;  %v1816_v0 = vadd.f32 %v1815_v35, %v1266_v52  ;;  %v1817_v3 = vpop.f32.mrb[6].mxu0 }
 0x33a   : > { %v1870_v50 = vpop.f32.mrb[6].mxu1  ;;  %v1818_v6 = vadd.f32 %v1817_v3, %v1262_v49  ;;  %v1819_v9 = vpop.f32.mrb[7].mxu0  ;;  %v1869_v30 = vadd.f32 %v1868_v55, %v1274_v22 }
 0x33b   : > { %v3766_v17 = vpack.c.bf16 %v1867_v58, %v1867_v58  ;;  %v1871_v7 = vadd.f32 %v1870_v50, %v1270_v51  ;;  %v1872_v10 = vpop.f32.mrb[7].mxu1  ;;  %v3765_v5 = vpack.c.bf16 %v1816_v0, %v1814_v41  ;;  %v1820_v12 = vadd.f32 %v1819_v9, %v1266_v52 }
 0x33c   : > { %v1873_v37 = vadd.f32 %v1872_v10, %v1274_v22 }
 0x33d   : > { %1985 = vst [vmem:[#allocation2 + $0x20] sm:$0xf] %v3766_v17  ;;  %v3768_v13 = vpack.c.bf16 %v1871_v7, %v1871_v7  ;;  %1984 = vst [vmem:[#allocation2 + $0x18] sm:$0xff] %v3765_v5  ;;  %v3767_v15 = vpack.c.bf16 %v1820_v12, %v1818_v6 }
 0x33f   : > { %1987 = vst [vmem:[#allocation2 + $0x2c] sm:$0xf] %v3768_v13  ;;  %1986 = vst [vmem:[#allocation2 + $0x24] sm:$0xff] %v3767_v15 }
 0x36f   : > { %v1909_v25 = vpop.f32.mrb[8].mxu0 }
 0x370   : > { %v1919_v27 = vpop.f32.mrb[8].mxu1  ;;  %v1910_v31 = vadd.f32 %v1909_v25, %v1278_v32  ;;  %v1911_v34 = vpop.f32.mrb[9].mxu0 }
 0x371   : > { %v1920_v33 = vadd.f32 %v1919_v27, %v1278_v32  ;;  %v1921_v23 = vpop.f32.mrb[9].mxu1  ;;  %v1912_v39 = vadd.f32 %v1911_v34, %v1282_v24  ;;  %v1913_v42 = vpop.f32.mrb[10].mxu0 }
 0x372   : > { %v1922_v40 = vadd.f32 %v1921_v23, %v1282_v24  ;;  %v1923_v43 = vpop.f32.mrb[10].mxu1  ;;  %v3769_v45 = vpack.c.bf16 %v1910_v31, %v1859_v28  ;;  %v1914_v62 = vadd.f32 %v1913_v42, %v1278_v32  ;;  %v1915_v49 = vpop.f32.mrb[11].mxu0 }
 0x373   : > { %v3773_v46 = vpack.c.bf16 %v1920_v33, %v1869_v30  ;;  %v1924_v2 = vadd.f32 %v1923_v43, %v1278_v32  ;;  %v1925_v48 = vpop.f32.mrb[11].mxu1  ;;  %v3770_v51 = vpack.c.bf16 %v1912_v39, %v1912_v39  ;;  %v1916_v4 = vadd.f32 %v1915_v49, %v1282_v24 }
 0x374   : > { %v3774_v52 = vpack.c.bf16 %v1922_v40, %v1922_v40  ;;  %v1926_v53 = vadd.f32 %v1925_v48, %v1282_v24  ;;  %2040 = vst [vmem:[#allocation3] sm:$0xff] %v3769_v45  ;;  %v3771_v11 = vpack.c.bf16 %v1914_v62, %v1863_v44 }
 0x375   : > { %2044 = vst [vmem:[#allocation3 + $0x18] sm:$0xff] %v3773_v46  ;;  %v3775_v54 = vpack.c.bf16 %v1924_v2, %v1873_v37  ;;  %2041 = vst [vmem:[#allocation3 + $0x8] sm:$0xf] %v3770_v51  ;;  %v3772_v57 = vpack.c.bf16 %v1916_v4, %v1916_v4 }
 0x376   : > { %2045 = vst [vmem:[#allocation3 + $0x20] sm:$0xf] %v3774_v52  ;;  %v3776_v26 = vpack.c.bf16 %v1926_v53, %v1926_v53  ;;  %2042 = vst [vmem:[#allocation3 + $0xc] sm:$0xff] %v3771_v11 }
 0x377   : > { %2046 = vst [vmem:[#allocation3 + $0x24] sm:$0xff] %v3775_v54  ;;  %2043 = vst [vmem:[#allocation3 + $0x14] sm:$0xf] %v3772_v57 }
 0x378   : > { %2047 = vst [vmem:[#allocation3 + $0x2c] sm:$0xf] %v3776_v26 }
 0x379 PF: > { %v5475_v36 = vld [vmem:[%s4738_s28 + $0x4] ss:$12 sps:$4 sm:$0xff]   ;;  %v5478_v60 = vld [vmem:[%s4738_s28] ss:$12 sps:$4 sm:$0xff]   ;;  %v6173_v8 = vmov 0.0   ;;  %v6171_v29 = vmov 0   ;;  %v2128_v45 = vlaneseq }
 0x37a   : > { %3849 = vmatprep.subr.bf16.mxu1 %v6173_v8  ;;  %2303 = vmatprep.mubr.bf16.mxu0 %v6171_v29  ;;  %v5484_v38 = vld [vmem:[%s4738_s28 + $0x1c] ss:$12 sps:$4 sm:$0xff]   ;;  %vm4509_vm0 = vmmov 0   ;;  %v5490_v59 = vld [vmem:[%s4738_s28 + $0x18] ss:$12 sps:$4 sm:$0xff]   ;;  %s4510_s11 = smov [#allocation12]  }
 0x37b   : > { %2271 = vmatprep.subr.bf16.mxu0 %v5475_v36  ;;  %3865 = vmatprep.mubr.msk.bf16.mxu1 %vm4509_vm0, %v6173_v8  ;;  %v5494_v47 = vld [vmem:[%s4738_s28 + $0x34] ss:$12 sps:$4 sm:$0xff]   ;;  %v5498_v20 = vld [vmem:[%s4738_s28 + $0x30] ss:$12 sps:$4 sm:$0xff]   ;;  %v5502_v19 = vld [vmem:[%s4738_s28 + $0x4c] ss:$12 sps:$4 sm:$0xff]  }
 0x37c   : > { %2272 = vmatpush1.bf16.msra.mxu0 %v5478_v60  ;;  %v5505_v56 = vld [vmem:[%s4738_s28 + $0x8] ss:$12 sps:$4 sm:$0xff]   ;;  %v5512_v1 = vld [vmem:[%s4738_s28 + $0x64] ss:$12 sps:$4 sm:$0xff]   ;;  %v5517_v61 = vld [vmem:[%s4738_s28 + $0x20] ss:$12 sps:$4 sm:$0xff]  }
 0x37d   : > { %2273 = vmatprep.subr.bf16.mxu0 %v5484_v38  ;;  %v5509_v14 = vld [vmem:[%s4738_s28 + $0x48] ss:$12 sps:$4 sm:$0xff]   ;;  %6390 = vst [vmem:[#allocation21_spill] sm:$0xff] %v5512_v1  ;;  %3850 = vmatpush3.bf16.msra.mxu1 %v5505_v56  ;;  %v5521_v63 = vld [vmem:[%s4738_s28 + $0x60] ss:$12 sps:$4 sm:$0xff]   ;;  %v5729_v46 = vshrl.u32 %v2128_v45, 7 }
 0x37e   : > { %3851 = vmatprep.subr.bf16.mxu1 %v6173_v8  ;;  %6391 = vst [vmem:[#allocation19_spill] sm:$0xff] %v5521_v63  ;;  %v5525_v41 = vld [vmem:[%s4738_s28 + $0x7c] ss:$12 sps:$4 sm:$0xff]   ;;  %v5530_v58 = vld [vmem:[%s4738_s28 + $0x38] ss:$12 sps:$4 sm:$0xff]   ;;  %s3289_s24 = sshll.u32 %s4510_s11, 4  ;;  %s3290_s24 = int_to_ptr.vmem [resolvable:$true] %s3289_s24 }
 0x37f   : > { %6392 = vst [vmem:[#allocation27_spill] sm:$0xff] %v5525_v41  ;;  %v5535_v35 = vld [vmem:[%s4738_s28 + $0x78] ss:$12 sps:$4 sm:$0xff]   ;;  %v5539_v55 = vld [vmem:[%s4738_s28 + $0x94] ss:$12 sps:$4 sm:$0xff]   ;;  %v2130_v62 = vsub.s32 0, %v5729_v46  ;;  %p4430_p6 = scmp.lt.s32.totalorder %s3290_s24, %s3290_s24 }
 0x380   : > { %2274 = vmatpush1.bf16.msra.mxu0 %v5490_v59  ;;  %6393 = vst [vmem:[#allocation42_spill] sm:$0xff] %v5535_v35  ;;  %6394 = vst [vmem:[#allocation40_spill] sm:$0xff] %v5539_v55  ;;  %v5543_v0 = vld [vmem:[%s4738_s28 + $0x50] ss:$12 sps:$4 sm:$0xff]   ;;  %v5551_v50 = vld [vmem:[%s4738_s28 + $0xac] ss:$12 sps:$4 sm:$0xff]  }
 0x381   : > { %2275 = vmatprep.subr.bf16.mxu0 %v5494_v47  ;;  %3852 = vmatpush3.bf16.msra.mxu1 %v5517_v61  ;;  %6395 = vst [vmem:[#allocation47_spill] sm:$0xff] %v5543_v0  ;;  %v5547_v3 = vld [vmem:[%s4738_s28 + $0x90] ss:$12 sps:$4 sm:$0xff]   ;;  %6397 = vst [vmem:[#allocation48_spill] sm:$0xff] %v5551_v50  ;;  %v5556_v17 = vld [vmem:[%s4738_s28 + $0x68] ss:$12 sps:$4 sm:$0xff]  }
 0x382   : > { %3853 = vmatprep.subr.bf16.mxu1 %v6173_v8  ;;  %6396 = vst [vmem:[#allocation44_spill] sm:$0xff] %v5547_v3  ;;  %6398 = vst [vmem:[#allocation45_spill] sm:$0xff] %v5556_v17  ;;  %v5561_v6 = vld [vmem:[%s4738_s28 + $0xa8] ss:$12 sps:$4 sm:$0xff]   ;;  %v5564_v7 = vld [vmem:[%s4738_s28 + $0xc4] ss:$12 sps:$4 sm:$0xff]  }
 0x383   : > { %6399 = vst [vmem:[#allocation53_spill] sm:$0xff] %v5561_v6  ;;  %6400 = vst [vmem:[#allocation50_spill] sm:$0xff] %v5564_v7  ;;  %v5569_v9 = vld [vmem:[%s4738_s28 + $0x80] ss:$12 sps:$4 sm:$0xff]   ;;  %v5577_v5 = vld [vmem:[%s4738_s28 + $0xdc] ss:$12 sps:$4 sm:$0xff]  }
 0x384   : > { %2276 = vmatpush1.bf16.msra.mxu0 %v5498_v20  ;;  %6401 = vst [vmem:[#allocation54_spill] sm:$0xff] %v5569_v9  ;;  %v5573_v10 = vld [vmem:[%s4738_s28 + $0xc0] ss:$12 sps:$4 sm:$0xff]   ;;  %v5582_v12 = vld [vmem:[%s4738_s28 + $0x98] ss:$12 sps:$4 sm:$0xff]   ;;  %v2134_v49 = vsub.s32 1, %v5729_v46 }
 0x385   : > { %2277 = vmatprep.subr.bf16.mxu0 %v5502_v19  ;;  %3854 = vmatpush3.bf16.msra.mxu1 %v5530_v58  ;;  %6402 = vst [vmem:[#allocation51_spill] sm:$0xff] %v5582_v12  ;;  %v5587_v13 = vld [vmem:[%s4738_s28 + $0xd8] ss:$12 sps:$4 sm:$0xff]   ;;  %v5591_v15 = vld [vmem:[%s4738_s28 + $0xf4] ss:$12 sps:$4 sm:$0xff]   ;;  %p4114_p5 = scmp.eq.s32.totalorder %s4624_s9, 1 }
 0x386   : > { %3855 = vmatprep.subr.bf16.mxu1 %v6173_v8  ;;  %v5597_v16 = vld [vmem:[%s4738_s28 + $0xb0] ss:$12 sps:$4 sm:$0xff]   ;;  %v5606_v21 = vld [vmem:[%s4738_s28 + $0x10c] ss:$12 sps:$4 sm:$0xff]   ;;  %v5610_v22 = vld [vmem:[%s4738_s28 + $0xc8] ss:$12 sps:$4 sm:$0xff]  }
 0x387   : > { %6403 = vst [vmem:[#allocation59_spill] sm:$0xff] %v5597_v16  ;;  %v5602_v18 = vld [vmem:[%s4738_s28 + $0xf0] ss:$12 sps:$4 sm:$0xff]   ;;  %v5615_v32 = vld [vmem:[%s4738_s28 + $0x108] ss:$12 sps:$4 sm:$0xff]   ;;  %v2116_v48 = vld [vmem:[#allocation2] sm:$0xff] }
 0x388   : > { %2278 = vmatpush1.bf16.msra.mxu0 %v5509_v14  ;;  %v5620_v24 = vld [vmem:[%s4738_s28 + $0x124] ss:$12 sps:$4 sm:$0xff]   ;;  %v5624_v25 = vld [vmem:[%s4738_s28 + $0xe0] ss:$12 sps:$4 sm:$0xff]   ;;  %v5635_v28 = vld [vmem:[%s4738_s28 + $0x13c] ss:$12 sps:$4 sm:$0xff]   ;;  %v2118_v4 = vunpack.c.l.bf16 %v2116_v48  ;;  %v2119_v57 = vunpack.c.h.bf16 %v2116_v48 }
 0x389   : > { %2279 = vmatprep.subr.bf16.mxu0 %v5512_v1  ;;  %3856 = vmatpush3.bf16.msra.mxu1 %v5543_v0  ;;  %v5631_v27 = vld [vmem:[%s4738_s28 + $0x120] ss:$12 sps:$4 sm:$0xff]   ;;  %v5639_v30 = vld [vmem:[%s4738_s28 + $0xf8] ss:$12 sps:$4 sm:$0xff]   ;;  %v5652_v34 = vld [vmem:[%s4738_s28 + $0x110] ss:$12 sps:$4 sm:$0xff]  }
 0x38a   : > { %3857 = vmatprep.subr.bf16.mxu1 %v6173_v8  ;;  %v5644_v31 = vld [vmem:[%s4738_s28 + $0x138] ss:$12 sps:$4 sm:$0xff]   ;;  %v5648_v33 = vld [vmem:[%s4738_s28 + $0x154] ss:$12 sps:$4 sm:$0xff]   ;;  %v5657_v23 = vld [vmem:[%s4738_s28 + $0x150] ss:$12 sps:$4 sm:$0xff]  }
 0x38b   : > { %v5661_v44 = vld [vmem:[%s4738_s28 + $0x16c] ss:$12 sps:$4 sm:$0xff]   ;;  %v5665_v37 = vld [vmem:[%s4738_s28 + $0x128] ss:$12 sps:$4 sm:$0xff]   ;;  %v5690_v43 = vld [vmem:[%s4738_s28 + $0x170] ss:$12 sps:$4 sm:$0xff]  }
 0x38c   : > { %2280 = vmatpush1.bf16.msra.mxu0 %v5521_v63  ;;  %v5670_v39 = vld [vmem:[%s4738_s28 + $0x168] ss:$12 sps:$4 sm:$0xff]   ;;  %v5675_v40 = vld [vmem:[%s4738_s28 + $0x140] ss:$12 sps:$4 sm:$0xff]   ;;  %v5681_v42 = vld [vmem:[%s4738_s28 + $0x158] ss:$12 sps:$4 sm:$0xff]  }
 0x38d   : > { %2281 = vmatprep.subr.bf16.mxu0 %v5525_v41  ;;  %3858 = vmatpush3.bf16.msra.mxu1 %v5556_v17  ;;  %v2113_v2 = vld [vmem:[%s4751_s21] sm:$0x7]  ;;  %s4423_s30 = scalar_lea.vmem %s3290_s24, 1024 }
 0x38e   : > { %3859 = vmatprep.subr.bf16.mxu1 %v6173_v8  ;;  %v5734_v51 = vrot.slane %v2113_v2, %v2130_v62  ;;  %v5736_v52 = vrot.slane %v2113_v2, %v2134_v49  ;;  %p4424_p9 = scmp.ne.s32.totalorder %s3290_s24, %s4423_s30  ;;  %p4431_p10 = scmp.lt.s32.totalorder %s4423_s30, %s4423_s30 }
 0x390   : > { %2282 = vmatpush1.bf16.msra.mxu0 %v5535_v35  ;;  %6404 = vst [vmem:[#allocation56_spill] sm:$0xff] %v5734_v51  ;;  %6405 = vst [vmem:[#allocation60_spill] sm:$0xff] %v5736_v52  ;;  %p4425_p2 = pnand %p4424_p9, %p4114_p5  ;;  %p4432_p11 = por %p4431_p10, %p4430_p6 }
 0x391   : > { %2283 = vmatprep.subr.bf16.mxu0 %v5539_v55  ;;  %3860 = vmatpush3.bf16.msra.mxu1 %v5569_v9 }
 0x392   : > { %3861 = vmatprep.subr.bf16.mxu1 %v6173_v8  ;;  %p4426_p3 = pneg %p4425_p2 }
 0x394   : > { %2284 = vmatpush1.bf16.msra.mxu0 %v5547_v3  ;;  %p4433_p8 = pnand %p4432_p11, %p4426_p3 }
 0x395   : > { %2285 = vmatprep.subr.bf16.mxu0 %v5551_v50  ;;  %3862 = vmatpush3.bf16.msra.mxu1 %v5582_v12 }
 0x396   : > { %3863 = vmatprep.subr.bf16.mxu1 %v6173_v8 }
 0x398   : > { %2286 = vmatpush1.bf16.msra.mxu0 %v5561_v6 }
 0x399   : > { %2496 = vmatprep.subr.bf16.mxu0 %v5564_v7  ;;  %3864 = vmatpush3.bf16.msra.mxu1 %v5597_v16 }
 0x39a   : > { %3869 = vmatprep.subr.bf16.mxu1 %v6173_v8 }
 0x39b   : > { %2304 = vmatmul.mubr.bf16.vlgmr.msra.gmra.mrb[0].mxu0 %v6171_v29 }
 0x39c   : > { %2497 = vmatpush1.bf16.msra.mxu0 %v5573_v10  ;;  %2528 = vmatprep.mubr.bf16.mxu0 %v6171_v29 }
 0x39d   : > { %2498 = vmatprep.subr.bf16.mxu0 %v5577_v5  ;;  %3866 = vmatmul.mubr.bf16.vlgmr.msra.gmra.mrb[0].mxu1 %v6171_v29 }
 0x39e   : > { %3870 = vmatpush3.bf16.msra.mxu1 %v5610_v22  ;;  %3885 = vmatprep.mubr.msk.bf16.mxu1 %vm4509_vm0, %v6173_v8 }
 0x39f   : > { %3871 = vmatprep.subr.bf16.mxu1 %v6173_v8 }
 0x3a0   : > { %2499 = vmatpush1.bf16.msra.mxu0 %v5587_v13 }
 0x3a1   : > { %2500 = vmatprep.subr.bf16.mxu0 %v5591_v15 }
 0x3a2   : > { %3872 = vmatpush3.bf16.msra.mxu1 %v5624_v25 }
 0x3a3   : > { %3873 = vmatprep.subr.bf16.mxu1 %v6173_v8 }
 0x3a4   : > { %2501 = vmatpush1.bf16.msra.mxu0 %v5602_v18 }
 0x3a5   : > { %2502 = vmatprep.subr.bf16.mxu0 %v5606_v21 }
 0x3a6   : > { %3874 = vmatpush3.bf16.msra.mxu1 %v5639_v30 }
 0x3a7   : > { %3875 = vmatprep.subr.bf16.mxu1 %v6173_v8 }
 0x3a8   : > { %2503 = vmatpush1.bf16.msra.mxu0 %v5615_v32 }
 0x3a9   : > { %2504 = vmatprep.subr.bf16.mxu0 %v5620_v24 }
 0x3aa   : > { %3876 = vmatpush3.bf16.msra.mxu1 %v5652_v34 }
 0x3ab   : > { %3877 = vmatprep.subr.bf16.mxu1 %v6173_v8 }
 0x3ac   : > { %2505 = vmatpush1.bf16.msra.mxu0 %v5631_v27 }
 0x3ad   : > { %2506 = vmatprep.subr.bf16.mxu0 %v5635_v28 }
 0x3ae   : > { %3878 = vmatpush3.bf16.msra.mxu1 %v5665_v37 }
 0x3af   : > { %3879 = vmatprep.subr.bf16.mxu1 %v6173_v8 }
 0x3b0   : > { %2507 = vmatpush1.bf16.msra.mxu0 %v5644_v31 }
 0x3b1   : > { %2508 = vmatprep.subr.bf16.mxu0 %v5648_v33 }
 0x3b2   : > { %3880 = vmatpush3.bf16.msra.mxu1 %v5675_v40 }
 0x3b3   : > { %3881 = vmatprep.subr.bf16.mxu1 %v6173_v8 }
 0x3b4   : > { %2509 = vmatpush1.bf16.msra.mxu0 %v5657_v23 }
 0x3b5   : > { %2510 = vmatprep.subr.bf16.mxu0 %v5661_v44 }
 0x3b6   : > { %3882 = vmatpush3.bf16.msra.mxu1 %v5681_v42 }
 0x3b7   : > { %3883 = vmatprep.subr.bf16.mxu1 %v6173_v8 }
 0x3b8   : > { %2511 = vmatpush1.bf16.msra.mxu0 %v5670_v39 }
 0x3b9   : > { %2635 = vmatprep.subr.bf16.mxu0 %v5475_v36 }
 0x3ba   : > { %3884 = vmatpush3.bf16.msra.mxu1 %v5690_v43 }
 0x3bb   : > { %2529 = vmatmul.mubr.bf16.vlgmr.msra.gmra.mrb[4].mxu0 %v6171_v29  ;;  %3889 = vmatprep.subr.bf16.mxu1 %v6173_v8 }
 0x3bc   : > { %2636 = vmatpush1.bf16.msra.mxu0 %v5478_v60  ;;  %2667 = vmatprep.mubr.bf16.mxu0 %v6171_v29 }
 0x3bd   : > { %2637 = vmatprep.subr.bf16.mxu0 %v5484_v38  ;;  %3886 = vmatmul.mubr.bf16.vlgmr.msra.gmra.mrb[4].mxu1 %v6171_v29 }
 0x3be   : > { %3890 = vmatpush3.bf16.msra.mxu1 %v5505_v56  ;;  %3905 = vmatprep.mubr.msk.bf16.mxu1 %vm4509_vm0, %v6173_v8 }
 0x3bf   : > { %3891 = vmatprep.subr.bf16.mxu1 %v6173_v8 }
 0x3c0   : > { %2638 = vmatpush1.bf16.msra.mxu0 %v5490_v59 }
 0x3c1   : > { %2639 = vmatprep.subr.bf16.mxu0 %v5494_v47 }
 0x3c2   : > { %3892 = vmatpush3.bf16.msra.mxu1 %v5517_v61 }
 0x3c3   : > { %3893 = vmatprep.subr.bf16.mxu1 %v6173_v8 }
 0x3c4   : > { %2640 = vmatpush1.bf16.msra.mxu0 %v5498_v20 }
 0x3c5   : > { %2641 = vmatprep.subr.bf16.mxu0 %v5502_v19 }
 0x3c6   : > { %3894 = vmatpush3.bf16.msra.mxu1 %v5530_v58 }
 0x3c7   : > { %3895 = vmatprep.subr.bf16.mxu1 %v6173_v8 }
 0x3c8   : > { %2642 = vmatpush1.bf16.msra.mxu0 %v5509_v14 }
 0x3c9   : > { %2643 = vmatprep.subr.bf16.mxu0 %v5512_v1 }
 0x3ca   : > { %3896 = vmatpush3.bf16.msra.mxu1 %v5543_v0 }
 0x3cb   : > { %3897 = vmatprep.subr.bf16.mxu1 %v6173_v8 }
 0x3cc   : > { %2644 = vmatpush1.bf16.msra.mxu0 %v5521_v63 }
 0x3cd   : > { %2645 = vmatprep.subr.bf16.mxu0 %v5525_v41 }
 0x3ce   : > { %3898 = vmatpush3.bf16.msra.mxu1 %v5556_v17 }
 0x3cf   : > { %3899 = vmatprep.subr.bf16.mxu1 %v6173_v8 }
 0x3d0   : > { %2646 = vmatpush1.bf16.msra.mxu0 %v5535_v35 }
 0x3d1   : > { %2647 = vmatprep.subr.bf16.mxu0 %v5539_v55 }
 0x3d2   : > { %3900 = vmatpush3.bf16.msra.mxu1 %v5569_v9 }
 0x3d3   : > { %3901 = vmatprep.subr.bf16.mxu1 %v6173_v8 }
 0x3d4   : > { %2648 = vmatpush1.bf16.msra.mxu0 %v5547_v3 }
 0x3d5   : > { %2649 = vmatprep.subr.bf16.mxu0 %v5551_v50 }
 0x3d6   : > { %3902 = vmatpush3.bf16.msra.mxu1 %v5582_v12 }
 0x3d7   : > { %3903 = vmatprep.subr.bf16.mxu1 %v6173_v8 }
 0x3d8   : > { %2650 = vmatpush1.bf16.msra.mxu0 %v5561_v6 }
 0x3d9   : > { %2717 = vmatprep.subr.bf16.mxu0 %v5564_v7 }
 0x3da   : > { %3904 = vmatpush3.bf16.msra.mxu1 %v5597_v16 }
 0x3db   : > { %3909 = vmatprep.subr.bf16.mxu1 %v6173_v8 }
 0x46e   : > { %v2305_v53 = vpop.f32.mrb[0].mxu0 }
 0x46f   : > { %v2306_v11 = vadd.f32 %v2305_v53, %v5734_v51  ;;  %v2307_v54 = vpop.f32.mrb[1].mxu0  ;;  %v2138_v53 = vsub.s32 2, %v5729_v46 }
 0x470   : > { %v2308_v26 = vadd.f32 %v2307_v54, %v5736_v52  ;;  %v2309_v45 = vpop.f32.mrb[2].mxu0  ;;  %v2346_v6 = vpop.f32.mrb[0].mxu1 }
 0x471   : > { %v2577_v29 = vadd.f32 %v2306_v11, %v2118_v4  ;;  %v2310_v8 = vpop.f32.mrb[3].mxu0  ;;  %v3867_v12 = vpop.f32.mrb[1].mxu1  ;;  %v5741_v48 = vrot.slane %v2113_v2, %v2138_v53  ;;  %v5743_v4 = vld [vmem:[#allocation2 + $0x8] ss:$12 sps:$4 sm:$0xff]  }
 0x472   : > { %v2584_v16 = vadd.f32 %v2308_v26, %v2119_v57  ;;  %v2349_v3 = vpop.f32.mrb[2].mxu1  ;;  %6407 = vst [vmem:[#allocation65_spill] sm:$0xff] %v5743_v4  ;;  %v3676_v8 = vld [vmem:[%s4751_s21 + $0x3] sm:$0x7]  ;;  %v2122_v11 = vld [vmem:[#allocation3 + $0x24] sm:$0xff]  ;;  %v2120_v12 = vunpack.c.l.bf16 %v5743_v4 }
 0x473   : > { %v3725_v7 = vmul.f32 -1.442695, %v2577_v29  ;;  %v3868_v55 = vpop.f32.mrb[3].mxu1  ;;  %6406 = vst [vmem:[#allocation57_spill] sm:$0xff] %v5741_v48  ;;  %v5748_v3 = vrot.slane %v3676_v8, %v2130_v62  ;;  %v2125_v26 = vunpack.c.h.bf16 %v2122_v11 }
 0x474   : > { %v3726_v50 = vmul.f32 -1.442695, %v2584_v16 }
 0x475   : > { %4225 = vpow2.f32 %v3725_v7  ;;  %v2347_v7 = vadd.f32 %v2346_v6, %v5741_v48  ;;  %6408 = vst [vmem:[#allocation62_spill] sm:$0xff] %v5748_v3 }
 0x476   : > { %4227 = vpow2.f32 %v3726_v50  ;;  %v5750_v50 = vrot.slane %v3676_v8, %v2134_v49 }
 0x47f   : > { %v4226_v9 = vpop.eup %4225 }
 0x480   : > { %v2581_v35 = vadd.f32 1.0, %v4226_v9  ;;  %v4228_v54 = vpop.eup %4227 }
 0x481   : > { %v2588_v29 = vadd.f32 1.0, %v4228_v54 }
 0x482   : > { %4229 = vrcp.f32 %v2581_v35  ;;  %v2124_v35 = vunpack.c.l.bf16 %v2122_v11 }
 0x483   : > { %4231 = vrcp.f32 %v2588_v29 }
 0x48c   : > { %v4230_v55 = vpop.eup %4229 }
 0x48d   : > { %v2591_v9 = vmul.f32 %v4230_v55, %v2347_v7  ;;  %v4232_v49 = vpop.eup %4231 }
 0x48e   : > { %v2530_v16 = vpop.f32.mrb[4].mxu0  ;;  %v2594_v51 = vsub.f32 1.0, %v4232_v49  ;;  %v2596_v11 = vmul.f32 0.0, %v4232_v49 }
 0x48f   : > { %v2592_v46 = vadd.f32 %v2591_v9, %v2120_v12  ;;  %v2531_v2 = vadd.f32 %v2530_v16, %v5748_v3  ;;  %v2532_v57 = vpop.f32.mrb[5].mxu0 }
 0x490   : > { %v2533_v45 = vadd.f32 %v2532_v57, %v5750_v50  ;;  %v2534_v6 = vpop.f32.mrb[6].mxu0  ;;  %v2571_v52 = vpop.f32.mrb[4].mxu1 }
 0x491   : > { %4233 = vtanh.f32 %v2592_v46  ;;  %v2598_v54 = vadd.f32 %v2531_v2, %v2124_v35  ;;  %v2535_v48 = vpop.f32.mrb[7].mxu0  ;;  %v3887_v7 = vpop.f32.mrb[5].mxu1  ;;  %v6410_v35 = vmov 0  }
 0x492   : > { %v2605_v4 = vadd.f32 %v2533_v45, %v2125_v26  ;;  %v2574_v55 = vpop.f32.mrb[6].mxu1  ;;  %v5770_v26 = vld [vmem:[#allocation3 + $0x20] ss:$12 sps:$4 sm:$0xff]  }
 0x493   : > { %v3727_v62 = vmul.f32 -1.442695, %v2598_v54  ;;  %v3888_v12 = vpop.f32.mrb[7].mxu1 }
 0x494   : > { %v3728_v29 = vmul.f32 -1.442695, %v2605_v4  ;;  %v5763_v4 = vrot.slane %v3676_v8, %v2138_v53  ;;  %v2126_v8 = vunpack.c.h.bf16 %v5770_v26 }
 0x495   : > { %4235 = vpow2.f32 %v3727_v62 }
 0x496   : > { %4237 = vpow2.f32 %v3728_v29  ;;  %v2572_v53 = vadd.f32 %v2571_v52, %v5763_v4 }
 0x49b   : > { %v4234_v9 = vpop.eup %4233 }
 0x49c   : > { %v2595_v16 = vmul.f32 %v4234_v9, %v2594_v51  ;;  %v6409_v51 = vmov 0.0  }
 0x49e   : > { %v5754_v3 = vadd.f32 %v2596_v11, %v2595_v16  ;;  %v6411_v16 = vld [vmem:[#allocation42_spill] sm:$0xff] }
 0x49f   : > { %v4236_v57 = vpop.eup %4235  ;;  %v6412_v11 = vld [vmem:[#allocation54_spill] sm:$0xff] }
 0x4a0   : > { %v2602_v46 = vadd.f32 1.0, %v4236_v57  ;;  %2619 = vst [vmem:[#allocation12] sm:$0xff] %v5754_v3  ;;  %v2634_v48 = vpack.c.bf16 %v5754_v3, %v5754_v3  ;;  %v4238_v2 = vpop.eup %4237  ;;  %v6413_v57 = vld [vmem:[#allocation40_spill] sm:$0xff] }
 0x4a1   : > { %v2609_v45 = vadd.f32 1.0, %v4238_v2  ;;  %v6416_v2 = vld [vmem:[#allocation48_spill] sm:$0xff] }
 0x4a2   : > { %4239 = vrcp.f32 %v2602_v46  ;;  %2668 = vmatmul.mubr.bf16.vlgmr.msra.gmra.mrb[8].mxu0 %v2634_v48  ;;  %3906 = vmatmul.mubr.bf16.vlgmr.msra.gmra.mrb[8].mxu1 %v2634_v48  ;;  %v6414_v46 = vld [vmem:[#allocation44_spill] sm:$0xff]  ;;  %v6415_v48 = vld [vmem:[#allocation51_spill] sm:$0xff] }
 0x4a3   : > { %2718 = vmatpush1.bf16.msra.mxu0 %v5573_v10  ;;  %3910 = vmatpush3.bf16.msra.mxu1 %v5610_v22  ;;  %4241 = vrcp.f32 %v2609_v45  ;;  %v6417_v45 = vld [vmem:[#allocation53_spill] sm:$0xff] }
 0x4a4   : > { %2719 = vmatprep.subr.bf16.mxu0 %v5577_v5  ;;  %3911 = vmatprep.subr.bf16.mxu1 %v6409_v51 }
 0x4a5   : > { %2749 = vmatprep.mubr.bf16.mxu0 %v6410_v35  ;;  %3925 = vmatprep.mubr.msk.bf16.mxu1 %vm4509_vm0, %v6409_v51 }
 0x4a7   : > { %2720 = vmatpush1.bf16.msra.mxu0 %v5587_v13  ;;  %3912 = vmatpush3.bf16.msra.mxu1 %v5624_v25 }
 0x4a8   : > { %2721 = vmatprep.subr.bf16.mxu0 %v5591_v15  ;;  %3913 = vmatprep.subr.bf16.mxu1 %v6409_v51 }
 0x4ab   : > { %2722 = vmatpush1.bf16.msra.mxu0 %v5602_v18  ;;  %3914 = vmatpush3.bf16.msra.mxu1 %v5639_v30 }
 0x4ac   : > { %v4240_v6 = vpop.eup %4239  ;;  %2723 = vmatprep.subr.bf16.mxu0 %v5606_v21  ;;  %3915 = vmatprep.subr.bf16.mxu1 %v6409_v51 }
 0x4ad   : > { %v2612_v54 = vmul.f32 %v4240_v6, %v2572_v53  ;;  %v4242_v52 = vpop.eup %4241  ;;  %v6418_v53 = vld [vmem:[#allocation59_spill] sm:$0xff] }
 0x4ae   : > { %v2615_v49 = vsub.f32 1.0, %v4242_v52  ;;  %v2617_v55 = vmul.f32 0.0, %v4242_v52  ;;  %v2623_v6 = vld [vmem:[#allocation2 + $0xc] sm:$0xff] }
 0x4af   : > { %v2613_v62 = vadd.f32 %v2612_v54, %v2126_v8  ;;  %2724 = vmatpush1.bf16.msra.mxu0 %v5615_v32  ;;  %3916 = vmatpush3.bf16.msra.mxu1 %v5652_v34  ;;  %v6419_v8 = vld [vmem:[#allocation50_spill] sm:$0xff]  ;;  %v2625_v54 = vunpack.c.l.bf16 %v2623_v6 }
 0x4b0   : > { %2725 = vmatprep.subr.bf16.mxu0 %v5620_v24  ;;  %3917 = vmatprep.subr.bf16.mxu1 %v6409_v51 }
 0x4b1   : > { %4243 = vtanh.f32 %v2613_v62 }
 0x4b3   : > { %2726 = vmatpush1.bf16.msra.mxu0 %v5631_v27  ;;  %3918 = vmatpush3.bf16.msra.mxu1 %v5665_v37 }
 0x4b4   : > { %2727 = vmatprep.subr.bf16.mxu0 %v5635_v28  ;;  %3919 = vmatprep.subr.bf16.mxu1 %v6409_v51 }
 0x4b7   : > { %2728 = vmatpush1.bf16.msra.mxu0 %v5644_v31  ;;  %3920 = vmatpush3.bf16.msra.mxu1 %v5675_v40 }
 0x4b8   : > { %2729 = vmatprep.subr.bf16.mxu0 %v5648_v33  ;;  %3921 = vmatprep.subr.bf16.mxu1 %v6409_v51 }
 0x4bb   : > { %v4244_v29 = vpop.eup %4243  ;;  %2730 = vmatpush1.bf16.msra.mxu0 %v5657_v23  ;;  %3922 = vmatpush3.bf16.msra.mxu1 %v5681_v42 }
 0x4bc   : > { %2731 = vmatprep.subr.bf16.mxu0 %v5661_v44  ;;  %3923 = vmatprep.subr.bf16.mxu1 %v6409_v51  ;;  %v2616_v7 = vmul.f32 %v4244_v29, %v2615_v49  ;;  %v6420_v49 = vld [vmem:[#allocation56_spill] sm:$0xff] }
 0x4be   : > { %v5796_v12 = vadd.f32 %v2617_v55, %v2616_v7 }
 0x4bf   : > { %2732 = vmatpush1.bf16.msra.mxu0 %v5670_v39  ;;  %3924 = vmatpush3.bf16.msra.mxu1 %v5690_v43 }
 0x4c0   : > { %2621 = vst [vmem:[#allocation12 + $0x38] sm:$0xff] %v5796_v12  ;;  %v2716_v9 = vpack.c.bf16 %v5796_v12, %v5796_v12  ;;  %2857 = vmatprep.subr.bf16.mxu0 %v5475_v36  ;;  %3929 = vmatprep.subr.bf16.mxu1 %v6409_v51 }
 0x4c2   : > { %2750 = vmatmul.mubr.bf16.vlgmr.msra.gmra.mrb[12].mxu0 %v2716_v9  ;;  %3926 = vmatmul.mubr.bf16.vlgmr.msra.gmra.mrb[12].mxu1 %v2716_v9  ;;  %v2626_v9 = vunpack.c.h.bf16 %v2623_v6 }
 0x4c3   : > { %2858 = vmatpush1.bf16.msra.mxu0 %v5478_v60  ;;  %3930 = vmatpush3.bf16.msra.mxu1 %v5505_v56 }
 0x4c4   : > { %2859 = vmatprep.subr.bf16.mxu0 %v5484_v38  ;;  %3931 = vmatprep.subr.bf16.mxu1 %v6409_v51 }
 0x4c5   : > { %2889 = vmatprep.mubr.bf16.mxu0 %v6410_v35  ;;  %3945 = vmatprep.mubr.msk.bf16.mxu1 %vm4509_vm0, %v6409_v51 }
 0x4c7   : > { %2860 = vmatpush1.bf16.msra.mxu0 %v5490_v59  ;;  %3932 = vmatpush3.bf16.msra.mxu1 %v5517_v61 }
 0x4c8   : > { %2861 = vmatprep.subr.bf16.mxu0 %v5494_v47  ;;  %3933 = vmatprep.subr.bf16.mxu1 %v6409_v51 }
 0x4cb   : > { %2862 = vmatpush1.bf16.msra.mxu0 %v5498_v20  ;;  %3934 = vmatpush3.bf16.msra.mxu1 %v5530_v58 }
 0x4cc   : > { %2863 = vmatprep.subr.bf16.mxu0 %v5502_v19  ;;  %3935 = vmatprep.subr.bf16.mxu1 %v6409_v51 }
 0x4cf   : > { %2864 = vmatpush1.bf16.msra.mxu0 %v5509_v14  ;;  %3936 = vmatpush3.bf16.msra.mxu1 %v5543_v0  ;;  %v6423_v0 = vld [vmem:[#allocation57_spill] sm:$0xff] }
 0x4d0   : > { %2865 = vmatprep.subr.bf16.mxu0 %v5512_v1  ;;  %3937 = vmatprep.subr.bf16.mxu1 %v6409_v51 }
 0x4d3   : > { %2866 = vmatpush1.bf16.msra.mxu0 %v5521_v63  ;;  %3938 = vmatpush3.bf16.msra.mxu1 %v5556_v17 }
 0x4d4   : > { %2867 = vmatprep.subr.bf16.mxu0 %v5525_v41  ;;  %3939 = vmatprep.subr.bf16.mxu1 %v6409_v51 }
 0x4d7   : > { %2868 = vmatpush1.bf16.msra.mxu0 %v6411_v16  ;;  %3940 = vmatpush3.bf16.msra.mxu1 %v6412_v11 }
 0x4d8   : > { %2869 = vmatprep.subr.bf16.mxu0 %v6413_v57  ;;  %3941 = vmatprep.subr.bf16.mxu1 %v6409_v51 }
 0x4db   : > { %2870 = vmatpush1.bf16.msra.mxu0 %v6414_v46  ;;  %3942 = vmatpush3.bf16.msra.mxu1 %v6415_v48 }
 0x4dc   : > { %2871 = vmatprep.subr.bf16.mxu0 %v6416_v2  ;;  %3943 = vmatprep.subr.bf16.mxu1 %v6409_v51  ;;  %v6421_v2 = vld [vmem:[#allocation60_spill] sm:$0xff] }
 0x4df   : > { %2872 = vmatpush1.bf16.msra.mxu0 %v6417_v45  ;;  %3944 = vmatpush3.bf16.msra.mxu1 %v6418_v53 }
 0x4e0   : > { %2939 = vmatprep.subr.bf16.mxu0 %v6419_v8  ;;  %3949 = vmatprep.subr.bf16.mxu1 %v6409_v51 }
 0x575   : > { %v2669_v62 = vpop.f32.mrb[8].mxu0  ;;  %v2710_v52 = vpop.f32.mrb[8].mxu1 }
 0x576   : > { %v2670_v29 = vadd.f32 %v2669_v62, %v6420_v49  ;;  %v2671_v7 = vpop.f32.mrb[9].mxu0  ;;  %v3907_v55 = vpop.f32.mrb[9].mxu1  ;;  %v2629_v49 = vld [vmem:[#allocation3 + $0x18] sm:$0xff] }
 0x577   : > { %v2672_v48 = vadd.f32 %v2671_v7, %v6421_v2  ;;  %v2673_v46 = vpop.f32.mrb[10].mxu0  ;;  %v2713_v57 = vpop.f32.mrb[10].mxu1  ;;  %v6422_v55 = vld [vmem:[#allocation65_spill] sm:$0xff]  ;;  %v2711_v7 = vadd.f32 %v2710_v52, %v6423_v0 }
 0x578   : > { %v2798_v45 = vadd.f32 %v2670_v29, %v2625_v54  ;;  %v2674_v11 = vpop.f32.mrb[11].mxu0  ;;  %v3908_v53 = vpop.f32.mrb[11].mxu1  ;;  %v2627_v6 = vunpack.c.h.bf16 %v6422_v55 }
 0x579   : > { %v2805_v8 = vadd.f32 %v2672_v48, %v2626_v9  ;;  %v2631_v11 = vunpack.c.l.bf16 %v2629_v49 }
 0x57a   : > { %v3729_v16 = vmul.f32 -1.442695, %v2798_v45 }
 0x57b   : > { %v3730_v41 = vmul.f32 -1.442695, %v2805_v8 }
 0x57c   : > { %4245 = vpow2.f32 %v3729_v16  ;;  %v6424_v16 = vld [vmem:[#allocation62_spill] sm:$0xff] }
 0x57d   : > { %4247 = vpow2.f32 %v3730_v41 }
 0x586   : > { %v4246_v17 = vpop.eup %4245 }
 0x587   : > { %v2802_v63 = vadd.f32 1.0, %v4246_v17  ;;  %v4248_v1 = vpop.eup %4247  ;;  %v2632_v17 = vunpack.c.h.bf16 %v2629_v49 }
 0x588   : > { %v2809_v62 = vadd.f32 1.0, %v4248_v1 }
 0x589   : > { %4249 = vrcp.f32 %v2802_v63 }
 0x58a   : > { %4251 = vrcp.f32 %v2809_v62 }
 0x593   : > { %v4250_v46 = vpop.eup %4249 }
 0x594   : > { %v2812_v57 = vmul.f32 %v4250_v46, %v2711_v7  ;;  %v4252_v62 = vpop.eup %4251 }
 0x595   : > { %v2751_v53 = vpop.f32.mrb[12].mxu0  ;;  %v2792_v45 = vpop.f32.mrb[12].mxu1  ;;  %v2815_v2 = vsub.f32 1.0, %v4252_v62 }
 0x596   : > { %v2813_v48 = vadd.f32 %v2812_v57, %v2627_v6  ;;  %v2752_v8 = vadd.f32 %v2751_v53, %v6424_v16  ;;  %v2753_v41 = vpop.f32.mrb[13].mxu0  ;;  %v3927_v54 = vpop.f32.mrb[13].mxu1  ;;  %v2817_v53 = vmul.f32 %v4252_v62, %v5754_v3  ;;  %v6438_v62 = vld [vmem:[#allocation50_spill] sm:$0xff] }
 0x597   : > { %v2754_v63 = vadd.f32 %v2753_v41, %v5750_v50  ;;  %v2755_v1 = vpop.f32.mrb[14].mxu0  ;;  %v2795_v29 = vpop.f32.mrb[14].mxu1 }
 0x598   : > { %4253 = vtanh.f32 %v2813_v48  ;;  %v2819_v9 = vadd.f32 %v2752_v8, %v2631_v11  ;;  %v2756_v55 = vpop.f32.mrb[15].mxu0  ;;  %v3928_v52 = vpop.f32.mrb[15].mxu1  ;;  %v2793_v48 = vadd.f32 %v2792_v45, %v5763_v4 }
 0x599   : > { %v2826_v7 = vadd.f32 %v2754_v63, %v2632_v17 }
 0x59a   : > { %v3731_v0 = vmul.f32 -1.442695, %v2819_v9 }
 0x59b   : > { %v3732_v46 = vmul.f32 -1.442695, %v2826_v7  ;;  %v6437_v7 = vld [vmem:[#allocation59_spill] sm:$0xff] }
 0x59c   : > { %4255 = vpow2.f32 %v3731_v0 }
 0x59d   : > { %4257 = vpow2.f32 %v3732_v46  ;;  %v2845_v46 = vld [vmem:[#allocation2 + $0x18] sm:$0xff] }
 0x5a2   : > { %v4254_v6 = vpop.eup %4253 }
 0x5a3   : > { %v2816_v57 = vmul.f32 %v4254_v6, %v2815_v2  ;;  %v2633_v2 = vunpack.c.l.bf16 %v5770_v26  ;;  %v2847_v6 = vunpack.c.l.bf16 %v2845_v46 }
 0x5a5   : > { %v5847_v49 = vadd.f32 %v2817_v53, %v2816_v57 }
 0x5a6   : > { %v4256_v41 = vpop.eup %4255 }
 0x5a7   : > { %v2823_v54 = vadd.f32 1.0, %v4256_v41  ;;  %2841 = vst [vmem:[#allocation12 + $0x10] sm:$0xff] %v5847_v49  ;;  %v2856_v11 = vpack.c.bf16 %v5847_v49, %v5847_v49  ;;  %v4258_v0 = vpop.eup %4257  ;;  %v6439_v41 = vld [vmem:[#allocation56_spill] sm:$0xff] }
 0x5a8   : > { %v2830_v3 = vadd.f32 1.0, %v4258_v0 }
 0x5a9   : > { %4259 = vrcp.f32 %v2823_v54  ;;  %2890 = vmatmul.mubr.bf16.vlgmr.msra.gmra.mrb[16].mxu0 %v2856_v11  ;;  %3946 = vmatmul.mubr.bf16.vlgmr.msra.gmra.mrb[16].mxu1 %v2856_v11 }
 0x5aa   : > { %2940 = vmatpush1.bf16.msra.mxu0 %v5573_v10  ;;  %3950 = vmatpush3.bf16.msra.mxu1 %v5610_v22  ;;  %4261 = vrcp.f32 %v2830_v3  ;;  %v2848_v3 = vunpack.c.h.bf16 %v2845_v46 }
 0x5ab   : > { %2941 = vmatprep.subr.bf16.mxu0 %v5577_v5  ;;  %3951 = vmatprep.subr.bf16.mxu1 %v6409_v51 }
 0x5ac   : > { %2971 = vmatprep.mubr.bf16.mxu0 %v6410_v35  ;;  %3965 = vmatprep.mubr.msk.bf16.mxu1 %vm4509_vm0, %v6409_v51 }
 0x5ae   : > { %2942 = vmatpush1.bf16.msra.mxu0 %v5587_v13  ;;  %3952 = vmatpush3.bf16.msra.mxu1 %v5624_v25 }
 0x5af   : > { %2943 = vmatprep.subr.bf16.mxu0 %v5591_v15  ;;  %3953 = vmatprep.subr.bf16.mxu1 %v6409_v51 }
 0x5b2   : > { %2944 = vmatpush1.bf16.msra.mxu0 %v5602_v18  ;;  %3954 = vmatpush3.bf16.msra.mxu1 %v5639_v30 }
 0x5b3   : > { %v4260_v8 = vpop.eup %4259  ;;  %2945 = vmatprep.subr.bf16.mxu0 %v5606_v21  ;;  %3955 = vmatprep.subr.bf16.mxu1 %v6409_v51 }
 0x5b4   : > { %v2833_v17 = vmul.f32 %v4260_v8, %v2793_v48  ;;  %v4262_v26 = vpop.eup %4261 }
 0x5b5   : > { %v2836_v45 = vsub.f32 1.0, %v4262_v26  ;;  %v2838_v9 = vmul.f32 %v4262_v26, %v5796_v12  ;;  %v6436_v12 = vld [vmem:[#allocation53_spill] sm:$0xff] }
 0x5b6   : > { %v2834_v63 = vadd.f32 %v2833_v17, %v2633_v2  ;;  %2946 = vmatpush1.bf16.msra.mxu0 %v5615_v32  ;;  %3956 = vmatpush3.bf16.msra.mxu1 %v5652_v34  ;;  %v6440_v2 = vld [vmem:[#allocation60_spill] sm:$0xff] }
 0x5b7   : > { %2947 = vmatprep.subr.bf16.mxu0 %v5620_v24  ;;  %3957 = vmatprep.subr.bf16.mxu1 %v6409_v51 }
 0x5b8   : > { %4263 = vtanh.f32 %v2834_v63 }
 0x5ba   : > { %2948 = vmatpush1.bf16.msra.mxu0 %v5631_v27  ;;  %3958 = vmatpush3.bf16.msra.mxu1 %v5665_v37 }
 0x5bb   : > { %2949 = vmatprep.subr.bf16.mxu0 %v5635_v28  ;;  %3959 = vmatprep.subr.bf16.mxu1 %v6409_v51 }
 0x5be   : > { %2950 = vmatpush1.bf16.msra.mxu0 %v5644_v31  ;;  %3960 = vmatpush3.bf16.msra.mxu1 %v5675_v40 }
 0x5bf   : > { %2951 = vmatprep.subr.bf16.mxu0 %v5648_v33  ;;  %3961 = vmatprep.subr.bf16.mxu1 %v6409_v51 }
 0x5c2   : > { %v4264_v1 = vpop.eup %4263  ;;  %2952 = vmatpush1.bf16.msra.mxu0 %v5657_v23  ;;  %3962 = vmatpush3.bf16.msra.mxu1 %v5681_v42 }
 0x5c3   : > { %2953 = vmatprep.subr.bf16.mxu0 %v5661_v44  ;;  %3963 = vmatprep.subr.bf16.mxu1 %v6409_v51  ;;  %v2837_v29 = vmul.f32 %v4264_v1, %v2836_v45 }
 0x5c5   : > { %v5886_v55 = vadd.f32 %v2838_v9, %v2837_v29 }
 0x5c6   : > { %2954 = vmatpush1.bf16.msra.mxu0 %v5670_v39  ;;  %3964 = vmatpush3.bf16.msra.mxu1 %v5690_v43 }
 0x5c7   : > { %2843 = vst [vmem:[#allocation12 + $0x28] sm:$0xff] %v5886_v55  ;;  %v2938_v52 = vpack.c.bf16 %v5886_v55, %v5886_v55  ;;  %3076 = vmatprep.subr.bf16.mxu0 %v5475_v36  ;;  %3969 = vmatprep.subr.bf16.mxu1 %v6409_v51  ;;  %v6425_v36 = vld [vmem:[#allocation47_spill] sm:$0xff] }
 0x5c9   : > { %2972 = vmatmul.mubr.bf16.vlgmr.msra.gmra.mrb[20].mxu0 %v2938_v52  ;;  %3966 = vmatmul.mubr.bf16.vlgmr.msra.gmra.mrb[20].mxu1 %v2938_v52 }
 0x5ca   : > { %3077 = vmatpush1.bf16.msra.mxu0 %v5478_v60  ;;  %3970 = vmatpush3.bf16.msra.mxu1 %v5505_v56  ;;  %v6426_v60 = vld [vmem:[#allocation21_spill] sm:$0xff]  ;;  %v6432_v56 = vld [vmem:[#allocation40_spill] sm:$0xff] }
 0x5cb   : > { %3078 = vmatprep.subr.bf16.mxu0 %v5484_v38  ;;  %3971 = vmatprep.subr.bf16.mxu1 %v6409_v51  ;;  %v6427_v38 = vld [vmem:[#allocation19_spill] sm:$0xff] }
 0x5cc   : > { %3108 = vmatprep.mubr.bf16.mxu0 %v6410_v35  ;;  %3985 = vmatprep.mubr.msk.bf16.mxu1 %vm4509_vm0, %v6409_v51 }
 0x5ce   : > { %3079 = vmatpush1.bf16.msra.mxu0 %v5490_v59  ;;  %3972 = vmatpush3.bf16.msra.mxu1 %v5517_v61  ;;  %v6428_v59 = vld [vmem:[#allocation45_spill] sm:$0xff]  ;;  %v6434_v61 = vld [vmem:[#allocation51_spill] sm:$0xff] }
 0x5cf   : > { %3080 = vmatprep.subr.bf16.mxu0 %v5494_v47  ;;  %3973 = vmatprep.subr.bf16.mxu1 %v6409_v51  ;;  %v6429_v47 = vld [vmem:[#allocation27_spill] sm:$0xff] }
 0x5d2   : > { %3081 = vmatpush1.bf16.msra.mxu0 %v5498_v20  ;;  %3974 = vmatpush3.bf16.msra.mxu1 %v5530_v58  ;;  %v6430_v20 = vld [vmem:[#allocation42_spill] sm:$0xff]  ;;  %v6435_v58 = vld [vmem:[#allocation48_spill] sm:$0xff] }
 0x5d3   : > { %3082 = vmatprep.subr.bf16.mxu0 %v5502_v19  ;;  %3975 = vmatprep.subr.bf16.mxu1 %v6409_v51  ;;  %v6431_v19 = vld [vmem:[#allocation54_spill] sm:$0xff] }
 0x5d6   : > { %3083 = vmatpush1.bf16.msra.mxu0 %v5509_v14  ;;  %3976 = vmatpush3.bf16.msra.mxu1 %v6425_v36  ;;  %v6433_v14 = vld [vmem:[#allocation44_spill] sm:$0xff] }
 0x5d7   : > { %3084 = vmatprep.subr.bf16.mxu0 %v6426_v60  ;;  %3977 = vmatprep.subr.bf16.mxu1 %v6409_v51 }
 0x5da   : > { %3085 = vmatpush1.bf16.msra.mxu0 %v6427_v38  ;;  %3978 = vmatpush3.bf16.msra.mxu1 %v6428_v59  ;;  %v5932_v38 = vld [vmem:[#allocation2 + $0x20] ss:$12 sps:$4 sm:$0xff]  }
 0x5db   : > { %3086 = vmatprep.subr.bf16.mxu0 %v6429_v47  ;;  %3979 = vmatprep.subr.bf16.mxu1 %v6409_v51  ;;  %v2851_v47 = vld [vmem:[#allocation3 + $0xc] sm:$0xff] }
 0x5de   : > { %3087 = vmatpush1.bf16.msra.mxu0 %v6430_v20  ;;  %3980 = vmatpush3.bf16.msra.mxu1 %v6431_v19  ;;  %v2849_v20 = vunpack.c.l.bf16 %v5932_v38  ;;  %v6441_v19 = vld [vmem:[#allocation57_spill] sm:$0xff] }
 0x5df   : > { %3088 = vmatprep.subr.bf16.mxu0 %v6432_v56  ;;  %3981 = vmatprep.subr.bf16.mxu1 %v6409_v51 }
 0x5e2   : > { %3089 = vmatpush1.bf16.msra.mxu0 %v6433_v14  ;;  %3982 = vmatpush3.bf16.msra.mxu1 %v6434_v61 }
 0x5e3   : > { %3090 = vmatprep.subr.bf16.mxu0 %v6435_v58  ;;  %3983 = vmatprep.subr.bf16.mxu1 %v6409_v51  ;;  %v2853_v58 = vunpack.c.l.bf16 %v2851_v47 }
 0x5e6   : > { %3091 = vmatpush1.bf16.msra.mxu0 %v6436_v12  ;;  %3984 = vmatpush3.bf16.msra.mxu1 %v6437_v7 }
 0x5e7   : > { %3158 = vmatprep.subr.bf16.mxu0 %v6438_v62  ;;  %3989 = vmatprep.subr.bf16.mxu1 %v6409_v51 }
 0x67c   : > { %v2891_v57 = vpop.f32.mrb[16].mxu0  ;;  %v2932_v53 = vpop.f32.mrb[16].mxu1 }
 0x67d   : > { %v2892_v54 = vadd.f32 %v2891_v57, %v6439_v41  ;;  %v2893_v11 = vpop.f32.mrb[17].mxu0  ;;  %v3947_v0 = vpop.f32.mrb[17].mxu1  ;;  %v2933_v56 = vadd.f32 %v2932_v53, %v6441_v19 }
 0x67e   : > { %v2894_v48 = vadd.f32 %v2893_v11, %v6440_v2  ;;  %v2895_v8 = vpop.f32.mrb[18].mxu0  ;;  %v2935_v17 = vpop.f32.mrb[18].mxu1 }
 0x67f   : > { %v3020_v63 = vadd.f32 %v2892_v54, %v2847_v6  ;;  %v2896_v26 = vpop.f32.mrb[19].mxu0  ;;  %v3948_v45 = vpop.f32.mrb[19].mxu1  ;;  %v2854_v54 = vunpack.c.h.bf16 %v2851_v47 }
 0x680   : > { %v3027_v29 = vadd.f32 %v2894_v48, %v2848_v3 }
 0x681   : > { %v3733_v1 = vmul.f32 -1.442695, %v3020_v63 }
 0x682   : > { %v3734_v9 = vmul.f32 -1.442695, %v3027_v29 }
 0x683   : > { %4265 = vpow2.f32 %v3733_v1 }
 0x684   : > { %4267 = vpow2.f32 %v3734_v9 }
 0x68d   : > { %v4266_v52 = vpop.eup %4265 }
 0x68e   : > { %v3024_v36 = vadd.f32 1.0, %v4266_v52  ;;  %v4268_v60 = vpop.eup %4267 }
 0x68f   : > { %v3031_v59 = vadd.f32 1.0, %v4268_v60 }
 0x690   : > { %4269 = vrcp.f32 %v3024_v36 }
 0x691   : > { %4271 = vrcp.f32 %v3031_v59 }
 0x69a   : > { %v4270_v14 = vpop.eup %4269 }
 0x69b   : > { %v3034_v61 = vmul.f32 %v4270_v14, %v2933_v56  ;;  %v4272_v26 = vpop.eup %4271 }
 0x69c   : > { %v2973_v12 = vpop.f32.mrb[20].mxu0  ;;  %v3014_v7 = vpop.f32.mrb[20].mxu1  ;;  %v3037_v1 = vsub.f32 1.0, %v4272_v26  ;;  %v3039_v52 = vmul.f32 %v4272_v26, %v5847_v49 }
 0x69d   : > { %v3035_v62 = vadd.f32 %v3034_v61, %v2849_v20  ;;  %v2974_v46 = vadd.f32 %v2973_v12, %v6424_v16  ;;  %v2975_v6 = vpop.f32.mrb[21].mxu0  ;;  %v3967_v57 = vpop.f32.mrb[21].mxu1  ;;  %v5953_v20 = vld [vmem:[#allocation3 + $0x8] ss:$12 sps:$4 sm:$0xff]  }
 0x69e   : > { %v2976_v11 = vadd.f32 %v2975_v6, %v5750_v50  ;;  %v2977_v0 = vpop.f32.mrb[22].mxu0  ;;  %v3017_v3 = vpop.f32.mrb[22].mxu1  ;;  %v3069_v6 = vunpack.c.h.bf16 %v5932_v38 }
 0x69f   : > { %4273 = vtanh.f32 %v3035_v62  ;;  %v3041_v48 = vadd.f32 %v2974_v46, %v2853_v58  ;;  %v2978_v8 = vpop.f32.mrb[23].mxu0  ;;  %v3968_v53 = vpop.f32.mrb[23].mxu1  ;;  %v3070_v46 = vld [vmem:[#allocation3] sm:$0xff] }
 0x6a0   : > { %v3048_v63 = vadd.f32 %v2976_v11, %v2854_v54  ;;  %v3072_v11 = vunpack.c.l.bf16 %v3070_v46 }
 0x6a1   : > { %v3735_v17 = vmul.f32 -1.442695, %v3041_v48 }
 0x6a2   : > { %v3736_v45 = vmul.f32 -1.442695, %v3048_v63  ;;  %v3073_v63 = vunpack.c.h.bf16 %v3070_v46 }
 0x6a3   : > { %4275 = vpow2.f32 %v3735_v17 }
 0x6a4   : > { %4277 = vpow2.f32 %v3736_v45 }
 0x6a9   : > { %v4274_v29 = vpop.eup %4273 }
 0x6aa   : > { %v3038_v9 = vmul.f32 %v4274_v29, %v3037_v1 }
 0x6ac   : > { %v5939_v36 = vadd.f32 %v3039_v52, %v3038_v9 }
 0x6ad   : > { %v4276_v60 = vpop.eup %4275 }
 0x6ae   : > { %v3045_v59 = vadd.f32 1.0, %v4276_v60  ;;  %3062 = vst [vmem:[#allocation12 + $0x20] sm:$0xff] %v5939_v36  ;;  %v3075_v47 = vpack.c.bf16 %v5939_v36, %v5939_v36  ;;  %v4278_v49 = vpop.eup %4277 }
 0x6b0   : > { %4279 = vrcp.f32 %v3045_v59  ;;  %3109 = vmatmul.mubr.bf16.vlgmr.msra.gmra.mrb[24].mxu0 %v3075_v47  ;;  %3986 = vmatmul.mubr.bf16.vlgmr.msra.gmra.mrb[24].mxu1 %v3075_v47 }
 0x6b1   : > { %3159 = vmatpush1.bf16.msra.mxu0 %v5573_v10  ;;  %3990 = vmatpush3.bf16.msra.mxu1 %v5610_v22  ;;  %v3052_v10 = vadd.f32 1.0, %v4278_v49  ;;  %v3015_v22 = vadd.f32 %v3014_v7, %v5763_v4 }
 0x6b2   : > { %3160 = vmatprep.subr.bf16.mxu0 %v5577_v5  ;;  %3991 = vmatprep.subr.bf16.mxu1 %v6409_v51  ;;  %v2855_v5 = vunpack.c.h.bf16 %v5953_v20 }
 0x6b3   : > { %3190 = vmatprep.mubr.bf16.mxu0 %v6410_v35  ;;  %4005 = vmatprep.mubr.msk.bf16.mxu1 %vm4509_vm0, %v6409_v51  ;;  %4281 = vrcp.f32 %v3052_v10 }
 0x6b5   : > { %3161 = vmatpush1.bf16.msra.mxu0 %v5587_v13  ;;  %3992 = vmatpush3.bf16.msra.mxu1 %v5624_v25 }
 0x6b6   : > { %3162 = vmatprep.subr.bf16.mxu0 %v5591_v15  ;;  %3993 = vmatprep.subr.bf16.mxu1 %v6409_v51 }
 0x6b9   : > { %3163 = vmatpush1.bf16.msra.mxu0 %v5602_v18  ;;  %3994 = vmatpush3.bf16.msra.mxu1 %v5639_v30  ;;  %v3065_v30 = vld [vmem:[#allocation2 + $0x24] sm:$0xff] }
 0x6ba   : > { %v4280_v35 = vpop.eup %4279  ;;  %3164 = vmatprep.subr.bf16.mxu0 %v5606_v21  ;;  %3995 = vmatprep.subr.bf16.mxu1 %v6409_v51 }
 0x6bb   : > { %v3055_v13 = vmul.f32 %v4280_v35, %v3015_v22 }
 0x6bd   : > { %v3056_v25 = vadd.f32 %v3055_v13, %v2855_v5  ;;  %3165 = vmatpush1.bf16.msra.mxu0 %v5615_v32  ;;  %3996 = vmatpush3.bf16.msra.mxu1 %v5652_v34  ;;  %v4282_v15 = vpop.eup %4281 }
 0x6be   : > { %3166 = vmatprep.subr.bf16.mxu0 %v5620_v24  ;;  %3997 = vmatprep.subr.bf16.mxu1 %v6409_v51  ;;  %v3058_v18 = vsub.f32 1.0, %v4282_v15  ;;  %v3060_v24 = vmul.f32 %v4282_v15, %v5886_v55 }
 0x6bf   : > { %4283 = vtanh.f32 %v3056_v25  ;;  %v3074_v25 = vunpack.c.l.bf16 %v5953_v20 }
 0x6c1   : > { %3167 = vmatpush1.bf16.msra.mxu0 %v5631_v27  ;;  %3998 = vmatpush3.bf16.msra.mxu1 %v5665_v37 }
 0x6c2   : > { %3168 = vmatprep.subr.bf16.mxu0 %v5635_v28  ;;  %3999 = vmatprep.subr.bf16.mxu1 %v6409_v51 }
 0x6c5   : > { %3169 = vmatpush1.bf16.msra.mxu0 %v5644_v31  ;;  %4000 = vmatpush3.bf16.msra.mxu1 %v5675_v40  ;;  %v3067_v31 = vunpack.c.l.bf16 %v3065_v30  ;;  %v3068_v40 = vunpack.c.h.bf16 %v3065_v30 }
 0x6c6   : > { %3170 = vmatprep.subr.bf16.mxu0 %v5648_v33  ;;  %4001 = vmatprep.subr.bf16.mxu1 %v6409_v51 }
 0x6c9   : > { %v4284_v21 = vpop.eup %4283  ;;  %3171 = vmatpush1.bf16.msra.mxu0 %v5657_v23  ;;  %4002 = vmatpush3.bf16.msra.mxu1 %v5681_v42 }
 0x6ca   : > { %3172 = vmatprep.subr.bf16.mxu0 %v5661_v44  ;;  %4003 = vmatprep.subr.bf16.mxu1 %v6409_v51  ;;  %v3059_v32 = vmul.f32 %v4284_v21, %v3058_v18 }
 0x6cc   : > { %v5980_v27 = vadd.f32 %v3060_v24, %v3059_v32 }
 0x6cd   : > { %3173 = vmatpush1.bf16.msra.mxu0 %v5670_v39  ;;  %4004 = vmatpush3.bf16.msra.mxu1 %v5690_v43 }
 0x6ce   : > { %3063 = vst [vmem:[#allocation12 + $0x18] sm:$0xff] %v5980_v27  ;;  %v3157_v28 = vpack.c.bf16 %v5980_v27, %v5980_v27 }
 0x6d0   : > { %3191 = vmatmul.mubr.bf16.vlgmr.msra.gmra.mrb[28].mxu0 %v3157_v28  ;;  %4006 = vmatmul.mubr.bf16.vlgmr.msra.gmra.mrb[28].mxu1 %v3157_v28 }
 0x783   : > { %v3110_v33 = vpop.f32.mrb[24].mxu0  ;;  %v3151_v34 = vpop.f32.mrb[24].mxu1 }
 0x784   : > { %v3111_v23 = vadd.f32 %v3110_v33, %v6439_v41  ;;  %v3112_v44 = vpop.f32.mrb[25].mxu0  ;;  %v3987_v37 = vpop.f32.mrb[25].mxu1 }
 0x785   : > { %v3113_v39 = vadd.f32 %v3112_v44, %v6440_v2  ;;  %v3114_v42 = vpop.f32.mrb[26].mxu0  ;;  %v3154_v43 = vpop.f32.mrb[26].mxu1  ;;  %v3152_v2 = vadd.f32 %v3151_v34, %v6441_v19 }
 0x786   : > { %v3239_v51 = vadd.f32 %v3111_v23, %v3067_v31  ;;  %v3115_v55 = vpop.f32.mrb[27].mxu0  ;;  %v3988_v56 = vpop.f32.mrb[27].mxu1 }
 0x787   : > { %v3246_v61 = vadd.f32 %v3113_v39, %v3068_v40 }
 0x788   : > { %v3737_v14 = vmul.f32 -1.442695, %v3239_v51 }
 0x789   : > { %v3738_v58 = vmul.f32 -1.442695, %v3246_v61 }
 0x78a   : > { %4285 = vpow2.f32 %v3737_v14 }
 0x78b   : > { %4287 = vpow2.f32 %v3738_v58 }
 0x794   : > { %v4286_v12 = vpop.eup %4285 }
 0x795   : > { %v3243_v7 = vadd.f32 1.0, %v4286_v12  ;;  %v4288_v62 = vpop.eup %4287 }
 0x796   : > { %v3250_v41 = vadd.f32 1.0, %v4288_v62 }
 0x797   : > { %4289 = vrcp.f32 %v3243_v7 }
 0x798   : > { %4291 = vrcp.f32 %v3250_v41 }
 0x7a1   : > { %v4290_v57 = vpop.eup %4289 }
 0x7a2   : > { %v3253_v54 = vmul.f32 %v4290_v57, %v3152_v2  ;;  %v4292_v60 = vpop.eup %4291 }
 0x7a3   : > { %v3192_v0 = vpop.f32.mrb[28].mxu0  ;;  %v3233_v3 = vpop.f32.mrb[28].mxu1  ;;  %v3256_v47 = vsub.f32 1.0, %v4292_v60 }
 0x7a4   : > { %v3254_v48 = vadd.f32 %v3253_v54, %v3069_v6  ;;  %v3193_v8 = vadd.f32 %v3192_v0, %v6424_v16  ;;  %v3194_v53 = vpop.f32.mrb[29].mxu0  ;;  %v4007_v17 = vpop.f32.mrb[29].mxu1  ;;  %v3258_v16 = vmul.f32 %v4292_v60, %v5939_v36  ;;  %v3234_v15 = vadd.f32 %v3233_v3, %v5763_v4 }
 0x7a5   : > { %v3195_v26 = vadd.f32 %v3194_v53, %v5750_v50  ;;  %v3196_v45 = vpop.f32.mrb[30].mxu0  ;;  %v3236_v1 = vpop.f32.mrb[30].mxu1 }
 0x7a6   : > { %4293 = vtanh.f32 %v3254_v48  ;;  %v3260_v38 = vadd.f32 %v3193_v8, %v3072_v11  ;;  %v3197_v29 = vpop.f32.mrb[31].mxu0  ;;  %v4008_v19 = vpop.f32.mrb[31].mxu1 }
 0x7a7   : > { %v3267_v52 = vadd.f32 %v3195_v26, %v3073_v63 }
 0x7a8   : > { %v3739_v9 = vmul.f32 -1.442695, %v3260_v38 }
 0x7a9   : > { %v3740_v59 = vmul.f32 -1.442695, %v3267_v52 }
 0x7aa   : > { %4295 = vpow2.f32 %v3739_v9 }
 0x7ab   : > { %4297 = vpow2.f32 %v3740_v59 }
 0x7b0   : > { %v4294_v49 = vpop.eup %4293 }
 0x7b1   : > { %v3257_v10 = vmul.f32 %v4294_v49, %v3256_v47 }
 0x7b3   : > { %v3259_v5 = vadd.f32 %v3258_v16, %v3257_v10 }
 0x7b4   : > { %v4296_v22 = vpop.eup %4295 }
 0x7b5   : > { %3281 = vst [vmem:[#allocation12 + $0x30] sm:$0xff] %v3259_v5  ;;  %v3264_v50 = vadd.f32 1.0, %v4296_v22  ;;  %v4298_v35 = vpop.eup %4297 }
 0x7b6   : > { %v3271_v13 = vadd.f32 1.0, %v4298_v35 }
 0x7b7   : > { %4299 = vrcp.f32 %v3264_v50 }
 0x7b8   : > { %4301 = vrcp.f32 %v3271_v13 }
 0x7c1   : > { %v4300_v18 = vpop.eup %4299 }
 0x7c2   : > { %v3274_v21 = vmul.f32 %v4300_v18, %v3234_v15  ;;  %v4302_v36 = vpop.eup %4301 }
 0x7c3   : > { %v3277_v24 = vsub.f32 1.0, %v4302_v36  ;;  %v3279_v31 = vmul.f32 %v4302_v36, %v5980_v27 }
 0x7c4   : > { %v3275_v32 = vadd.f32 %v3274_v21, %v3074_v25 }
 0x7c6   : > { %4303 = vtanh.f32 %v3275_v32 }
 0x7d0   : > { %v4304_v28 = vpop.eup %4303 }
 0x7d1   : > { %v3278_v30 = vmul.f32 %v4304_v28, %v3277_v24 }
 0x7d3   : > { %v3280_v33 = vadd.f32 %v3279_v31, %v3278_v30 }
 0x7d5   : > { %3282 = vst [vmem:[#allocation12 + $0x8] sm:$0xff] %v3280_v33 }
 0x7d6   : > { %4436 = shalt.err (!%p4433_p8)
}
 0x7d7   : > { %s4437_s15 = scalar_lea.hbm %s6038_s5, 1024 }
 0x7d8   : > { %p4438_p12 = scmp.ne.s32.totalorder %s6038_s5, %s4437_s15  ;;  %p4443_p13 = scmp.lt.u32.totalorder %s4437_s15, %s6038_s5 }
 0x7da   : > { %p4439_p7 = pnand %p4438_p12, %p4114_p5 }
 0x7dc   : > { %p4440_p1 = pneg %p4439_p7 }
 0x7de   : > { %p4445_p0 = pnand %p4443_p13, %p4440_p1 }
 0x7e0   : > { %4448 = shalt.err (!%p4445_p0)
}
 0x7e1   : > { %s4511_s1 = smov 256   ;;  %s4512_s23 = smov 16  }
 0x7e2   : > { %4094 = dma.vmem_to_hbm [thread:$0]  (%p4114_p5), %s3290_s24, 1024, %s6038_s5, [#allocation6], %s4511_s1, %s4511_s1, %s4512_s23  }
 0x7e3   : > { %4478 = dma.done.wait (%p4114_p5), [#allocation6], 1024  }
 0x7e4   : > { %4480 = vsyncadd (%p4114_p5), [#allocation6], 4294966272 }
 0x7e5 PF: > { %s6442_s14 = sld [smem:[#allocation17_spill]]  ;;  %s6443_s20 = sld [smem:[#allocation18_spill]] }
 0x7e6   : > { %p20_p4 = scmp.ge.s32.totalorder %s4564_s22, 4   ;;  %s6444_s18 = smov %s4487_s19 }
 0x7e7   : > { %s6446_s21 = smov %s4564_s22 }
 0x7e8   :  { %22 = sbr.rel (!%p20_p4) target bundleno = 9 (0x9), region = 128 }
 0x7eb   : > { %s6445_s19 = smov %s6442_s14 }
 0x7ef   :  { %3305 = vsyncpa [#allocation5], 1 }
 0x7f0   :  { %3307 = vsyncpa [#allocation5 + $0x1], 1 }
 0x7f1   :  { %3308 = vsyncpa [#allocation8], 1 }
 0x7f2   :  { %3310 = vsyncpa [#allocation8 + $0x1], 1 }
 0x7f3   :  { %3311 = vsyncpa [#allocation11], 1 }
 0x7f4   :  { %3313 = vsyncpa [#allocation11 + $0x1], 1 }
 0x7f5   :  { %3314 = vsyncpa [#allocation6], 1 }
 0x7f6   :  { %3316 = vsyncpa [#allocation6 + $0x1], 1 }

</bundles_post_ra>
